<compile_context>
chip_gen: v5e
topology: v5e:2x2
jax: 0.10.0
libtpu: 0.0.40
codegen_flags: <defaults>
</compile_context>

<pallas_src>
import jax
import jax.numpy as jnp
from jax.experimental import pallas as pl
from jax.experimental.pallas import tpu as pltpu

KH = KW = 10
STRIDE = 2
C_IN = 3
C_OUT = 32
H = W = 32
OH = OW = (H - KH) // STRIDE + 1   # 12
P = OH * OW                        # 144  (the 144 in the PyTorch module)
K = C_IN * KH * KW                 # 300  (unpadded contraction dim)
LANE = 128
PC = 16                            # output pixels per in-kernel chunk; must divide P
TB_IMG = 32                        # images per grid step (multiple of 16 for bf16)


def _round_up(a, m):
    return ((a + m - 1) // m) * m


def _fused_kernel(p_ref, cw_ref, cb_ref, fw_ref, fb_ref, o_ref):
    """One image tile: conv-as-matmul + bias + ReLU + FC, all resident in VMEM.

    p_ref : (P, tb, K)       bf16  im2col patches, p-major / b-minor rows
    cw_ref: (K, C_OUT)       bf16  conv weight
    cb_ref: (1, C_OUT)       f32   conv bias
    fw_ref: (P, C_OUT, NCP)  bf16  FC weight permuted to [p, c, n]
    fb_ref: (1, NCP)         f32   FC bias
    o_ref : (tb, NCP)        f32   logits (classes padded to lane width)
    """
    tb = o_ref.shape[0]
    ncp = o_ref.shape[1]
    acc = jnp.zeros((tb, ncp), jnp.float32)
    for c in range(P // PC):                                  # static, unrolled (9 chunks)
        lhs = p_ref[pl.ds(c * PC, PC)]                        # (PC, tb, K) bf16
        lhs = lhs.reshape(PC * tb, K)                         # rows = (p-major, b-minor)
        conv = jnp.dot(lhs, cw_ref[...],
                       preferred_element_type=jnp.float32)   # (PC*tb, 32) f32
        relu = jnp.maximum(conv + cb_ref[...], 0.0)
        relu = relu.astype(jnp.bfloat16).reshape(PC, tb, C_OUT)
        fw = fw_ref[pl.ds(c * PC, PC)]                        # (PC, 32, NCP) bf16
        part = jnp.einsum('pbc,pcn->pbn', relu, fw,
                          preferred_element_type=jnp.float32)  # (PC, tb, NCP) f32
        acc = acc + part.sum(axis=0)
    o_ref[...] = acc + fb_ref[...]


def im2col_pmajor(x):
    """x: (B, C, H, W) -> (P, B, K); K ordered (c, kh, kw), p = oh*OW + ow."""
    idx_h = (jnp.arange(OH) * STRIDE)[:, None] + jnp.arange(KH)[None, :]  # (OH, KH)
    idx_w = (jnp.arange(OW) * STRIDE)[:, None] + jnp.arange(KW)[None, :]  # (OW, KW)
    p = x[:, :, idx_h, :]                 # (B, C, OH, KH, W)
    p = p[:, :, :, :, idx_w]              # (B, C, OH, KH, OW, KW)
    p = p.transpose(2, 4, 0, 1, 3, 5)     # (OH, OW, B, C, KH, KW)
    return p.reshape(P, x.shape[0], K)


def simple_cnn_32filter(x, conv_w, conv_b, fc_w, fc_b):
    """Forward pass. x: (B, 3, 32, 32) float32 -> (B, num_classes) float32."""
    B = x.shape[0]
    num_classes = fc_w.shape[0]
    ncp = _round_up(num_classes, LANE)    # lane-dense output / resident FC weight

    # Image-tile size: multiples of 16 sublanes (bf16), and for batches >= 32 keep
    # at least 2 grid steps so v7x's two TensorCores both get work.
    b16 = _round_up(B, 16)
    tb = min(TB_IMG, b16)
    if b16 >= 32:
        tb = min(tb, max(16, _round_up(b16 // 2, 16)))
    b_pad = _round_up(B, tb)
    nb = b_pad // tb

    # ---- parameters: bf16 for matmul operands, f32 biases ----
    cw = conv_w.reshape(C_OUT, K).T.astype(jnp.bfloat16)             # (300, 32)
    cb = conv_b.reshape(1, C_OUT).astype(jnp.float32)                # (1, 32)
    # PyTorch flatten of (32, 12, 12) indexes columns as c*P + p; permute to [p, c, n].
    fw = fc_w.reshape(num_classes, C_OUT, P).transpose(2, 1, 0)      # (144, 32, nc)
    fw = jnp.pad(fw, ((0, 0), (0, 0), (0, ncp - num_classes))).astype(jnp.bfloat16)
    fb = jnp.pad(fc_b.reshape(1, num_classes),
                 ((0, 0), (0, ncp - num_classes))).astype(jnp.float32)

    # ---- im2col in XLA glue (bf16, p-major, K unpadded) ----
    xb = jnp.pad(x, ((0, b_pad - B), (0, 0), (0, 0), (0, 0))).astype(jnp.bfloat16)
    patches = im2col_pmajor(xb)                                       # (P, b_pad, 300)

    out = pl.pallas_call(
        _fused_kernel,
        out_shape=jax.ShapeDtypeStruct((b_pad, ncp), jnp.float32),
        grid=(nb,),
        in_specs=[
            pl.BlockSpec((P, tb, K), lambda i: (0, i, 0)),            # streamed patches
            pl.BlockSpec((K, C_OUT), lambda i: (0, 0)),               # resident conv W
            pl.BlockSpec((1, C_OUT), lambda i: (0, 0)),               # resident conv b
            pl.BlockSpec((P, C_OUT, ncp), lambda i: (0, 0, 0)),       # resident FC W
            pl.BlockSpec((1, ncp), lambda i: (0, 0)),                 # resident FC b
        ],
        out_specs=pl.BlockSpec((tb, ncp), lambda i: (i, 0)),
        compiler_params=pltpu.CompilerParams(
            dimension_semantics=("parallel",),
            vmem_limit_bytes=32 * 1024 * 1024),
    )(patches, cw, cb, fw, fb)

    return out[:B, :num_classes]


def reference(x, conv_w, conv_b, fc_w, fc_b):
    """Pure-JAX reference matching the PyTorch forward exactly (full f32 precision)."""
    y = jax.lax.conv_general_dilated(
        x, conv_w, window_strides=(STRIDE, STRIDE), padding="VALID",
        dimension_numbers=("NCHW", "OIHW", "NCHW"),
        precision=jax.lax.Precision.HIGHEST)
    y = jnp.maximum(y + conv_b[None, :, None, None], 0.0)
    y = y.reshape(x.shape[0], -1)                  # NCHW contiguous flatten (torch .view)
    return jnp.dot(y, fc_w.T, precision=jax.lax.Precision.HIGHEST) + fc_b


if __name__ == "__main__":
    B = 2
    num_classes = 10

    key = jax.random.PRNGKey(0)
    k_x, k_cw, k_cb, k_fw, k_fb = jax.random.split(key, 5)

    x = jax.random.normal(k_x, (B, C_IN, H, W), dtype=jnp.float32)
    conv_w = jax.random.normal(k_cw, (C_OUT, C_IN, KH, KW), dtype=jnp.float32) * 0.05
    conv_b = jax.random.normal(k_cb, (C_OUT,), dtype=jnp.float32) * 0.05
    fc_w = jax.random.normal(k_fw, (num_classes, P * C_OUT), dtype=jnp.float32) * 0.02
    fc_b = jax.random.normal(k_fb, (num_classes,), dtype=jnp.float32) * 0.02

    out = jax.jit(simple_cnn_32filter)(x, conv_w, conv_b, fc_w, fc_b)
    out = jax.block_until_ready(out)

    ref = reference(x, conv_w, conv_b, fc_w, fc_b)
    assert out.shape == (B, num_classes)
    # Kernel streams bf16 operands with f32 accumulation; reference is full-f32
    # HIGHEST, so compare with a correspondingly looser tolerance.
    assert jnp.allclose(out, ref, rtol=5e-2, atol=5e-2), (out, ref)

    print("KERNEL_OK")
</pallas_src>

<mosaic_0001>
module attributes {stable_mosaic.version = 11 : i64} {
  func.func @_fused_kernel(%arg0: i32, %arg1: memref<144x16x300xbf16, #tpu.memory_space<vmem>>, %arg2: memref<300x32xbf16, #tpu.memory_space<vmem>>, %arg3: memref<1x32xf32, #tpu.memory_space<vmem>>, %arg4: memref<144x32x128xbf16, #tpu.memory_space<vmem>>, %arg5: memref<1x128xf32, #tpu.memory_space<vmem>>, %arg6: memref<16x128xf32, #tpu.memory_space<vmem>>) attributes {dimension_semantics = [#tpu.dimension_semantics<parallel>], iteration_bounds = array<i64: 1>, scalar_prefetch = 0 : i64, scratch_operands = 0 : i64, tpu.core_type = #tpu.core_type<tc>, window_params = [{transform_indices = @transform_0, window_bounds = array<i64: 144, 16, 300>}, {pipeline_mode = #tpu.pipeline_mode<synchronous>, transform_indices = @transform_1, window_bounds = array<i64: 300, 32>}, {pipeline_mode = #tpu.pipeline_mode<synchronous>, transform_indices = @transform_2, window_bounds = array<i64: 1, 32>}, {pipeline_mode = #tpu.pipeline_mode<synchronous>, transform_indices = @transform_3, window_bounds = array<i64: 144, 32, 128>}, {pipeline_mode = #tpu.pipeline_mode<synchronous>, transform_indices = @transform_4, window_bounds = array<i64: 1, 128>}, {transform_indices = @transform_5, window_bounds = array<i64: 16, 128>}]} {
    %cst = arith.constant 0.000000e+00 : f32
    %0 = vector.broadcast %cst : f32 to vector<16x128xf32>
    %c0 = arith.constant 0 : index
    %c0_0 = arith.constant 0 : index
    %c0_1 = arith.constant 0 : index
    %1 = vector.load %arg1[%c0, %c0_0, %c0_1] : memref<144x16x300xbf16, #tpu.memory_space<vmem>>, vector<16x16x300xbf16>
    %2 = vector.shape_cast %1 : vector<16x16x300xbf16> to vector<256x300xbf16>
    %c0_2 = arith.constant 0 : index
    %c0_3 = arith.constant 0 : index
    %3 = vector.load %arg2[%c0_2, %c0_3] : memref<300x32xbf16, #tpu.memory_space<vmem>>, vector<300x32xbf16>
    %cst_4 = arith.constant dense<0.000000e+00> : vector<256x32xf32>
    %4 = tpu.matmul %2, %3, %cst_4 {dimension_numbers = #tpu.dot_dimension_numbers<[1], [0], [0], [1], [0, 0, 1, 1], [], []>} : vector<256x300xbf16>, vector<300x32xbf16>, vector<256x32xf32> -> vector<256x32xf32>
    %c0_5 = arith.constant 0 : index
    %c0_6 = arith.constant 0 : index
    %5 = vector.load %arg3[%c0_5, %c0_6] : memref<1x32xf32, #tpu.memory_space<vmem>>, vector<1x32xf32>
    %6 = vector.broadcast %5 : vector<1x32xf32> to vector<256x32xf32>
    %7 = arith.addf %4, %6 : vector<256x32xf32>
    %cst_7 = arith.constant 0.000000e+00 : f32
    %8 = vector.broadcast %cst_7 : f32 to vector<256x32xf32>
    %9 = arith.maximumf %7, %8 : vector<256x32xf32>
    %10 = arith.truncf %9 : vector<256x32xf32> to vector<256x32xbf16>
    %11 = vector.shape_cast %10 : vector<256x32xbf16> to vector<16x16x32xbf16>
    %c0_8 = arith.constant 0 : index
    %c0_9 = arith.constant 0 : index
    %c0_10 = arith.constant 0 : index
    %12 = vector.load %arg4[%c0_8, %c0_9, %c0_10] : memref<144x32x128xbf16, #tpu.memory_space<vmem>>, vector<16x32x128xbf16>
    "tpu.trace_start"() <{level = 10 : i32, message = "pbc,pcn->pbn"}> : () -> ()
    %cst_11 = arith.constant dense<0.000000e+00> : vector<16x16x128xf32>
    %13 = tpu.matmul %11, %12, %cst_11 {dimension_numbers = #tpu.dot_dimension_numbers<[2], [1], [1], [2], [0, 0, 0, 1, 1, 2], [0], [0]>} : vector<16x16x32xbf16>, vector<16x32x128xbf16>, vector<16x16x128xf32> -> vector<16x16x128xf32>
    "tpu.trace_stop"() : () -> ()
    %cst_12 = arith.constant dense<0.000000e+00> : vector<16x128xf32>
    %14 = vector.multi_reduction <add>, %13, %cst_12 [0] : vector<16x16x128xf32> to vector<16x128xf32>
    %15 = arith.addf %0, %14 : vector<16x128xf32>
    %c16 = arith.constant 16 : index
    %c0_13 = arith.constant 0 : index
    %c0_14 = arith.constant 0 : index
    %16 = vector.load %arg1[%c16, %c0_13, %c0_14] : memref<144x16x300xbf16, #tpu.memory_space<vmem>>, vector<16x16x300xbf16>
    %17 = vector.shape_cast %16 : vector<16x16x300xbf16> to vector<256x300xbf16>
    %c0_15 = arith.constant 0 : index
    %c0_16 = arith.constant 0 : index
    %18 = vector.load %arg2[%c0_15, %c0_16] : memref<300x32xbf16, #tpu.memory_space<vmem>>, vector<300x32xbf16>
    %cst_17 = arith.constant dense<0.000000e+00> : vector<256x32xf32>
    %19 = tpu.matmul %17, %18, %cst_17 {dimension_numbers = #tpu.dot_dimension_numbers<[1], [0], [0], [1], [0, 0, 1, 1], [], []>} : vector<256x300xbf16>, vector<300x32xbf16>, vector<256x32xf32> -> vector<256x32xf32>
    %c0_18 = arith.constant 0 : index
    %c0_19 = arith.constant 0 : index
    %20 = vector.load %arg3[%c0_18, %c0_19] : memref<1x32xf32, #tpu.memory_space<vmem>>, vector<1x32xf32>
    %21 = vector.broadcast %20 : vector<1x32xf32> to vector<256x32xf32>
    %22 = arith.addf %19, %21 : vector<256x32xf32>
    %cst_20 = arith.constant 0.000000e+00 : f32
    %23 = vector.broadcast %cst_20 : f32 to vector<256x32xf32>
    %24 = arith.maximumf %22, %23 : vector<256x32xf32>
    %25 = arith.truncf %24 : vector<256x32xf32> to vector<256x32xbf16>
    %26 = vector.shape_cast %25 : vector<256x32xbf16> to vector<16x16x32xbf16>
    %c16_21 = arith.constant 16 : index
    %c0_22 = arith.constant 0 : index
    %c0_23 = arith.constant 0 : index
    %27 = vector.load %arg4[%c16_21, %c0_22, %c0_23] : memref<144x32x128xbf16, #tpu.memory_space<vmem>>, vector<16x32x128xbf16>
    "tpu.trace_start"() <{level = 10 : i32, message = "pbc,pcn->pbn"}> : () -> ()
    %cst_24 = arith.constant dense<0.000000e+00> : vector<16x16x128xf32>
    %28 = tpu.matmul %26, %27, %cst_24 {dimension_numbers = #tpu.dot_dimension_numbers<[2], [1], [1], [2], [0, 0, 0, 1, 1, 2], [0], [0]>} : vector<16x16x32xbf16>, vector<16x32x128xbf16>, vector<16x16x128xf32> -> vector<16x16x128xf32>
    "tpu.trace_stop"() : () -> ()
    %cst_25 = arith.constant dense<0.000000e+00> : vector<16x128xf32>
    %29 = vector.multi_reduction <add>, %28, %cst_25 [0] : vector<16x16x128xf32> to vector<16x128xf32>
    %30 = arith.addf %15, %29 : vector<16x128xf32>
    %c32 = arith.constant 32 : index
    %c0_26 = arith.constant 0 : index
    %c0_27 = arith.constant 0 : index
    %31 = vector.load %arg1[%c32, %c0_26, %c0_27] : memref<144x16x300xbf16, #tpu.memory_space<vmem>>, vector<16x16x300xbf16>
    %32 = vector.shape_cast %31 : vector<16x16x300xbf16> to vector<256x300xbf16>
    %c0_28 = arith.constant 0 : index
    %c0_29 = arith.constant 0 : index
    %33 = vector.load %arg2[%c0_28, %c0_29] : memref<300x32xbf16, #tpu.memory_space<vmem>>, vector<300x32xbf16>
    %cst_30 = arith.constant dense<0.000000e+00> : vector<256x32xf32>
    %34 = tpu.matmul %32, %33, %cst_30 {dimension_numbers = #tpu.dot_dimension_numbers<[1], [0], [0], [1], [0, 0, 1, 1], [], []>} : vector<256x300xbf16>, vector<300x32xbf16>, vector<256x32xf32> -> vector<256x32xf32>
    %c0_31 = arith.constant 0 : index
    %c0_32 = arith.constant 0 : index
    %35 = vector.load %arg3[%c0_31, %c0_32] : memref<1x32xf32, #tpu.memory_space<vmem>>, vector<1x32xf32>
    %36 = vector.broadcast %35 : vector<1x32xf32> to vector<256x32xf32>
    %37 = arith.addf %34, %36 : vector<256x32xf32>
    %cst_33 = arith.constant 0.000000e+00 : f32
    %38 = vector.broadcast %cst_33 : f32 to vector<256x32xf32>
    %39 = arith.maximumf %37, %38 : vector<256x32xf32>
    %40 = arith.truncf %39 : vector<256x32xf32> to vector<256x32xbf16>
    %41 = vector.shape_cast %40 : vector<256x32xbf16> to vector<16x16x32xbf16>
    %c32_34 = arith.constant 32 : index
    %c0_35 = arith.constant 0 : index
    %c0_36 = arith.constant 0 : index
    %42 = vector.load %arg4[%c32_34, %c0_35, %c0_36] : memref<144x32x128xbf16, #tpu.memory_space<vmem>>, vector<16x32x128xbf16>
    "tpu.trace_start"() <{level = 10 : i32, message = "pbc,pcn->pbn"}> : () -> ()
    %cst_37 = arith.constant dense<0.000000e+00> : vector<16x16x128xf32>
    %43 = tpu.matmul %41, %42, %cst_37 {dimension_numbers = #tpu.dot_dimension_numbers<[2], [1], [1], [2], [0, 0, 0, 1, 1, 2], [0], [0]>} : vector<16x16x32xbf16>, vector<16x32x128xbf16>, vector<16x16x128xf32> -> vector<16x16x128xf32>
    "tpu.trace_stop"() : () -> ()
    %cst_38 = arith.constant dense<0.000000e+00> : vector<16x128xf32>
    %44 = vector.multi_reduction <add>, %43, %cst_38 [0] : vector<16x16x128xf32> to vector<16x128xf32>
    %45 = arith.addf %30, %44 : vector<16x128xf32>
    %c48 = arith.constant 48 : index
    %c0_39 = arith.constant 0 : index
    %c0_40 = arith.constant 0 : index
    %46 = vector.load %arg1[%c48, %c0_39, %c0_40] : memref<144x16x300xbf16, #tpu.memory_space<vmem>>, vector<16x16x300xbf16>
    %47 = vector.shape_cast %46 : vector<16x16x300xbf16> to vector<256x300xbf16>
    %c0_41 = arith.constant 0 : index
    %c0_42 = arith.constant 0 : index
    %48 = vector.load %arg2[%c0_41, %c0_42] : memref<300x32xbf16, #tpu.memory_space<vmem>>, vector<300x32xbf16>
    %cst_43 = arith.constant dense<0.000000e+00> : vector<256x32xf32>
    %49 = tpu.matmul %47, %48, %cst_43 {dimension_numbers = #tpu.dot_dimension_numbers<[1], [0], [0], [1], [0, 0, 1, 1], [], []>} : vector<256x300xbf16>, vector<300x32xbf16>, vector<256x32xf32> -> vector<256x32xf32>
    %c0_44 = arith.constant 0 : index
    %c0_45 = arith.constant 0 : index
    %50 = vector.load %arg3[%c0_44, %c0_45] : memref<1x32xf32, #tpu.memory_space<vmem>>, vector<1x32xf32>
    %51 = vector.broadcast %50 : vector<1x32xf32> to vector<256x32xf32>
    %52 = arith.addf %49, %51 : vector<256x32xf32>
    %cst_46 = arith.constant 0.000000e+00 : f32
    %53 = vector.broadcast %cst_46 : f32 to vector<256x32xf32>
    %54 = arith.maximumf %52, %53 : vector<256x32xf32>
    %55 = arith.truncf %54 : vector<256x32xf32> to vector<256x32xbf16>
    %56 = vector.shape_cast %55 : vector<256x32xbf16> to vector<16x16x32xbf16>
    %c48_47 = arith.constant 48 : index
    %c0_48 = arith.constant 0 : index
    %c0_49 = arith.constant 0 : index
    %57 = vector.load %arg4[%c48_47, %c0_48, %c0_49] : memref<144x32x128xbf16, #tpu.memory_space<vmem>>, vector<16x32x128xbf16>
    "tpu.trace_start"() <{level = 10 : i32, message = "pbc,pcn->pbn"}> : () -> ()
    %cst_50 = arith.constant dense<0.000000e+00> : vector<16x16x128xf32>
    %58 = tpu.matmul %56, %57, %cst_50 {dimension_numbers = #tpu.dot_dimension_numbers<[2], [1], [1], [2], [0, 0, 0, 1, 1, 2], [0], [0]>} : vector<16x16x32xbf16>, vector<16x32x128xbf16>, vector<16x16x128xf32> -> vector<16x16x128xf32>
    "tpu.trace_stop"() : () -> ()
    %cst_51 = arith.constant dense<0.000000e+00> : vector<16x128xf32>
    %59 = vector.multi_reduction <add>, %58, %cst_51 [0] : vector<16x16x128xf32> to vector<16x128xf32>
    %60 = arith.addf %45, %59 : vector<16x128xf32>
    %c64 = arith.constant 64 : index
    %c0_52 = arith.constant 0 : index
    %c0_53 = arith.constant 0 : index
    %61 = vector.load %arg1[%c64, %c0_52, %c0_53] : memref<144x16x300xbf16, #tpu.memory_space<vmem>>, vector<16x16x300xbf16>
    %62 = vector.shape_cast %61 : vector<16x16x300xbf16> to vector<256x300xbf16>
    %c0_54 = arith.constant 0 : index
    %c0_55 = arith.constant 0 : index
    %63 = vector.load %arg2[%c0_54, %c0_55] : memref<300x32xbf16, #tpu.memory_space<vmem>>, vector<300x32xbf16>
    %cst_56 = arith.constant dense<0.000000e+00> : vector<256x32xf32>
    %64 = tpu.matmul %62, %63, %cst_56 {dimension_numbers = #tpu.dot_dimension_numbers<[1], [0], [0], [1], [0, 0, 1, 1], [], []>} : vector<256x300xbf16>, vector<300x32xbf16>, vector<256x32xf32> -> vector<256x32xf32>
    %c0_57 = arith.constant 0 : index
    %c0_58 = arith.constant 0 : index
    %65 = vector.load %arg3[%c0_57, %c0_58] : memref<1x32xf32, #tpu.memory_space<vmem>>, vector<1x32xf32>
    %66 = vector.broadcast %65 : vector<1x32xf32> to vector<256x32xf32>
    %67 = arith.addf %64, %66 : vector<256x32xf32>
    %cst_59 = arith.constant 0.000000e+00 : f32
    %68 = vector.broadcast %cst_59 : f32 to vector<256x32xf32>
    %69 = arith.maximumf %67, %68 : vector<256x32xf32>
    %70 = arith.truncf %69 : vector<256x32xf32> to vector<256x32xbf16>
    %71 = vector.shape_cast %70 : vector<256x32xbf16> to vector<16x16x32xbf16>
    %c64_60 = arith.constant 64 : index
    %c0_61 = arith.constant 0 : index
    %c0_62 = arith.constant 0 : index
    %72 = vector.load %arg4[%c64_60, %c0_61, %c0_62] : memref<144x32x128xbf16, #tpu.memory_space<vmem>>, vector<16x32x128xbf16>
    "tpu.trace_start"() <{level = 10 : i32, message = "pbc,pcn->pbn"}> : () -> ()
    %cst_63 = arith.constant dense<0.000000e+00> : vector<16x16x128xf32>
    %73 = tpu.matmul %71, %72, %cst_63 {dimension_numbers = #tpu.dot_dimension_numbers<[2], [1], [1], [2], [0, 0, 0, 1, 1, 2], [0], [0]>} : vector<16x16x32xbf16>, vector<16x32x128xbf16>, vector<16x16x128xf32> -> vector<16x16x128xf32>
    "tpu.trace_stop"() : () -> ()
    %cst_64 = arith.constant dense<0.000000e+00> : vector<16x128xf32>
    %74 = vector.multi_reduction <add>, %73, %cst_64 [0] : vector<16x16x128xf32> to vector<16x128xf32>
    %75 = arith.addf %60, %74 : vector<16x128xf32>
    %c80 = arith.constant 80 : index
    %c0_65 = arith.constant 0 : index
    %c0_66 = arith.constant 0 : index
    %76 = vector.load %arg1[%c80, %c0_65, %c0_66] : memref<144x16x300xbf16, #tpu.memory_space<vmem>>, vector<16x16x300xbf16>
    %77 = vector.shape_cast %76 : vector<16x16x300xbf16> to vector<256x300xbf16>
    %c0_67 = arith.constant 0 : index
    %c0_68 = arith.constant 0 : index
    %78 = vector.load %arg2[%c0_67, %c0_68] : memref<300x32xbf16, #tpu.memory_space<vmem>>, vector<300x32xbf16>
    %cst_69 = arith.constant dense<0.000000e+00> : vector<256x32xf32>
    %79 = tpu.matmul %77, %78, %cst_69 {dimension_numbers = #tpu.dot_dimension_numbers<[1], [0], [0], [1], [0, 0, 1, 1], [], []>} : vector<256x300xbf16>, vector<300x32xbf16>, vector<256x32xf32> -> vector<256x32xf32>
    %c0_70 = arith.constant 0 : index
    %c0_71 = arith.constant 0 : index
    %80 = vector.load %arg3[%c0_70, %c0_71] : memref<1x32xf32, #tpu.memory_space<vmem>>, vector<1x32xf32>
    %81 = vector.broadcast %80 : vector<1x32xf32> to vector<256x32xf32>
    %82 = arith.addf %79, %81 : vector<256x32xf32>
    %cst_72 = arith.constant 0.000000e+00 : f32
    %83 = vector.broadcast %cst_72 : f32 to vector<256x32xf32>
    %84 = arith.maximumf %82, %83 : vector<256x32xf32>
    %85 = arith.truncf %84 : vector<256x32xf32> to vector<256x32xbf16>
    %86 = vector.shape_cast %85 : vector<256x32xbf16> to vector<16x16x32xbf16>
    %c80_73 = arith.constant 80 : index
    %c0_74 = arith.constant 0 : index
    %c0_75 = arith.constant 0 : index
    %87 = vector.load %arg4[%c80_73, %c0_74, %c0_75] : memref<144x32x128xbf16, #tpu.memory_space<vmem>>, vector<16x32x128xbf16>
    "tpu.trace_start"() <{level = 10 : i32, message = "pbc,pcn->pbn"}> : () -> ()
    %cst_76 = arith.constant dense<0.000000e+00> : vector<16x16x128xf32>
    %88 = tpu.matmul %86, %87, %cst_76 {dimension_numbers = #tpu.dot_dimension_numbers<[2], [1], [1], [2], [0, 0, 0, 1, 1, 2], [0], [0]>} : vector<16x16x32xbf16>, vector<16x32x128xbf16>, vector<16x16x128xf32> -> vector<16x16x128xf32>
    "tpu.trace_stop"() : () -> ()
    %cst_77 = arith.constant dense<0.000000e+00> : vector<16x128xf32>
    %89 = vector.multi_reduction <add>, %88, %cst_77 [0] : vector<16x16x128xf32> to vector<16x128xf32>
    %90 = arith.addf %75, %89 : vector<16x128xf32>
    %c96 = arith.constant 96 : index
    %c0_78 = arith.constant 0 : index
    %c0_79 = arith.constant 0 : index
    %91 = vector.load %arg1[%c96, %c0_78, %c0_79] : memref<144x16x300xbf16, #tpu.memory_space<vmem>>, vector<16x16x300xbf16>
    %92 = vector.shape_cast %91 : vector<16x16x300xbf16> to vector<256x300xbf16>
    %c0_80 = arith.constant 0 : index
    %c0_81 = arith.constant 0 : index
    %93 = vector.load %arg2[%c0_80, %c0_81] : memref<300x32xbf16, #tpu.memory_space<vmem>>, vector<300x32xbf16>
    %cst_82 = arith.constant dense<0.000000e+00> : vector<256x32xf32>
    %94 = tpu.matmul %92, %93, %cst_82 {dimension_numbers = #tpu.dot_dimension_numbers<[1], [0], [0], [1], [0, 0, 1, 1], [], []>} : vector<256x300xbf16>, vector<300x32xbf16>, vector<256x32xf32> -> vector<256x32xf32>
    %c0_83 = arith.constant 0 : index
    %c0_84 = arith.constant 0 : index
    %95 = vector.load %arg3[%c0_83, %c0_84] : memref<1x32xf32, #tpu.memory_space<vmem>>, vector<1x32xf32>
    %96 = vector.broadcast %95 : vector<1x32xf32> to vector<256x32xf32>
    %97 = arith.addf %94, %96 : vector<256x32xf32>
    %cst_85 = arith.constant 0.000000e+00 : f32
    %98 = vector.broadcast %cst_85 : f32 to vector<256x32xf32>
    %99 = arith.maximumf %97, %98 : vector<256x32xf32>
    %100 = arith.truncf %99 : vector<256x32xf32> to vector<256x32xbf16>
    %101 = vector.shape_cast %100 : vector<256x32xbf16> to vector<16x16x32xbf16>
    %c96_86 = arith.constant 96 : index
    %c0_87 = arith.constant 0 : index
    %c0_88 = arith.constant 0 : index
    %102 = vector.load %arg4[%c96_86, %c0_87, %c0_88] : memref<144x32x128xbf16, #tpu.memory_space<vmem>>, vector<16x32x128xbf16>
    "tpu.trace_start"() <{level = 10 : i32, message = "pbc,pcn->pbn"}> : () -> ()
    %cst_89 = arith.constant dense<0.000000e+00> : vector<16x16x128xf32>
    %103 = tpu.matmul %101, %102, %cst_89 {dimension_numbers = #tpu.dot_dimension_numbers<[2], [1], [1], [2], [0, 0, 0, 1, 1, 2], [0], [0]>} : vector<16x16x32xbf16>, vector<16x32x128xbf16>, vector<16x16x128xf32> -> vector<16x16x128xf32>
    "tpu.trace_stop"() : () -> ()
    %cst_90 = arith.constant dense<0.000000e+00> : vector<16x128xf32>
    %104 = vector.multi_reduction <add>, %103, %cst_90 [0] : vector<16x16x128xf32> to vector<16x128xf32>
    %105 = arith.addf %90, %104 : vector<16x128xf32>
    %c112 = arith.constant 112 : index
    %c0_91 = arith.constant 0 : index
    %c0_92 = arith.constant 0 : index
    %106 = vector.load %arg1[%c112, %c0_91, %c0_92] : memref<144x16x300xbf16, #tpu.memory_space<vmem>>, vector<16x16x300xbf16>
    %107 = vector.shape_cast %106 : vector<16x16x300xbf16> to vector<256x300xbf16>
    %c0_93 = arith.constant 0 : index
    %c0_94 = arith.constant 0 : index
    %108 = vector.load %arg2[%c0_93, %c0_94] : memref<300x32xbf16, #tpu.memory_space<vmem>>, vector<300x32xbf16>
    %cst_95 = arith.constant dense<0.000000e+00> : vector<256x32xf32>
    %109 = tpu.matmul %107, %108, %cst_95 {dimension_numbers = #tpu.dot_dimension_numbers<[1], [0], [0], [1], [0, 0, 1, 1], [], []>} : vector<256x300xbf16>, vector<300x32xbf16>, vector<256x32xf32> -> vector<256x32xf32>
    %c0_96 = arith.constant 0 : index
    %c0_97 = arith.constant 0 : index
    %110 = vector.load %arg3[%c0_96, %c0_97] : memref<1x32xf32, #tpu.memory_space<vmem>>, vector<1x32xf32>
    %111 = vector.broadcast %110 : vector<1x32xf32> to vector<256x32xf32>
    %112 = arith.addf %109, %111 : vector<256x32xf32>
    %cst_98 = arith.constant 0.000000e+00 : f32
    %113 = vector.broadcast %cst_98 : f32 to vector<256x32xf32>
    %114 = arith.maximumf %112, %113 : vector<256x32xf32>
    %115 = arith.truncf %114 : vector<256x32xf32> to vector<256x32xbf16>
    %116 = vector.shape_cast %115 : vector<256x32xbf16> to vector<16x16x32xbf16>
    %c112_99 = arith.constant 112 : index
    %c0_100 = arith.constant 0 : index
    %c0_101 = arith.constant 0 : index
    %117 = vector.load %arg4[%c112_99, %c0_100, %c0_101] : memref<144x32x128xbf16, #tpu.memory_space<vmem>>, vector<16x32x128xbf16>
    "tpu.trace_start"() <{level = 10 : i32, message = "pbc,pcn->pbn"}> : () -> ()
    %cst_102 = arith.constant dense<0.000000e+00> : vector<16x16x128xf32>
    %118 = tpu.matmul %116, %117, %cst_102 {dimension_numbers = #tpu.dot_dimension_numbers<[2], [1], [1], [2], [0, 0, 0, 1, 1, 2], [0], [0]>} : vector<16x16x32xbf16>, vector<16x32x128xbf16>, vector<16x16x128xf32> -> vector<16x16x128xf32>
    "tpu.trace_stop"() : () -> ()
    %cst_103 = arith.constant dense<0.000000e+00> : vector<16x128xf32>
    %119 = vector.multi_reduction <add>, %118, %cst_103 [0] : vector<16x16x128xf32> to vector<16x128xf32>
    %120 = arith.addf %105, %119 : vector<16x128xf32>
    %c128 = arith.constant 128 : index
    %c0_104 = arith.constant 0 : index
    %c0_105 = arith.constant 0 : index
    %121 = vector.load %arg1[%c128, %c0_104, %c0_105] : memref<144x16x300xbf16, #tpu.memory_space<vmem>>, vector<16x16x300xbf16>
    %122 = vector.shape_cast %121 : vector<16x16x300xbf16> to vector<256x300xbf16>
    %c0_106 = arith.constant 0 : index
    %c0_107 = arith.constant 0 : index
    %123 = vector.load %arg2[%c0_106, %c0_107] : memref<300x32xbf16, #tpu.memory_space<vmem>>, vector<300x32xbf16>
    %cst_108 = arith.constant dense<0.000000e+00> : vector<256x32xf32>
    %124 = tpu.matmul %122, %123, %cst_108 {dimension_numbers = #tpu.dot_dimension_numbers<[1], [0], [0], [1], [0, 0, 1, 1], [], []>} : vector<256x300xbf16>, vector<300x32xbf16>, vector<256x32xf32> -> vector<256x32xf32>
    %c0_109 = arith.constant 0 : index
    %c0_110 = arith.constant 0 : index
    %125 = vector.load %arg3[%c0_109, %c0_110] : memref<1x32xf32, #tpu.memory_space<vmem>>, vector<1x32xf32>
    %126 = vector.broadcast %125 : vector<1x32xf32> to vector<256x32xf32>
    %127 = arith.addf %124, %126 : vector<256x32xf32>
    %cst_111 = arith.constant 0.000000e+00 : f32
    %128 = vector.broadcast %cst_111 : f32 to vector<256x32xf32>
    %129 = arith.maximumf %127, %128 : vector<256x32xf32>
    %130 = arith.truncf %129 : vector<256x32xf32> to vector<256x32xbf16>
    %131 = vector.shape_cast %130 : vector<256x32xbf16> to vector<16x16x32xbf16>
    %c128_112 = arith.constant 128 : index
    %c0_113 = arith.constant 0 : index
    %c0_114 = arith.constant 0 : index
    %132 = vector.load %arg4[%c128_112, %c0_113, %c0_114] : memref<144x32x128xbf16, #tpu.memory_space<vmem>>, vector<16x32x128xbf16>
    "tpu.trace_start"() <{level = 10 : i32, message = "pbc,pcn->pbn"}> : () -> ()
    %cst_115 = arith.constant dense<0.000000e+00> : vector<16x16x128xf32>
    %133 = tpu.matmul %131, %132, %cst_115 {dimension_numbers = #tpu.dot_dimension_numbers<[2], [1], [1], [2], [0, 0, 0, 1, 1, 2], [0], [0]>} : vector<16x16x32xbf16>, vector<16x32x128xbf16>, vector<16x16x128xf32> -> vector<16x16x128xf32>
    "tpu.trace_stop"() : () -> ()
    %cst_116 = arith.constant dense<0.000000e+00> : vector<16x128xf32>
    %134 = vector.multi_reduction <add>, %133, %cst_116 [0] : vector<16x16x128xf32> to vector<16x128xf32>
    %135 = arith.addf %120, %134 : vector<16x128xf32>
    %c0_117 = arith.constant 0 : index
    %c0_118 = arith.constant 0 : index
    %136 = vector.load %arg5[%c0_117, %c0_118] : memref<1x128xf32, #tpu.memory_space<vmem>>, vector<1x128xf32>
    %137 = vector.broadcast %136 : vector<1x128xf32> to vector<16x128xf32>
    %138 = arith.addf %135, %137 : vector<16x128xf32>
    %c0_119 = arith.constant 0 : index
    %c0_120 = arith.constant 0 : index
    %139 = vector.load %arg6[%c0_119, %c0_120] : memref<16x128xf32, #tpu.memory_space<vmem>>, vector<16x128xf32>
    tpu.vector_store %arg6[%c0_119, %c0_120], %138 {strides = array<i32>} : memref<16x128xf32, #tpu.memory_space<vmem>>, vector<16x128xf32>,
    return
  }
  func.func @transform_0(%arg0: i32) -> (i32, i32, i32) {
    %c0_i32 = arith.constant 0 : i32
    %c0_i32_0 = arith.constant 0 : i32
    %c0_i32_1 = arith.constant 0 : i32
    return %c0_i32, %arg0, %c0_i32_0 : i32, i32, i32
  }
  func.func @transform_1(%arg0: i32) -> (i32, i32) {
    %c0_i32 = arith.constant 0 : i32
    %c0_i32_0 = arith.constant 0 : i32
    %c0_i32_1 = arith.constant 0 : i32
    return %c0_i32, %c0_i32_0 : i32, i32
  }
  func.func @transform_2(%arg0: i32) -> (i32, i32) {
    %c0_i32 = arith.constant 0 : i32
    %c0_i32_0 = arith.constant 0 : i32
    %c0_i32_1 = arith.constant 0 : i32
    return %c0_i32, %c0_i32_0 : i32, i32
  }
  func.func @transform_3(%arg0: i32) -> (i32, i32, i32) {
    %c0_i32 = arith.constant 0 : i32
    %c0_i32_0 = arith.constant 0 : i32
    %c0_i32_1 = arith.constant 0 : i32
    %c0_i32_2 = arith.constant 0 : i32
    return %c0_i32, %c0_i32_0, %c0_i32_1 : i32, i32, i32
  }
  func.func @transform_4(%arg0: i32) -> (i32, i32) {
    %c0_i32 = arith.constant 0 : i32
    %c0_i32_0 = arith.constant 0 : i32
    %c0_i32_1 = arith.constant 0 : i32
    return %c0_i32, %c0_i32_0 : i32, i32
  }
  func.func @transform_5(%arg0: i32) -> (i32, i32) {
    %c0_i32 = arith.constant 0 : i32
    %c0_i32_0 = arith.constant 0 : i32
    return %arg0, %c0_i32 : i32, i32
  }
}

</mosaic_0001>

<bundles_post_ra>
// kernel: simple_cnn_32filter.1
= control target key start
LH: loop header
LB: loop body
LE: loop exit
PB: predicated region body
PF: predicated region fallthrough
CT: control target
= control target key end

     0   :  { %vm529_vm0 = vcmask 1045504   ;;  %vm480_vm1 = vcmask 359424   ;;  %vm945_vm2 = vcmask 261120   ;;  %s25125_s1 = inlined_call_operand.vmem [shape: bf16[300,32], index: 1, kind: input, shape index: {}]   ;;  %s25126_s0 = inlined_call_operand.vmem [shape: bf16[144,16,300], index: 0, kind: input, shape index: {}]   ;;  %s25127_s2 = inlined_call_operand.vmem [shape: f32[1,32], index: 2, kind: input, shape index: {}]   ;;  %s25128_s3 = inlined_call_operand.vmem [shape: bf16[144,32,128], index: 3, kind: input, shape index: {}]   ;;  %s25129_s4 = inlined_call_operand.vmem [shape: f32[1,128], index: 4, kind: input, shape index: {}]   ;;  %s25130_s5 = inlined_call_operand.vmem [shape: f32[16,128], index: 5, kind: output, shape index: {}]  }
   0x1   :  { %v18312_v0 = vld [vmem:[%s25125_s1 + $0x38] sm:$0xff]  ;;  %v18311_v2 = vld [vmem:[%s25125_s1 + $0x30] sm:$0xff]  ;;  %v18310_v8 = vld [vmem:[%s25125_s1 + $0x28] sm:$0xff] }
   0x2   :  { %v18320_v1 = vld [vmem:[%s25125_s1 + $0x78] sm:$0xff]  ;;  %533 = vmatpush.bf16.msra.mxu0 %v18312_v0  ;;  %v18319_v3 = vld [vmem:[%s25125_s1 + $0x70] sm:$0xff]  ;;  %v18318_v9 = vld [vmem:[%s25125_s1 + $0x68] sm:$0xff] }
   0x3   :  { %622 = vmatpush.bf16.msra.mxu1 %v18320_v1  ;;  %v13647_v4 = vld [vmem:[%s25125_s1 + $0x90] sm:$0xf]  ;;  %v18323_v5 = vld [vmem:[%s25125_s1 + $0x90] sm:$0x30]  ;;  %v18322_v10 = vld [vmem:[%s25125_s1 + $0x88] sm:$0xff] }
   0x4   :  { %v13648_v6 = vor.u32 %v18323_v5, %v13647_v4  ;;  %v18309_v11 = vld [vmem:[%s25125_s1 + $0x20] sm:$0xff]  ;;  %v13391_v14 = vld [vmem:[%s25126_s0 + $0x8] sm:$0xf]  ;;  %v18259_v15 = vld [vmem:[%s25126_s0 + $0x10] sm:$0xf0] }
   0x5   :  { %v18317_v12 = vld [vmem:[%s25125_s1 + $0x60] sm:$0xff]  ;;  %v18308_v16 = vld [vmem:[%s25125_s1 + $0x18] sm:$0xff]  ;;  %v13392_v18 = vor.u32 %v18259_v15, %v13391_v14  ;;  %v18307_v19 = vld [vmem:[%s25125_s1 + $0x10] sm:$0xff] }
   0x6   :  { %v531_v7 = vsel %vm529_vm0, %v13648_v6, 0  ;;  %534 = vmatpush.bf16.msra.mxu0 %v18311_v2  ;;  %v18321_v13 = vld [vmem:[%s25125_s1 + $0x80] sm:$0xff]  ;;  %v18316_v17 = vld [vmem:[%s25125_s1 + $0x58] sm:$0xff]  ;;  %v18315_v20 = vld [vmem:[%s25125_s1 + $0x50] sm:$0xff] }
   0x7   :  { %623 = vmatpush.bf16.msra.mxu1 %v18319_v3  ;;  %716 = vmatpush.bf16.msra.mxu2 %v531_v7  ;;  %v18306_v21 = vld [vmem:[%s25125_s1 + $0x8] sm:$0xff]  ;;  %v18305_v23 = vld [vmem:[%s25125_s1] sm:$0xff]  ;;  %v13385_v28 = vld [vmem:[%s25126_s0 + $0xc] sm:$0xf0] }
   0x8   :  { %v18314_v22 = vld [vmem:[%s25125_s1 + $0x48] sm:$0xff]  ;;  %v18313_v24 = vld [vmem:[%s25125_s1 + $0x40] sm:$0xff]  ;;  %v13395_v34 = vld [vmem:[%s25126_s0 + $0x18] sm:$0xf] }
   0x9   :  { %v13383_v25 = vld [vmem:[%s25126_s0] sm:$0xf]  ;;  %v18258_v26 = vld [vmem:[%s25126_s0 + $0x8] sm:$0xf0]  ;;  %v18257_v27 = vld [vmem:[%s25126_s0 + $0x4] sm:$0xf] }
   0xa   :  { %535 = vmatpush.bf16.msra.mxu0 %v18310_v8  ;;  %v13403_v29 = vld [vmem:[%s25126_s0 + $0x20] sm:$0xf]  ;;  %v18262_v30 = vld [vmem:[%s25126_s0 + $0x28] sm:$0xf0]  ;;  %v13384_v31 = vor.u32 %v18258_v26, %v13383_v25  ;;  %v13388_v32 = vor.u32 %v18257_v27, %v13385_v28  ;;  %v18261_v35 = vld [vmem:[%s25126_s0 + $0x20] sm:$0xf0] }
   0xb   :  { %624 = vmatpush.bf16.msra.mxu1 %v18318_v9  ;;  %717 = vmatpush.bf16.msra.mxu2 %v18322_v10  ;;  %v13404_v33 = vor.u32 %v18262_v30, %v13403_v29  ;;  %v18260_v36 = vld [vmem:[%s25126_s0 + $0x1c] sm:$0xf]  ;;  %v13397_v37 = vld [vmem:[%s25126_s0 + $0x24] sm:$0xf0]  ;;  %v13415_v38 = vld [vmem:[%s25126_s0 + $0x38] sm:$0xf]  ;;  %v13396_v40 = vor.u32 %v18261_v35, %v13395_v34 }
   0xc   :  { %v18265_v39 = vld [vmem:[%s25126_s0 + $0x40] sm:$0xf0]  ;;  %v13400_v41 = vor.u32 %v18260_v36, %v13397_v37  ;;  %v13407_v43 = vld [vmem:[%s25126_s0 + $0x30] sm:$0xf]  ;;  %v18264_v44 = vld [vmem:[%s25126_s0 + $0x38] sm:$0xf0] }
   0xd   :  { %v13416_v42 = vor.u32 %v18265_v39, %v13415_v38  ;;  %v18263_v45 = vld [vmem:[%s25126_s0 + $0x34] sm:$0xf]  ;;  %v13409_v46 = vld [vmem:[%s25126_s0 + $0x3c] sm:$0xf0]  ;;  %v13427_v47 = vld [vmem:[%s25126_s0 + $0x50] sm:$0xf]  ;;  %v13408_v49 = vor.u32 %v18264_v44, %v13407_v43 }
   0xe   :  { %536 = vmatpush.bf16.msra.mxu0 %v18309_v11  ;;  %v18268_v48 = vld [vmem:[%s25126_s0 + $0x58] sm:$0xf0]  ;;  %v13412_v50 = vor.u32 %v18263_v45, %v13409_v46  ;;  %v13419_v52 = vld [vmem:[%s25126_s0 + $0x48] sm:$0xf]  ;;  %v18267_v53 = vld [vmem:[%s25126_s0 + $0x50] sm:$0xf0] }
   0xf   :  { %625 = vmatpush.bf16.msra.mxu1 %v18317_v12  ;;  %718 = vmatpush.bf16.msra.mxu2 %v18321_v13  ;;  %v13428_v51 = vor.u32 %v18268_v48, %v13427_v47  ;;  %v18266_v54 = vld [vmem:[%s25126_s0 + $0x4c] sm:$0xf]  ;;  %v13421_v55 = vld [vmem:[%s25126_s0 + $0x54] sm:$0xf0]  ;;  %v13439_v56 = vld [vmem:[%s25126_s0 + $0x68] sm:$0xf]  ;;  %v13420_v58 = vor.u32 %v18267_v53, %v13419_v52 }
  0x10   :  { %v18271_v57 = vld [vmem:[%s25126_s0 + $0x70] sm:$0xf0]  ;;  %v13424_v59 = vor.u32 %v18266_v54, %v13421_v55  ;;  %v13431_v61 = vld [vmem:[%s25126_s0 + $0x60] sm:$0xf]  ;;  %v18270_v62 = vld [vmem:[%s25126_s0 + $0x68] sm:$0xf0] }
  0x11   :  { %v13440_v60 = vor.u32 %v18271_v57, %v13439_v56  ;;  %v18269_v63 = vld [vmem:[%s25126_s0 + $0x64] sm:$0xf]  ;;  %v13433_v0 = vld [vmem:[%s25126_s0 + $0x6c] sm:$0xf0]  ;;  %v13451_v1 = vld [vmem:[%s25126_s0 + $0x80] sm:$0xf]  ;;  %v13432_v3 = vor.u32 %v18270_v62, %v13431_v61 }
  0x12   :  { %537 = vmatpush.bf16.msra.mxu0 %v18308_v16  ;;  %13649 = vmatmul.msk.bf16.vlgmr.msra.gmra.mxu2 %vm480_vm1, %v13392_v18  ;;  %v18274_v2 = vld [vmem:[%s25126_s0 + $0x88] sm:$0xf0]  ;;  %v13436_v4 = vor.u32 %v18269_v63, %v13433_v0  ;;  %v13443_v6 = vld [vmem:[%s25126_s0 + $0x78] sm:$0xf]  ;;  %v18273_v7 = vld [vmem:[%s25126_s0 + $0x80] sm:$0xf0] }
  0x13   :  { %626 = vmatpush.bf16.msra.mxu1 %v18316_v17  ;;  %v13452_v5 = vor.u32 %v18274_v2, %v13451_v1  ;;  %v18272_v8 = vld [vmem:[%s25126_s0 + $0x7c] sm:$0xf]  ;;  %v13445_v9 = vld [vmem:[%s25126_s0 + $0x84] sm:$0xf0]  ;;  %v13463_v10 = vld [vmem:[%s25126_s0 + $0x98] sm:$0xf]  ;;  %v13444_v12 = vor.u32 %v18273_v7, %v13443_v6 }
  0x14   :  { %v18277_v11 = vld [vmem:[%s25126_s0 + $0xa0] sm:$0xf0]  ;;  %v13448_v13 = vor.u32 %v18272_v8, %v13445_v9  ;;  %v13455_v15 = vld [vmem:[%s25126_s0 + $0x90] sm:$0xf]  ;;  %v18276_v16 = vld [vmem:[%s25126_s0 + $0x98] sm:$0xf0] }
  0x15   :  { %v13464_v14 = vor.u32 %v18277_v11, %v13463_v10  ;;  %v18275_v17 = vld [vmem:[%s25126_s0 + $0x94] sm:$0xf]  ;;  %v13457_v18 = vld [vmem:[%s25126_s0 + $0x9c] sm:$0xf0]  ;;  %v18278_v26 = vld [vmem:[%s25126_s0 + $0xac] sm:$0xf] }
  0x16   :  { %538 = vmatpush.bf16.msra.mxu0 %v18307_v19  ;;  %v13475_v19 = vld [vmem:[%s25126_s0 + $0xb0] sm:$0xf]  ;;  %v18279_v25 = vld [vmem:[%s25126_s0 + $0xb0] sm:$0xf0]  ;;  %v13469_v27 = vld [vmem:[%s25126_s0 + $0xb4] sm:$0xf0] }
  0x17   :  { %627 = vmatpush.bf16.msra.mxu1 %v18315_v20  ;;  %v18280_v20 = vld [vmem:[%s25126_s0 + $0xb8] sm:$0xf0]  ;;  %v13487_v28 = vld [vmem:[%s25126_s0 + $0xc8] sm:$0xf]  ;;  %v18283_v29 = vld [vmem:[%s25126_s0 + $0xd0] sm:$0xf0] }
  0x18   :  { %v18325_v30 = vld [vmem:[%s25128_s3 + $0x8] sm:$0xff]  ;;  %v18324_v34 = vld [vmem:[%s25128_s3] sm:$0xff]  ;;  %v18411_v37 = vld [vmem:[%s25125_s1 + $0x38] sm:$0xff] }
  0x19   :  { %955 = vmatpush.bf16.msra.mxu3 %v18325_v30  ;;  %v13479_v36 = vld [vmem:[%s25126_s0 + $0xc0] sm:$0xf]  ;;  %v18327_v38 = vld [vmem:[%s25128_s3 + $0x18] sm:$0xff]  ;;  %v18282_v39 = vld [vmem:[%s25126_s0 + $0xc8] sm:$0xf0]  ;;  %2016 = vmatpush.bf16.msrb.mxu2 %v18411_v37 }
  0x1a   :  { %539 = vmatpush.bf16.msra.mxu0 %v18306_v21  ;;  %v13456_v21 = vor.u32 %v18276_v16, %v13455_v15  ;;  %v13499_v43 = vld [vmem:[%s25126_s0 + $0xe0] sm:$0xf]  ;;  %v18286_v44 = vld [vmem:[%s25126_s0 + $0xe8] sm:$0xf0]  ;;  %v13480_v45 = vor.u32 %v18282_v39, %v13479_v36  ;;  %v18326_v52 = vld [vmem:[%s25128_s3 + $0x10] sm:$0xff] }
  0x1b   :  { %628 = vmatpush.bf16.msra.mxu1 %v18314_v22  ;;  %v13460_v22 = vor.u32 %v18275_v17, %v13457_v18  ;;  %v14139_v54 = vld [vmem:[%s25125_s1 + $0x90] sm:$0xf]  ;;  %v18422_v55 = vld [vmem:[%s25125_s1 + $0x90] sm:$0x30]  ;;  %v13491_v1 = vld [vmem:[%s25126_s0 + $0xd8] sm:$0xf] }
  0x1c   :  { %v14140_v56 = vor.u32 %v18422_v55, %v14139_v54  ;;  %v18285_v2 = vld [vmem:[%s25126_s0 + $0xe0] sm:$0xf0]  ;;  %v13511_v6 = vld [vmem:[%s25126_s0 + $0xf8] sm:$0xf]  ;;  %v13523_v37 = vld [vmem:[%s25126_s0 + $0x110] sm:$0xf] }
  0x1d   :  { %956 = vmatpush.bf16.msra.mxu3 %v18324_v34  ;;  %v18289_v7 = vld [vmem:[%s25126_s0 + $0x100] sm:$0xf0]  ;;  %v13492_v10 = vor.u32 %v18285_v2, %v13491_v1  ;;  %v18287_v34 = vld [vmem:[%s25126_s0 + $0xf4] sm:$0xf]  ;;  %v18290_v1 = vld [vmem:[%s25126_s0 + $0x10c] sm:$0xf] }
  0x1e   :  { %540 = vmatpush.bf16.msra.mxu0 %v18305_v23  ;;  %v13476_v23 = vor.u32 %v18280_v20, %v13475_v19  ;;  %v13512_v17 = vor.u32 %v18289_v7, %v13511_v6  ;;  %v13517_v2 = vld [vmem:[%s25126_s0 + $0x114] sm:$0xf0] }
  0x1f   :  { %629 = vmatpush.bf16.msra.mxu1 %v18313_v24  ;;  %v13467_v24 = vld [vmem:[%s25126_s0 + $0xa8] sm:$0xf] }
  0x21   :  { %541 = vmatmul.bf16.vlgmr.msra.gmra.mxu0 %v13384_v31  ;;  %v13468_v31 = vor.u32 %v18279_v25, %v13467_v24  ;;  %989 = vmatpush.bf16.msrb.mxu3 %v18327_v38  ;;  %v18292_v38 = vld [vmem:[%s25126_s0 + $0x118] sm:$0xf0] }
  0x22   :  { %630 = vmatmul.bf16.vlgmr.msra.gmra.mxu1 %v13388_v32  ;;  %13650 = vmatmul.msk.bf16.gmra.mxu2 %vm480_vm1, %v13404_v33  ;;  %v13472_v32 = vor.u32 %v18278_v26, %v13469_v27  ;;  %v13488_v33 = vor.u32 %v18283_v29, %v13487_v28  ;;  %v18328_v26 = vld [vmem:[%s25128_s3 + $0x20] sm:$0xff] }
  0x25   :  { %990 = vmatpush.bf16.msrb.mxu3 %v18326_v52 }
  0x31   :  { %546 = vmatmul.bf16.gmra.mxu0 %v13396_v40  ;;  %v18281_v40 = vld [vmem:[%s25126_s0 + $0xc4] sm:$0xf] }
  0x32   :  { %635 = vmatmul.bf16.gmra.mxu1 %v13400_v41  ;;  %13651 = vmatmul.msk.bf16.gmra.mxu2 %vm480_vm1, %v13416_v42  ;;  %v13481_v41 = vld [vmem:[%s25126_s0 + $0xcc] sm:$0xf0]  ;;  %v19442_v42 = vld [vmem:[%s25127_s2] ss:$0 sm:$0xff] }
  0x33   :  { %v13484_v46 = vor.u32 %v18281_v40, %v13481_v41 }
  0x41   :  { %551 = vmatmul.bf16.gmra.mxu0 %v13408_v49 }
  0x42   :  { %640 = vmatmul.bf16.gmra.mxu1 %v13412_v50  ;;  %13652 = vmatmul.msk.bf16.gmra.mxu2 %vm480_vm1, %v13428_v51  ;;  %v13500_v51 = vor.u32 %v18286_v44, %v13499_v43 }
  0x51   :  { %556 = vmatmul.bf16.gmra.mxu0 %v13420_v58 }
  0x52   :  { %645 = vmatmul.bf16.gmra.mxu1 %v13424_v59  ;;  %13653 = vmatmul.msk.bf16.gmra.mxu2 %vm480_vm1, %v13440_v60  ;;  %v2014_v60 = vsel %vm529_vm0, %v14140_v56, 0 }
  0x53   :  { %2199 = vmatpush.bf16.msrb.mxu0 %v2014_v60 }
  0x61   :  { %561 = vmatmul.bf16.gmra.mxu0 %v13432_v3  ;;  %v18284_v3 = vld [vmem:[%s25126_s0 + $0xdc] sm:$0xf] }
  0x62   :  { %650 = vmatmul.bf16.gmra.mxu1 %v13436_v4  ;;  %13654 = vmatmul.msk.bf16.gmra.mxu2 %vm480_vm1, %v13452_v5  ;;  %v13493_v4 = vld [vmem:[%s25126_s0 + $0xe4] sm:$0xf0] }
  0x63   :  { %v13496_v11 = vor.u32 %v18284_v3, %v13493_v4  ;;  %v13535_v4 = vld [vmem:[%s25126_s0 + $0x128] sm:$0xf] }
  0x71   :  { %566 = vmatmul.bf16.gmra.mxu0 %v13444_v12 }
  0x72   :  { %655 = vmatmul.bf16.gmra.mxu1 %v13448_v13  ;;  %13655 = vmatmul.msk.bf16.gmra.mxu2 %vm480_vm1, %v13464_v14 }
  0x81   :  { %571 = vmatmul.bf16.gmra.mxu0 %v13456_v21  ;;  %v18329_v21 = vld [vmem:[%s25128_s3 + $0x28] sm:$0xff] }
  0x82   :  { %660 = vmatmul.bf16.gmra.mxu1 %v13460_v22  ;;  %13656 = vmatmul.msk.bf16.gmra.mxu2 %vm480_vm1, %v13476_v23 }
  0x91   :  { %576 = vmatmul.bf16.gmra.mxu0 %v13468_v31  ;;  %v13503_v31 = vld [vmem:[%s25126_s0 + $0xf0] sm:$0xf] }
  0x92   :  { %665 = vmatmul.bf16.gmra.mxu1 %v13472_v32  ;;  %13657 = vmatmul.msk.bf16.gmra.mxu2 %vm480_vm1, %v13488_v33  ;;  %v18410_v32 = vld [vmem:[%s25125_s1 + $0x30] sm:$0xff]  ;;  %v18288_v33 = vld [vmem:[%s25126_s0 + $0xf8] sm:$0xf0] }
  0x93   :  { %2017 = vmatpush.bf16.msrb.mxu2 %v18410_v32  ;;  %v13504_v41 = vor.u32 %v18288_v33, %v13503_v31  ;;  %v18294_v31 = vld [vmem:[%s25126_s0 + $0x128] sm:$0xf0]  ;;  %v18293_v32 = vld [vmem:[%s25126_s0 + $0x124] sm:$0xf]  ;;  %v13529_v33 = vld [vmem:[%s25126_s0 + $0x12c] sm:$0xf0] }
  0x95   :  { %v720_v35 = vpop.f32.mrf.mxu2 }
  0x9d   :  { %v722_v50 = vpop.f32.mrf.mxu2 }
  0x9e   :  { %v542_v47 = vpop.f32.mrf.mxu0 }
  0x9f   :  { %v631_v48 = vpop.f32.mrf.mxu1  ;;  %v543_v49 = vadd.f32 %v19442_v42, %v542_v47 }
  0xa1   :  { %v632_v53 = vadd.f32 %v631_v48, %v543_v49  ;;  %581 = vmatmul.bf16.gmra.mxu0 %v13480_v45  ;;  %v13524_v49 = vor.u32 %v18292_v38, %v13523_v37 }
  0xa2   :  { %670 = vmatmul.bf16.gmra.mxu1 %v13484_v46  ;;  %13658 = vmatmul.msk.bf16.gmra.mxu2 %vm480_vm1, %v13500_v51 }
  0xa3   :  { %v721_v57 = vadd.f32 %v720_v35, %v632_v53  ;;  %v13505_v35 = vld [vmem:[%s25126_s0 + $0xfc] sm:$0xf0]  ;;  %v18331_v53 = vld [vmem:[%s25128_s3 + $0x38] sm:$0xff] }
  0xa4   :  { %v13508_v43 = vor.u32 %v18287_v34, %v13505_v35  ;;  %v13547_v35 = vld [vmem:[%s25126_s0 + $0x140] sm:$0xf] }
  0xa5   :  { %v725_v62 = vpop.f32.mrf.mxu2  ;;  %v800_v63 = vmax.f32 %v721_v57, 0.0 }
  0xa6   :  { %v544_v58 = vpop.f32.mrf.mxu0 }
  0xa7   :  { %v633_v59 = vpop.f32.mrf.mxu1  ;;  %v545_v61 = vadd.f32 %v19442_v42, %v544_v58  ;;  %v832_v8 = vpack.c.bf16 %v800_v63, %v800_v63  ;;  %v18330_v58 = vld [vmem:[%s25128_s3 + $0x30] sm:$0xff]  ;;  %v13515_v63 = vld [vmem:[%s25126_s0 + $0x108] sm:$0xf] }
  0xa9   :  { %v634_v0 = vadd.f32 %v633_v59, %v545_v61  ;;  %v930_v18 = vunpack.c.l.b16 %v832_v8 }
  0xab   :  { %v723_v5 = vadd.f32 %v722_v50, %v634_v0  ;;  %v18291_v0 = vld [vmem:[%s25126_s0 + $0x110] sm:$0xf0] }
  0xac   :  { %v13516_v8 = vor.u32 %v18291_v0, %v13515_v63  ;;  %v18296_v63 = vld [vmem:[%s25126_s0 + $0x13c] sm:$0xf]  ;;  %v13541_v0 = vld [vmem:[%s25126_s0 + $0x144] sm:$0xf0] }
  0xad   :  { %v801_v9 = vmax.f32 %v723_v5, 0.0  ;;  %v727_v16 = vpop.f32.mrf.mxu2  ;;  %v18295_v5 = vld [vmem:[%s25126_s0 + $0x130] sm:$0xf0] }
  0xae   :  { %v547_v12 = vpop.f32.mrf.mxu0 }
  0xaf   :  { %v636_v13 = vpop.f32.mrf.mxu1  ;;  %v833_v14 = vpack.c.bf16 %v801_v9, %v801_v9  ;;  %v548_v15 = vadd.f32 %v19442_v42, %v547_v12  ;;  %v13520_v9 = vor.u32 %v18290_v1, %v13517_v2  ;;  %v13559_v2 = vld [vmem:[%s25126_s0 + $0x158] sm:$0xf] }
  0xb1   :  { %v931_v19 = vunpack.c.l.b16 %v833_v14  ;;  %v637_v20 = vadd.f32 %v636_v13, %v548_v15  ;;  %586 = vmatmul.bf16.gmra.mxu0 %v13492_v10  ;;  %v13536_v15 = vor.u32 %v18295_v5, %v13535_v4 }
  0xb2   :  { %675 = vmatmul.bf16.gmra.mxu1 %v13496_v11  ;;  %13659 = vmatmul.msk.bf16.gmra.mxu2 %vm480_vm1, %v13512_v17 }
  0xb3   :  { %v932_v22 = vpack.c.b16 %v931_v19, %v930_v18  ;;  %v726_v23 = vadd.f32 %v725_v62, %v637_v20  ;;  %v18333_v19 = vld [vmem:[%s25128_s3 + $0x48] sm:$0xff] }
  0xb5   :  { %13673 = vmatmul.msk.bf16.vlgmr.msra.gmra.mxu3 %vm945_vm2, %v932_v22  ;;  %v730_v28 = vpop.f32.mrf.mxu2  ;;  %v802_v29 = vmax.f32 %v726_v23, 0.0 }
  0xb6   :  { %v549_v24 = vpop.f32.mrf.mxu0  ;;  %1023 = vmatpush.bf16.msra.mxu3 %v18329_v21 }
  0xb7   :  { %v638_v25 = vpop.f32.mrf.mxu1  ;;  %v550_v27 = vadd.f32 %v19442_v42, %v549_v24  ;;  %v834_v39 = vpack.c.bf16 %v802_v29, %v802_v29  ;;  %v18332_v24 = vld [vmem:[%s25128_s3 + $0x40] sm:$0xff] }
  0xb8   :  { %v13527_v29 = vld [vmem:[%s25126_s0 + $0x120] sm:$0xf] }
  0xb9   :  { %v639_v30 = vadd.f32 %v638_v25, %v550_v27  ;;  %v965_v50 = vunpack.c.l.b16 %v834_v39  ;;  %v13528_v39 = vor.u32 %v18294_v31, %v13527_v29  ;;  %v18421_v29 = vld [vmem:[%s25125_s1 + $0x88] sm:$0xff]  ;;  %v18299_v31 = vld [vmem:[%s25126_s0 + $0x154] sm:$0xf] }
  0xba   :  { %1024 = vmatpush.bf16.msra.mxu3 %v18328_v26  ;;  %2200 = vmatpush.bf16.msrb.mxu0 %v18421_v29 }
  0xbb   :  { %v728_v36 = vadd.f32 %v727_v16, %v639_v30  ;;  %v18409_v30 = vld [vmem:[%s25125_s1 + $0x28] sm:$0xff] }
  0xbc   :  { %2018 = vmatpush.bf16.msrb.mxu2 %v18409_v30  ;;  %v18300_v30 = vld [vmem:[%s25126_s0 + $0x158] sm:$0xf0] }
  0xbd   :  { %v803_v40 = vmax.f32 %v728_v36, 0.0  ;;  %v732_v48 = vpop.f32.mrf.mxu2  ;;  %v18298_v36 = vld [vmem:[%s25126_s0 + $0x148] sm:$0xf0] }
  0xbe   :  { %v552_v44 = vpop.f32.mrf.mxu0 }
  0xbf   :  { %v641_v45 = vpop.f32.mrf.mxu1  ;;  %v835_v46 = vpack.c.bf16 %v803_v40, %v803_v40  ;;  %v553_v47 = vadd.f32 %v19442_v42, %v552_v44  ;;  %v13532_v40 = vor.u32 %v18293_v32, %v13529_v33  ;;  %v13553_v32 = vld [vmem:[%s25126_s0 + $0x15c] sm:$0xf0] }
  0xc1   :  { %v966_v51 = vunpack.c.l.b16 %v835_v46  ;;  %v642_v52 = vadd.f32 %v641_v45, %v553_v47  ;;  %591 = vmatmul.bf16.gmra.mxu0 %v13504_v41  ;;  %v13548_v47 = vor.u32 %v18298_v36, %v13547_v35  ;;  %v18304_v35 = vld [vmem:[%s25126_s0 + $0x178] sm:$0xf0] }
  0xc2   :  { %680 = vmatmul.bf16.gmra.mxu1 %v13508_v43  ;;  %13660 = vmatmul.msk.bf16.gmra.mxu2 %vm480_vm1, %v13524_v49 }
  0xc3   :  { %v967_v54 = vpack.c.b16 %v966_v51, %v965_v50  ;;  %v731_v55 = vadd.f32 %v730_v28, %v642_v52  ;;  %v18335_v51 = vld [vmem:[%s25128_s3 + $0x58] sm:$0xff] }
  0xc5   :  { %13682 = vmatmul.msk.bf16.vlgmr.msrb.gmra.mxu3 %vm945_vm2, %v967_v54  ;;  %v735_v60 = vpop.f32.mrf.mxu2  ;;  %v804_v61 = vmax.f32 %v731_v55, 0.0 }
  0xc6   :  { %v554_v56 = vpop.f32.mrf.mxu0  ;;  %1057 = vmatpush.bf16.msrb.mxu3 %v18331_v53 }
  0xc7   :  { %v643_v57 = vpop.f32.mrf.mxu1  ;;  %v555_v59 = vadd.f32 %v19442_v42, %v554_v56  ;;  %v836_v6 = vpack.c.bf16 %v804_v61, %v804_v61  ;;  %v18334_v56 = vld [vmem:[%s25128_s3 + $0x50] sm:$0xff]  ;;  %v13539_v61 = vld [vmem:[%s25126_s0 + $0x138] sm:$0xf] }
  0xc9   :  { %v644_v62 = vadd.f32 %v643_v57, %v555_v59  ;;  %v999_v16 = vunpack.c.l.b16 %v836_v6 }
  0xca   :  { %1058 = vmatpush.bf16.msrb.mxu3 %v18330_v58 }
  0xcb   :  { %v733_v3 = vadd.f32 %v732_v48, %v644_v62  ;;  %v18297_v62 = vld [vmem:[%s25126_s0 + $0x140] sm:$0xf0] }
  0xcc   :  { %v13540_v6 = vor.u32 %v18297_v62, %v13539_v61  ;;  %v18303_v61 = vld [vmem:[%s25126_s0 + $0x170] sm:$0xf0]  ;;  %v18302_v62 = vld [vmem:[%s25126_s0 + $0x16c] sm:$0xf] }
  0xcd   :  { %v805_v7 = vmax.f32 %v733_v3, 0.0  ;;  %v737_v14 = vpop.f32.mrf.mxu2  ;;  %v18301_v3 = vld [vmem:[%s25126_s0 + $0x160] sm:$0xf0] }
  0xce   :  { %v557_v10 = vpop.f32.mrf.mxu0 }
  0xcf   :  { %v646_v11 = vpop.f32.mrf.mxu1  ;;  %v837_v12 = vpack.c.bf16 %v805_v7, %v805_v7  ;;  %v558_v13 = vadd.f32 %v19442_v42, %v557_v10  ;;  %v13544_v7 = vor.u32 %v18296_v63, %v13541_v0  ;;  %v13565_v63 = vld [vmem:[%s25126_s0 + $0x174] sm:$0xf0] }
  0xd1   :  { %v1000_v17 = vunpack.c.l.b16 %v837_v12  ;;  %v647_v18 = vadd.f32 %v646_v11, %v558_v13  ;;  %596 = vmatmul.bf16.gmra.mxu0 %v13516_v8  ;;  %v13560_v13 = vor.u32 %v18301_v3, %v13559_v2 }
  0xd2   :  { %685 = vmatmul.bf16.gmra.mxu1 %v13520_v9  ;;  %13661 = vmatmul.msk.bf16.gmra.mxu2 %vm480_vm1, %v13536_v15 }
  0xd3   :  { %v1001_v20 = vpack.c.b16 %v1000_v17, %v999_v16  ;;  %v736_v21 = vadd.f32 %v735_v60, %v647_v18  ;;  %v18337_v17 = vld [vmem:[%s25128_s3 + $0x68] sm:$0xff] }
  0xd5   :  { %13691 = vmatmul.msk.bf16.vlgmr.msra.gmra.mxu3 %vm945_vm2, %v1001_v20  ;;  %v740_v26 = vpop.f32.mrf.mxu2  ;;  %v806_v27 = vmax.f32 %v736_v21, 0.0 }
  0xd6   :  { %v559_v22 = vpop.f32.mrf.mxu0  ;;  %1091 = vmatpush.bf16.msra.mxu3 %v18333_v19 }
  0xd7   :  { %v648_v23 = vpop.f32.mrf.mxu1  ;;  %v560_v25 = vadd.f32 %v19442_v42, %v559_v22  ;;  %v838_v37 = vpack.c.bf16 %v806_v27, %v806_v27  ;;  %v18336_v22 = vld [vmem:[%s25128_s3 + $0x60] sm:$0xff]  ;;  %v13551_v27 = vld [vmem:[%s25126_s0 + $0x150] sm:$0xf] }
  0xd9   :  { %v649_v28 = vadd.f32 %v648_v23, %v560_v25  ;;  %v1033_v48 = vunpack.c.l.b16 %v838_v37 }
  0xda   :  { %1092 = vmatpush.bf16.msra.mxu3 %v18332_v24 }
  0xdb   :  { %v738_v34 = vadd.f32 %v737_v14, %v649_v28  ;;  %v18408_v28 = vld [vmem:[%s25125_s1 + $0x20] sm:$0xff] }
  0xdc   :  { %2019 = vmatpush.bf16.msrb.mxu2 %v18408_v28 }
  0xdd   :  { %v807_v38 = vmax.f32 %v738_v34, 0.0  ;;  %v742_v46 = vpop.f32.mrf.mxu2  ;;  %v13571_v34 = vld [vmem:[%s25126_s0 + $0x170] sm:$0xf] }
  0xde   :  { %v562_v41 = vpop.f32.mrf.mxu0 }
  0xdf   :  { %v651_v43 = vpop.f32.mrf.mxu1  ;;  %v839_v44 = vpack.c.bf16 %v807_v38, %v807_v38  ;;  %v563_v45 = vadd.f32 %v19442_v42, %v562_v41  ;;  %v13552_v38 = vor.u32 %v18300_v30, %v13551_v27 }
  0xe1   :  { %v1034_v49 = vunpack.c.l.b16 %v839_v44  ;;  %v652_v50 = vadd.f32 %v651_v43, %v563_v45  ;;  %601 = vmatmul.bf16.gmra.mxu0 %v13528_v39  ;;  %v13556_v39 = vor.u32 %v18299_v31, %v13553_v32 }
  0xe2   :  { %690 = vmatmul.bf16.gmra.mxu1 %v13532_v40  ;;  %13662 = vmatmul.msk.bf16.gmra.mxu2 %vm480_vm1, %v13548_v47 }
  0xe3   :  { %v1035_v52 = vpack.c.b16 %v1034_v49, %v1033_v48  ;;  %v741_v53 = vadd.f32 %v740_v26, %v652_v50  ;;  %v18339_v50 = vld [vmem:[%s25128_s3 + $0x78] sm:$0xff] }
  0xe5   :  { %13700 = vmatmul.msk.bf16.vlgmr.msrb.gmra.mxu3 %vm945_vm2, %v1035_v52  ;;  %v745_v58 = vpop.f32.mrf.mxu2  ;;  %v808_v59 = vmax.f32 %v741_v53, 0.0 }
  0xe6   :  { %v564_v54 = vpop.f32.mrf.mxu0  ;;  %1125 = vmatpush.bf16.msrb.mxu3 %v18335_v51 }
  0xe7   :  { %v653_v55 = vpop.f32.mrf.mxu1  ;;  %v565_v57 = vadd.f32 %v19442_v42, %v564_v54  ;;  %v840_v4 = vpack.c.bf16 %v808_v59, %v808_v59 }
  0xe9   :  { %v654_v60 = vadd.f32 %v653_v55, %v565_v57  ;;  %v1067_v14 = vunpack.c.l.b16 %v840_v4  ;;  %v18338_v55 = vld [vmem:[%s25128_s3 + $0x70] sm:$0xff]  ;;  %v13568_v4 = vor.u32 %v18302_v62, %v13565_v63  ;;  %v18344_v63 = vld [vmem:[%s25128_s3 + $0xa0] sm:$0xff] }
  0xea   :  { %1126 = vmatpush.bf16.msrb.mxu3 %v18334_v56 }
  0xeb   :  { %v743_v1 = vadd.f32 %v742_v46, %v654_v60  ;;  %v13572_v46 = vor.u32 %v18304_v35, %v13571_v34  ;;  %v13563_v60 = vld [vmem:[%s25126_s0 + $0x168] sm:$0xf]  ;;  %v18343_v35 = vld [vmem:[%s25128_s3 + $0x98] sm:$0xff] }
  0xec   :  { %v13564_v3 = vor.u32 %v18303_v61, %v13563_v60 }
  0xed   :  { %v809_v5 = vmax.f32 %v743_v1, 0.0  ;;  %v747_v12 = vpop.f32.mrf.mxu2 }
  0xee   :  { %v567_v8 = vpop.f32.mrf.mxu0 }
  0xef   :  { %v656_v9 = vpop.f32.mrf.mxu1  ;;  %v841_v10 = vpack.c.bf16 %v809_v5, %v809_v5  ;;  %v568_v11 = vadd.f32 %v19442_v42, %v567_v8 }
  0xf1   :  { %v1068_v15 = vunpack.c.l.b16 %v841_v10  ;;  %v657_v16 = vadd.f32 %v656_v9, %v568_v11  ;;  %606 = vmatmul.bf16.gmra.mxu0 %v13540_v6 }
  0xf2   :  { %695 = vmatmul.bf16.gmra.mxu1 %v13544_v7  ;;  %13663 = vmatmul.msk.bf16.gmra.mxu2 %vm480_vm1, %v13560_v13  ;;  %v18341_v13 = vld [vmem:[%s25128_s3 + $0x88] sm:$0xff] }
  0xf3   :  { %v1069_v18 = vpack.c.b16 %v1068_v15, %v1067_v14  ;;  %v746_v19 = vadd.f32 %v745_v58, %v657_v16 }
  0xf5   :  { %13709 = vmatmul.msk.bf16.vlgmr.msra.gmra.mxu3 %vm945_vm2, %v1069_v18  ;;  %v750_v24 = vpop.f32.mrf.mxu2  ;;  %v810_v25 = vmax.f32 %v746_v19, 0.0  ;;  %v18340_v18 = vld [vmem:[%s25128_s3 + $0x80] sm:$0xff] }
  0xf6   :  { %v569_v20 = vpop.f32.mrf.mxu0  ;;  %1159 = vmatpush.bf16.msra.mxu3 %v18337_v17 }
  0xf7   :  { %v658_v21 = vpop.f32.mrf.mxu1  ;;  %v570_v23 = vadd.f32 %v19442_v42, %v569_v20  ;;  %v842_v36 = vpack.c.bf16 %v810_v25, %v810_v25 }
  0xf9   :  { %v659_v26 = vadd.f32 %v658_v21, %v570_v23  ;;  %v1101_v47 = vunpack.c.l.b16 %v842_v36  ;;  %v18407_v23 = vld [vmem:[%s25125_s1 + $0x18] sm:$0xff] }
  0xfa   :  { %1160 = vmatpush.bf16.msra.mxu3 %v18336_v22  ;;  %2020 = vmatpush.bf16.msrb.mxu2 %v18407_v23  ;;  %v18346_v23 = vld [vmem:[%s25128_s3 + $0xb0] sm:$0xff] }
  0xfb   :  { %v748_v33 = vadd.f32 %v747_v12, %v659_v26 }
  0xfd   :  { %v811_v37 = vmax.f32 %v748_v33, 0.0  ;;  %v752_v45 = vpop.f32.mrf.mxu2 }
  0xfe   :  { %v572_v40 = vpop.f32.mrf.mxu0 }
  0xff   :  { %v661_v41 = vpop.f32.mrf.mxu1  ;;  %v843_v43 = vpack.c.bf16 %v811_v37, %v811_v37  ;;  %v573_v44 = vadd.f32 %v19442_v42, %v572_v40  ;;  %v18342_v40 = vld [vmem:[%s25128_s3 + $0x90] sm:$0xff] }
 0x101   :  { %v1102_v48 = vunpack.c.l.b16 %v843_v43  ;;  %v662_v49 = vadd.f32 %v661_v41, %v573_v44  ;;  %611 = vmatmul.bf16.gmra.mxu0 %v13552_v38 }
 0x102   :  { %700 = vmatmul.bf16.gmra.mxu1 %v13556_v39  ;;  %13664 = vmatmul.msk.bf16.gmra.mxu2 %vm480_vm1, %v13572_v46 }
 0x103   :  { %v1103_v51 = vpack.c.b16 %v1102_v48, %v1101_v47  ;;  %v751_v52 = vadd.f32 %v750_v24, %v662_v49 }
 0x105   :  { %13718 = vmatmul.msk.bf16.vlgmr.msrb.gmra.mxu3 %vm945_vm2, %v1103_v51  ;;  %v755_v57 = vpop.f32.mrf.mxu2  ;;  %v812_v58 = vmax.f32 %v751_v52, 0.0 }
 0x106   :  { %v574_v53 = vpop.f32.mrf.mxu0  ;;  %1193 = vmatpush.bf16.msrb.mxu3 %v18339_v50 }
 0x107   :  { %v663_v54 = vpop.f32.mrf.mxu1  ;;  %v575_v56 = vadd.f32 %v19442_v42, %v574_v53  ;;  %v844_v1 = vpack.c.bf16 %v812_v58, %v812_v58 }
 0x109   :  { %v664_v59 = vadd.f32 %v663_v54, %v575_v56  ;;  %v1135_v10 = vunpack.c.l.b16 %v844_v1 }
 0x10a   :  { %1194 = vmatpush.bf16.msrb.mxu3 %v18338_v55 }
 0x10b   :  { %v753_v0 = vadd.f32 %v752_v45, %v664_v59  ;;  %v18424_v59 = vld [vmem:[%s25128_s3 + $0x108] sm:$0xff] }
 0x10c   :  { %2438 = vmatpush.bf16.msrb.mxu1 %v18424_v59 }
 0x10d   :  { %v813_v2 = vmax.f32 %v753_v0, 0.0  ;;  %v757_v9 = vpop.f32.mrf.mxu2 }
 0x10e   :  { %v577_v5 = vpop.f32.mrf.mxu0 }
 0x10f   :  { %v666_v6 = vpop.f32.mrf.mxu1  ;;  %v845_v7 = vpack.c.bf16 %v813_v2, %v813_v2  ;;  %v578_v8 = vadd.f32 %v19442_v42, %v577_v5  ;;  %v18406_v5 = vld [vmem:[%s25125_s1 + $0x10] sm:$0xff] }
 0x110   :  { %2021 = vmatpush.bf16.msrb.mxu2 %v18406_v5 }
 0x111   :  { %v1136_v11 = vunpack.c.l.b16 %v845_v7  ;;  %v667_v12 = vadd.f32 %v666_v6, %v578_v8  ;;  %616 = vmatmul.bf16.gmra.mxu0 %v13564_v3 }
 0x112   :  { %705 = vmatmul.bf16.gmra.mxu1 %v13568_v4 }
 0x113   :  { %v1137_v14 = vpack.c.b16 %v1136_v11, %v1135_v10  ;;  %v756_v15 = vadd.f32 %v755_v57, %v667_v12  ;;  %v18345_v57 = vld [vmem:[%s25128_s3 + $0xa8] sm:$0xff] }
 0x115   :  { %13727 = vmatmul.msk.bf16.vlgmr.msra.gmra.mxu3 %vm945_vm2, %v1137_v14  ;;  %v760_v20 = vpop.f32.mrf.mxu2  ;;  %v814_v21 = vmax.f32 %v756_v15, 0.0 }
 0x116   :  { %v579_v16 = vpop.f32.mrf.mxu0  ;;  %1227 = vmatpush.bf16.msra.mxu3 %v18341_v13 }
 0x117   :  { %v668_v17 = vpop.f32.mrf.mxu1  ;;  %v580_v19 = vadd.f32 %v19442_v42, %v579_v16  ;;  %v846_v25 = vpack.c.bf16 %v814_v21, %v814_v21 }
 0x119   :  { %v669_v22 = vadd.f32 %v668_v17, %v580_v19  ;;  %v1169_v32 = vunpack.c.l.b16 %v846_v25 }
 0x11a   :  { %1228 = vmatpush.bf16.msra.mxu3 %v18340_v18  ;;  %v18347_v18 = vld [vmem:[%s25128_s3 + $0xb8] sm:$0xff] }
 0x11b   :  { %v758_v24 = vadd.f32 %v757_v9, %v669_v22 }
 0x11d   :  { %v815_v26 = vmax.f32 %v758_v24, 0.0  ;;  %v762_v31 = vpop.f32.mrf.mxu2 }
 0x11e   :  { %v582_v27 = vpop.f32.mrf.mxu0 }
 0x11f   :  { %v671_v28 = vpop.f32.mrf.mxu1  ;;  %v847_v29 = vpack.c.bf16 %v815_v26, %v815_v26  ;;  %v583_v30 = vadd.f32 %v19442_v42, %v582_v27 }
 0x121   :  { %v1170_v33 = vunpack.c.l.b16 %v847_v29  ;;  %v672_v34 = vadd.f32 %v671_v28, %v583_v30 }
 0x123   :  { %v1171_v36 = vpack.c.b16 %v1170_v33, %v1169_v32  ;;  %v761_v37 = vadd.f32 %v760_v20, %v672_v34 }
 0x125   :  { %13736 = vmatmul.msk.bf16.vlgmr.msrb.gmra.mxu3 %vm945_vm2, %v1171_v36  ;;  %v765_v43 = vpop.f32.mrf.mxu2  ;;  %v816_v44 = vmax.f32 %v761_v37, 0.0 }
 0x126   :  { %v584_v38 = vpop.f32.mrf.mxu0  ;;  %1261 = vmatpush.bf16.msrb.mxu3 %v18343_v35 }
 0x127   :  { %v673_v39 = vpop.f32.mrf.mxu1  ;;  %v585_v41 = vadd.f32 %v19442_v42, %v584_v38  ;;  %v848_v47 = vpack.c.bf16 %v816_v44, %v816_v44  ;;  %v18349_v44 = vld [vmem:[%s25128_s3 + $0xc8] sm:$0xff] }
 0x129   :  { %v674_v45 = vadd.f32 %v673_v39, %v585_v41  ;;  %v1203_v54 = vunpack.c.l.b16 %v848_v47 }
 0x12a   :  { %1262 = vmatpush.bf16.msrb.mxu3 %v18342_v40 }
 0x12b   :  { %v763_v46 = vadd.f32 %v762_v31, %v674_v45 }
 0x12d   :  { %v817_v48 = vmax.f32 %v763_v46, 0.0  ;;  %v767_v53 = vpop.f32.mrf.mxu2  ;;  %v18420_v46 = vld [vmem:[%s25125_s1 + $0x80] sm:$0xff] }
 0x12e   :  { %v587_v49 = vpop.f32.mrf.mxu0  ;;  %2201 = vmatpush.bf16.msrb.mxu0 %v18420_v46 }
 0x12f   :  { %v676_v50 = vpop.f32.mrf.mxu1  ;;  %v849_v51 = vpack.c.bf16 %v817_v48, %v817_v48  ;;  %v588_v52 = vadd.f32 %v19442_v42, %v587_v49 }
 0x131   :  { %v1204_v55 = vunpack.c.l.b16 %v849_v51  ;;  %v677_v56 = vadd.f32 %v676_v50, %v588_v52  ;;  %v18348_v50 = vld [vmem:[%s25128_s3 + $0xc0] sm:$0xff] }
 0x133   :  { %v1205_v58 = vpack.c.b16 %v1204_v55, %v1203_v54  ;;  %v766_v60 = vadd.f32 %v765_v43, %v677_v56 }
 0x135   :  { %13745 = vmatmul.msk.bf16.vlgmr.msra.gmra.mxu3 %vm945_vm2, %v1205_v58  ;;  %v770_v1 = vpop.f32.mrf.mxu2  ;;  %v818_v3 = vmax.f32 %v766_v60, 0.0 }
 0x136   :  { %v589_v61 = vpop.f32.mrf.mxu0  ;;  %1295 = vmatpush.bf16.msra.mxu3 %v18345_v57  ;;  %v18405_v57 = vld [vmem:[%s25125_s1 + $0x8] sm:$0xff] }
 0x137   :  { %v678_v62 = vpop.f32.mrf.mxu1  ;;  %v590_v0 = vadd.f32 %v19442_v42, %v589_v61  ;;  %v850_v7 = vpack.c.bf16 %v818_v3, %v818_v3  ;;  %2022 = vmatpush.bf16.msrb.mxu2 %v18405_v57 }
 0x138   :  { %v958_v2 = vpop.f32.mrf.mxu3 }
 0x139   :  { %v679_v4 = vadd.f32 %v678_v62, %v590_v0  ;;  %v1237_v15 = vunpack.c.l.b16 %v850_v7  ;;  %v18351_v7 = vld [vmem:[%s25128_s3 + $0xd8] sm:$0xff] }
 0x13a   :  { %1296 = vmatpush.bf16.msra.mxu3 %v18344_v63 }
 0x13b   :  { %v768_v6 = vadd.f32 %v767_v53, %v679_v4 }
 0x13d   :  { %v819_v8 = vmax.f32 %v768_v6, 0.0  ;;  %v772_v13 = vpop.f32.mrf.mxu2 }
 0x13e   :  { %v592_v9 = vpop.f32.mrf.mxu0 }
 0x13f   :  { %v681_v10 = vpop.f32.mrf.mxu1  ;;  %v851_v11 = vpack.c.bf16 %v819_v8, %v819_v8  ;;  %v593_v12 = vadd.f32 %v19442_v42, %v592_v9 }
 0x140   :  { %v960_v14 = vpop.f32.mrf.mxu3 }
 0x141   :  { %v1238_v16 = vunpack.c.l.b16 %v851_v11  ;;  %v682_v17 = vadd.f32 %v681_v10, %v593_v12  ;;  %v18350_v12 = vld [vmem:[%s25128_s3 + $0xd0] sm:$0xff] }
 0x143   :  { %v1239_v19 = vpack.c.b16 %v1238_v16, %v1237_v15  ;;  %v771_v20 = vadd.f32 %v770_v1, %v682_v17 }
 0x145   :  { %13754 = vmatmul.msk.bf16.vlgmr.msrb.gmra.mxu3 %vm945_vm2, %v1239_v19  ;;  %v775_v25 = vpop.f32.mrf.mxu2  ;;  %v820_v27 = vmax.f32 %v771_v20, 0.0 }
 0x146   :  { %v594_v21 = vpop.f32.mrf.mxu0  ;;  %1329 = vmatpush.bf16.msrb.mxu3 %v18347_v18 }
 0x147   :  { %v683_v22 = vpop.f32.mrf.mxu1  ;;  %v595_v24 = vadd.f32 %v19442_v42, %v594_v21  ;;  %v852_v31 = vpack.c.bf16 %v820_v27, %v820_v27 }
 0x148   :  { %v992_v26 = vpop.f32.mrf.mxu3 }
 0x149   :  { %v684_v28 = vadd.f32 %v683_v22, %v595_v24  ;;  %v1473_v29 = vadd.f32 %v992_v26, %v958_v2  ;;  %v1271_v39 = vunpack.c.l.b16 %v852_v31 }
 0x14a   :  { %1330 = vmatpush.bf16.msrb.mxu3 %v18346_v23 }
 0x14b   :  { %v773_v30 = vadd.f32 %v772_v13, %v684_v28 }
 0x14d   :  { %v821_v32 = vmax.f32 %v773_v30, 0.0  ;;  %v777_v37 = vpop.f32.mrf.mxu2 }
 0x14e   :  { %v597_v33 = vpop.f32.mrf.mxu0 }
 0x14f   :  { %v686_v34 = vpop.f32.mrf.mxu1  ;;  %v853_v35 = vpack.c.bf16 %v821_v32, %v821_v32  ;;  %v598_v36 = vadd.f32 %v19442_v42, %v597_v33  ;;  %v18353_v32 = vld [vmem:[%s25128_s3 + $0xe8] sm:$0xff] }
 0x150   :  { %v994_v38 = vpop.f32.mrf.mxu3 }
 0x151   :  { %v1272_v40 = vunpack.c.l.b16 %v853_v35  ;;  %v687_v41 = vadd.f32 %v686_v34, %v598_v36  ;;  %v1488_v43 = vadd.f32 %v994_v38, %v960_v14 }
 0x153   :  { %v1273_v45 = vpack.c.b16 %v1272_v40, %v1271_v39  ;;  %v776_v47 = vadd.f32 %v775_v25, %v687_v41 }
 0x155   :  { %13763 = vmatmul.msk.bf16.vlgmr.msra.gmra.mxu3 %vm945_vm2, %v1273_v45  ;;  %v780_v52 = vpop.f32.mrf.mxu2  ;;  %v822_v54 = vmax.f32 %v776_v47, 0.0 }
 0x156   :  { %v599_v48 = vpop.f32.mrf.mxu0  ;;  %1363 = vmatpush.bf16.msra.mxu3 %v18349_v44  ;;  %v18404_v44 = vld [vmem:[%s25125_s1] sm:$0xff] }
 0x157   :  { %v688_v49 = vpop.f32.mrf.mxu1  ;;  %v600_v51 = vadd.f32 %v19442_v42, %v599_v48  ;;  %v854_v59 = vpack.c.bf16 %v822_v54, %v822_v54  ;;  %2023 = vmatpush.bf16.msrb.mxu2 %v18404_v44 }
 0x158   :  { %v1026_v53 = vpop.f32.mrf.mxu3 }
 0x159   :  { %v689_v55 = vadd.f32 %v688_v49, %v600_v51  ;;  %v1474_v56 = vadd.f32 %v1473_v29, %v1026_v53  ;;  %v1305_v3 = vunpack.c.l.b16 %v854_v59 }
 0x15a   :  { %1364 = vmatpush.bf16.msra.mxu3 %v18348_v50 }
 0x15b   :  { %v778_v58 = vadd.f32 %v777_v37, %v689_v55  ;;  %v18352_v37 = vld [vmem:[%s25128_s3 + $0xe0] sm:$0xff] }
 0x15d   :  { %v823_v60 = vmax.f32 %v778_v58, 0.0  ;;  %v782_v1 = vpop.f32.mrf.mxu2  ;;  %v18355_v58 = vld [vmem:[%s25128_s3 + $0xf8] sm:$0xff] }
 0x15e   :  { %v602_v61 = vpop.f32.mrf.mxu0 }
 0x15f   :  { %v691_v62 = vpop.f32.mrf.mxu1  ;;  %v855_v63 = vpack.c.bf16 %v823_v60, %v823_v60  ;;  %v603_v0 = vadd.f32 %v19442_v42, %v602_v61 }
 0x160   :  { %v1028_v2 = vpop.f32.mrf.mxu3 }
 0x161   :  { %v1306_v4 = vunpack.c.l.b16 %v855_v63  ;;  %v692_v5 = vadd.f32 %v691_v62, %v603_v0  ;;  %v1489_v6 = vadd.f32 %v1488_v43, %v1028_v2  ;;  %v18354_v0 = vld [vmem:[%s25128_s3 + $0xf0] sm:$0xff] }
 0x163   :  { %v1307_v8 = vpack.c.b16 %v1306_v4, %v1305_v3  ;;  %v781_v9 = vadd.f32 %v780_v52, %v692_v5  ;;  %v13875_v3 = vld [vmem:[%s25126_s0 + $0x180] sm:$0xf]  ;;  %v18357_v4 = vld [vmem:[%s25126_s0 + $0x188] sm:$0xf0] }
 0x165   :  { %13772 = vmatmul.msk.bf16.vlgmr.msrb.gmra.mxu3 %vm945_vm2, %v1307_v8  ;;  %v785_v14 = vpop.f32.mrf.mxu2  ;;  %v824_v16 = vmax.f32 %v781_v9, 0.0  ;;  %v13876_v8 = vor.u32 %v18357_v4, %v13875_v3 }
 0x166   :  { %v604_v10 = vpop.f32.mrf.mxu0  ;;  %1397 = vmatpush.bf16.msrb.mxu3 %v18351_v7 }
 0x167   :  { %v693_v11 = vpop.f32.mrf.mxu1  ;;  %v605_v13 = vadd.f32 %v19442_v42, %v604_v10  ;;  %v856_v20 = vpack.c.bf16 %v824_v16, %v824_v16  ;;  %2024 = vmatmul.bf16.vlgmr.msrb.gmra.mxu2 %v13876_v8 }
 0x168   :  { %v1060_v15 = vpop.f32.mrf.mxu3 }
 0x169   :  { %v694_v17 = vadd.f32 %v693_v11, %v605_v13  ;;  %v1475_v18 = vadd.f32 %v1474_v56, %v1060_v15  ;;  %v1339_v27 = vunpack.c.l.b16 %v856_v20 }
 0x16a   :  { %1398 = vmatpush.bf16.msrb.mxu3 %v18350_v12 }
 0x16b   :  { %v783_v19 = vadd.f32 %v782_v1, %v694_v17 }
 0x16d   :  { %v825_v21 = vmax.f32 %v783_v19, 0.0  ;;  %v787_v31 = vpop.f32.mrf.mxu2 }
 0x16e   :  { %v607_v22 = vpop.f32.mrf.mxu0 }
 0x16f   :  { %v696_v23 = vpop.f32.mrf.mxu1  ;;  %v857_v24 = vpack.c.bf16 %v825_v21, %v825_v21  ;;  %v608_v25 = vadd.f32 %v19442_v42, %v607_v22  ;;  %v18419_v22 = vld [vmem:[%s25125_s1 + $0x78] sm:$0xff] }
 0x170   :  { %v1062_v26 = vpop.f32.mrf.mxu3 }
 0x171   :  { %v1340_v28 = vunpack.c.l.b16 %v857_v24  ;;  %v697_v29 = vadd.f32 %v696_v23, %v608_v25  ;;  %v1490_v30 = vadd.f32 %v1489_v6, %v1062_v26  ;;  %v13883_v23 = vld [vmem:[%s25126_s0 + $0x188] sm:$0xf]  ;;  %v18358_v25 = vld [vmem:[%s25126_s0 + $0x190] sm:$0xf0] }
 0x173   :  { %v1341_v33 = vpack.c.b16 %v1340_v28, %v1339_v27  ;;  %v786_v34 = vadd.f32 %v785_v14, %v697_v29  ;;  %v18418_v28 = vld [vmem:[%s25125_s1 + $0x70] sm:$0xff]  ;;  %v19158_v29 = vld [vmem:[%s25127_s2] ss:$0 sm:$0xff] }
 0x175   :  { %13781 = vmatmul.msk.bf16.vlgmr.msra.gmra.mxu3 %vm945_vm2, %v1341_v33  ;;  %v826_v40 = vmax.f32 %v786_v34, 0.0  ;;  %v790_v46 = vpop.f32.mrf.mxu2  ;;  %v13887_v33 = vld [vmem:[%s25126_s0 + $0x198] sm:$0xf]  ;;  %v18360_v34 = vld [vmem:[%s25126_s0 + $0x1a0] sm:$0xf0] }
 0x176   :  { %v609_v35 = vpop.f32.mrf.mxu0  ;;  %1431 = vmatpush.bf16.msra.mxu3 %v18353_v32 }
 0x177   :  { %v698_v36 = vpop.f32.mrf.mxu1  ;;  %v610_v38 = vadd.f32 %v19442_v42, %v609_v35  ;;  %v858_v47 = vpack.c.bf16 %v826_v40, %v826_v40  ;;  %v18417_v40 = vld [vmem:[%s25125_s1 + $0x68] sm:$0xff] }
 0x178   :  { %v1094_v39 = vpop.f32.mrf.mxu3 }
 0x179   :  { %v699_v41 = vadd.f32 %v698_v36, %v610_v38  ;;  %v1476_v43 = vadd.f32 %v1475_v18, %v1094_v39  ;;  %v1373_v54 = vunpack.c.l.b16 %v858_v47  ;;  %v13888_v38 = vor.u32 %v18360_v34, %v13887_v33 }
 0x17a   :  { %1432 = vmatpush.bf16.msra.mxu3 %v18352_v37 }
 0x17b   :  { %v788_v45 = vadd.f32 %v787_v31, %v699_v41  ;;  %2029 = vmatmul.bf16.gmra.mxu2 %v13888_v38 }
 0x17d   :  { %v827_v48 = vmax.f32 %v788_v45, 0.0  ;;  %v792_v61 = vpop.f32.mrf.mxu2  ;;  %v18416_v45 = vld [vmem:[%s25125_s1 + $0x60] sm:$0xff] }
 0x17e   :  { %v612_v49 = vpop.f32.mrf.mxu0 }
 0x17f   :  { %v701_v50 = vpop.f32.mrf.mxu1  ;;  %v859_v51 = vpack.c.bf16 %v827_v48, %v827_v48  ;;  %v613_v52 = vadd.f32 %v19442_v42, %v612_v49 }
 0x180   :  { %v1096_v53 = vpop.f32.mrf.mxu3 }
 0x181   :  { %v1374_v55 = vunpack.c.l.b16 %v859_v51  ;;  %v702_v56 = vadd.f32 %v701_v50, %v613_v52  ;;  %v1491_v57 = vadd.f32 %v1490_v30, %v1096_v53  ;;  %v18415_v51 = vld [vmem:[%s25125_s1 + $0x58] sm:$0xff]  ;;  %v13895_v52 = vld [vmem:[%s25126_s0 + $0x1a0] sm:$0xf]  ;;  %v18361_v53 = vld [vmem:[%s25126_s0 + $0x1a8] sm:$0xf0] }
 0x183   :  { %v1375_v59 = vpack.c.b16 %v1374_v55, %v1373_v54  ;;  %v791_v60 = vadd.f32 %v790_v46, %v702_v56  ;;  %v13896_v55 = vor.u32 %v18361_v53, %v13895_v52  ;;  %v18414_v56 = vld [vmem:[%s25125_s1 + $0x50] sm:$0xff]  ;;  %v18368_v53 = vld [vmem:[%s25126_s0 + $0x1e4] sm:$0xf] }
 0x185   :  { %13790 = vmatmul.msk.bf16.vlgmr.msrb.gmra.mxu3 %vm945_vm2, %v1375_v59  ;;  %v828_v5 = vmax.f32 %v791_v60, 0.0  ;;  %v795_v16 = vpop.f32.mrf.mxu2  ;;  %v18363_v59 = vld [vmem:[%s25126_s0 + $0x1b8] sm:$0xf0] }
 0x186   :  { %v614_v62 = vpop.f32.mrf.mxu0  ;;  %1465 = vmatpush.bf16.msrb.mxu3 %v18355_v58  ;;  %v13899_v58 = vld [vmem:[%s25126_s0 + $0x1b0] sm:$0xf] }
 0x187   :  { %v703_v63 = vpop.f32.mrf.mxu1  ;;  %v615_v1 = vadd.f32 %v19442_v42, %v614_v62  ;;  %v860_v10 = vpack.c.bf16 %v828_v5, %v828_v5  ;;  %v18423_v62 = vld [vmem:[%s25128_s3 + $0x100] sm:$0xff] }
 0x188   :  { %v1128_v2 = vpop.f32.mrf.mxu3  ;;  %2439 = vmatpush.bf16.msrb.mxu1 %v18423_v62  ;;  %v13959_v62 = vld [vmem:[%s25126_s0 + $0x228] sm:$0xf] }
 0x189   :  { %v704_v6 = vadd.f32 %v703_v63, %v615_v1  ;;  %v1477_v7 = vadd.f32 %v1476_v43, %v1128_v2  ;;  %v1407_v18 = vunpack.c.l.b16 %v860_v10  ;;  %v18413_v63 = vld [vmem:[%s25125_s1 + $0x48] sm:$0xff]  ;;  %v18356_v1 = vld [vmem:[%s25126_s0 + $0x184] sm:$0xf]  ;;  %v13877_v2 = vld [vmem:[%s25126_s0 + $0x18c] sm:$0xf0] }
 0x18a   :  { %1466 = vmatpush.bf16.msrb.mxu3 %v18354_v0  ;;  %v18412_v0 = vld [vmem:[%s25125_s1 + $0x40] sm:$0xff]  ;;  %v13880_v5 = vor.u32 %v18356_v1, %v13877_v2  ;;  %v13911_v10 = vld [vmem:[%s25126_s0 + $0x1c8] sm:$0xf]  ;;  %v18371_v2 = vld [vmem:[%s25126_s0 + $0x1fc] sm:$0xf] }
 0x18b   :  { %v793_v9 = vadd.f32 %v792_v61, %v704_v6  ;;  %v13900_v61 = vor.u32 %v18363_v59, %v13899_v58  ;;  %v13907_v6 = vld [vmem:[%s25126_s0 + $0x1b8] sm:$0xf]  ;;  %v18376_v59 = vld [vmem:[%s25126_s0 + $0x220] sm:$0xf0] }
 0x18c   :  { %v13955_v58 = vld [vmem:[%s25126_s0 + $0x218] sm:$0xf] }
 0x18d   :  { %v829_v11 = vmax.f32 %v793_v9, 0.0  ;;  %v797_v39 = vpop.f32.mrf.mxu2  ;;  %2034 = vmatmul.bf16.gmra.mxu2 %v13900_v61 }
 0x18e   :  { %v617_v12 = vpop.f32.mrf.mxu0 }
 0x18f   :  { %v706_v13 = vpop.f32.mrf.mxu1  ;;  %v861_v14 = vpack.c.bf16 %v829_v11, %v829_v11  ;;  %v618_v15 = vadd.f32 %v19442_v42, %v617_v12  ;;  %v13884_v42 = vor.u32 %v18358_v25, %v13883_v23  ;;  %v18366_v11 = vld [vmem:[%s25126_s0 + $0x1d0] sm:$0xf0]  ;;  %v13923_v23 = vld [vmem:[%s25126_s0 + $0x1e0] sm:$0xf] }
 0x190   :  { %v1130_v17 = vpop.f32.mrf.mxu3 }
 0x191   :  { %v1408_v19 = vunpack.c.l.b16 %v861_v14  ;;  %v707_v20 = vadd.f32 %v706_v13, %v618_v15  ;;  %v1492_v21 = vadd.f32 %v1491_v57, %v1130_v17  ;;  %14141 = vmatmul.msk.bf16.vlgmr.msrb.gmra.mxu0 %vm480_vm1, %v13884_v42  ;;  %v13912_v13 = vor.u32 %v18366_v11, %v13911_v10  ;;  %v18359_v14 = vld [vmem:[%s25126_s0 + $0x19c] sm:$0xf]  ;;  %v13889_v15 = vld [vmem:[%s25126_s0 + $0x1a4] sm:$0xf0]  ;;  %v13971_v11 = vld [vmem:[%s25126_s0 + $0x240] sm:$0xf] }
 0x193   :  { %v1409_v24 = vpack.c.b16 %v1408_v19, %v1407_v18  ;;  %v796_v26 = vadd.f32 %v795_v16, %v707_v20  ;;  %v13892_v18 = vor.u32 %v18359_v14, %v13889_v15  ;;  %v13919_v19 = vld [vmem:[%s25126_s0 + $0x1d0] sm:$0xf]  ;;  %v18367_v20 = vld [vmem:[%s25126_s0 + $0x1d8] sm:$0xf0]  ;;  %v18374_v15 = vld [vmem:[%s25126_s0 + $0x214] sm:$0xf] }
 0x195   :  { %13799 = vmatmul.msk.bf16.vlgmr.msra.gmra.mxu3 %vm945_vm2, %v1409_v24  ;;  %v830_v35 = vmax.f32 %v796_v26, 0.0  ;;  %v18369_v24 = vld [vmem:[%s25126_s0 + $0x1e8] sm:$0xf0]  ;;  %v18362_v26 = vld [vmem:[%s25126_s0 + $0x1b4] sm:$0xf] }
 0x196   :  { %v619_v27 = vpop.f32.mrf.mxu0  ;;  %2105 = vmatpush.bf16.msra.mxu3 %v18419_v22  ;;  %v13924_v42 = vor.u32 %v18369_v24, %v13923_v23  ;;  %v18382_v23 = vld [vmem:[%s25126_s0 + $0x250] sm:$0xf0] }
 0x197   :  { %v620_v30 = vadd.f32 %v19158_v29, %v619_v27  ;;  %v708_v31 = vpop.f32.mrf.mxu1  ;;  %v862_v43 = vpack.c.bf16 %v830_v35, %v830_v35  ;;  %v13901_v27 = vld [vmem:[%s25126_s0 + $0x1bc] sm:$0xf0]  ;;  %v13935_v35 = vld [vmem:[%s25126_s0 + $0x1f8] sm:$0xf] }
 0x198   :  { %v1162_v32 = vpop.f32.mrf.mxu3 }
 0x199   :  { %v709_v36 = vadd.f32 %v708_v31, %v620_v30  ;;  %v1478_v37 = vadd.f32 %v1477_v7, %v1162_v32  ;;  %v1441_v48 = vunpack.c.l.b16 %v862_v43  ;;  %v18364_v7 = vld [vmem:[%s25126_s0 + $0x1c0] sm:$0xf0]  ;;  %v13904_v30 = vor.u32 %v18362_v26, %v13901_v27  ;;  %v13931_v31 = vld [vmem:[%s25126_s0 + $0x1e8] sm:$0xf]  ;;  %v18370_v32 = vld [vmem:[%s25126_s0 + $0x1f0] sm:$0xf0] }
 0x19a   :  { %2106 = vmatpush.bf16.msra.mxu3 %v18418_v28  ;;  %v13908_v8 = vor.u32 %v18364_v7, %v13907_v6  ;;  %v13932_v33 = vor.u32 %v18370_v32, %v13931_v31  ;;  %v13967_v7 = vld [vmem:[%s25126_s0 + $0x230] sm:$0xf]  ;;  %v13983_v27 = vld [vmem:[%s25126_s0 + $0x258] sm:$0xf]  ;;  %v18377_v32 = vld [vmem:[%s25126_s0 + $0x22c] sm:$0xf] }
 0x19b   :  { %v798_v41 = vadd.f32 %v797_v39, %v709_v36  ;;  %v18372_v36 = vld [vmem:[%s25126_s0 + $0x200] sm:$0xf0]  ;;  %v18365_v39 = vld [vmem:[%s25126_s0 + $0x1cc] sm:$0xf] }
 0x19c   :  { %v13936_v38 = vor.u32 %v18372_v36, %v13935_v35 }
 0x19d   :  { %v831_v44 = vmax.f32 %v798_v41, 0.0  ;;  %2039 = vmatmul.bf16.gmra.mxu2 %v13912_v13 }
 0x19e   :  { %2107 = vmatpush.bf16.msra.mxu3 %v18417_v40  ;;  %v13913_v40 = vld [vmem:[%s25126_s0 + $0x1d4] sm:$0xf0] }
 0x19f   :  { %v863_v46 = vpack.c.bf16 %v831_v44, %v831_v44  ;;  %v13916_v44 = vor.u32 %v18365_v39, %v13913_v40  ;;  %v13991_v39 = vld [vmem:[%s25126_s0 + $0x260] sm:$0xf] }
 0x1a0   :  { %v1164_v47 = vpop.f32.mrf.mxu3 }
 0x1a1   :  { %v1442_v49 = vunpack.c.l.b16 %v863_v46  ;;  %v1493_v50 = vadd.f32 %v1492_v21, %v1164_v47  ;;  %14142 = vmatmul.msk.bf16.gmra.mxu0 %vm480_vm1, %v13896_v55  ;;  %v13920_v21 = vor.u32 %v18367_v20, %v13919_v19  ;;  %v18373_v46 = vld [vmem:[%s25126_s0 + $0x208] sm:$0xf0] }
 0x1a2   :  { %2108 = vmatpush.bf16.msra.mxu3 %v18416_v45  ;;  %v13943_v45 = vld [vmem:[%s25126_s0 + $0x200] sm:$0xf] }
 0x1a3   :  { %v1443_v54 = vpack.c.b16 %v1442_v49, %v1441_v48  ;;  %v13944_v47 = vor.u32 %v18373_v46, %v13943_v45  ;;  %v13947_v49 = vld [vmem:[%s25126_s0 + $0x210] sm:$0xf] }
 0x1a4   :  { %v13995_v46 = vld [vmem:[%s25126_s0 + $0x270] sm:$0xf] }
 0x1a5   :  { %13808 = vmatmul.msk.bf16.vlgmr.msrb.gmra.mxu3 %vm945_vm2, %v1443_v54  ;;  %v13925_v54 = vld [vmem:[%s25126_s0 + $0x1ec] sm:$0xf0] }
 0x1a6   :  { %2109 = vmatpush.bf16.msra.mxu3 %v18415_v51 }
 0x1a8   :  { %v1196_v57 = vpop.f32.mrf.mxu3 }
 0x1a9   :  { %v1479_v60 = vadd.f32 %v1478_v37, %v1196_v57  ;;  %v13928_v57 = vor.u32 %v18368_v53, %v13925_v54 }
 0x1aa   :  { %2110 = vmatpush.bf16.msra.mxu3 %v18414_v56 }
 0x1ad   :  { %2044 = vmatmul.bf16.gmra.mxu2 %v13924_v42 }
 0x1ae   :  { %2111 = vmatpush.bf16.msra.mxu3 %v18413_v63  ;;  %v18378_v63 = vld [vmem:[%s25126_s0 + $0x230] sm:$0xf0] }
 0x1af   :  { %v13960_v1 = vor.u32 %v18378_v63, %v13959_v62 }
 0x1b0   :  { %v1198_v3 = vpop.f32.mrf.mxu3 }
 0x1b1   :  { %v1494_v4 = vadd.f32 %v1493_v50, %v1198_v3  ;;  %14143 = vmatmul.msk.bf16.gmra.mxu0 %vm480_vm1, %v13908_v8  ;;  %v18375_v50 = vld [vmem:[%s25126_s0 + $0x218] sm:$0xf0]  ;;  %v13937_v3 = vld [vmem:[%s25126_s0 + $0x204] sm:$0xf0] }
 0x1b2   :  { %2112 = vmatpush.bf16.msra.mxu3 %v18412_v0  ;;  %v13948_v52 = vor.u32 %v18375_v50, %v13947_v49  ;;  %v13940_v6 = vor.u32 %v18371_v2, %v13937_v3  ;;  %v18379_v8 = vld [vmem:[%s25126_s0 + $0x238] sm:$0xf0]  ;;  %v18425_v2 = vld [vmem:[%s25128_s3 + $0x110] sm:$0xff]  ;;  %v14007_v3 = vld [vmem:[%s25126_s0 + $0x288] sm:$0xf] }
 0x1b5   :  { %2113 = vmatmul.bf16.vlgmr.msra.gmra.mxu3 %v13880_v5 }
 0x1b8   :  { %v1230_v9 = vpop.f32.mrf.mxu3 }
 0x1b9   :  { %v1480_v12 = vadd.f32 %v1479_v60, %v1230_v9  ;;  %v13956_v60 = vor.u32 %v18376_v59, %v13955_v58  ;;  %v13968_v9 = vor.u32 %v18379_v8, %v13967_v7  ;;  %v18426_v58 = vld [vmem:[%s25128_s3 + $0x118] sm:$0xff]  ;;  %v18509_v7 = vld [vmem:[%s25125_s1 + $0x30] sm:$0xff] }
 0x1ba   :  { %v14003_v59 = vld [vmem:[%s25126_s0 + $0x278] sm:$0xf]  ;;  %2472 = vmatpush.bf16.msra.mxu1 %v18426_v58  ;;  %v18394_v58 = vld [vmem:[%s25126_s0 + $0x2b0] sm:$0xf0] }
 0x1bd   :  { %2049 = vmatmul.bf16.gmra.mxu2 %v13936_v38  ;;  %v18518_v38 = vld [vmem:[%s25125_s1 + $0x78] sm:$0xff] }
 0x1be   :  { %3588 = vmatpush.bf16.msra.mxu0 %v18518_v38  ;;  %2473 = vmatpush.bf16.msra.mxu1 %v18425_v2 }
 0x1c0   :  { %v1232_v16 = vpop.f32.mrf.mxu3 }
 0x1c1   :  { %v1495_v17 = vadd.f32 %v1494_v4, %v1232_v16  ;;  %14144 = vmatmul.msk.bf16.gmra.mxu0 %vm480_vm1, %v13920_v21  ;;  %v13949_v16 = vld [vmem:[%s25126_s0 + $0x21c] sm:$0xf0]  ;;  %v18510_v21 = vld [vmem:[%s25125_s1 + $0x38] sm:$0xff] }
 0x1c2   :  { %v13952_v20 = vor.u32 %v18374_v15, %v13949_v16  ;;  %3499 = vmatpush.bf16.msrb.mxu3 %v18510_v21 }
 0x1c5   :  { %2118 = vmatmul.bf16.gmra.mxu3 %v13892_v18 }
 0x1c6   :  { %3500 = vmatpush.bf16.msrb.mxu3 %v18509_v7  ;;  %v18430_v7 = vld [vmem:[%s25128_s3 + $0x138] sm:$0xff] }
 0x1c8   :  { %v1264_v22 = vpop.f32.mrf.mxu3 }
 0x1c9   :  { %v1481_v25 = vadd.f32 %v1480_v12, %v1264_v22  ;;  %v18381_v12 = vld [vmem:[%s25126_s0 + $0x248] sm:$0xf0]  ;;  %v13979_v22 = vld [vmem:[%s25126_s0 + $0x248] sm:$0xf] }
 0x1ca   :  { %v13972_v14 = vor.u32 %v18381_v12, %v13971_v11  ;;  %v13985_v11 = vld [vmem:[%s25126_s0 + $0x264] sm:$0xf0] }
 0x1cd   :  { %2054 = vmatmul.bf16.gmra.mxu2 %v13948_v52  ;;  %v13973_v52 = vld [vmem:[%s25126_s0 + $0x24c] sm:$0xf0] }
 0x1d0   :  { %v1266_v28 = vpop.f32.mrf.mxu3 }
 0x1d1   :  { %v1496_v29 = vadd.f32 %v1495_v17, %v1266_v28  ;;  %14145 = vmatmul.msk.bf16.gmra.mxu0 %vm480_vm1, %v13932_v33  ;;  %v18384_v28 = vld [vmem:[%s25126_s0 + $0x260] sm:$0xf0]  ;;  %v13961_v33 = vld [vmem:[%s25126_s0 + $0x234] sm:$0xf0] }
 0x1d5   :  { %2123 = vmatmul.bf16.gmra.mxu3 %v13904_v30  ;;  %v13984_v30 = vor.u32 %v18384_v28, %v13983_v27 }
 0x1d8   :  { %v1298_v34 = vpop.f32.mrf.mxu3 }
 0x1d9   :  { %v1482_v37 = vadd.f32 %v1481_v25, %v1298_v34  ;;  %v13980_v25 = vor.u32 %v18382_v23, %v13979_v22  ;;  %v18391_v22 = vld [vmem:[%s25126_s0 + $0x298] sm:$0xf0] }
 0x1dd   :  { %2059 = vmatmul.bf16.gmra.mxu2 %v13960_v1 }
 0x1e0   :  { %v1300_v41 = vpop.f32.mrf.mxu3 }
 0x1e1   :  { %v1497_v43 = vadd.f32 %v1496_v29, %v1300_v41  ;;  %14146 = vmatmul.msk.bf16.gmra.mxu0 %vm480_vm1, %v13944_v47  ;;  %v18385_v41 = vld [vmem:[%s25126_s0 + $0x268] sm:$0xf0]  ;;  %v18387_v47 = vld [vmem:[%s25126_s0 + $0x278] sm:$0xf0] }
 0x1e2   :  { %v13996_v49 = vor.u32 %v18387_v47, %v13995_v46 }
 0x1e5   :  { %2128 = vmatmul.bf16.gmra.mxu3 %v13916_v44 }
 0x1e8   :  { %v1332_v48 = vpop.f32.mrf.mxu3 }
 0x1e9   :  { %v1483_v51 = vadd.f32 %v1482_v37, %v1332_v48  ;;  %v13964_v37 = vor.u32 %v18377_v32, %v13961_v33 }
 0x1ea   :  { %v2025_v17 = vpop.f32.mrf.mxu2 }
 0x1ed   :  { %2064 = vmatmul.bf16.gmra.mxu2 %v13972_v14 }
 0x1f0   :  { %v1334_v55 = vpop.f32.mrf.mxu3 }
 0x1f1   :  { %v1498_v56 = vadd.f32 %v1497_v43, %v1334_v55  ;;  %14147 = vmatmul.msk.bf16.gmra.mxu0 %vm480_vm1, %v13956_v60  ;;  %v13992_v43 = vor.u32 %v18385_v41, %v13991_v39  ;;  %v19991_v55 = vld [vmem:[%s25127_s2] ss:$0 sm:$0xff]  ;;  %v18386_v39 = vld [vmem:[%s25126_s0 + $0x274] sm:$0xf] }
 0x1f2   :  { %v2027_v42 = vpop.f32.mrf.mxu2  ;;  %v2026_v63 = vadd.f32 %v19991_v55, %v2025_v17  ;;  %v13997_v41 = vld [vmem:[%s25126_s0 + $0x27c] sm:$0xf0] }
 0x1f5   :  { %2133 = vmatmul.bf16.gmra.mxu3 %v13928_v57 }
 0x1f8   :  { %v1366_v61 = vpop.f32.mrf.mxu3 }
 0x1f9   :  { %v1484_v0 = vadd.f32 %v1483_v51, %v1366_v61  ;;  %v18380_v51 = vld [vmem:[%s25126_s0 + $0x244] sm:$0xf] }
 0x1fa   :  { %v13976_v57 = vor.u32 %v18380_v51, %v13973_v52  ;;  %v18388_v61 = vld [vmem:[%s25126_s0 + $0x280] sm:$0xf0]  ;;  %v14000_v51 = vor.u32 %v18386_v39, %v13997_v41  ;;  %v14027_v52 = vld [vmem:[%s25126_s0 + $0x2a8] sm:$0xf] }
 0x1fb   :  { %v14004_v62 = vor.u32 %v18388_v61, %v14003_v59  ;;  %v14028_v59 = vor.u32 %v18394_v58, %v14027_v52  ;;  %v18432_v39 = vld [vmem:[%s25128_s3 + $0x148] sm:$0xff] }
 0x1fd   :  { %2069 = vmatmul.bf16.gmra.mxu2 %v13984_v30  ;;  %v18393_v30 = vld [vmem:[%s25126_s0 + $0x2a8] sm:$0xf0] }
 0x1fe   :  { %v19954_v34 = vpop.f32.mrf.mxu2 }
 0x200   :  { %v1368_v4 = vpop.f32.mrf.mxu3 }
 0x201   :  { %v1499_v5 = vadd.f32 %v1498_v56, %v1368_v4  ;;  %14148 = vmatmul.msk.bf16.gmra.mxu0 %vm480_vm1, %v13968_v9  ;;  %v18390_v4 = vld [vmem:[%s25126_s0 + $0x290] sm:$0xf0] }
 0x205   :  { %2138 = vmatmul.bf16.gmra.mxu3 %v13940_v6  ;;  %v14008_v6 = vor.u32 %v18390_v4, %v14007_v3  ;;  %v18396_v3 = vld [vmem:[%s25126_s0 + $0x2c0] sm:$0xf0] }
 0x206   :  { %v19968_v44 = vpop.f32.mrf.mxu2 }
 0x208   :  { %v1400_v10 = vpop.f32.mrf.mxu3 }
 0x209   :  { %v1485_v13 = vadd.f32 %v1484_v0, %v1400_v10  ;;  %v18383_v10 = vld [vmem:[%s25126_s0 + $0x25c] sm:$0xf] }
 0x20a   :  { %v13988_v17 = vor.u32 %v18383_v10, %v13985_v11  ;;  %v18508_v10 = vld [vmem:[%s25125_s1 + $0x28] sm:$0xff] }
 0x20b   :  { %3501 = vmatpush.bf16.msrb.mxu3 %v18508_v10 }
 0x20d   :  { %2074 = vmatmul.bf16.gmra.mxu2 %v13996_v49 }
 0x20e   :  { %v2203_v24 = vpop.f32.mrf.mxu0 }
 0x210   :  { %v1402_v18 = vpop.f32.mrf.mxu3  ;;  %v19986_v53 = vpop.f32.mrf.mxu2 }
 0x211   :  { %v1500_v19 = vadd.f32 %v1499_v5, %v1402_v18  ;;  %14149 = vmatmul.msk.bf16.gmra.mxu0 %vm480_vm1, %v13980_v25  ;;  %v18517_v18 = vld [vmem:[%s25125_s1 + $0x70] sm:$0xff]  ;;  %v2031_v25 = vadd.f32 %v19991_v55, %v19954_v34 }
 0x212   :  { %3589 = vmatpush.bf16.msra.mxu0 %v18517_v18 }
 0x215   :  { %2143 = vmatmul.bf16.gmra.mxu3 %v13952_v20 }
 0x216   :  { %v19946_v31 = vpop.f32.mrf.mxu0 }
 0x218   :  { %v1434_v26 = vpop.f32.mrf.mxu3  ;;  %v20008_v0 = vpop.f32.mrf.mxu2 }
 0x219   :  { %v1486_v29 = vadd.f32 %v1485_v13, %v1434_v26  ;;  %v2028_v13 = vadd.f32 %v19991_v55, %v2027_v42 }
 0x21d   :  { %2079 = vmatmul.bf16.gmra.mxu2 %v14008_v6 }
 0x21e   :  { %v19962_v40 = vpop.f32.mrf.mxu0 }
 0x220   :  { %v1436_v35 = vpop.f32.mrf.mxu3  ;;  %v20030_v12 = vpop.f32.mrf.mxu2 }
 0x221   :  { %v1501_v36 = vadd.f32 %v1500_v19, %v1436_v35  ;;  %14150 = vmatmul.msk.bf16.gmra.mxu0 %vm480_vm1, %v13992_v43  ;;  %v14015_v19 = vld [vmem:[%s25126_s0 + $0x290] sm:$0xf]  ;;  %v18428_v35 = vld [vmem:[%s25128_s3 + $0x128] sm:$0xff]  ;;  %v18427_v43 = vld [vmem:[%s25128_s3 + $0x120] sm:$0xff] }
 0x222   :  { %v14016_v23 = vor.u32 %v18391_v22, %v14015_v19 }
 0x225   :  { %2148 = vmatmul.bf16.gmra.mxu3 %v13964_v37 }
 0x226   :  { %v19978_v50 = vpop.f32.mrf.mxu0 }
 0x228   :  { %v1468_v45 = vpop.f32.mrf.mxu3  ;;  %v20048_v26 = vpop.f32.mrf.mxu2 }
 0x229   :  { %v19976_v48 = vadd.f32 %v1486_v29, %v1468_v45  ;;  %v14019_v29 = vld [vmem:[%s25126_s0 + $0x2a0] sm:$0xf] }
 0x22a   :  { %v14020_v34 = vor.u32 %v18393_v30, %v14019_v29  ;;  %v2041_v29 = vadd.f32 %v19991_v55, %v20030_v12 }
 0x22d   :  { %2084 = vmatmul.bf16.gmra.mxu2 %v14020_v34  ;;  %v18399_v34 = vld [vmem:[%s25126_s0 + $0x2d8] sm:$0xf0] }
 0x22e   :  { %v20001_v60 = vpop.f32.mrf.mxu0 }
 0x230   :  { %v1470_v54 = vpop.f32.mrf.mxu3  ;;  %v20072_v45 = vpop.f32.mrf.mxu2 }
 0x231   :  { %v19993_v56 = vadd.f32 %v1501_v36, %v1470_v54  ;;  %14151 = vmatmul.msk.bf16.gmra.mxu0 %vm480_vm1, %v14004_v62 }
 0x235   :  { %2153 = vmatmul.bf16.gmra.mxu3 %v13976_v57 }
 0x236   :  { %v20022_v8 = vpop.f32.mrf.mxu0 }
 0x238   :  { %v2114_v1 = vpop.f32.mrf.mxu3 }
 0x239   :  { %v2115_v5 = vadd.f32 %v2114_v1, %v2026_v63  ;;  %v20088_v63 = vpop.f32.mrf.mxu2 }
 0x23b   :  { %v2204_v9 = vadd.f32 %v2203_v24, %v2115_v5 }
 0x23d   :  { %v2283_v15 = vmax.f32 %v2204_v9, 0.0 }
 0x23e   :  { %v20040_v21 = vpop.f32.mrf.mxu0 }
 0x23f   :  { %v2315_v24 = vpack.c.bf16 %v2283_v15, %v2283_v15  ;;  %v14009_v15 = vld [vmem:[%s25126_s0 + $0x294] sm:$0xf0] }
 0x240   :  { %v2116_v14 = vpop.f32.mrf.mxu3 }
 0x241   :  { %v2117_v16 = vadd.f32 %v2116_v14, %v2028_v13  ;;  %14152 = vmatmul.msk.bf16.gmra.mxu0 %vm480_vm1, %v14016_v23  ;;  %v18389_v14 = vld [vmem:[%s25126_s0 + $0x28c] sm:$0xf] }
 0x242   :  { %v14012_v22 = vor.u32 %v18389_v14, %v14009_v15  ;;  %v18516_v23 = vld [vmem:[%s25125_s1 + $0x68] sm:$0xff]  ;;  %v18395_v14 = vld [vmem:[%s25126_s0 + $0x2bc] sm:$0xf] }
 0x243   :  { %v2206_v20 = vadd.f32 %v19946_v31, %v2117_v16  ;;  %v2414_v31 = vunpack.c.l.b16 %v2315_v24  ;;  %v18429_v16 = vld [vmem:[%s25128_s3 + $0x130] sm:$0xff]  ;;  %v14039_v24 = vld [vmem:[%s25126_s0 + $0x2c0] sm:$0xf]  ;;  %3590 = vmatpush.bf16.msra.mxu0 %v18516_v23  ;;  %v14033_v15 = vld [vmem:[%s25126_s0 + $0x2c4] sm:$0xf0] }
 0x245   :  { %v2284_v42 = vmax.f32 %v2206_v20, 0.0  ;;  %2158 = vmatmul.bf16.gmra.mxu3 %v13988_v17  ;;  %v20115_v17 = vpop.f32.mrf.mxu2 }
 0x246   :  { %v20059_v37 = vpop.f32.mrf.mxu0 }
 0x247   :  { %v2316_v27 = vpack.c.bf16 %v2284_v42, %v2284_v42 }
 0x248   :  { %v2119_v28 = vpop.f32.mrf.mxu3 }
 0x249   :  { %v2415_v32 = vunpack.c.l.b16 %v2316_v27  ;;  %v2120_v33 = vadd.f32 %v2119_v28, %v2031_v25 }
 0x24b   :  { %v2416_v36 = vpack.c.b16 %v2415_v32, %v2414_v31  ;;  %v2209_v38 = vadd.f32 %v19962_v40, %v2120_v33  ;;  %v2033_v40 = vadd.f32 %v19991_v55, %v19968_v44  ;;  %v2036_v44 = vadd.f32 %v19991_v55, %v19986_v53  ;;  %v14043_v33 = vld [vmem:[%s25126_s0 + $0x2d0] sm:$0xf] }
 0x24c   :  { %v14044_v12 = vor.u32 %v18399_v34, %v14043_v33 }
 0x24d   :  { %14229 = vmatmul.msk.bf16.vlgmr.msrb.gmra.mxu1 %vm945_vm2, %v2416_v36  ;;  %v2285_v47 = vmax.f32 %v2209_v38, 0.0  ;;  %v20134_v31 = vpop.f32.mrf.mxu2 }
 0x24e   :  { %2506 = vmatpush.bf16.msrb.mxu1 %v18428_v35  ;;  %v20080_v57 = vpop.f32.mrf.mxu0 }
 0x24f   :  { %v2317_v61 = vpack.c.bf16 %v2285_v47, %v2285_v47  ;;  %v14021_v47 = vld [vmem:[%s25126_s0 + $0x2ac] sm:$0xf0] }
 0x250   :  { %v2121_v46 = vpop.f32.mrf.mxu3 }
 0x251   :  { %v2122_v49 = vadd.f32 %v2121_v46, %v2033_v40  ;;  %14153 = vmatmul.msk.bf16.gmra.mxu0 %vm480_vm1, %v14028_v59  ;;  %v2448_v4 = vunpack.c.l.b16 %v2317_v61  ;;  %v18392_v46 = vld [vmem:[%s25126_s0 + $0x2a4] sm:$0xf]  ;;  %v14051_v61 = vld [vmem:[%s25126_s0 + $0x2d8] sm:$0xf] }
 0x252   :  { %2507 = vmatpush.bf16.msrb.mxu1 %v18427_v43  ;;  %v14024_v59 = vor.u32 %v18392_v46, %v14021_v47  ;;  %v18398_v46 = vld [vmem:[%s25126_s0 + $0x2d4] sm:$0xf]  ;;  %v14045_v47 = vld [vmem:[%s25126_s0 + $0x2dc] sm:$0xf0] }
 0x253   :  { %v2211_v54 = vadd.f32 %v19978_v50, %v2122_v49  ;;  %v14031_v50 = vld [vmem:[%s25126_s0 + $0x2b8] sm:$0xf]  ;;  %v18431_v49 = vld [vmem:[%s25128_s3 + $0x140] sm:$0xff] }
 0x254   :  { %v14032_v53 = vor.u32 %v18396_v3, %v14031_v50 }
 0x255   :  { %v2286_v62 = vmax.f32 %v2211_v54, 0.0  ;;  %2163 = vmatmul.bf16.gmra.mxu3 %v14000_v51  ;;  %v20158_v51 = vpop.f32.mrf.mxu2 }
 0x256   :  { %v20102_v11 = vpop.f32.mrf.mxu0  ;;  %2089 = vmatmul.bf16.gmra.mxu2 %v14032_v53 }
 0x257   :  { %v2318_v1 = vpack.c.bf16 %v2286_v62, %v2286_v62  ;;  %v18400_v62 = vld [vmem:[%s25126_s0 + $0x2e0] sm:$0xf0] }
 0x258   :  { %v2124_v2 = vpop.f32.mrf.mxu3 }
 0x259   :  { %v2449_v5 = vunpack.c.l.b16 %v2318_v1  ;;  %v2125_v6 = vadd.f32 %v2124_v2, %v2036_v44  ;;  %v14052_v2 = vor.u32 %v18400_v62, %v14051_v61  ;;  %v2056_v62 = vadd.f32 %v19991_v55, %v20158_v51 }
 0x25b   :  { %v2450_v9 = vpack.c.b16 %v2449_v5, %v2448_v4  ;;  %v2214_v13 = vadd.f32 %v20001_v60, %v2125_v6  ;;  %v2038_v60 = vadd.f32 %v19991_v55, %v20008_v0  ;;  %v18397_v0 = vld [vmem:[%s25126_s0 + $0x2c8] sm:$0xf0] }
 0x25c   :  { %v14040_v27 = vor.u32 %v18397_v0, %v14039_v24  ;;  %v14036_v24 = vor.u32 %v18395_v14, %v14033_v15 }
 0x25d   :  { %14238 = vmatmul.msk.bf16.vlgmr.msra.gmra.mxu1 %vm945_vm2, %v2450_v9  ;;  %v2287_v19 = vmax.f32 %v2214_v13, 0.0  ;;  %v20174_v6 = vpop.f32.mrf.mxu2  ;;  %v18434_v9 = vld [vmem:[%s25128_s3 + $0x158] sm:$0xff] }
 0x25e   :  { %2540 = vmatpush.bf16.msra.mxu1 %v18430_v7  ;;  %v20126_v42 = vpop.f32.mrf.mxu0 }
 0x25f   :  { %v2319_v28 = vpack.c.bf16 %v2287_v19, %v2287_v19  ;;  %v14055_v19 = vld [vmem:[%s25126_s0 + $0x2e8] sm:$0xf] }
 0x260   :  { %v2126_v18 = vpop.f32.mrf.mxu3 }
 0x261   :  { %v2127_v20 = vadd.f32 %v2126_v18, %v2038_v60  ;;  %14154 = vmatmul.msk.bf16.gmra.mxu0 %vm480_vm1, %v14040_v27  ;;  %v2482_v35 = vunpack.c.l.b16 %v2319_v28 }
 0x262   :  { %2541 = vmatpush.bf16.msra.mxu1 %v18429_v16  ;;  %v18433_v16 = vld [vmem:[%s25128_s3 + $0x150] sm:$0xff] }
 0x263   :  { %v2216_v25 = vadd.f32 %v20022_v8, %v2127_v20  ;;  %v18402_v20 = vld [vmem:[%s25126_s0 + $0x2f0] sm:$0xf0] }
 0x264   :  { %v14056_v0 = vor.u32 %v18402_v20, %v14055_v19  ;;  %v18454_v19 = vld [vmem:[%s25128_s3 + $0x1f8] sm:$0xff] }
 0x265   :  { %v2288_v30 = vmax.f32 %v2216_v25, 0.0  ;;  %2168 = vmatmul.bf16.gmra.mxu3 %v14012_v22  ;;  %v18515_v25 = vld [vmem:[%s25125_s1 + $0x60] sm:$0xff]  ;;  %v20206_v27 = vpop.f32.mrf.mxu2  ;;  %2948 = vmatpush.bf16.msra.mxu2 %v18454_v19 }
 0x266   :  { %v20145_v43 = vpop.f32.mrf.mxu0  ;;  %2094 = vmatmul.bf16.gmra.mxu2 %v14044_v12  ;;  %3591 = vmatpush.bf16.msra.mxu0 %v18515_v25 }
 0x267   :  { %v2320_v32 = vpack.c.bf16 %v2288_v30, %v2288_v30 }
 0x268   :  { %v2129_v8 = vpop.f32.mrf.mxu3 }
 0x269   :  { %v2483_v36 = vunpack.c.l.b16 %v2320_v32  ;;  %v2130_v38 = vadd.f32 %v2129_v8, %v2041_v29  ;;  %v2051_v29 = vadd.f32 %v19991_v55, %v20115_v17  ;;  %v18403_v17 = vld [vmem:[%s25126_s0 + $0x2f8] sm:$0xf0] }
 0x26b   :  { %v2484_v41 = vpack.c.b16 %v2483_v36, %v2482_v35  ;;  %v2219_v40 = vadd.f32 %v20040_v21, %v2130_v38  ;;  %v2043_v21 = vadd.f32 %v19991_v55, %v20048_v26  ;;  %v2046_v26 = vadd.f32 %v19991_v55, %v20072_v45  ;;  %v18507_v45 = vld [vmem:[%s25125_s1 + $0x20] sm:$0xff]  ;;  %v18436_v38 = vld [vmem:[%s25128_s3 + $0x168] sm:$0xff] }
 0x26c   :  { %3502 = vmatpush.bf16.msrb.mxu3 %v18507_v45  ;;  %v18437_v45 = vld [vmem:[%s25128_s3 + $0x170] sm:$0xff] }
 0x26d   :  { %14247 = vmatmul.msk.bf16.vlgmr.msrb.gmra.mxu1 %vm945_vm2, %v2484_v41  ;;  %v2289_v54 = vmax.f32 %v2219_v40, 0.0  ;;  %v20222_v41 = vpop.f32.mrf.mxu2 }
 0x26e   :  { %2574 = vmatpush.bf16.msrb.mxu1 %v18432_v39  ;;  %v20169_v1 = vpop.f32.mrf.mxu0 }
 0x26f   :  { %v2321_v50 = vpack.c.bf16 %v2289_v54, %v2289_v54 }
 0x270   :  { %v2131_v52 = vpop.f32.mrf.mxu3 }
 0x271   :  { %v2132_v58 = vadd.f32 %v2131_v52, %v2043_v21  ;;  %14155 = vmatmul.msk.bf16.gmra.mxu0 %vm480_vm1, %v14052_v2 }
 0x272   :  { %2575 = vmatpush.bf16.msrb.mxu1 %v18431_v49  ;;  %v18435_v49 = vld [vmem:[%s25128_s3 + $0x160] sm:$0xff] }
 0x273   :  { %v2221_v44 = vadd.f32 %v20059_v37, %v2132_v58  ;;  %v2516_v37 = vunpack.c.l.b16 %v2321_v50  ;;  %v14048_v58 = vor.u32 %v18398_v46, %v14045_v47 }
 0x275   :  { %v2290_v3 = vmax.f32 %v2221_v44, 0.0  ;;  %2173 = vmatmul.bf16.gmra.mxu3 %v14024_v59  ;;  %v2065_v50 = vpop.f32.mrf.mxu2 }
 0x276   :  { %v20193_v60 = vpop.f32.mrf.mxu0  ;;  %2099 = vmatmul.bf16.gmra.mxu2 %v14056_v0 }
 0x277   :  { %v2322_v4 = vpack.c.bf16 %v2290_v3, %v2290_v3 }
 0x278   :  { %v2134_v5 = vpop.f32.mrf.mxu3 }
 0x279   :  { %v2517_v53 = vunpack.c.l.b16 %v2322_v4  ;;  %v2135_v7 = vadd.f32 %v2134_v5, %v2046_v26 }
 0x27b   :  { %v2518_v10 = vpack.c.b16 %v2517_v53, %v2516_v37  ;;  %v2224_v13 = vadd.f32 %v20080_v57, %v2135_v7  ;;  %v2048_v57 = vadd.f32 %v19991_v55, %v20088_v63  ;;  %v18438_v37 = vld [vmem:[%s25128_s3 + $0x178] sm:$0xff] }
 0x27d   :  { %14256 = vmatmul.msk.bf16.vlgmr.msra.gmra.mxu1 %vm945_vm2, %v2518_v10  ;;  %v2291_v22 = vmax.f32 %v2224_v13, 0.0  ;;  %v14057_v10 = vld [vmem:[%s25126_s0 + $0x2f4] sm:$0xf0]  ;;  %v2058_v13 = vadd.f32 %v19991_v55, %v20174_v6  ;;  %v2067_v14 = vpop.f32.mrf.mxu2  ;;  %v2061_v6 = vadd.f32 %v19991_v55, %v20206_v27  ;;  %v18439_v27 = vld [vmem:[%s25128_s3 + $0x180] sm:$0xff] }
 0x27e   :  { %2608 = vmatpush.bf16.msra.mxu1 %v18434_v9  ;;  %v20211_v33 = vpop.f32.mrf.mxu0  ;;  %v18401_v9 = vld [vmem:[%s25126_s0 + $0x2ec] sm:$0xf] }
 0x27f   :  { %v2323_v28 = vpack.c.bf16 %v2291_v22, %v2291_v22 }
 0x280   :  { %v2136_v18 = vpop.f32.mrf.mxu3 }
 0x281   :  { %v2137_v23 = vadd.f32 %v2136_v18, %v2048_v57  ;;  %v2550_v34 = vunpack.c.l.b16 %v2323_v28  ;;  %v14060_v57 = vor.u32 %v18401_v9, %v14057_v10  ;;  %v18514_v18 = vld [vmem:[%s25125_s1 + $0x58] sm:$0xff] }
 0x282   :  { %2609 = vmatpush.bf16.msra.mxu1 %v18433_v16  ;;  %3592 = vmatpush.bf16.msra.mxu0 %v18514_v18 }
 0x283   :  { %v2226_v63 = vadd.f32 %v20102_v11, %v2137_v23  ;;  %v14063_v11 = vld [vmem:[%s25126_s0 + $0x2f0] sm:$0xf] }
 0x284   :  { %v14064_v39 = vor.u32 %v18403_v17, %v14063_v11 }
 0x285   :  { %v2292_v30 = vmax.f32 %v2226_v63, 0.0  ;;  %2178 = vmatmul.bf16.gmra.mxu3 %v14036_v24 }
 0x286   :  { %14156 = vmatmul.msk.bf16.gmra.mxu0 %vm480_vm1, %v14064_v39  ;;  %v2240_v59 = vpop.f32.mrf.mxu0 }
 0x287   :  { %v2324_v32 = vpack.c.bf16 %v2292_v30, %v2292_v30  ;;  %v18440_v30 = vld [vmem:[%s25128_s3 + $0x188] sm:$0xff] }
 0x288   :  { %v2139_v8 = vpop.f32.mrf.mxu3 }
 0x289   :  { %v2551_v35 = vunpack.c.l.b16 %v2324_v32  ;;  %v2140_v36 = vadd.f32 %v2139_v8, %v2051_v29  ;;  %v2070_v32 = vpop.f32.mrf.mxu2 }
 0x28b   :  { %v2552_v12 = vpack.c.b16 %v2551_v35, %v2550_v34  ;;  %v2229_v40 = vadd.f32 %v20126_v42, %v2140_v36  ;;  %v2053_v42 = vadd.f32 %v19991_v55, %v20134_v31  ;;  %v2063_v34 = vadd.f32 %v19991_v55, %v20222_v41  ;;  %v18442_v41 = vld [vmem:[%s25128_s3 + $0x198] sm:$0xff] }
 0x28d   :  { %14265 = vmatmul.msk.bf16.vlgmr.msrb.gmra.mxu1 %vm945_vm2, %v2552_v12  ;;  %v2293_v52 = vmax.f32 %v2229_v40, 0.0 }
 0x28e   :  { %2642 = vmatpush.bf16.msrb.mxu1 %v18436_v38  ;;  %v2243_v7 = vpop.f32.mrf.mxu0 }
 0x28f   :  { %v2325_v44 = vpack.c.bf16 %v2293_v52, %v2293_v52 }
 0x290   :  { %v2141_v21 = vpop.f32.mrf.mxu3 }
 0x291   :  { %v2142_v54 = vadd.f32 %v2141_v21, %v2053_v42  ;;  %v2584_v4 = vunpack.c.l.b16 %v2325_v44  ;;  %v2072_v12 = vpop.f32.mrf.mxu2  ;;  %v18441_v44 = vld [vmem:[%s25128_s3 + $0x190] sm:$0xff] }
 0x292   :  { %2643 = vmatpush.bf16.msrb.mxu1 %v18435_v49  ;;  %v2073_v18 = vadd.f32 %v19991_v55, %v2072_v12  ;;  %v18445_v12 = vld [vmem:[%s25128_s3 + $0x1b0] sm:$0xff] }
 0x293   :  { %v2231_v61 = vadd.f32 %v20145_v43, %v2142_v54  ;;  %v18506_v43 = vld [vmem:[%s25125_s1 + $0x18] sm:$0xff] }
 0x294   :  { %3503 = vmatpush.bf16.msrb.mxu3 %v18506_v43 }
 0x295   :  { %v2294_v2 = vmax.f32 %v2231_v61, 0.0  ;;  %2183 = vmatmul.bf16.gmra.mxu3 %v14048_v58  ;;  %v18505_v58 = vld [vmem:[%s25125_s1 + $0x10] sm:$0xff] }
 0x296   :  { %v2245_v24 = vpop.f32.mrf.mxu0 }
 0x297   :  { %v2326_v26 = vpack.c.bf16 %v2294_v2, %v2294_v2 }
 0x298   :  { %v2144_v3 = vpop.f32.mrf.mxu3  ;;  %3504 = vmatpush.bf16.msrb.mxu3 %v18505_v58 }
 0x299   :  { %v2585_v5 = vunpack.c.l.b16 %v2326_v26  ;;  %v2145_v31 = vadd.f32 %v2144_v3, %v2056_v62  ;;  %v2075_v61 = vpop.f32.mrf.mxu2  ;;  %v2068_v62 = vadd.f32 %v19991_v55, %v2067_v14  ;;  %v18513_v3 = vld [vmem:[%s25125_s1 + $0x50] sm:$0xff] }
 0x29a   :  { %3593 = vmatpush.bf16.msra.mxu0 %v18513_v3  ;;  %v18448_v3 = vld [vmem:[%s25128_s3 + $0x1c8] sm:$0xff] }
 0x29b   :  { %v2586_v53 = vpack.c.b16 %v2585_v5, %v2584_v4  ;;  %v2234_v51 = vadd.f32 %v20169_v1, %v2145_v31 }
 0x29d   :  { %14274 = vmatmul.msk.bf16.vlgmr.msra.gmra.mxu1 %vm945_vm2, %v2586_v53  ;;  %v2295_v15 = vmax.f32 %v2234_v51, 0.0 }
 0x29e   :  { %2676 = vmatpush.bf16.msra.mxu1 %v18438_v37  ;;  %v2248_v36 = vpop.f32.mrf.mxu0  ;;  %v2071_v37 = vadd.f32 %v19991_v55, %v2070_v32 }
 0x29f   :  { %v2327_v22 = vpack.c.bf16 %v2295_v15, %v2295_v15 }
 0x2a0   :  { %v2146_v1 = vpop.f32.mrf.mxu3 }
 0x2a1   :  { %v2147_v16 = vadd.f32 %v2146_v1, %v2058_v13  ;;  %v2618_v63 = vunpack.c.l.b16 %v2327_v22  ;;  %v2077_v51 = vpop.f32.mrf.mxu2  ;;  %v18444_v1 = vld [vmem:[%s25128_s3 + $0x1a8] sm:$0xff] }
 0x2a2   :  { %2677 = vmatpush.bf16.msra.mxu1 %v18437_v45 }
 0x2a3   :  { %v2236_v20 = vadd.f32 %v20193_v60, %v2147_v16 }
 0x2a5   :  { %v2296_v23 = vmax.f32 %v2236_v20, 0.0  ;;  %2188 = vmatmul.bf16.gmra.mxu3 %v14060_v57  ;;  %v18443_v57 = vld [vmem:[%s25128_s3 + $0x1a0] sm:$0xff] }
 0x2a6   :  { %v2250_v52 = vpop.f32.mrf.mxu0 }
 0x2a7   :  { %v2328_v25 = vpack.c.bf16 %v2296_v23, %v2296_v23 }
 0x2a8   :  { %v2149_v0 = vpop.f32.mrf.mxu3 }
 0x2a9   :  { %v2619_v28 = vunpack.c.l.b16 %v2328_v25  ;;  %v2150_v29 = vadd.f32 %v2149_v0, %v2061_v6  ;;  %v2080_v23 = vpop.f32.mrf.mxu2  ;;  %v2076_v0 = vadd.f32 %v19991_v55, %v2075_v61 }
 0x2ab   :  { %v2620_v60 = vpack.c.b16 %v2619_v28, %v2618_v63  ;;  %v2239_v8 = vadd.f32 %v20211_v33, %v2150_v29  ;;  %v2066_v33 = vadd.f32 %v19991_v55, %v2065_v50 }
 0x2ad   :  { %14283 = vmatmul.msk.bf16.vlgmr.msrb.gmra.mxu1 %vm945_vm2, %v2620_v60  ;;  %v2297_v38 = vmax.f32 %v2239_v8, 0.0 }
 0x2ae   :  { %2710 = vmatpush.bf16.msrb.mxu1 %v18440_v30  ;;  %v2253_v5 = vpop.f32.mrf.mxu0 }
 0x2af   :  { %v2329_v39 = vpack.c.bf16 %v2297_v38, %v2297_v38  ;;  %v18504_v38 = vld [vmem:[%s25125_s1 + $0x8] sm:$0xff] }
 0x2b0   :  { %v2151_v35 = vpop.f32.mrf.mxu3  ;;  %3505 = vmatpush.bf16.msrb.mxu3 %v18504_v38 }
 0x2b1   :  { %v2152_v11 = vadd.f32 %v2151_v35, %v2063_v34  ;;  %v2652_v49 = vunpack.c.l.b16 %v2329_v39  ;;  %v18446_v34 = vld [vmem:[%s25128_s3 + $0x1b8] sm:$0xff]  ;;  %v2078_v39 = vadd.f32 %v19991_v55, %v2077_v51 }
 0x2b2   :  { %2711 = vmatpush.bf16.msrb.mxu1 %v18439_v27 }
 0x2b3   :  { %v2241_v17 = vadd.f32 %v2240_v59, %v2152_v11  ;;  %v2082_v11 = vpop.f32.mrf.mxu2 }
 0x2b5   :  { %v2298_v40 = vmax.f32 %v2241_v17, 0.0 }
 0x2b6   :  { %v2255_v16 = vpop.f32.mrf.mxu0 }
 0x2b7   :  { %v2330_v46 = vpack.c.bf16 %v2298_v40, %v2298_v40 }
 0x2b8   :  { %v2154_v47 = vpop.f32.mrf.mxu3 }
 0x2b9   :  { %v2653_v42 = vunpack.c.l.b16 %v2330_v46  ;;  %v2155_v21 = vadd.f32 %v2154_v47, %v2066_v33  ;;  %v18512_v47 = vld [vmem:[%s25125_s1 + $0x48] sm:$0xff] }
 0x2ba   :  { %3594 = vmatpush.bf16.msra.mxu0 %v18512_v47  ;;  %v14431_v47 = vld [vmem:[%s25126_s0 + $0x300] sm:$0xf] }
 0x2bb   :  { %v2654_v54 = vpack.c.b16 %v2653_v42, %v2652_v49  ;;  %v2244_v59 = vadd.f32 %v2243_v7, %v2155_v21 }
 0x2bd   :  { %14292 = vmatmul.msk.bf16.vlgmr.msra.gmra.mxu1 %vm945_vm2, %v2654_v54  ;;  %v2299_v50 = vmax.f32 %v2244_v59, 0.0  ;;  %v2081_v54 = vadd.f32 %v19991_v55, %v2080_v23  ;;  %v2085_v59 = vpop.f32.mrf.mxu2 }
 0x2be   :  { %2744 = vmatpush.bf16.msra.mxu1 %v18442_v41  ;;  %v2258_v30 = vpop.f32.mrf.mxu0 }
 0x2bf   :  { %v2331_v31 = vpack.c.bf16 %v2299_v50, %v2299_v50 }
 0x2c0   :  { %v2156_v2 = vpop.f32.mrf.mxu3 }
 0x2c1   :  { %v2157_v26 = vadd.f32 %v2156_v2, %v2068_v62  ;;  %v2686_v9 = vunpack.c.l.b16 %v2331_v31 }
 0x2c2   :  { %2745 = vmatpush.bf16.msra.mxu1 %v18441_v44 }
 0x2c3   :  { %v2246_v4 = vadd.f32 %v2245_v24, %v2157_v26 }
 0x2c5   :  { %v2300_v53 = vmax.f32 %v2246_v4, 0.0  ;;  %v2087_v51 = vpop.f32.mrf.mxu2 }
 0x2c6   :  { %v2260_v42 = vpop.f32.mrf.mxu0 }
 0x2c7   :  { %v2332_v43 = vpack.c.bf16 %v2300_v53, %v2300_v53  ;;  %v18447_v53 = vld [vmem:[%s25128_s3 + $0x1c0] sm:$0xff] }
 0x2c8   :  { %v2159_v7 = vpop.f32.mrf.mxu3 }
 0x2c9   :  { %v2687_v10 = vunpack.c.l.b16 %v2332_v43  ;;  %v2160_v45 = vadd.f32 %v2159_v7, %v2071_v37  ;;  %v2083_v43 = vadd.f32 %v19991_v55, %v2082_v11 }
 0x2ca   :  { %v2441_v13 = vpop.f32.mrf.mxu1 }
 0x2cb   :  { %v2688_v14 = vpack.c.b16 %v2687_v10, %v2686_v9  ;;  %v2249_v15 = vadd.f32 %v2248_v36, %v2160_v45 }
 0x2cd   :  { %14301 = vmatmul.msk.bf16.vlgmr.msrb.gmra.mxu1 %vm945_vm2, %v2688_v14  ;;  %v2301_v20 = vmax.f32 %v2249_v15, 0.0  ;;  %v2086_v15 = vadd.f32 %v19991_v55, %v2085_v59  ;;  %v18452_v59 = vld [vmem:[%s25128_s3 + $0x1e8] sm:$0xff] }
 0x2ce   :  { %2778 = vmatpush.bf16.msrb.mxu1 %v18444_v1  ;;  %v2263_v31 = vpop.f32.mrf.mxu0 }
 0x2cf   :  { %v2333_v25 = vpack.c.bf16 %v2301_v20, %v2301_v20 }
 0x2d0   :  { %v2161_v19 = vpop.f32.mrf.mxu3 }
 0x2d1   :  { %v2162_v22 = vadd.f32 %v2161_v19, %v2073_v18  ;;  %v2720_v32 = vunpack.c.l.b16 %v2333_v25  ;;  %v18450_v25 = vld [vmem:[%s25128_s3 + $0x1d8] sm:$0xff] }
 0x2d2   :  { %v2443_v6 = vpop.f32.mrf.mxu1  ;;  %2779 = vmatpush.bf16.msrb.mxu1 %v18443_v57 }
 0x2d3   :  { %v2251_v24 = vadd.f32 %v2250_v52, %v2162_v22 }
 0x2d5   :  { %v2302_v63 = vmax.f32 %v2251_v24, 0.0 }
 0x2d6   :  { %v2265_v57 = vpop.f32.mrf.mxu0 }
 0x2d7   :  { %v2334_v28 = vpack.c.bf16 %v2302_v63, %v2302_v63 }
 0x2d8   :  { %v2164_v29 = vpop.f32.mrf.mxu3 }
 0x2d9   :  { %v2721_v60 = vunpack.c.l.b16 %v2334_v28  ;;  %v2165_v8 = vadd.f32 %v2164_v29, %v2076_v0  ;;  %v2090_v24 = vpop.f32.mrf.mxu2  ;;  %v18503_v28 = vld [vmem:[%s25125_s1] sm:$0xff] }
 0x2da   :  { %v2475_v27 = vpop.f32.mrf.mxu1  ;;  %3506 = vmatpush.bf16.msrb.mxu3 %v18503_v28 }
 0x2db   :  { %v2722_v35 = vpack.c.b16 %v2721_v60, %v2720_v32  ;;  %v2956_v36 = vadd.f32 %v2475_v27, %v2441_v13  ;;  %v2254_v17 = vadd.f32 %v2253_v5, %v2165_v8  ;;  %v2088_v32 = vadd.f32 %v19991_v55, %v2087_v51 }
 0x2dd   :  { %14310 = vmatmul.msk.bf16.vlgmr.msra.gmra.mxu1 %vm945_vm2, %v2722_v35  ;;  %v2303_v40 = vmax.f32 %v2254_v17, 0.0  ;;  %v18511_v35 = vld [vmem:[%s25125_s1 + $0x40] sm:$0xff] }
 0x2de   :  { %2812 = vmatpush.bf16.msra.mxu1 %v18446_v34  ;;  %v2268_v8 = vpop.f32.mrf.mxu0  ;;  %3595 = vmatpush.bf16.msra.mxu0 %v18511_v35  ;;  %v18458_v35 = vld [vmem:[%s25126_s0 + $0x31c] sm:$0xf] }
 0x2df   :  { %v2335_v41 = vpack.c.bf16 %v2303_v40, %v2303_v40 }
 0x2e0   :  { %v2166_v33 = vpop.f32.mrf.mxu3 }
 0x2e1   :  { %v2167_v46 = vadd.f32 %v2166_v33, %v2078_v39  ;;  %v2754_v62 = vunpack.c.l.b16 %v2335_v41  ;;  %v2092_v17 = vpop.f32.mrf.mxu2  ;;  %v2091_v39 = vadd.f32 %v19991_v55, %v2090_v24  ;;  %v18459_v24 = vld [vmem:[%s25126_s0 + $0x320] sm:$0xf0] }
 0x2e2   :  { %v2477_v49 = vpop.f32.mrf.mxu1  ;;  %2813 = vmatpush.bf16.msra.mxu1 %v18445_v12 }
 0x2e3   :  { %v2256_v21 = vadd.f32 %v2255_v16, %v2167_v46  ;;  %v2971_v52 = vadd.f32 %v2477_v49, %v2443_v6  ;;  %v18456_v49 = vld [vmem:[%s25126_s0 + $0x308] sm:$0xf0] }
 0x2e4   :  { %v14432_v41 = vor.u32 %v18456_v49, %v14431_v47 }
 0x2e5   :  { %v2304_v58 = vmax.f32 %v2256_v21, 0.0 }
 0x2e6   :  { %3507 = vmatmul.bf16.vlgmr.msrb.gmra.mxu3 %v14432_v41  ;;  %v14455_v41 = vld [vmem:[%s25126_s0 + $0x330] sm:$0xf] }
 0x2e7   :  { %v2336_v61 = vpack.c.bf16 %v2304_v58, %v2304_v58 }
 0x2e8   :  { %v2169_v44 = vpop.f32.mrf.mxu3 }
 0x2e9   :  { %v2755_v2 = vunpack.c.l.b16 %v2336_v61  ;;  %v2170_v50 = vadd.f32 %v2169_v44, %v2081_v54  ;;  %v2270_v54 = vpop.f32.mrf.mxu0 }
 0x2ea   :  { %v2509_v26 = vpop.f32.mrf.mxu1 }
 0x2eb   :  { %v2756_v4 = vpack.c.b16 %v2755_v2, %v2754_v62  ;;  %v2957_v5 = vadd.f32 %v2956_v36, %v2509_v26  ;;  %v2259_v37 = vadd.f32 %v2258_v30, %v2170_v50  ;;  %v18449_v30 = vld [vmem:[%s25128_s3 + $0x1d0] sm:$0xff]  ;;  %v2095_v2 = vpop.f32.mrf.mxu2  ;;  %v18451_v50 = vld [vmem:[%s25128_s3 + $0x1e0] sm:$0xff]  ;;  %v2093_v26 = vadd.f32 %v19991_v55, %v2092_v17 }
 0x2ed   :  { %14319 = vmatmul.msk.bf16.vlgmr.msrb.gmra.mxu1 %vm945_vm2, %v2756_v4  ;;  %v2305_v9 = vmax.f32 %v2259_v37, 0.0  ;;  %v18455_v4 = vld [vmem:[%s25126_s0 + $0x304] sm:$0xf] }
 0x2ee   :  { %2846 = vmatpush.bf16.msrb.mxu1 %v18448_v3 }
 0x2ef   :  { %v2337_v14 = vpack.c.bf16 %v2305_v9, %v2305_v9 }
 0x2f0   :  { %v2171_v7 = vpop.f32.mrf.mxu3 }
 0x2f1   :  { %v2172_v10 = vadd.f32 %v2171_v7, %v2083_v43  ;;  %v2788_v20 = vunpack.c.l.b16 %v2337_v14  ;;  %v2273_v9 = vpop.f32.mrf.mxu0 }
 0x2f2   :  { %v2511_v45 = vpop.f32.mrf.mxu1  ;;  %2847 = vmatpush.bf16.msrb.mxu1 %v18447_v53 }
 0x2f3   :  { %v2261_v13 = vadd.f32 %v2260_v42, %v2172_v10  ;;  %v2972_v1 = vadd.f32 %v2971_v52, %v2511_v45  ;;  %v14695_v10 = vld [vmem:[%s25125_s1 + $0x90] sm:$0xf]  ;;  %v18521_v45 = vld [vmem:[%s25125_s1 + $0x90] sm:$0x30] }
 0x2f5   :  { %v2306_v16 = vmax.f32 %v2261_v13, 0.0 }
 0x2f7   :  { %v2338_v18 = vpack.c.bf16 %v2306_v16, %v2306_v16  ;;  %v14696_v16 = vor.u32 %v18521_v45, %v14695_v10 }
 0x2f8   :  { %v2174_v19 = vpop.f32.mrf.mxu3 }
 0x2f9   :  { %v2789_v22 = vunpack.c.l.b16 %v2338_v18  ;;  %v2175_v6 = vadd.f32 %v2174_v19, %v2086_v15  ;;  %v18453_v19 = vld [vmem:[%s25128_s3 + $0x1f0] sm:$0xff] }
 0x2fa   :  { %v2543_v23 = vpop.f32.mrf.mxu1  ;;  %2949 = vmatpush.bf16.msra.mxu2 %v18453_v19  ;;  %v18465_v19 = vld [vmem:[%s25126_s0 + $0x350] sm:$0xf0] }
 0x2fb   :  { %v2790_v0 = vpack.c.b16 %v2789_v22, %v2788_v20  ;;  %v2958_v63 = vadd.f32 %v2957_v5, %v2543_v23  ;;  %v2264_v29 = vadd.f32 %v2263_v31, %v2175_v6  ;;  %v14433_v5 = vld [vmem:[%s25126_s0 + $0x30c] sm:$0xf0]  ;;  %v14443_v20 = vld [vmem:[%s25126_s0 + $0x318] sm:$0xf] }
 0x2fc   :  { %v14436_v53 = vor.u32 %v18455_v4, %v14433_v5 }
 0x2fd   :  { %14328 = vmatmul.msk.bf16.vlgmr.msra.gmra.mxu1 %vm945_vm2, %v2790_v0  ;;  %v2307_v27 = vmax.f32 %v2264_v29, 0.0  ;;  %v14444_v0 = vor.u32 %v18459_v24, %v14443_v20  ;;  %v3497_v29 = vsel %vm529_vm0, %v14696_v16, 0 }
 0x2fe   :  { %2880 = vmatpush.bf16.msra.mxu1 %v18450_v25  ;;  %3596 = vmatmul.bf16.vlgmr.msra.gmra.mxu0 %v14436_v53  ;;  %v18461_v53 = vld [vmem:[%s25126_s0 + $0x334] sm:$0xf] }
 0x2ff   :  { %v2339_v12 = vpack.c.bf16 %v2307_v27, %v2307_v27  ;;  %3512 = vmatmul.bf16.gmra.mxu3 %v14444_v0  ;;  %v18464_v0 = vld [vmem:[%s25126_s0 + $0x34c] sm:$0xf] }
 0x300   :  { %v2176_v60 = vpop.f32.mrf.mxu3 }
 0x301   :  { %v2177_v34 = vadd.f32 %v2176_v60, %v2088_v32  ;;  %v2822_v42 = vunpack.c.l.b16 %v2339_v12  ;;  %v2275_v32 = vpop.f32.mrf.mxu0  ;;  %v18520_v60 = vld [vmem:[%s25125_s1 + $0x88] sm:$0xff] }
 0x302   :  { %v2545_v36 = vpop.f32.mrf.mxu1  ;;  %2881 = vmatpush.bf16.msra.mxu1 %v18449_v30 }
 0x303   :  { %v2266_v38 = vadd.f32 %v2265_v57, %v2177_v34  ;;  %v2973_v11 = vadd.f32 %v2972_v1, %v2545_v36  ;;  %v2096_v1 = vadd.f32 %v19991_v55, %v2095_v2  ;;  %v2097_v57 = vpop.f32.mrf.mxu2  ;;  %v14445_v36 = vld [vmem:[%s25126_s0 + $0x324] sm:$0xf0] }
 0x304   :  { %v14448_v17 = vor.u32 %v18458_v35, %v14445_v36 }
 0x305   :  { %v2308_v33 = vmax.f32 %v2266_v38, 0.0 }
 0x307   :  { %v2340_v40 = vpack.c.bf16 %v2308_v33, %v2308_v33 }
 0x308   :  { %v2179_v46 = vpop.f32.mrf.mxu3 }
 0x309   :  { %v2823_v21 = vunpack.c.l.b16 %v2340_v40  ;;  %v2180_v52 = vadd.f32 %v2179_v46, %v2091_v39  ;;  %v18519_v39 = vld [vmem:[%s25125_s1 + $0x80] sm:$0xff] }
 0x30a   :  { %v2577_v58 = vpop.f32.mrf.mxu1 }
 0x30b   :  { %v2824_v61 = vpack.c.b16 %v2823_v21, %v2822_v42  ;;  %v2959_v44 = vadd.f32 %v2958_v63, %v2577_v58  ;;  %v2269_v62 = vadd.f32 %v2268_v8, %v2180_v52  ;;  %v2098_v8 = vadd.f32 %v19991_v55, %v2097_v57  ;;  %v2100_v34 = vpop.f32.mrf.mxu2  ;;  %v2278_v42 = vpop.f32.mrf.mxu0 }
 0x30c   :  { %v2101_v49 = vadd.f32 %v19991_v55, %v2100_v34 }
 0x30d   :  { %14337 = vmatmul.msk.bf16.vlgmr.msrb.gmra.mxu1 %vm945_vm2, %v2824_v61  ;;  %v2309_v31 = vmax.f32 %v2269_v62, 0.0 }
 0x30e   :  { %2914 = vmatpush.bf16.msrb.mxu1 %v18452_v59  ;;  %3601 = vmatmul.bf16.gmra.mxu0 %v14448_v17  ;;  %v14481_v17 = vld [vmem:[%s25126_s0 + $0x36c] sm:$0xf0] }
 0x30f   :  { %v2341_v13 = vpack.c.bf16 %v2309_v31, %v2309_v31 }
 0x310   :  { %v2181_v3 = vpop.f32.mrf.mxu3 }
 0x311   :  { %v2182_v37 = vadd.f32 %v2181_v3, %v2093_v26  ;;  %v2856_v22 = vunpack.c.l.b16 %v2341_v13  ;;  %v19159_v3 = vld [vmem:[%s25127_s2] ss:$0 sm:$0xff] }
 0x312   :  { %v2579_v43 = vpop.f32.mrf.mxu1  ;;  %2915 = vmatpush.bf16.msrb.mxu1 %v18451_v50 }
 0x313   :  { %v2271_v7 = vadd.f32 %v2270_v54, %v2182_v37  ;;  %v2974_v51 = vadd.f32 %v2973_v11, %v2579_v43  ;;  %v18462_v54 = vld [vmem:[%s25126_s0 + $0x338] sm:$0xf0]  ;;  %v2102_v2 = vpop.f32.mrf.mxu2  ;;  %v2280_v37 = vpop.f32.mrf.mxu0  ;;  %v14457_v43 = vld [vmem:[%s25126_s0 + $0x33c] sm:$0xf0] }
 0x314   :  { %v2103_v4 = vadd.f32 %v19159_v3, %v2102_v2  ;;  %v18466_v2 = vld [vmem:[%s25126_s0 + $0x358] sm:$0xf0] }
 0x315   :  { %v2310_v14 = vmax.f32 %v2271_v7, 0.0 }
 0x317   :  { %v2342_v15 = vpack.c.bf16 %v2310_v14, %v2310_v14  ;;  %v14439_v14 = vld [vmem:[%s25126_s0 + $0x308] sm:$0xf] }
 0x318   :  { %v2184_v18 = vpop.f32.mrf.mxu3 }
 0x319   :  { %v2857_v6 = vunpack.c.l.b16 %v2342_v15  ;;  %v2185_v23 = vadd.f32 %v2184_v18, %v2096_v1  ;;  %v18457_v15 = vld [vmem:[%s25126_s0 + $0x310] sm:$0xf0]  ;;  %v14467_v18 = vld [vmem:[%s25126_s0 + $0x348] sm:$0xf] }
 0x31a   :  { %v2611_v25 = vpop.f32.mrf.mxu1 }
 0x31b   :  { %v2858_v63 = vpack.c.b16 %v2857_v6, %v2856_v22  ;;  %v2960_v28 = vadd.f32 %v2959_v44, %v2611_v25  ;;  %v2274_v30 = vadd.f32 %v2273_v9, %v2185_v23  ;;  %v14456_v44 = vor.u32 %v18462_v54, %v14455_v41  ;;  %v18470_v54 = vld [vmem:[%s25126_s0 + $0x37c] sm:$0xf] }
 0x31c   :  { %v14440_v22 = vor.u32 %v18457_v15, %v14439_v14  ;;  %v14468_v6 = vor.u32 %v18465_v19, %v14467_v18 }
 0x31d   :  { %14346 = vmatmul.msk.bf16.vlgmr.msra.gmra.mxu1 %vm945_vm2, %v2858_v63  ;;  %v2311_v38 = vmax.f32 %v2274_v30, 0.0  ;;  %3517 = vmatmul.bf16.gmra.mxu3 %v14456_v44  ;;  %v14469_v63 = vld [vmem:[%s25126_s0 + $0x354] sm:$0xf0] }
 0x31e   :  { %3682 = vmatpush.bf16.msra.mxu1 %v3497_v29 }
 0x31f   :  { %v2343_v46 = vpack.c.bf16 %v2311_v38, %v2311_v38 }
 0x320   :  { %v2186_v27 = vpop.f32.mrf.mxu3 }
 0x321   :  { %v2187_v11 = vadd.f32 %v2186_v27, %v2098_v8  ;;  %v2890_v58 = vunpack.c.l.b16 %v2343_v46  ;;  %v14479_v8 = vld [vmem:[%s25126_s0 + $0x360] sm:$0xf]  ;;  %v18468_v27 = vld [vmem:[%s25126_s0 + $0x368] sm:$0xf0]  ;;  %v18463_v46 = vld [vmem:[%s25126_s0 + $0x340] sm:$0xf0] }
 0x322   :  { %v2613_v12 = vpop.f32.mrf.mxu1  ;;  %3683 = vmatpush.bf16.msra.mxu1 %v18520_v60  ;;  %v18460_v60 = vld [vmem:[%s25126_s0 + $0x328] sm:$0xf0]  ;;  %v14480_v35 = vor.u32 %v18468_v27, %v14479_v8 }
 0x323   :  { %v2276_v33 = vadd.f32 %v2275_v32, %v2187_v11  ;;  %v2975_v40 = vadd.f32 %v2974_v51, %v2613_v12  ;;  %v14460_v51 = vor.u32 %v18461_v53, %v14457_v43  ;;  %v14451_v32 = vld [vmem:[%s25126_s0 + $0x320] sm:$0xf]  ;;  %v18467_v11 = vld [vmem:[%s25126_s0 + $0x364] sm:$0xf] }
 0x324   :  { %v14452_v34 = vor.u32 %v18460_v60, %v14451_v32  ;;  %v14484_v12 = vor.u32 %v18467_v11, %v14481_v17  ;;  %v18479_v32 = vld [vmem:[%s25126_s0 + $0x3c4] sm:$0xf]  ;;  %v14529_v60 = vld [vmem:[%s25126_s0 + $0x3cc] sm:$0xf0]  ;;  %v14539_v17 = vld [vmem:[%s25126_s0 + $0x3d8] sm:$0xf] }
 0x325   :  { %v2312_v47 = vmax.f32 %v2276_v33, 0.0  ;;  %3606 = vmatmul.bf16.gmra.mxu0 %v14460_v51  ;;  %v14487_v51 = vld [vmem:[%s25126_s0 + $0x368] sm:$0xf]  ;;  %v14532_v8 = vor.u32 %v18479_v32, %v14529_v60  ;;  %v14565_v60 = vld [vmem:[%s25126_s0 + $0x414] sm:$0xf0] }
 0x326   :  { %3684 = vmatpush.bf16.msra.mxu1 %v18519_v39 }
 0x327   :  { %v2344_v21 = vpack.c.bf16 %v2312_v47, %v2312_v47  ;;  %v14491_v47 = vld [vmem:[%s25126_s0 + $0x378] sm:$0xf] }
 0x328   :  { %v2189_v52 = vpop.f32.mrf.mxu3 }
 0x329   :  { %v2891_v59 = vunpack.c.l.b16 %v2344_v21  ;;  %v2190_v61 = vadd.f32 %v2189_v52, %v2101_v49  ;;  %v18471_v49 = vld [vmem:[%s25126_s0 + $0x380] sm:$0xf0] }
 0x32a   :  { %v2645_v62 = vpop.f32.mrf.mxu1  ;;  %v14492_v21 = vor.u32 %v18471_v49, %v14491_v47 }
 0x32b   :  { %v2892_v50 = vpack.c.b16 %v2891_v59, %v2890_v58  ;;  %v2279_v55 = vadd.f32 %v2278_v42, %v2190_v61  ;;  %v2961_v26 = vadd.f32 %v2960_v28, %v2645_v62  ;;  %v14472_v28 = vor.u32 %v18464_v0, %v14469_v63  ;;  %v14493_v58 = vld [vmem:[%s25126_s0 + $0x384] sm:$0xf0]  ;;  %v14475_v62 = vld [vmem:[%s25126_s0 + $0x350] sm:$0xf] }
 0x32c   :  { %v14496_v59 = vor.u32 %v18470_v54, %v14493_v58 }
 0x32d   :  { %14355 = vmatmul.msk.bf16.vlgmr.msrb.gmra.mxu1 %vm945_vm2, %v2892_v50  ;;  %v2313_v5 = vmax.f32 %v2279_v55, 0.0  ;;  %3522 = vmatmul.bf16.gmra.mxu3 %v14468_v6  ;;  %v14503_v50 = vld [vmem:[%s25126_s0 + $0x390] sm:$0xf]  ;;  %v18474_v55 = vld [vmem:[%s25126_s0 + $0x398] sm:$0xf0] }
 0x32e   :  { %v14504_v3 = vor.u32 %v18474_v55, %v14503_v50  ;;  %v18472_v6 = vld [vmem:[%s25126_s0 + $0x388] sm:$0xf0]  ;;  %v14551_v50 = vld [vmem:[%s25126_s0 + $0x3f0] sm:$0xf]  ;;  %v18486_v55 = vld [vmem:[%s25126_s0 + $0x3f8] sm:$0xf0] }
 0x32f   :  { %v2345_v10 = vpack.c.bf16 %v2313_v5, %v2313_v5 }
 0x330   :  { %v2191_v31 = vpop.f32.mrf.mxu3 }
 0x331   :  { %v2192_v7 = vadd.f32 %v2191_v31, %v2103_v4  ;;  %v2924_v16 = vunpack.c.l.b16 %v2345_v10  ;;  %v18473_v31 = vld [vmem:[%s25126_s0 + $0x394] sm:$0xf]  ;;  %v14515_v10 = vld [vmem:[%s25126_s0 + $0x3a8] sm:$0xf] }
 0x332   :  { %v2647_v9 = vpop.f32.mrf.mxu1 }
 0x333   :  { %v2281_v45 = vadd.f32 %v2280_v37, %v2192_v7  ;;  %v2976_v13 = vadd.f32 %v2975_v40, %v2647_v9  ;;  %v14463_v40 = vld [vmem:[%s25126_s0 + $0x338] sm:$0xf]  ;;  %v14505_v37 = vld [vmem:[%s25126_s0 + $0x39c] sm:$0xf0]  ;;  %v18469_v9 = vld [vmem:[%s25126_s0 + $0x370] sm:$0xf0] }
 0x334   :  { %v14464_v42 = vor.u32 %v18463_v46, %v14463_v40  ;;  %v14508_v53 = vor.u32 %v18473_v31, %v14505_v37  ;;  %v20583_v37 = vld [vmem:[%s25127_s2] ss:$0 sm:$0xff] }
 0x335   :  { %v2314_v1 = vmax.f32 %v2281_v45, 0.0  ;;  %3611 = vmatmul.bf16.gmra.mxu0 %v14472_v28  ;;  %v18477_v45 = vld [vmem:[%s25126_s0 + $0x3b0] sm:$0xf0] }
 0x337   :  { %v2346_v57 = vpack.c.bf16 %v2314_v1, %v2314_v1  ;;  %v14516_v1 = vor.u32 %v18477_v45, %v14515_v10  ;;  %v18609_v10 = vld [vmem:[%s25125_s1 + $0x38] sm:$0xff] }
 0x338   :  { %4982 = vmatpush.bf16.msrb.mxu1 %v18609_v10  ;;  %v18616_v10 = vld [vmem:[%s25125_s1 + $0x70] sm:$0xff] }
 0x339   :  { %v2925_v20 = vunpack.c.l.b16 %v2346_v57  ;;  %v14517_v57 = vld [vmem:[%s25126_s0 + $0x3b4] sm:$0xf0] }
 0x33a   :  { %v2679_v23 = vpop.f32.mrf.mxu1 }
 0x33b   :  { %v2926_v24 = vpack.c.b16 %v2925_v20, %v2924_v16  ;;  %v2962_v25 = vadd.f32 %v2961_v26, %v2679_v23  ;;  %v14476_v26 = vor.u32 %v18466_v2, %v14475_v62  ;;  %v18476_v16 = vld [vmem:[%s25126_s0 + $0x3ac] sm:$0xf]  ;;  %v14527_v23 = vld [vmem:[%s25126_s0 + $0x3c0] sm:$0xf] }
 0x33c   :  { %v14520_v18 = vor.u32 %v18476_v16, %v14517_v57  ;;  %v18522_v62 = vld [vmem:[%s25128_s3 + $0x200] sm:$0xff]  ;;  %v18481_v16 = vld [vmem:[%s25126_s0 + $0x3d0] sm:$0xf0] }
 0x33d   :  { %14364 = vmatmul.msk.bf16.vlgmr.msra.gmra.mxu2 %vm945_vm2, %v2926_v24  ;;  %14697 = vmatmul.msk.bf16.vlgmr.msra.gmra.mxu1 %vm480_vm1, %v14440_v22  ;;  %v14499_v22 = vld [vmem:[%s25126_s0 + $0x380] sm:$0xf]  ;;  %v18480_v24 = vld [vmem:[%s25126_s0 + $0x3c8] sm:$0xf0] }
 0x33e   :  { %3527 = vmatmul.bf16.gmra.mxu3 %v14480_v35  ;;  %v14528_v0 = vor.u32 %v18480_v24, %v14527_v23  ;;  %v14511_v35 = vld [vmem:[%s25126_s0 + $0x398] sm:$0xf] }
 0x342   :  { %v2681_v29 = vpop.f32.mrf.mxu1 }
 0x343   :  { %v2977_v30 = vadd.f32 %v2976_v13, %v2681_v29  ;;  %v14488_v13 = vor.u32 %v18469_v9, %v14487_v51  ;;  %v18617_v51 = vld [vmem:[%s25125_s1 + $0x78] sm:$0xff] }
 0x344   :  { %v18525_v9 = vld [vmem:[%s25128_s3 + $0x218] sm:$0xff]  ;;  %5071 = vmatpush.bf16.msra.mxu3 %v18617_v51 }
 0x345   :  { %3616 = vmatmul.bf16.gmra.mxu0 %v14484_v12  ;;  %v18483_v12 = vld [vmem:[%s25126_s0 + $0x3e0] sm:$0xf0] }
 0x348   :  { %5072 = vmatpush.bf16.msra.mxu3 %v18616_v10 }
 0x34a   :  { %v2713_v36 = vpop.f32.mrf.mxu1 }
 0x34b   :  { %v2963_v38 = vadd.f32 %v2962_v25, %v2713_v36  ;;  %v14500_v25 = vor.u32 %v18472_v6, %v14499_v22  ;;  %v18475_v36 = vld [vmem:[%s25126_s0 + $0x3a0] sm:$0xf0]  ;;  %v18489_v22 = vld [vmem:[%s25126_s0 + $0x410] sm:$0xf0] }
 0x34d   :  { %14698 = vmatmul.msk.bf16.gmra.mxu1 %vm480_vm1, %v14452_v34 }
 0x34e   :  { %3532 = vmatmul.bf16.gmra.mxu3 %v14492_v21  ;;  %v14541_v21 = vld [vmem:[%s25126_s0 + $0x3e4] sm:$0xf0] }
 0x352   :  { %v2715_v39 = vpop.f32.mrf.mxu1 }
 0x353   :  { %v2978_v33 = vadd.f32 %v2977_v30, %v2715_v39  ;;  %v14512_v39 = vor.u32 %v18475_v36, %v14511_v35 }
 0x355   :  { %3621 = vmatmul.bf16.gmra.mxu0 %v14496_v59  ;;  %v14523_v59 = vld [vmem:[%s25126_s0 + $0x3b0] sm:$0xf] }
 0x35a   :  { %v2747_v52 = vpop.f32.mrf.mxu1 }
 0x35b   :  { %v2964_v41 = vadd.f32 %v2963_v38, %v2747_v52  ;;  %v18523_v52 = vld [vmem:[%s25128_s3 + $0x208] sm:$0xff] }
 0x35c   :  { %3921 = vmatpush.bf16.msrb.mxu2 %v18523_v52 }
 0x35d   :  { %14699 = vmatmul.msk.bf16.gmra.mxu1 %vm480_vm1, %v14464_v42  ;;  %v18482_v42 = vld [vmem:[%s25126_s0 + $0x3dc] sm:$0xf] }
 0x35e   :  { %3537 = vmatmul.bf16.gmra.mxu3 %v14504_v3  ;;  %v14552_v3 = vor.u32 %v18486_v55, %v14551_v50 }
 0x360   :  { %3922 = vmatpush.bf16.msrb.mxu2 %v18522_v62 }
 0x362   :  { %v2749_v61 = vpop.f32.mrf.mxu1 }
 0x363   :  { %v2979_v44 = vadd.f32 %v2978_v33, %v2749_v61  ;;  %v14540_v33 = vor.u32 %v18483_v12, %v14539_v17  ;;  %v18478_v61 = vld [vmem:[%s25126_s0 + $0x3b8] sm:$0xf0] }
 0x364   :  { %3955 = vmatpush.bf16.msra.mxu2 %v18525_v9 }
 0x365   :  { %3626 = vmatmul.bf16.gmra.mxu0 %v14508_v53 }
 0x369   :  { %v3508_v29 = vpop.f32.mrf.mxu3 }
 0x36a   :  { %v2781_v4 = vpop.f32.mrf.mxu1 }
 0x36b   :  { %v2965_v5 = vadd.f32 %v2964_v41, %v2781_v4  ;;  %v14544_v41 = vor.u32 %v18482_v42, %v14541_v21 }
 0x36d   :  { %14700 = vmatmul.msk.bf16.gmra.mxu1 %vm480_vm1, %v14476_v26  ;;  %v14524_v26 = vor.u32 %v18478_v61, %v14523_v59 }
 0x36e   :  { %3542 = vmatmul.bf16.gmra.mxu3 %v14516_v1 }
 0x371   :  { %v20534_v38 = vpop.f32.mrf.mxu3 }
 0x372   :  { %v2783_v43 = vpop.f32.mrf.mxu1 }
 0x373   :  { %v2980_v7 = vadd.f32 %v2979_v44, %v2783_v43  ;;  %v18485_v43 = vld [vmem:[%s25126_s0 + $0x3f4] sm:$0xf] }
 0x375   :  { %3631 = vmatmul.bf16.gmra.mxu0 %v14520_v18  ;;  %v18524_v18 = vld [vmem:[%s25128_s3 + $0x210] sm:$0xff] }
 0x376   :  { %3956 = vmatpush.bf16.msra.mxu2 %v18524_v18  ;;  %v14559_v18 = vld [vmem:[%s25126_s0 + $0x3f8] sm:$0xf] }
 0x37a   :  { %v2815_v14 = vpop.f32.mrf.mxu1 }
 0x37b   :  { %v2966_v15 = vadd.f32 %v2965_v5, %v2815_v14  ;;  %v20520_v30 = vpop.f32.mrf.mxu0  ;;  %v3509_v14 = vadd.f32 %v20583_v37, %v3508_v29 }
 0x37d   :  { %14701 = vmatmul.msk.bf16.gmra.mxu1 %vm480_vm1, %v14488_v13  ;;  %v3598_v6 = vadd.f32 %v20520_v30, %v3509_v14  ;;  %v18488_v30 = vld [vmem:[%s25126_s0 + $0x40c] sm:$0xf] }
 0x37e   :  { %3547 = vmatmul.bf16.gmra.mxu3 %v14528_v0  ;;  %v3511_v0 = vadd.f32 %v20583_v37, %v20534_v38  ;;  %v14568_v35 = vor.u32 %v18488_v30, %v14565_v60 }
 0x382   :  { %v2817_v19 = vpop.f32.mrf.mxu1  ;;  %v20545_v47 = vpop.f32.mrf.mxu3 }
 0x383   :  { %v2981_v20 = vadd.f32 %v2980_v7, %v2817_v19  ;;  %v20536_v11 = vpop.f32.mrf.mxu0  ;;  %v14553_v7 = vld [vmem:[%s25126_s0 + $0x3fc] sm:$0xf0]  ;;  %v3514_v12 = vadd.f32 %v20583_v37, %v20545_v47 }
 0x384   :  { %v14556_v45 = vor.u32 %v18485_v43, %v14553_v7  ;;  %v14575_v47 = vld [vmem:[%s25126_s0 + $0x420] sm:$0xf] }
 0x385   :  { %3636 = vmatmul.bf16.gmra.mxu0 %v14532_v8  ;;  %v3600_v8 = vadd.f32 %v20536_v11, %v3511_v0  ;;  %v18484_v11 = vld [vmem:[%s25126_s0 + $0x3e8] sm:$0xf0] }
 0x38a   :  { %v2849_v63 = vpop.f32.mrf.mxu1  ;;  %v20564_v44 = vpop.f32.mrf.mxu3 }
 0x38b   :  { %v2967_v28 = vadd.f32 %v2966_v15, %v2849_v63  ;;  %v20547_v49 = vpop.f32.mrf.mxu0  ;;  %v14535_v15 = vld [vmem:[%s25126_s0 + $0x3c8] sm:$0xf] }
 0x38c   :  { %v14536_v23 = vor.u32 %v18481_v16, %v14535_v15 }
 0x38d   :  { %14702 = vmatmul.msk.bf16.gmra.mxu1 %vm480_vm1, %v14500_v25 }
 0x38e   :  { %3552 = vmatmul.bf16.gmra.mxu3 %v14540_v33 }
 0x392   :  { %v2851_v27 = vpop.f32.mrf.mxu1 }
 0x393   :  { %v2982_v34 = vadd.f32 %v2981_v20, %v2851_v27  ;;  %v20569_v2 = vpop.f32.mrf.mxu0  ;;  %v14563_v20 = vld [vmem:[%s25126_s0 + $0x408] sm:$0xf] }
 0x394   :  { %v14564_v24 = vor.u32 %v18489_v22, %v14563_v20  ;;  %v18487_v20 = vld [vmem:[%s25126_s0 + $0x400] sm:$0xf0] }
 0x395   :  { %3641 = vmatmul.bf16.gmra.mxu0 %v14544_v41 }
 0x39a   :  { %v2883_v40 = vpop.f32.mrf.mxu1 }
 0x39b   :  { %v2968_v46 = vadd.f32 %v2967_v28, %v2883_v40  ;;  %v14547_v40 = vld [vmem:[%s25126_s0 + $0x3e0] sm:$0xf] }
 0x39c   :  { %v14548_v52 = vor.u32 %v18484_v11, %v14547_v40 }
 0x39d   :  { %14703 = vmatmul.msk.bf16.gmra.mxu1 %vm480_vm1, %v14512_v39 }
 0x39e   :  { %3557 = vmatmul.bf16.gmra.mxu3 %v14552_v3  ;;  %v3516_v3 = vadd.f32 %v20583_v37, %v20564_v44  ;;  %v14577_v44 = vld [vmem:[%s25126_s0 + $0x42c] sm:$0xf0] }
 0x3a0   :  { %v20578_v31 = vpop.f32.mrf.mxu3  ;;  %v3605_v51 = vadd.f32 %v20569_v2, %v3516_v3 }
 0x3a1   :  { %v3519_v15 = vadd.f32 %v20583_v37, %v20578_v31  ;;  %v14587_v31 = vld [vmem:[%s25126_s0 + $0x438] sm:$0xf] }
 0x3a2   :  { %v2885_v54 = vpop.f32.mrf.mxu1  ;;  %v20585_v53 = vpop.f32.mrf.mxu0 }
 0x3a3   :  { %v2983_v58 = vadd.f32 %v2982_v34, %v2885_v54  ;;  %v18492_v54 = vld [vmem:[%s25126_s0 + $0x428] sm:$0xf0] }
 0x3a4   :  { %v14576_v62 = vor.u32 %v18492_v54, %v14575_v47  ;;  %v14571_v47 = vld [vmem:[%s25126_s0 + $0x410] sm:$0xf]  ;;  %v18490_v54 = vld [vmem:[%s25126_s0 + $0x418] sm:$0xf0] }
 0x3a5   :  { %3646 = vmatmul.bf16.gmra.mxu0 %v14556_v45  ;;  %v18608_v45 = vld [vmem:[%s25125_s1 + $0x30] sm:$0xff] }
 0x3a6   :  { %4983 = vmatpush.bf16.msrb.mxu1 %v18608_v45  ;;  %v18497_v45 = vld [vmem:[%s25126_s0 + $0x454] sm:$0xf] }
 0x3a8   :  { %v20609_v57 = vpop.f32.mrf.mxu3 }
 0x3aa   :  { %v2917_v4 = vpop.f32.mrf.mxu1  ;;  %v20614_v19 = vpop.f32.mrf.mxu0 }
 0x3ab   :  { %v2969_v5 = vadd.f32 %v2968_v46, %v2917_v4 }
 0x3ad   :  { %14704 = vmatmul.msk.bf16.gmra.mxu1 %vm480_vm1, %v14524_v26 }
 0x3ae   :  { %3562 = vmatmul.bf16.gmra.mxu3 %v14564_v24 }
 0x3b0   :  { %v20626_v28 = vpop.f32.mrf.mxu3 }
 0x3b2   :  { %v2919_v13 = vpop.f32.mrf.mxu1  ;;  %v20628_v32 = vpop.f32.mrf.mxu0 }
 0x3b3   :  { %v2984_v1 = vadd.f32 %v2983_v58, %v2919_v13 }
 0x3b5   :  { %3651 = vmatmul.bf16.gmra.mxu0 %v14568_v35  ;;  %v18528_v35 = vld [vmem:[%s25128_s3 + $0x230] sm:$0xff] }
 0x3b8   :  { %v20648_v42 = vpop.f32.mrf.mxu3 }
 0x3ba   :  { %v3686_v25 = vpop.f32.mrf.mxu1  ;;  %v20651_v41 = vpop.f32.mrf.mxu0 }
 0x3bb   :  { %v3687_v63 = vadd.f32 %v3686_v25, %v3598_v6  ;;  %v18495_v25 = vld [vmem:[%s25126_s0 + $0x440] sm:$0xf0] }
 0x3bc   :  { %v14588_v30 = vor.u32 %v18495_v25, %v14587_v31  ;;  %v18493_v31 = vld [vmem:[%s25126_s0 + $0x430] sm:$0xf0] }
 0x3bd   :  { %14705 = vmatmul.msk.bf16.gmra.mxu1 %vm480_vm1, %v14536_v23  ;;  %v3766_v27 = vmax.f32 %v3687_v63, 0.0  ;;  %v3608_v23 = vadd.f32 %v20585_v53, %v3519_v15  ;;  %v18607_v15 = vld [vmem:[%s25125_s1 + $0x28] sm:$0xff] }
 0x3be   :  { %3567 = vmatmul.bf16.gmra.mxu3 %v14576_v62  ;;  %v18498_v62 = vld [vmem:[%s25126_s0 + $0x458] sm:$0xf0]  ;;  %4984 = vmatpush.bf16.msrb.mxu1 %v18607_v15 }
 0x3bf   :  { %v3798_v39 = vpack.c.bf16 %v3766_v27, %v3766_v27  ;;  %v3521_v27 = vadd.f32 %v20583_v37, %v20609_v57  ;;  %v14589_v57 = vld [vmem:[%s25126_s0 + $0x444] sm:$0xf0] }
 0x3c0   :  { %v2951_v29 = vpop.f32.mrf.mxu2 }
 0x3c1   :  { %v2970_v34 = vadd.f32 %v2969_v5, %v2951_v29  ;;  %v3897_v58 = vunpack.c.l.b16 %v3798_v39  ;;  %v18526_v5 = vld [vmem:[%s25128_s3 + $0x220] sm:$0xff]  ;;  %v20672_v43 = vpop.f32.mrf.mxu3  ;;  %v14560_v29 = vor.u32 %v18487_v20, %v14559_v18  ;;  %v3610_v39 = vadd.f32 %v20614_v19, %v3521_v27 }
 0x3c2   :  { %v3688_v36 = vpop.f32.mrf.mxu1  ;;  %v20674_v7 = vpop.f32.mrf.mxu0  ;;  %v3529_v20 = vadd.f32 %v20583_v37, %v20672_v43  ;;  %v14611_v43 = vld [vmem:[%s25126_s0 + $0x468] sm:$0xf] }
 0x3c3   :  { %v20638_v38 = vadd.f32 %v2970_v34, %v19976_v48  ;;  %v3689_v17 = vadd.f32 %v3688_v36, %v3600_v8  ;;  %v3603_v48 = vadd.f32 %v20547_v49, %v3514_v12  ;;  %v18527_v49 = vld [vmem:[%s25128_s3 + $0x228] sm:$0xff]  ;;  %v18529_v8 = vld [vmem:[%s25128_s3 + $0x238] sm:$0xff] }
 0x3c4   :  { %v18494_v12 = vld [vmem:[%s25126_s0 + $0x43c] sm:$0xf] }
 0x3c5   :  { %v3767_v33 = vmax.f32 %v3689_v17, 0.0  ;;  %v14592_v40 = vor.u32 %v18494_v12, %v14589_v57 }
 0x3c7   :  { %v3799_v46 = vpack.c.bf16 %v3767_v33, %v3767_v33 }
 0x3c8   :  { %v2953_v21 = vpop.f32.mrf.mxu2 }
 0x3c9   :  { %v3898_v59 = vunpack.c.l.b16 %v3799_v46  ;;  %v2985_v61 = vadd.f32 %v2984_v1, %v2953_v21  ;;  %v20697_v6 = vpop.f32.mrf.mxu3 }
 0x3ca   :  { %v3691_v50 = vpop.f32.mrf.mxu1  ;;  %v20700_v24 = vpop.f32.mrf.mxu0  ;;  %v3531_v12 = vadd.f32 %v20583_v37, %v20697_v6  ;;  %v14613_v6 = vld [vmem:[%s25126_s0 + $0x474] sm:$0xf0] }
 0x3cb   :  { %v3899_v55 = vpack.c.b16 %v3898_v59, %v3897_v58  ;;  %v20663_v26 = vadd.f32 %v2985_v61, %v19993_v56  ;;  %v3692_v4 = vadd.f32 %v3691_v50, %v3603_v48  ;;  %v18491_v56 = vld [vmem:[%s25126_s0 + $0x424] sm:$0xf]  ;;  %v3524_v48 = vadd.f32 %v20583_v37, %v20626_v28  ;;  %v14599_v28 = vld [vmem:[%s25126_s0 + $0x450] sm:$0xf] }
 0x3cc   :  { %v14580_v13 = vor.u32 %v18491_v56, %v14577_v44  ;;  %v14600_v3 = vor.u32 %v18498_v62, %v14599_v28  ;;  %v3526_v56 = vadd.f32 %v20583_v37, %v20648_v42  ;;  %v14601_v42 = vld [vmem:[%s25126_s0 + $0x45c] sm:$0xf0] }
 0x3cd   :  { %14706 = vmatmul.msk.bf16.gmra.mxu1 %vm480_vm1, %v14548_v52  ;;  %14785 = vmatmul.msk.bf16.vlgmr.msrb.gmra.mxu2 %vm945_vm2, %v3899_v55  ;;  %v3768_v9 = vmax.f32 %v3692_v4, 0.0  ;;  %v3613_v59 = vadd.f32 %v20628_v32, %v3524_v48  ;;  %v14572_v55 = vor.u32 %v18490_v54, %v14571_v47  ;;  %v14595_v28 = vld [vmem:[%s25126_s0 + $0x440] sm:$0xf] }
 0x3ce   :  { %3989 = vmatpush.bf16.msrb.mxu2 %v18527_v49  ;;  %3656 = vmatmul.bf16.gmra.mxu0 %v14580_v13  ;;  %v3615_v13 = vadd.f32 %v20651_v41, %v3526_v56 }
 0x3cf   :  { %v3800_v2 = vpack.c.bf16 %v3768_v9, %v3768_v9  ;;  %3572 = vmatmul.bf16.gmra.mxu3 %v14588_v30 }
 0x3d1   :  { %v3931_v0 = vunpack.c.l.b16 %v3800_v2  ;;  %v20718_v36 = vpop.f32.mrf.mxu3  ;;  %v14604_v2 = vor.u32 %v18497_v45, %v14601_v42 }
 0x3d2   :  { %v3693_v1 = vpop.f32.mrf.mxu1  ;;  %3990 = vmatpush.bf16.msrb.mxu2 %v18526_v5  ;;  %v20720_v17 = vpop.f32.mrf.mxu0  ;;  %v18531_v5 = vld [vmem:[%s25128_s3 + $0x248] sm:$0xff] }
 0x3d3   :  { %v3694_v14 = vadd.f32 %v3693_v1, %v3605_v51  ;;  %v18530_v51 = vld [vmem:[%s25128_s3 + $0x240] sm:$0xff] }
 0x3d5   :  { %v3769_v16 = vmax.f32 %v3694_v14, 0.0  ;;  %v18615_v14 = vld [vmem:[%s25125_s1 + $0x68] sm:$0xff] }
 0x3d6   :  { %5073 = vmatpush.bf16.msra.mxu3 %v18615_v14 }
 0x3d7   :  { %v3801_v22 = vpack.c.bf16 %v3769_v16, %v3769_v16 }
 0x3d9   :  { %v3932_v63 = vunpack.c.l.b16 %v3801_v22  ;;  %v20737_v58 = vpop.f32.mrf.mxu3 }
 0x3da   :  { %v3696_v60 = vpop.f32.mrf.mxu1  ;;  %v20740_v61 = vpop.f32.mrf.mxu0  ;;  %v3536_v56 = vadd.f32 %v20583_v37, %v20737_v58  ;;  %v18606_v58 = vld [vmem:[%s25125_s1 + $0x20] sm:$0xff] }
 0x3db   :  { %v3933_v53 = vpack.c.b16 %v3932_v63, %v3931_v0  ;;  %v3697_v34 = vadd.f32 %v3696_v60, %v3608_v23  ;;  %v14583_v23 = vld [vmem:[%s25126_s0 + $0x428] sm:$0xf]  ;;  %v3618_v63 = vadd.f32 %v20674_v7, %v3529_v20  ;;  %4985 = vmatpush.bf16.msrb.mxu1 %v18606_v58  ;;  %v18499_v20 = vld [vmem:[%s25126_s0 + $0x460] sm:$0xf0]  ;;  %v18541_v58 = vld [vmem:[%s25128_s3 + $0x298] sm:$0xff] }
 0x3dc   :  { %v3625_v45 = vadd.f32 %v20740_v61, %v3536_v56 }
 0x3dd   :  { %14707 = vmatmul.msk.bf16.gmra.mxu1 %vm480_vm1, %v14560_v29  ;;  %14794 = vmatmul.msk.bf16.vlgmr.msra.gmra.mxu2 %vm945_vm2, %v3933_v53  ;;  %v3770_v33 = vmax.f32 %v3697_v34, 0.0  ;;  %v18501_v29 = vld [vmem:[%s25126_s0 + $0x470] sm:$0xf0]  ;;  %v18533_v34 = vld [vmem:[%s25128_s3 + $0x258] sm:$0xff] }
 0x3de   :  { %4023 = vmatpush.bf16.msra.mxu2 %v18529_v8  ;;  %3661 = vmatmul.bf16.gmra.mxu0 %v14592_v40  ;;  %v14584_v8 = vor.u32 %v18493_v31, %v14583_v23  ;;  %v14612_v53 = vor.u32 %v18501_v29, %v14611_v43  ;;  %v18500_v40 = vld [vmem:[%s25126_s0 + $0x46c] sm:$0xf] }
 0x3df   :  { %v3802_v21 = vpack.c.bf16 %v3770_v33, %v3770_v33  ;;  %3577 = vmatmul.bf16.gmra.mxu3 %v14600_v3  ;;  %v14616_v48 = vor.u32 %v18500_v40, %v14613_v6  ;;  %v14619_v40 = vld [vmem:[%s25126_s0 + $0x470] sm:$0xf]  ;;  %v18502_v6 = vld [vmem:[%s25126_s0 + $0x478] sm:$0xf0] }
 0x3e1   :  { %v3965_v50 = vunpack.c.l.b16 %v3802_v21  ;;  %v20758_v9 = vpop.f32.mrf.mxu3 }
 0x3e2   :  { %v3698_v11 = vpop.f32.mrf.mxu1  ;;  %4024 = vmatpush.bf16.msra.mxu2 %v18528_v35  ;;  %v20760_v10 = vpop.f32.mrf.mxu0 }
 0x3e3   :  { %v3699_v46 = vadd.f32 %v3698_v11, %v3610_v39  ;;  %v18532_v39 = vld [vmem:[%s25128_s3 + $0x250] sm:$0xff]  ;;  %v3620_v11 = vadd.f32 %v20700_v24, %v3531_v12  ;;  %v18496_v24 = vld [vmem:[%s25126_s0 + $0x448] sm:$0xf0] }
 0x3e4   :  { %v14596_v3 = vor.u32 %v18496_v24, %v14595_v28 }
 0x3e5   :  { %v3771_v52 = vmax.f32 %v3699_v46, 0.0 }
 0x3e7   :  { %v3803_v19 = vpack.c.bf16 %v3771_v52, %v3771_v52 }
 0x3e9   :  { %v3966_v49 = vunpack.c.l.b16 %v3803_v19  ;;  %v20783_v0 = vpop.f32.mrf.mxu3  ;;  %v3534_v19 = vadd.f32 %v20583_v37, %v20718_v36  ;;  %v18535_v36 = vld [vmem:[%s25128_s3 + $0x268] sm:$0xff] }
 0x3ea   :  { %v3701_v4 = vpop.f32.mrf.mxu1  ;;  %v20795_v35 = vpop.f32.mrf.mxu0 }
 0x3eb   :  { %v3967_v32 = vpack.c.b16 %v3966_v49, %v3965_v50  ;;  %v3702_v44 = vadd.f32 %v3701_v4, %v3613_v59  ;;  %v3623_v49 = vadd.f32 %v20720_v17, %v3534_v19  ;;  %v18534_v17 = vld [vmem:[%s25128_s3 + $0x260] sm:$0xff] }
 0x3ed   :  { %14708 = vmatmul.msk.bf16.gmra.mxu1 %vm480_vm1, %v14572_v55  ;;  %14803 = vmatmul.msk.bf16.vlgmr.msrb.gmra.mxu2 %vm945_vm2, %v3967_v32  ;;  %v3772_v1 = vmax.f32 %v3702_v44, 0.0 }
 0x3ee   :  { %4057 = vmatpush.bf16.msrb.mxu2 %v18531_v5  ;;  %3666 = vmatmul.bf16.gmra.mxu0 %v14604_v2 }
 0x3ef   :  { %v3804_v41 = vpack.c.bf16 %v3772_v1, %v3772_v1  ;;  %3582 = vmatmul.bf16.gmra.mxu3 %v14612_v53 }
 0x3f1   :  { %v3999_v30 = vunpack.c.l.b16 %v3804_v41  ;;  %v20804_v33 = vpop.f32.mrf.mxu3 }
 0x3f2   :  { %v3703_v16 = vpop.f32.mrf.mxu1  ;;  %4058 = vmatpush.bf16.msrb.mxu2 %v18530_v51  ;;  %v20813_v47 = vpop.f32.mrf.mxu0 }
 0x3f3   :  { %v3704_v18 = vadd.f32 %v3703_v16, %v3615_v13  ;;  %v18614_v13 = vld [vmem:[%s25125_s1 + $0x60] sm:$0xff]  ;;  %v3539_v16 = vadd.f32 %v20583_v37, %v20758_v9  ;;  %v18537_v9 = vld [vmem:[%s25128_s3 + $0x278] sm:$0xff] }
 0x3f4   :  { %5074 = vmatpush.bf16.msra.mxu3 %v18614_v13 }
 0x3f5   :  { %v3773_v22 = vmax.f32 %v3704_v18, 0.0  ;;  %v14607_v18 = vld [vmem:[%s25126_s0 + $0x458] sm:$0xf]  ;;  %v3628_v31 = vadd.f32 %v20760_v10, %v3539_v16  ;;  %v18536_v10 = vld [vmem:[%s25128_s3 + $0x270] sm:$0xff] }
 0x3f7   :  { %v3805_v25 = vpack.c.bf16 %v3773_v22, %v3773_v22 }
 0x3f9   :  { %v4000_v60 = vunpack.c.l.b16 %v3805_v25  ;;  %v3545_v5 = vpop.f32.mrf.mxu3 }
 0x3fa   :  { %v3706_v27 = vpop.f32.mrf.mxu1  ;;  %v3634_v51 = vpop.f32.mrf.mxu0  ;;  %v3546_v28 = vadd.f32 %v20583_v37, %v3545_v5 }
 0x3fb   :  { %v4001_v7 = vpack.c.b16 %v4000_v60, %v3999_v30  ;;  %v3707_v57 = vadd.f32 %v3706_v27, %v3618_v63  ;;  %v14608_v63 = vor.u32 %v18499_v20, %v14607_v18  ;;  %v3541_v30 = vadd.f32 %v20583_v37, %v20783_v0 }
 0x3fc   :  { %v3544_v0 = vadd.f32 %v20583_v37, %v20804_v33  ;;  %v18539_v33 = vld [vmem:[%s25128_s3 + $0x288] sm:$0xff] }
 0x3fd   :  { %14709 = vmatmul.msk.bf16.gmra.mxu1 %vm480_vm1, %v14584_v8  ;;  %14812 = vmatmul.msk.bf16.vlgmr.msra.gmra.mxu2 %vm945_vm2, %v4001_v7  ;;  %v3774_v46 = vmax.f32 %v3707_v57, 0.0  ;;  %v3630_v53 = vadd.f32 %v20795_v35, %v3541_v30 }
 0x3fe   :  { %4091 = vmatpush.bf16.msra.mxu2 %v18533_v34  ;;  %3671 = vmatmul.bf16.gmra.mxu0 %v14616_v48  ;;  %v3633_v48 = vadd.f32 %v20813_v47, %v3544_v0  ;;  %v18538_v47 = vld [vmem:[%s25128_s3 + $0x280] sm:$0xff] }
 0x3ff   :  { %v3806_v54 = vpack.c.bf16 %v3774_v46, %v3774_v46 }
 0x401   :  { %v4033_v50 = vunpack.c.l.b16 %v3806_v54  ;;  %v3548_v15 = vpop.f32.mrf.mxu3 }
 0x402   :  { %v3708_v21 = vpop.f32.mrf.mxu1  ;;  %4092 = vmatpush.bf16.msra.mxu2 %v18532_v39  ;;  %v3637_v22 = vpop.f32.mrf.mxu0 }
 0x403   :  { %v3709_v52 = vadd.f32 %v3708_v21, %v3620_v11 }
 0x405   :  { %v3775_v59 = vmax.f32 %v3709_v52, 0.0  ;;  %v14620_v52 = vor.u32 %v18502_v6, %v14619_v40  ;;  %v18612_v6 = vld [vmem:[%s25125_s1 + $0x50] sm:$0xff] }
 0x407   :  { %v3807_v62 = vpack.c.bf16 %v3775_v59, %v3775_v59 }
 0x409   :  { %v4034_v55 = vunpack.c.l.b16 %v3807_v62  ;;  %v3550_v8 = vpop.f32.mrf.mxu3  ;;  %v3635_v62 = vadd.f32 %v3634_v51, %v3546_v28 }
 0x40a   :  { %v3711_v4 = vpop.f32.mrf.mxu1  ;;  %v3639_v7 = vpop.f32.mrf.mxu0 }
 0x40b   :  { %v4035_v32 = vpack.c.b16 %v4034_v55, %v4033_v50  ;;  %v3712_v44 = vadd.f32 %v3711_v4, %v3623_v49  ;;  %v18613_v49 = vld [vmem:[%s25125_s1 + $0x58] sm:$0xff] }
 0x40c   :  { %v18605_v55 = vld [vmem:[%s25125_s1 + $0x18] sm:$0xff]  ;;  %5075 = vmatpush.bf16.msra.mxu3 %v18613_v49 }
 0x40d   :  { %14710 = vmatmul.msk.bf16.gmra.mxu1 %vm480_vm1, %v14596_v3  ;;  %14821 = vmatmul.msk.bf16.vlgmr.msrb.gmra.mxu2 %vm945_vm2, %v4035_v32  ;;  %v3776_v42 = vmax.f32 %v3712_v44, 0.0  ;;  %v3549_v32 = vadd.f32 %v20583_v37, %v3548_v15  ;;  %v18540_v15 = vld [vmem:[%s25128_s3 + $0x290] sm:$0xff] }
 0x40e   :  { %4125 = vmatpush.bf16.msrb.mxu2 %v18535_v36  ;;  %4986 = vmatpush.bf16.msrb.mxu1 %v18605_v55 }
 0x40f   :  { %v3808_v2 = vpack.c.bf16 %v3776_v42, %v3776_v42 }
 0x410   :  { %5076 = vmatpush.bf16.msra.mxu3 %v18612_v6 }
 0x411   :  { %v4067_v23 = vunpack.c.l.b16 %v3808_v2  ;;  %v3553_v35 = vpop.f32.mrf.mxu3  ;;  %v3551_v2 = vadd.f32 %v20583_v37, %v3550_v8  ;;  %v18543_v8 = vld [vmem:[%s25128_s3 + $0x2a8] sm:$0xff] }
 0x412   :  { %v3713_v1 = vpop.f32.mrf.mxu1  ;;  %4126 = vmatpush.bf16.msrb.mxu2 %v18534_v17  ;;  %v3642_v59 = vpop.f32.mrf.mxu0 }
 0x413   :  { %v3714_v14 = vadd.f32 %v3713_v1, %v3625_v45  ;;  %v3638_v45 = vadd.f32 %v3637_v22, %v3549_v32  ;;  %v3640_v18 = vadd.f32 %v3639_v7, %v3551_v2 }
 0x415   :  { %v3777_v61 = vmax.f32 %v3714_v14, 0.0 }
 0x417   :  { %v3809_v41 = vpack.c.bf16 %v3777_v61, %v3777_v61 }
 0x419   :  { %v4068_v25 = vunpack.c.l.b16 %v3809_v41  ;;  %v3555_v4 = vpop.f32.mrf.mxu3 }
 0x41a   :  { %v3716_v43 = vpop.f32.mrf.mxu1  ;;  %v3644_v44 = vpop.f32.mrf.mxu0 }
 0x41b   :  { %v4069_v29 = vpack.c.b16 %v4068_v25, %v4067_v23  ;;  %v3717_v60 = vadd.f32 %v3716_v43, %v3628_v31  ;;  %v3554_v31 = vadd.f32 %v20583_v37, %v3553_v35 }
 0x41d   :  { %14711 = vmatmul.msk.bf16.gmra.mxu1 %vm480_vm1, %v14608_v63  ;;  %14830 = vmatmul.msk.bf16.vlgmr.msra.gmra.mxu2 %vm945_vm2, %v4069_v29  ;;  %v3778_v27 = vmax.f32 %v3717_v60, 0.0  ;;  %v3643_v29 = vadd.f32 %v3642_v59, %v3554_v31 }
 0x41e   :  { %4159 = vmatpush.bf16.msra.mxu2 %v18537_v9 }
 0x41f   :  { %v3810_v57 = vpack.c.bf16 %v3778_v27, %v3778_v27  ;;  %v18622_v27 = vld [vmem:[%s25128_s3 + $0x308] sm:$0xff] }
 0x420   :  { %5404 = vmatpush.bf16.msrb.mxu0 %v18622_v27 }
 0x421   :  { %v4101_v46 = vunpack.c.l.b16 %v3810_v57  ;;  %v3558_v14 = vpop.f32.mrf.mxu3 }
 0x422   :  { %v3718_v34 = vpop.f32.mrf.mxu1  ;;  %4160 = vmatpush.bf16.msra.mxu2 %v18536_v10  ;;  %v3647_v61 = vpop.f32.mrf.mxu0 }
 0x423   :  { %v3719_v12 = vadd.f32 %v3718_v34, %v3630_v53  ;;  %v3556_v34 = vadd.f32 %v20583_v37, %v3555_v4 }
 0x425   :  { %v3779_v39 = vmax.f32 %v3719_v12, 0.0  ;;  %v18542_v12 = vld [vmem:[%s25128_s3 + $0x2a0] sm:$0xff] }
 0x427   :  { %v3811_v11 = vpack.c.bf16 %v3779_v39, %v3779_v39  ;;  %v3645_v39 = vadd.f32 %v3644_v44, %v3556_v34 }
 0x429   :  { %v4102_v21 = vunpack.c.l.b16 %v3811_v11  ;;  %v3560_v63 = vpop.f32.mrf.mxu3  ;;  %v18604_v11 = vld [vmem:[%s25125_s1 + $0x10] sm:$0xff] }
 0x42a   :  { %v3721_v54 = vpop.f32.mrf.mxu1  ;;  %v3649_v10 = vpop.f32.mrf.mxu0  ;;  %4987 = vmatpush.bf16.msrb.mxu1 %v18604_v11  ;;  %v3561_v55 = vadd.f32 %v20583_v37, %v3560_v63  ;;  %v18546_v63 = vld [vmem:[%s25128_s3 + $0x2c0] sm:$0xff] }
 0x42b   :  { %v4103_v19 = vpack.c.b16 %v4102_v21, %v4101_v46  ;;  %v3722_v24 = vadd.f32 %v3721_v54, %v3633_v48 }
 0x42c   :  { %v3650_v32 = vadd.f32 %v3649_v10, %v3561_v55  ;;  %v18603_v10 = vld [vmem:[%s25125_s1 + $0x8] sm:$0xff] }
 0x42d   :  { %14712 = vmatmul.msk.bf16.gmra.mxu1 %vm480_vm1, %v14620_v52  ;;  %14839 = vmatmul.msk.bf16.vlgmr.msrb.gmra.mxu2 %vm945_vm2, %v4103_v19  ;;  %v3780_v50 = vmax.f32 %v3722_v24, 0.0  ;;  %v3559_v52 = vadd.f32 %v20583_v37, %v3558_v14 }
 0x42e   :  { %4193 = vmatpush.bf16.msrb.mxu2 %v18539_v33  ;;  %4988 = vmatpush.bf16.msrb.mxu1 %v18603_v10 }
 0x42f   :  { %v3812_v5 = vpack.c.bf16 %v3780_v50, %v3780_v50  ;;  %v3648_v28 = vadd.f32 %v3647_v61, %v3559_v52  ;;  %v18545_v50 = vld [vmem:[%s25128_s3 + $0x2b8] sm:$0xff] }
 0x431   :  { %v4135_v51 = vunpack.c.l.b16 %v3812_v5  ;;  %v3563_v0 = vpop.f32.mrf.mxu3 }
 0x432   :  { %v3723_v3 = vpop.f32.mrf.mxu1  ;;  %4194 = vmatpush.bf16.msrb.mxu2 %v18538_v47  ;;  %v3652_v48 = vpop.f32.mrf.mxu0 }
 0x433   :  { %v3724_v36 = vadd.f32 %v3723_v3, %v3635_v62 }
 0x435   :  { %v3781_v56 = vmax.f32 %v3724_v36, 0.0  ;;  %v18544_v36 = vld [vmem:[%s25128_s3 + $0x2b0] sm:$0xff] }
 0x437   :  { %v3813_v17 = vpack.c.bf16 %v3781_v56, %v3781_v56 }
 0x439   :  { %v4136_v42 = vunpack.c.l.b16 %v3813_v17  ;;  %v3565_v62 = vpop.f32.mrf.mxu3 }
 0x43a   :  { %v3726_v13 = vpop.f32.mrf.mxu1  ;;  %v3654_v4 = vpop.f32.mrf.mxu0 }
 0x43b   :  { %v4137_v1 = vpack.c.b16 %v4136_v42, %v4135_v51  ;;  %v3727_v16 = vadd.f32 %v3726_v13, %v3638_v45  ;;  %v3564_v13 = vadd.f32 %v20583_v37, %v3563_v0 }
 0x43d   :  { %14848 = vmatmul.msk.bf16.vlgmr.msra.gmra.mxu2 %vm945_vm2, %v4137_v1  ;;  %v3782_v20 = vmax.f32 %v3727_v16, 0.0 }
 0x43e   :  { %4227 = vmatpush.bf16.msra.mxu2 %v18541_v58 }
 0x43f   :  { %v3814_v23 = vpack.c.bf16 %v3782_v20, %v3782_v20 }
 0x441   :  { %v4169_v9 = vunpack.c.l.b16 %v3814_v23  ;;  %v3568_v45 = vpop.f32.mrf.mxu3  ;;  %v3566_v23 = vadd.f32 %v20583_v37, %v3565_v62 }
 0x442   :  { %v3728_v41 = vpop.f32.mrf.mxu1  ;;  %4228 = vmatpush.bf16.msra.mxu2 %v18540_v15  ;;  %v3653_v15 = vadd.f32 %v3652_v48, %v3564_v13  ;;  %v18549_v48 = vld [vmem:[%s25128_s3 + $0x2d8] sm:$0xff] }
 0x443   :  { %v3729_v22 = vadd.f32 %v3728_v41, %v3640_v18  ;;  %v18547_v41 = vld [vmem:[%s25128_s3 + $0x2c8] sm:$0xff] }
 0x445   :  { %v3783_v25 = vmax.f32 %v3729_v22, 0.0 }
 0x447   :  { %v3815_v43 = vpack.c.bf16 %v3783_v25, %v3783_v25 }
 0x449   :  { %v4170_v30 = vunpack.c.l.b16 %v3815_v43  ;;  %v3570_v25 = vpop.f32.mrf.mxu3 }
 0x44a   :  { %v3731_v60 = vpop.f32.mrf.mxu1 }
 0x44b   :  { %v4171_v53 = vpack.c.b16 %v4170_v30, %v4169_v9  ;;  %v3732_v7 = vadd.f32 %v3731_v60, %v3643_v29  ;;  %v3657_v2 = vpop.f32.mrf.mxu0  ;;  %v3655_v9 = vadd.f32 %v3654_v4, %v3566_v23  ;;  %v18611_v60 = vld [vmem:[%s25125_s1 + $0x48] sm:$0xff] }
 0x44c   :  { %5077 = vmatpush.bf16.msra.mxu3 %v18611_v60 }
 0x44d   :  { %14857 = vmatmul.msk.bf16.vlgmr.msrb.gmra.mxu2 %vm945_vm2, %v4171_v53  ;;  %v3784_v40 = vmax.f32 %v3732_v7, 0.0  ;;  %v3569_v7 = vadd.f32 %v20583_v37, %v3568_v45 }
 0x44e   :  { %4261 = vmatpush.bf16.msrb.mxu2 %v18543_v8 }
 0x44f   :  { %v3816_v21 = vpack.c.bf16 %v3784_v40, %v3784_v40  ;;  %v3658_v6 = vadd.f32 %v3657_v2, %v3569_v7  ;;  %v18550_v2 = vld [vmem:[%s25128_s3 + $0x2e0] sm:$0xff]  ;;  %v18553_v7 = vld [vmem:[%s25128_s3 + $0x2f8] sm:$0xff] }
 0x450   :  { %v3924_v57 = vpop.f32.mrf.mxu2 }
 0x451   :  { %v4203_v59 = vunpack.c.l.b16 %v3816_v21 }
 0x452   :  { %v3733_v35 = vpop.f32.mrf.mxu1  ;;  %4262 = vmatpush.bf16.msrb.mxu2 %v18542_v12 }
 0x453   :  { %v3734_v46 = vadd.f32 %v3733_v35, %v3645_v39  ;;  %v3659_v53 = vpop.f32.mrf.mxu0  ;;  %v3573_v39 = vpop.f32.mrf.mxu3 }
 0x455   :  { %v3785_v54 = vmax.f32 %v3734_v46, 0.0 }
 0x457   :  { %v3817_v33 = vpack.c.bf16 %v3785_v54, %v3785_v54  ;;  %v3571_v54 = vadd.f32 %v20583_v37, %v3570_v25 }
 0x458   :  { %v3926_v19 = vpop.f32.mrf.mxu2 }
 0x459   :  { %v4204_v24 = vunpack.c.l.b16 %v3817_v33 }
 0x45a   :  { %v3736_v47 = vpop.f32.mrf.mxu1 }
 0x45b   :  { %v4205_v49 = vpack.c.b16 %v4204_v24, %v4203_v59  ;;  %v3737_v3 = vadd.f32 %v3736_v47, %v3648_v28  ;;  %v3662_v52 = vpop.f32.mrf.mxu0  ;;  %v3660_v28 = vadd.f32 %v3659_v53, %v3571_v54  ;;  %v14987_v54 = vld [vmem:[%s25126_s0 + $0x480] sm:$0xf] }
 0x45d   :  { %14866 = vmatmul.msk.bf16.vlgmr.msra.gmra.mxu2 %vm945_vm2, %v4205_v49  ;;  %v3786_v56 = vmax.f32 %v3737_v3, 0.0  ;;  %v3574_v3 = vadd.f32 %v20583_v37, %v3573_v39  ;;  %v18552_v39 = vld [vmem:[%s25128_s3 + $0x2f0] sm:$0xff] }
 0x45e   :  { %4295 = vmatpush.bf16.msra.mxu2 %v18545_v50  ;;  %v3575_v50 = vpop.f32.mrf.mxu3 }
 0x45f   :  { %v3818_v42 = vpack.c.bf16 %v3786_v56, %v3786_v56 }
 0x460   :  { %v3958_v5 = vpop.f32.mrf.mxu2 }
 0x461   :  { %v4439_v44 = vadd.f32 %v3958_v5, %v3924_v57  ;;  %v4237_v16 = vunpack.c.l.b16 %v3818_v42  ;;  %v18551_v42 = vld [vmem:[%s25128_s3 + $0x2e8] sm:$0xff] }
 0x462   :  { %v3738_v17 = vpop.f32.mrf.mxu1  ;;  %4296 = vmatpush.bf16.msra.mxu2 %v18544_v36 }
 0x463   :  { %v3739_v51 = vadd.f32 %v3738_v17, %v3650_v32  ;;  %v3664_v36 = vpop.f32.mrf.mxu0 }
 0x465   :  { %v3787_v58 = vmax.f32 %v3739_v51, 0.0 }
 0x467   :  { %v3819_v1 = vpack.c.bf16 %v3787_v58, %v3787_v58  ;;  %v3578_v58 = vpop.f32.mrf.mxu3 }
 0x468   :  { %v3960_v14 = vpop.f32.mrf.mxu2 }
 0x469   :  { %v4238_v61 = vunpack.c.l.b16 %v3819_v1  ;;  %v4454_v18 = vadd.f32 %v3960_v14, %v3926_v19  ;;  %v18548_v19 = vld [vmem:[%s25128_s3 + $0x2d0] sm:$0xff]  ;;  %v3576_v1 = vadd.f32 %v20583_v37, %v3575_v50 }
 0x46a   :  { %v3741_v20 = vpop.f32.mrf.mxu1 }
 0x46b   :  { %v4239_v22 = vpack.c.b16 %v4238_v61, %v4237_v16  ;;  %v3742_v31 = vadd.f32 %v3741_v20, %v3653_v15  ;;  %v3667_v16 = vpop.f32.mrf.mxu0  ;;  %v3665_v61 = vadd.f32 %v3664_v36, %v3576_v1 }
 0x46d   :  { %14875 = vmatmul.msk.bf16.vlgmr.msrb.gmra.mxu2 %vm945_vm2, %v4239_v22  ;;  %v3788_v29 = vmax.f32 %v3742_v31, 0.0  ;;  %v18602_v22 = vld [vmem:[%s25125_s1] sm:$0xff] }
 0x46e   :  { %4329 = vmatpush.bf16.msrb.mxu2 %v18547_v41  ;;  %v18610_v41 = vld [vmem:[%s25125_s1 + $0x40] sm:$0xff]  ;;  %4989 = vmatpush.bf16.msrb.mxu1 %v18602_v22 }
 0x46f   :  { %v3820_v34 = vpack.c.bf16 %v3788_v29, %v3788_v29  ;;  %5078 = vmatpush.bf16.msra.mxu3 %v18610_v41 }
 0x470   :  { %v3992_v43 = vpop.f32.mrf.mxu2 }
 0x471   :  { %v4440_v30 = vadd.f32 %v4439_v44, %v3992_v43  ;;  %v4271_v40 = vunpack.c.l.b16 %v3820_v34  ;;  %v3663_v44 = vadd.f32 %v3662_v52, %v3574_v3 }
 0x472   :  { %v3743_v8 = vpop.f32.mrf.mxu1  ;;  %4330 = vmatpush.bf16.msrb.mxu2 %v18546_v63  ;;  %v3579_v63 = vadd.f32 %v20583_v37, %v3578_v58 }
 0x473   :  { %v3744_v27 = vadd.f32 %v3743_v8, %v3655_v9  ;;  %v3580_v9 = vpop.f32.mrf.mxu3 }
 0x474   :  { %v3668_v10 = vadd.f32 %v3667_v16, %v3579_v63  ;;  %v18619_v16 = vld [vmem:[%s25125_s1 + $0x88] sm:$0xff]  ;;  %v18618_v63 = vld [vmem:[%s25125_s1 + $0x80] sm:$0xff] }
 0x475   :  { %v3789_v12 = vmax.f32 %v3744_v27, 0.0  ;;  %v3669_v27 = vpop.f32.mrf.mxu0 }
 0x477   :  { %v3821_v57 = vpack.c.bf16 %v3789_v12, %v3789_v12 }
 0x478   :  { %v3994_v0 = vpop.f32.mrf.mxu2 }
 0x479   :  { %v4272_v11 = vunpack.c.l.b16 %v3821_v57  ;;  %v4455_v35 = vadd.f32 %v4454_v18, %v3994_v0  ;;  %v3581_v57 = vadd.f32 %v20583_v37, %v3580_v9 }
 0x47a   :  { %v3746_v46 = vpop.f32.mrf.mxu1 }
 0x47b   :  { %v4273_v21 = vpack.c.b16 %v4272_v11, %v4271_v40  ;;  %v3747_v33 = vadd.f32 %v3746_v46, %v3658_v6  ;;  %v3583_v40 = vpop.f32.mrf.mxu3  ;;  %v18554_v11 = vld [vmem:[%s25126_s0 + $0x484] sm:$0xf]  ;;  %v3670_v46 = vadd.f32 %v3669_v27, %v3581_v57 }
 0x47d   :  { %14884 = vmatmul.msk.bf16.vlgmr.msra.gmra.mxu2 %vm945_vm2, %v4273_v21  ;;  %v3790_v24 = vmax.f32 %v3747_v33, 0.0  ;;  %v18555_v33 = vld [vmem:[%s25126_s0 + $0x488] sm:$0xf0] }
 0x47e   :  { %4363 = vmatpush.bf16.msra.mxu2 %v18549_v48 }
 0x47f   :  { %v3822_v55 = vpack.c.bf16 %v3790_v24, %v3790_v24  ;;  %v3672_v24 = vpop.f32.mrf.mxu0 }
 0x480   :  { %v4026_v59 = vpop.f32.mrf.mxu2 }
 0x481   :  { %v4441_v47 = vadd.f32 %v4440_v30, %v4026_v59  ;;  %v4305_v56 = vunpack.c.l.b16 %v3822_v55  ;;  %v14988_v59 = vor.u32 %v18555_v33, %v14987_v54  ;;  %v14995_v54 = vld [vmem:[%s25126_s0 + $0x488] sm:$0xf]  ;;  %v18556_v33 = vld [vmem:[%s25126_s0 + $0x490] sm:$0xf0] }
 0x482   :  { %v3748_v62 = vpop.f32.mrf.mxu1  ;;  %4364 = vmatpush.bf16.msra.mxu2 %v18548_v19 }
 0x483   :  { %v3749_v49 = vadd.f32 %v3748_v62, %v3660_v28  ;;  %v18620_v62 = vld [vmem:[%s25125_s1 + $0x90] sm:$0x30]  ;;  %4990 = vmatmul.bf16.vlgmr.msrb.gmra.mxu1 %v14988_v59 }
 0x485   :  { %v3791_v4 = vmax.f32 %v3749_v49, 0.0  ;;  %v3584_v49 = vadd.f32 %v20583_v37, %v3583_v40  ;;  %v18560_v40 = vld [vmem:[%s25126_s0 + $0x4b4] sm:$0xf] }
 0x487   :  { %v3823_v5 = vpack.c.bf16 %v3791_v4, %v3791_v4 }
 0x488   :  { %v4028_v32 = vpop.f32.mrf.mxu2 }
 0x489   :  { %v4306_v17 = vunpack.c.l.b16 %v3823_v5  ;;  %v4456_v51 = vadd.f32 %v4455_v35, %v4028_v32  ;;  %v14989_v35 = vld [vmem:[%s25126_s0 + $0x48c] sm:$0xf0]  ;;  %v3673_v32 = vadd.f32 %v3672_v24, %v3584_v49  ;;  %v15025_v49 = vld [vmem:[%s25126_s0 + $0x4d4] sm:$0xf0] }
 0x48a   :  { %v3751_v45 = vpop.f32.mrf.mxu1  ;;  %v14992_v52 = vor.u32 %v18554_v11, %v14989_v35  ;;  %v18715_v24 = vld [vmem:[%s25125_s1 + $0x70] sm:$0xff] }
 0x48b   :  { %v4307_v13 = vpack.c.b16 %v4306_v17, %v4305_v56  ;;  %v3752_v14 = vadd.f32 %v3751_v45, %v3663_v44  ;;  %v18716_v17 = vld [vmem:[%s25125_s1 + $0x78] sm:$0xff] }
 0x48c   :  { %5079 = vmatmul.bf16.vlgmr.msra.gmra.mxu3 %v14992_v52 }
 0x48d   :  { %14893 = vmatmul.msk.bf16.vlgmr.msrb.gmra.mxu2 %vm945_vm2, %v4307_v13  ;;  %v3792_v18 = vmax.f32 %v3752_v14, 0.0  ;;  %6554 = vmatpush.bf16.msrb.mxu3 %v18716_v17  ;;  %v18708_v14 = vld [vmem:[%s25125_s1 + $0x38] sm:$0xff] }
 0x48e   :  { %4397 = vmatpush.bf16.msrb.mxu2 %v18551_v42  ;;  %6465 = vmatpush.bf16.msra.mxu1 %v18708_v14  ;;  %v15035_v14 = vld [vmem:[%s25126_s0 + $0x4e0] sm:$0xf] }
 0x48f   :  { %v3824_v25 = vpack.c.bf16 %v3792_v18, %v3792_v18 }
 0x490   :  { %v4060_v15 = vpop.f32.mrf.mxu2 }
 0x491   :  { %v4442_v20 = vadd.f32 %v4441_v47, %v4060_v15  ;;  %v4339_v60 = vunpack.c.l.b16 %v3824_v25  ;;  %v15251_v47 = vld [vmem:[%s25125_s1 + $0x90] sm:$0xf]  ;;  %6555 = vmatpush.bf16.msrb.mxu3 %v18715_v24 }
 0x492   :  { %v3753_v23 = vpop.f32.mrf.mxu1  ;;  %4398 = vmatpush.bf16.msrb.mxu2 %v18550_v2  ;;  %v15252_v4 = vor.u32 %v18620_v62, %v15251_v47  ;;  %v3674_v2 = vpop.f32.mrf.mxu0  ;;  %v18707_v47 = vld [vmem:[%s25125_s1 + $0x30] sm:$0xff] }
 0x493   :  { %v3754_v31 = vadd.f32 %v3753_v23, %v3665_v61  ;;  %v18557_v61 = vld [vmem:[%s25126_s0 + $0x49c] sm:$0xf]  ;;  %v14999_v23 = vld [vmem:[%s25126_s0 + $0x498] sm:$0xf]  ;;  %6466 = vmatpush.bf16.msra.mxu1 %v18707_v47 }
 0x494   :  { %v4980_v13 = vsel %vm529_vm0, %v15252_v4, 0  ;;  %v15023_v4 = vld [vmem:[%s25126_s0 + $0x4c8] sm:$0xf] }
 0x495   :  { %v3793_v43 = vmax.f32 %v3754_v31, 0.0  ;;  %v18558_v31 = vld [vmem:[%s25126_s0 + $0x4a0] sm:$0xf0] }
 0x497   :  { %v3825_v29 = vpack.c.bf16 %v3793_v43, %v3793_v43  ;;  %v15000_v43 = vor.u32 %v18558_v31, %v14999_v23  ;;  %v18569_v31 = vld [vmem:[%s25126_s0 + $0x4fc] sm:$0xf] }
 0x498   :  { %v4062_v30 = vpop.f32.mrf.mxu2 }
 0x499   :  { %v4340_v8 = vunpack.c.l.b16 %v3825_v29  ;;  %v4457_v53 = vadd.f32 %v4456_v51, %v4062_v30  ;;  %v3585_v51 = vpop.f32.mrf.mxu3  ;;  %v15807_v29 = vld [vmem:[%s25125_s1 + $0x90] sm:$0xf]  ;;  %v18719_v30 = vld [vmem:[%s25125_s1 + $0x90] sm:$0x30]  ;;  %4995 = vmatmul.bf16.gmra.mxu1 %v15000_v43 }
 0x49a   :  { %v3756_v34 = vpop.f32.mrf.mxu1  ;;  %v3586_v58 = vadd.f32 %v20583_v37, %v3585_v51  ;;  %v15001_v37 = vld [vmem:[%s25126_s0 + $0x4a4] sm:$0xf0] }
 0x49b   :  { %v4341_v12 = vpack.c.b16 %v4340_v8, %v4339_v60  ;;  %v3757_v0 = vadd.f32 %v3756_v34, %v3668_v10  ;;  %v15004_v22 = vor.u32 %v18557_v61, %v15001_v37  ;;  %v18562_v61 = vld [vmem:[%s25126_s0 + $0x4c0] sm:$0xf0] }
 0x49c   :  { %v3675_v18 = vadd.f32 %v3674_v2, %v3586_v58  ;;  %v18567_v2 = vld [vmem:[%s25126_s0 + $0x4e8] sm:$0xf0] }
 0x49d   :  { %14902 = vmatmul.msk.bf16.vlgmr.msra.gmra.mxu2 %vm945_vm2, %v4341_v12  ;;  %v3794_v48 = vmax.f32 %v3757_v0, 0.0  ;;  %5084 = vmatmul.bf16.gmra.mxu3 %v15004_v22  ;;  %v18706_v22 = vld [vmem:[%s25125_s1 + $0x28] sm:$0xff] }
 0x49e   :  { %4431 = vmatpush.bf16.msra.mxu2 %v18553_v7  ;;  %6467 = vmatpush.bf16.msra.mxu1 %v18706_v22 }
 0x49f   :  { %v3826_v50 = vpack.c.bf16 %v3794_v48, %v3794_v48  ;;  %v15011_v48 = vld [vmem:[%s25126_s0 + $0x4b0] sm:$0xf] }
 0x4a0   :  { %v4094_v6 = vpop.f32.mrf.mxu2 }
 0x4a1   :  { %v4443_v21 = vadd.f32 %v4442_v20, %v4094_v6  ;;  %v4373_v5 = vunpack.c.l.b16 %v3826_v50  ;;  %v15013_v6 = vld [vmem:[%s25126_s0 + $0x4bc] sm:$0xf0]  ;;  %v18563_v50 = vld [vmem:[%s25126_s0 + $0x4cc] sm:$0xf] }
 0x4a2   :  { %v3758_v19 = vpop.f32.mrf.mxu1  ;;  %4432 = vmatpush.bf16.msra.mxu2 %v18552_v39  ;;  %v15016_v35 = vor.u32 %v18560_v40, %v15013_v6  ;;  %v15059_v40 = vld [vmem:[%s25126_s0 + $0x510] sm:$0xf]  ;;  %v18573_v6 = vld [vmem:[%s25126_s0 + $0x518] sm:$0xf0] }
 0x4a3   :  { %v3759_v28 = vadd.f32 %v3758_v19, %v3670_v46  ;;  %v18621_v46 = vld [vmem:[%s25128_s3 + $0x300] sm:$0xff] }
 0x4a4   :  { %5405 = vmatpush.bf16.msrb.mxu0 %v18621_v46  ;;  %v18568_v46 = vld [vmem:[%s25126_s0 + $0x4f0] sm:$0xf0] }
 0x4a5   :  { %v3795_v55 = vmax.f32 %v3759_v28, 0.0  ;;  %v14996_v28 = vor.u32 %v18556_v33, %v14995_v54  ;;  %v18713_v54 = vld [vmem:[%s25125_s1 + $0x60] sm:$0xff] }
 0x4a6   :  { %v18705_v33 = vld [vmem:[%s25125_s1 + $0x20] sm:$0xff] }
 0x4a7   :  { %v3827_v3 = vpack.c.bf16 %v3795_v55, %v3795_v55  ;;  %6468 = vmatpush.bf16.msra.mxu1 %v18705_v33  ;;  %v21243_v33 = vld [vmem:[%s25127_s2] ss:$0 sm:$0xff] }
 0x4a8   :  { %v4096_v36 = vpop.f32.mrf.mxu2 }
 0x4a9   :  { %v4374_v56 = vunpack.c.l.b16 %v3827_v3  ;;  %v4458_v44 = vadd.f32 %v4457_v53, %v4096_v36  ;;  %v15808_v53 = vor.u32 %v18719_v30, %v15807_v29  ;;  %v15028_v3 = vor.u32 %v18563_v50, %v15025_v49  ;;  %v18564_v36 = vld [vmem:[%s25126_s0 + $0x4d0] sm:$0xf0]  ;;  %v18570_v29 = vld [vmem:[%s25126_s0 + $0x500] sm:$0xf0] }
 0x4aa   :  { %v3761_v45 = vpop.f32.mrf.mxu1  ;;  %v18576_v50 = vld [vmem:[%s25126_s0 + $0x530] sm:$0xf0] }
 0x4ab   :  { %v4375_v42 = vpack.c.b16 %v4374_v56, %v4373_v5  ;;  %v3762_v1 = vadd.f32 %v3761_v45, %v3673_v32  ;;  %v6463_v0 = vsel %vm529_vm0, %v15808_v53, 0  ;;  %v15024_v5 = vor.u32 %v18564_v36, %v15023_v4  ;;  %v15007_v32 = vld [vmem:[%s25126_s0 + $0x4a0] sm:$0xf]  ;;  %v18559_v56 = vld [vmem:[%s25126_s0 + $0x4a8] sm:$0xf0] }
 0x4ac   :  { %v15008_v51 = vor.u32 %v18559_v56, %v15007_v32  ;;  %v18578_v56 = vld [vmem:[%s25126_s0 + $0x544] sm:$0xf] }
 0x4ad   :  { %14911 = vmatmul.msk.bf16.vlgmr.msrb.gmra.mxu2 %vm945_vm2, %v4375_v42  ;;  %v3796_v20 = vmax.f32 %v3762_v1, 0.0  ;;  %5089 = vmatmul.bf16.gmra.mxu3 %v15016_v35  ;;  %v18566_v42 = vld [vmem:[%s25126_s0 + $0x4e4] sm:$0xf]  ;;  %v15043_v35 = vld [vmem:[%s25126_s0 + $0x4e8] sm:$0xf] }
 0x4ae   :  { %5165 = vmatpush.bf16.msrb.mxu2 %v4980_v13  ;;  %v15037_v13 = vld [vmem:[%s25126_s0 + $0x4ec] sm:$0xf0] }
 0x4af   :  { %v3828_v60 = vpack.c.bf16 %v3796_v20, %v3796_v20  ;;  %v15040_v1 = vor.u32 %v18566_v42, %v15037_v13  ;;  %v15083_v42 = vld [vmem:[%s25126_s0 + $0x540] sm:$0xf]  ;;  %v18579_v13 = vld [vmem:[%s25126_s0 + $0x548] sm:$0xf0] }
 0x4b0   :  { %v4128_v15 = vpop.f32.mrf.mxu2 }
 0x4b1   :  { %v4444_v41 = vadd.f32 %v4443_v21, %v4128_v15  ;;  %v4407_v34 = vunpack.c.l.b16 %v3828_v60  ;;  %v18561_v21 = vld [vmem:[%s25126_s0 + $0x4b8] sm:$0xf0]  ;;  %v15019_v15 = vld [vmem:[%s25126_s0 + $0x4b8] sm:$0xf]  ;;  %v15031_v60 = vld [vmem:[%s25126_s0 + $0x4d0] sm:$0xf] }
 0x4b2   :  { %v3763_v25 = vpop.f32.mrf.mxu1  ;;  %5166 = vmatpush.bf16.msrb.mxu2 %v18619_v16  ;;  %v15012_v52 = vor.u32 %v18561_v21, %v15011_v48  ;;  %v15036_v16 = vor.u32 %v18567_v2, %v15035_v14  ;;  %v15020_v20 = vor.u32 %v18562_v61, %v15019_v15  ;;  %v18574_v14 = vld [vmem:[%s25126_s0 + $0x520] sm:$0xf0] }
 0x4b3   :  { %v3764_v9 = vadd.f32 %v3763_v25, %v3675_v18  ;;  %v15049_v25 = vld [vmem:[%s25126_s0 + $0x504] sm:$0xf0] }
 0x4b4   :  { %5000 = vmatmul.bf16.gmra.mxu1 %v15012_v52  ;;  %v15052_v43 = vor.u32 %v18569_v31, %v15049_v25  ;;  %v15044_v52 = vor.u32 %v18568_v46, %v15043_v35  ;;  %v15097_v31 = vld [vmem:[%s25126_s0 + $0x564] sm:$0xf0]  ;;  %v15107_v46 = vld [vmem:[%s25126_s0 + $0x570] sm:$0xf] }
 0x4b5   :  { %v3797_v10 = vmax.f32 %v3764_v9, 0.0  ;;  %v15047_v9 = vld [vmem:[%s25126_s0 + $0x4f8] sm:$0xf] }
 0x4b6   :  { %5167 = vmatpush.bf16.msrb.mxu2 %v18618_v63  ;;  %v15048_v30 = vor.u32 %v18570_v29, %v15047_v9  ;;  %v15095_v9 = vld [vmem:[%s25126_s0 + $0x558] sm:$0xf]  ;;  %v18582_v29 = vld [vmem:[%s25126_s0 + $0x560] sm:$0xf0] }
 0x4b7   :  { %v3829_v8 = vpack.c.bf16 %v3797_v10, %v3797_v10  ;;  %v18565_v10 = vld [vmem:[%s25126_s0 + $0x4d8] sm:$0xf0] }
 0x4b8   :  { %v4130_v27 = vpop.f32.mrf.mxu2 }
 0x4b9   :  { %v4408_v7 = vunpack.c.l.b16 %v3829_v8  ;;  %v4459_v12 = vadd.f32 %v4458_v44, %v4130_v27  ;;  %v15032_v27 = vor.u32 %v18565_v10, %v15031_v60  ;;  %v15079_v60 = vld [vmem:[%s25126_s0 + $0x530] sm:$0xf]  ;;  %v18577_v10 = vld [vmem:[%s25126_s0 + $0x538] sm:$0xf0] }
 0x4bb   :  { %v4409_v57 = vpack.c.b16 %v4408_v7, %v4407_v34  ;;  %v18572_v7 = vld [vmem:[%s25126_s0 + $0x514] sm:$0xf] }
 0x4bd   :  { %14920 = vmatmul.msk.bf16.vlgmr.msra.gmra.mxu2 %vm945_vm2, %v4409_v57  ;;  %5094 = vmatmul.bf16.gmra.mxu3 %v15028_v3  ;;  %v18571_v3 = vld [vmem:[%s25126_s0 + $0x508] sm:$0xf0] }
 0x4be   :  { %6648 = vmatpush.bf16.msra.mxu2 %v6463_v0 }
 0x4c0   :  { %v4162_v39 = vpop.f32.mrf.mxu2 }
 0x4c1   :  { %v4445_v11 = vadd.f32 %v4444_v41, %v4162_v39  ;;  %v18714_v41 = vld [vmem:[%s25125_s1 + $0x68] sm:$0xff] }
 0x4c2   :  { %6556 = vmatpush.bf16.msrb.mxu3 %v18714_v41  ;;  %v18718_v39 = vld [vmem:[%s25125_s1 + $0x88] sm:$0xff] }
 0x4c3   :  { %6649 = vmatpush.bf16.msra.mxu2 %v18718_v39  ;;  %v15109_v39 = vld [vmem:[%s25126_s0 + $0x57c] sm:$0xf0] }
 0x4c4   :  { %5005 = vmatmul.bf16.gmra.mxu1 %v15024_v5 }
 0x4c6   :  { %6557 = vmatpush.bf16.msrb.mxu3 %v18713_v54 }
 0x4c8   :  { %v4164_v19 = vpop.f32.mrf.mxu2 }
 0x4c9   :  { %v4460_v59 = vadd.f32 %v4459_v12, %v4164_v19  ;;  %v15061_v12 = vld [vmem:[%s25126_s0 + $0x51c] sm:$0xf0] }
 0x4ca   :  { %v15064_v0 = vor.u32 %v18572_v7, %v15061_v12 }
 0x4cd   :  { %15253 = vmatmul.msk.bf16.vlgmr.msrb.gmra.mxu2 %vm480_vm1, %v14996_v28  ;;  %5099 = vmatmul.bf16.gmra.mxu3 %v15040_v1  ;;  %v15073_v28 = vld [vmem:[%s25126_s0 + $0x534] sm:$0xf0] }
 0x4ce   :  { %v15067_v1 = vld [vmem:[%s25126_s0 + $0x518] sm:$0xf] }
 0x4cf   :  { %v15068_v61 = vor.u32 %v18574_v14, %v15067_v1  ;;  %v18583_v1 = vld [vmem:[%s25126_s0 + $0x568] sm:$0xf0] }
 0x4d0   :  { %v4196_v62 = vpop.f32.mrf.mxu2 }
 0x4d1   :  { %v4446_v55 = vadd.f32 %v4445_v11, %v4196_v62  ;;  %v15060_v11 = vor.u32 %v18573_v6, %v15059_v40  ;;  %v15071_v62 = vld [vmem:[%s25126_s0 + $0x528] sm:$0xf] }
 0x4d2   :  { %v15072_v49 = vor.u32 %v18576_v50, %v15071_v62 }
 0x4d4   :  { %5010 = vmatmul.bf16.gmra.mxu1 %v15036_v16 }
 0x4d8   :  { %v4198_v44 = vpop.f32.mrf.mxu2 }
 0x4d9   :  { %v4461_v17 = vadd.f32 %v4460_v59, %v4198_v44  ;;  %v18575_v59 = vld [vmem:[%s25126_s0 + $0x52c] sm:$0xf]  ;;  %v15085_v44 = vld [vmem:[%s25126_s0 + $0x54c] sm:$0xf0] }
 0x4da   :  { %v15076_v47 = vor.u32 %v18575_v59, %v15073_v28 }
 0x4dd   :  { %15254 = vmatmul.msk.bf16.gmra.mxu2 %vm480_vm1, %v15008_v51  ;;  %5104 = vmatmul.bf16.gmra.mxu3 %v15052_v43  ;;  %v15088_v51 = vor.u32 %v18578_v56, %v15085_v44 }
 0x4e0   :  { %v4230_v45 = vpop.f32.mrf.mxu2 }
 0x4e1   :  { %v4447_v58 = vadd.f32 %v4446_v55, %v4230_v45  ;;  %v15055_v55 = vld [vmem:[%s25126_s0 + $0x500] sm:$0xf] }
 0x4e2   :  { %v15056_v5 = vor.u32 %v18571_v3, %v15055_v55 }
 0x4e4   :  { %5015 = vmatmul.bf16.gmra.mxu1 %v15048_v30  ;;  %v15096_v30 = vor.u32 %v18582_v29, %v15095_v9 }
 0x4e8   :  { %v4232_v37 = vpop.f32.mrf.mxu2 }
 0x4e9   :  { %v4462_v18 = vadd.f32 %v4461_v17, %v4232_v37  ;;  %v18712_v37 = vld [vmem:[%s25125_s1 + $0x58] sm:$0xff] }
 0x4ea   :  { %6558 = vmatpush.bf16.msrb.mxu3 %v18712_v37 }
 0x4ed   :  { %15255 = vmatmul.msk.bf16.gmra.mxu2 %vm480_vm1, %v15020_v20  ;;  %5109 = vmatmul.bf16.gmra.mxu3 %v15064_v0  ;;  %v18704_v20 = vld [vmem:[%s25125_s1 + $0x18] sm:$0xff]  ;;  %v18584_v0 = vld [vmem:[%s25126_s0 + $0x574] sm:$0xf] }
 0x4ee   :  { %6469 = vmatpush.bf16.msra.mxu1 %v18704_v20  ;;  %v15112_v6 = vor.u32 %v18584_v0, %v15109_v39  ;;  %v15131_v39 = vld [vmem:[%s25126_s0 + $0x5a0] sm:$0xf] }
 0x4f0   :  { %v4264_v23 = vpop.f32.mrf.mxu2 }
 0x4f1   :  { %v4448_v63 = vadd.f32 %v4447_v58, %v4264_v23  ;;  %v15084_v58 = vor.u32 %v18579_v13, %v15083_v42  ;;  %v18581_v23 = vld [vmem:[%s25126_s0 + $0x55c] sm:$0xf]  ;;  %v18588_v42 = vld [vmem:[%s25126_s0 + $0x590] sm:$0xf0] }
 0x4f4   :  { %5020 = vmatmul.bf16.gmra.mxu1 %v15060_v11 }
 0x4f8   :  { %v4266_v8 = vpop.f32.mrf.mxu2 }
 0x4f9   :  { %v4463_v53 = vadd.f32 %v4462_v18, %v4266_v8 }
 0x4fd   :  { %15256 = vmatmul.msk.bf16.gmra.mxu2 %vm480_vm1, %v15032_v27  ;;  %5114 = vmatmul.bf16.gmra.mxu3 %v15076_v47 }
 0x500   :  { %v4298_v34 = vpop.f32.mrf.mxu2  ;;  %v4991_v45 = vpop.f32.mrf.mxu1 }
 0x501   :  { %v4449_v57 = vadd.f32 %v4448_v63, %v4298_v34  ;;  %v15100_v63 = vor.u32 %v18581_v23, %v15097_v31  ;;  %v15080_v34 = vor.u32 %v18577_v10, %v15079_v60  ;;  %v4992_v47 = vadd.f32 %v21243_v33, %v4991_v45  ;;  %v15119_v45 = vld [vmem:[%s25126_s0 + $0x588] sm:$0xf]  ;;  %v15133_v60 = vld [vmem:[%s25126_s0 + $0x5ac] sm:$0xf0] }
 0x502   :  { %v15120_v13 = vor.u32 %v18588_v42, %v15119_v45 }
 0x504   :  { %5025 = vmatmul.bf16.gmra.mxu1 %v15072_v49  ;;  %v18623_v49 = vld [vmem:[%s25128_s3 + $0x310] sm:$0xff] }
 0x508   :  { %v4300_v48 = vpop.f32.mrf.mxu2  ;;  %v4993_v18 = vpop.f32.mrf.mxu1 }
 0x509   :  { %v4464_v21 = vadd.f32 %v4463_v53, %v4300_v48  ;;  %v18585_v48 = vld [vmem:[%s25126_s0 + $0x578] sm:$0xf0]  ;;  %v4994_v44 = vadd.f32 %v21243_v33, %v4993_v18 }
 0x50d   :  { %15257 = vmatmul.msk.bf16.gmra.mxu2 %vm480_vm1, %v15044_v52  ;;  %5119 = vmatmul.bf16.gmra.mxu3 %v15088_v51  ;;  %v15091_v52 = vld [vmem:[%s25126_s0 + $0x548] sm:$0xf] }
 0x50f   :  { %v5080_v2 = vpop.f32.mrf.mxu3 }
 0x510   :  { %v4332_v19 = vpop.f32.mrf.mxu2  ;;  %v5081_v3 = vadd.f32 %v5080_v2, %v4992_v47 }
 0x511   :  { %v4450_v24 = vadd.f32 %v4449_v57, %v4332_v19  ;;  %v18624_v19 = vld [vmem:[%s25128_s3 + $0x318] sm:$0xff] }
 0x512   :  { %5438 = vmatpush.bf16.msra.mxu0 %v18624_v19 }
 0x514   :  { %5030 = vmatmul.bf16.gmra.mxu1 %v15084_v58  ;;  %v15103_v58 = vld [vmem:[%s25126_s0 + $0x560] sm:$0xf] }
 0x515   :  { %v15104_v37 = vor.u32 %v18583_v1, %v15103_v58  ;;  %v18627_v58 = vld [vmem:[%s25128_s3 + $0x330] sm:$0xff] }
 0x516   :  { %v21194_v43 = vpop.f32.mrf.mxu1  ;;  %5439 = vmatpush.bf16.msra.mxu0 %v18623_v49 }
 0x517   :  { %v21186_v41 = vpop.f32.mrf.mxu3  ;;  %v4997_v20 = vadd.f32 %v21243_v33, %v21194_v43  ;;  %v18590_v43 = vld [vmem:[%s25126_s0 + $0x5a4] sm:$0xf] }
 0x518   :  { %v4334_v4 = vpop.f32.mrf.mxu2  ;;  %v5083_v2 = vadd.f32 %v21186_v41, %v4994_v44 }
 0x519   :  { %v4465_v36 = vadd.f32 %v4464_v21, %v4334_v4  ;;  %v15108_v21 = vor.u32 %v18585_v48, %v15107_v46  ;;  %v18586_v46 = vld [vmem:[%s25126_s0 + $0x580] sm:$0xf0] }
 0x51d   :  { %15258 = vmatmul.msk.bf16.gmra.mxu2 %vm480_vm1, %v15056_v5  ;;  %5124 = vmatmul.bf16.gmra.mxu3 %v15100_v63  ;;  %v18711_v5 = vld [vmem:[%s25125_s1 + $0x50] sm:$0xff] }
 0x51e   :  { %v21210_v7 = vpop.f32.mrf.mxu1  ;;  %6559 = vmatpush.bf16.msrb.mxu3 %v18711_v5 }
 0x520   :  { %v4366_v32 = vpop.f32.mrf.mxu2  ;;  %v21208_v8 = vpop.f32.mrf.mxu3 }
 0x521   :  { %v4451_v17 = vadd.f32 %v4450_v24, %v4366_v32  ;;  %v18703_v32 = vld [vmem:[%s25125_s1 + $0x10] sm:$0xff]  ;;  %v5086_v41 = vadd.f32 %v21208_v8, %v4997_v20  ;;  %v15136_v8 = vor.u32 %v18590_v43, %v15133_v60 }
 0x522   :  { %6470 = vmatpush.bf16.msra.mxu1 %v18703_v32  ;;  %v18628_v32 = vld [vmem:[%s25128_s3 + $0x338] sm:$0xff] }
 0x524   :  { %5035 = vmatmul.bf16.gmra.mxu1 %v15096_v30  ;;  %v18626_v30 = vld [vmem:[%s25128_s3 + $0x328] sm:$0xff] }
 0x528   :  { %v4368_v16 = vpop.f32.mrf.mxu2  ;;  %v21213_v12 = vpop.f32.mrf.mxu3 }
 0x529   :  { %v4466_v15 = vadd.f32 %v4465_v36, %v4368_v16  ;;  %v18587_v36 = vld [vmem:[%s25126_s0 + $0x58c] sm:$0xf] }
 0x52d   :  { %15259 = vmatmul.msk.bf16.gmra.mxu2 %vm480_vm1, %v15068_v61  ;;  %5129 = vmatmul.bf16.gmra.mxu3 %v15112_v6  ;;  %v15115_v6 = vld [vmem:[%s25126_s0 + $0x578] sm:$0xf] }
 0x530   :  { %v4400_v22 = vpop.f32.mrf.mxu2  ;;  %v21238_v54 = vpop.f32.mrf.mxu3 }
 0x531   :  { %v4452_v25 = vadd.f32 %v4451_v17, %v4400_v22  ;;  %v21224_v35 = vpop.f32.mrf.mxu1 }
 0x534   :  { %5040 = vmatmul.bf16.gmra.mxu1 %v15108_v21 }
 0x538   :  { %v4402_v53 = vpop.f32.mrf.mxu2  ;;  %v21258_v55 = vpop.f32.mrf.mxu3 }
 0x539   :  { %v4467_v27 = vadd.f32 %v4466_v15, %v4402_v53  ;;  %v21252_v50 = vpop.f32.mrf.mxu1  ;;  %v18717_v53 = vld [vmem:[%s25125_s1 + $0x80] sm:$0xff] }
 0x53a   :  { %6650 = vmatpush.bf16.msra.mxu2 %v18717_v53  ;;  %v5004_v42 = vadd.f32 %v21243_v33, %v21252_v50  ;;  %v18594_v50 = vld [vmem:[%s25126_s0 + $0x5c0] sm:$0xf0] }
 0x53d   :  { %15260 = vmatmul.msk.bf16.gmra.mxu2 %vm480_vm1, %v15080_v34 }
 0x540   :  { %v4434_v57 = vpop.f32.mrf.mxu2  ;;  %v21287_v14 = vpop.f32.mrf.mxu3 }
 0x541   :  { %v4453_v40 = vadd.f32 %v4452_v25, %v4434_v57  ;;  %v21273_v51 = vpop.f32.mrf.mxu1  ;;  %v18625_v57 = vld [vmem:[%s25128_s3 + $0x320] sm:$0xff] }
 0x543   :  { %v21222_v11 = vadd.f32 %v4453_v40, %v20638_v38  ;;  %v18580_v38 = vld [vmem:[%s25126_s0 + $0x550] sm:$0xf0] }
 0x544   :  { %v15092_v24 = vor.u32 %v18580_v38, %v15091_v52  ;;  %5045 = vmatmul.bf16.gmra.mxu1 %v15120_v13 }
 0x548   :  { %v4436_v59 = vpop.f32.mrf.mxu2  ;;  %v21295_v25 = vpop.f32.mrf.mxu3 }
 0x549   :  { %v4468_v28 = vadd.f32 %v4467_v27, %v4436_v59  ;;  %v21292_v23 = vpop.f32.mrf.mxu1  ;;  %v4999_v27 = vadd.f32 %v21243_v33, %v21210_v7  ;;  %v18591_v7 = vld [vmem:[%s25126_s0 + $0x5a8] sm:$0xf0]  ;;  %v15116_v59 = vor.u32 %v18586_v46, %v15115_v6  ;;  %v15155_v46 = vld [vmem:[%s25126_s0 + $0x5d0] sm:$0xf] }
 0x54a   :  { %v15132_v40 = vor.u32 %v18591_v7, %v15131_v39  ;;  %v5009_v7 = vadd.f32 %v21243_v33, %v21292_v23 }
 0x54b   :  { %v21250_v62 = vadd.f32 %v4468_v28, %v20663_v26  ;;  %v15121_v26 = vld [vmem:[%s25126_s0 + $0x594] sm:$0xf0]  ;;  %v5088_v21 = vadd.f32 %v21213_v12, %v4999_v27  ;;  %v18630_v27 = vld [vmem:[%s25128_s3 + $0x348] sm:$0xff] }
 0x54c   :  { %v15124_v56 = vor.u32 %v18587_v36, %v15121_v26 }
 0x54d   :  { %15261 = vmatmul.msk.bf16.gmra.mxu2 %vm480_vm1, %v15092_v24  ;;  %v5002_v24 = vadd.f32 %v21243_v33, %v21224_v35  ;;  %v18593_v35 = vld [vmem:[%s25126_s0 + $0x5bc] sm:$0xf] }
 0x54e   :  { %5134 = vmatmul.bf16.gmra.mxu3 %v15124_v56  ;;  %v15145_v56 = vld [vmem:[%s25126_s0 + $0x5c4] sm:$0xf0] }
 0x54f   :  { %v5091_v12 = vadd.f32 %v21238_v54, %v5002_v24  ;;  %v18702_v54 = vld [vmem:[%s25125_s1 + $0x8] sm:$0xff]  ;;  %v15148_v45 = vor.u32 %v18593_v35, %v15145_v56 }
 0x550   :  { %v5169_v4 = vpop.f32.mrf.mxu2  ;;  %v21330_v48 = vpop.f32.mrf.mxu3  ;;  %6471 = vmatpush.bf16.msra.mxu1 %v18702_v54  ;;  %v18632_v54 = vld [vmem:[%s25128_s3 + $0x358] sm:$0xff] }
 0x551   :  { %v5170_v17 = vadd.f32 %v5169_v4, %v5081_v3  ;;  %v21316_v0 = vpop.f32.mrf.mxu1 }
 0x553   :  { %v5249_v16 = vmax.f32 %v5170_v17, 0.0  ;;  %v18710_v17 = vld [vmem:[%s25125_s1 + $0x48] sm:$0xff] }
 0x554   :  { %5050 = vmatmul.bf16.gmra.mxu1 %v15132_v40  ;;  %6560 = vmatpush.bf16.msrb.mxu3 %v18710_v17  ;;  %v18629_v40 = vld [vmem:[%s25128_s3 + $0x340] sm:$0xff] }
 0x555   :  { %v5281_v18 = vpack.c.bf16 %v5249_v16, %v5249_v16 }
 0x557   :  { %v5380_v63 = vunpack.c.l.b16 %v5281_v18  ;;  %v5093_v18 = vadd.f32 %v21258_v55, %v5004_v42 }
 0x558   :  { %v5171_v15 = vpop.f32.mrf.mxu2  ;;  %v21338_v4 = vpop.f32.mrf.mxu3 }
 0x559   :  { %v5172_v61 = vadd.f32 %v5171_v15, %v5083_v2  ;;  %v21335_v49 = vpop.f32.mrf.mxu1  ;;  %v15143_v2 = vld [vmem:[%s25126_s0 + $0x5b8] sm:$0xf]  ;;  %v15127_v15 = vld [vmem:[%s25126_s0 + $0x590] sm:$0xf] }
 0x55a   :  { %v15144_v16 = vor.u32 %v18594_v50, %v15143_v2  ;;  %v5014_v2 = vadd.f32 %v21243_v33, %v21335_v49  ;;  %v18600_v49 = vld [vmem:[%s25126_s0 + $0x5f0] sm:$0xf0] }
 0x55b   :  { %v5250_v22 = vmax.f32 %v5172_v61, 0.0  ;;  %v18589_v61 = vld [vmem:[%s25126_s0 + $0x598] sm:$0xf0] }
 0x55d   :  { %v5282_v31 = vpack.c.bf16 %v5250_v22, %v5250_v22  ;;  %15262 = vmatmul.msk.bf16.gmra.mxu2 %vm480_vm1, %v15104_v37 }
 0x55e   :  { %5139 = vmatmul.bf16.gmra.mxu3 %v15136_v8 }
 0x55f   :  { %v5381_v9 = vunpack.c.l.b16 %v5282_v31 }
 0x560   :  { %v5174_v29 = vpop.f32.mrf.mxu2  ;;  %v21376_v37 = vpop.f32.mrf.mxu3 }
 0x561   :  { %v5382_v10 = vpack.c.b16 %v5381_v9, %v5380_v63  ;;  %v5175_v34 = vadd.f32 %v5174_v29, %v5086_v41  ;;  %v21362_v1 = vpop.f32.mrf.mxu1  ;;  %v15128_v63 = vor.u32 %v18589_v61, %v15127_v15  ;;  %v5007_v9 = vadd.f32 %v21243_v33, %v21273_v51  ;;  %v18596_v51 = vld [vmem:[%s25126_s0 + $0x5d4] sm:$0xf]  ;;  %v15167_v61 = vld [vmem:[%s25126_s0 + $0x5e8] sm:$0xf] }
 0x563   :  { %15341 = vmatmul.msk.bf16.vlgmr.msrb.gmra.mxu0 %vm945_vm2, %v5382_v10  ;;  %v5251_v52 = vmax.f32 %v5175_v34, 0.0  ;;  %v5096_v55 = vadd.f32 %v21287_v14, %v5007_v9  ;;  %v15157_v34 = vld [vmem:[%s25126_s0 + $0x5dc] sm:$0xf0] }
 0x564   :  { %5472 = vmatpush.bf16.msrb.mxu0 %v18626_v30  ;;  %5055 = vmatmul.bf16.gmra.mxu1 %v15144_v16  ;;  %v15160_v39 = vor.u32 %v18596_v51, %v15157_v34  ;;  %v18631_v16 = vld [vmem:[%s25128_s3 + $0x350] sm:$0xff] }
 0x565   :  { %v5283_v28 = vpack.c.bf16 %v5251_v52, %v5251_v52  ;;  %v15139_v52 = vld [vmem:[%s25126_s0 + $0x5a8] sm:$0xf] }
 0x567   :  { %v5414_v36 = vunpack.c.l.b16 %v5283_v28 }
 0x568   :  { %v5176_v38 = vpop.f32.mrf.mxu2  ;;  %5473 = vmatpush.bf16.msrb.mxu0 %v18625_v57  ;;  %v21384_v60 = vpop.f32.mrf.mxu3 }
 0x569   :  { %v5177_v19 = vadd.f32 %v5176_v38, %v5088_v21  ;;  %v21381_v30 = vpop.f32.mrf.mxu1  ;;  %v18597_v21 = vld [vmem:[%s25126_s0 + $0x5d8] sm:$0xf0]  ;;  %v18592_v38 = vld [vmem:[%s25126_s0 + $0x5b0] sm:$0xf0] }
 0x56a   :  { %v15156_v23 = vor.u32 %v18597_v21, %v15155_v46  ;;  %v5019_v21 = vadd.f32 %v21243_v33, %v21381_v30 }
 0x56b   :  { %v5252_v47 = vmax.f32 %v5177_v19, 0.0 }
 0x56d   :  { %v5284_v3 = vpack.c.bf16 %v5252_v47, %v5252_v47  ;;  %15263 = vmatmul.msk.bf16.gmra.mxu2 %vm480_vm1, %v15116_v59  ;;  %v5098_v59 = vadd.f32 %v21295_v25, %v5009_v7  ;;  %v18634_v7 = vld [vmem:[%s25128_s3 + $0x368] sm:$0xff] }
 0x56e   :  { %5144 = vmatmul.bf16.gmra.mxu3 %v15148_v45  ;;  %v15169_v45 = vld [vmem:[%s25126_s0 + $0x5f4] sm:$0xf0] }
 0x56f   :  { %v5415_v26 = vunpack.c.l.b16 %v5284_v3  ;;  %v15140_v3 = vor.u32 %v18592_v38, %v15139_v52  ;;  %v15543_v38 = vld [vmem:[%s25126_s0 + $0x600] sm:$0xf] }
 0x570   :  { %v5179_v5 = vpop.f32.mrf.mxu2  ;;  %v21416_v19 = vpop.f32.mrf.mxu3 }
 0x571   :  { %v5416_v44 = vpack.c.b16 %v5415_v26, %v5414_v36  ;;  %v5180_v13 = vadd.f32 %v5179_v5, %v5091_v12  ;;  %v21402_v6 = vpop.f32.mrf.mxu1  ;;  %v5012_v12 = vadd.f32 %v21243_v33, %v21316_v0  ;;  %v18599_v0 = vld [vmem:[%s25126_s0 + $0x5ec] sm:$0xf] }
 0x573   :  { %15350 = vmatmul.msk.bf16.vlgmr.msra.gmra.mxu0 %vm945_vm2, %v5416_v44  ;;  %v5253_v20 = vmax.f32 %v5180_v13, 0.0  ;;  %v5101_v25 = vadd.f32 %v21330_v48, %v5012_v12  ;;  %v18709_v13 = vld [vmem:[%s25125_s1 + $0x40] sm:$0xff] }
 0x574   :  { %5506 = vmatpush.bf16.msra.mxu0 %v18628_v32  ;;  %5060 = vmatmul.bf16.gmra.mxu1 %v15156_v23  ;;  %v18701_v48 = vld [vmem:[%s25125_s1] sm:$0xff] }
 0x575   :  { %v5285_v41 = vpack.c.bf16 %v5253_v20, %v5253_v20  ;;  %6561 = vmatpush.bf16.msrb.mxu3 %v18709_v13  ;;  %6472 = vmatpush.bf16.msra.mxu1 %v18701_v48  ;;  %v15151_v20 = vld [vmem:[%s25126_s0 + $0x5c0] sm:$0xf]  ;;  %v18636_v48 = vld [vmem:[%s25128_s3 + $0x378] sm:$0xff] }
 0x576   :  { %v18633_v23 = vld [vmem:[%s25128_s3 + $0x360] sm:$0xff] }
 0x577   :  { %v5448_v10 = vunpack.c.l.b16 %v5285_v41 }
 0x578   :  { %v5181_v22 = vpop.f32.mrf.mxu2  ;;  %5507 = vmatpush.bf16.msra.mxu0 %v18627_v58  ;;  %v21424_v35 = vpop.f32.mrf.mxu3  ;;  %v15172_v58 = vor.u32 %v18599_v0, %v15169_v45 }
 0x579   :  { %v5182_v31 = vadd.f32 %v5181_v22, %v5093_v18  ;;  %v21421_v5 = vpop.f32.mrf.mxu1  ;;  %v15168_v18 = vor.u32 %v18600_v49, %v15167_v61  ;;  %v18595_v22 = vld [vmem:[%s25126_s0 + $0x5c8] sm:$0xf0] }
 0x57b   :  { %v5254_v29 = vmax.f32 %v5182_v31, 0.0 }
 0x57d   :  { %v5286_v43 = vpack.c.bf16 %v5254_v29, %v5254_v29  ;;  %15264 = vmatmul.msk.bf16.gmra.mxu2 %vm480_vm1, %v15128_v63  ;;  %v5103_v63 = vadd.f32 %v21338_v4, %v5014_v2 }
 0x57e   :  { %5149 = vmatmul.bf16.gmra.mxu3 %v15160_v39 }
 0x57f   :  { %v5449_v53 = vunpack.c.l.b16 %v5286_v43  ;;  %v15152_v43 = vor.u32 %v18595_v22, %v15151_v20  ;;  %v5024_v20 = vadd.f32 %v21243_v33, %v21421_v5  ;;  %v18657_v5 = vld [vmem:[%s25126_s0 + $0x620] sm:$0xf0] }
 0x580   :  { %v5184_v8 = vpop.f32.mrf.mxu2  ;;  %v21462_v31 = vpop.f32.mrf.mxu3 }
 0x581   :  { %v5450_v57 = vpack.c.b16 %v5449_v53, %v5448_v10  ;;  %v5185_v14 = vadd.f32 %v5184_v8, %v5096_v55  ;;  %v21448_v15 = vpop.f32.mrf.mxu1  ;;  %v5017_v55 = vadd.f32 %v21243_v33, %v21362_v1  ;;  %v18653_v1 = vld [vmem:[%s25126_s0 + $0x604] sm:$0xf] }
 0x583   :  { %15359 = vmatmul.msk.bf16.vlgmr.msrb.gmra.mxu0 %vm945_vm2, %v5450_v57  ;;  %v5255_v28 = vmax.f32 %v5185_v14, 0.0  ;;  %v5106_v4 = vadd.f32 %v21376_v37, %v5017_v55  ;;  %v15545_v14 = vld [vmem:[%s25126_s0 + $0x60c] sm:$0xf0]  ;;  %v18601_v55 = vld [vmem:[%s25126_s0 + $0x5f8] sm:$0xf0] }
 0x584   :  { %5540 = vmatpush.bf16.msrb.mxu0 %v18630_v27  ;;  %5065 = vmatmul.bf16.gmra.mxu1 %v15168_v18  ;;  %v15548_v46 = vor.u32 %v18653_v1, %v15545_v14  ;;  %v18807_v18 = vld [vmem:[%s25125_s1 + $0x38] sm:$0xff]  ;;  %v5027_v1 = vadd.f32 %v21243_v33, %v21448_v15  ;;  %v18659_v15 = vld [vmem:[%s25126_s0 + $0x634] sm:$0xf] }
 0x585   :  { %v5287_v36 = vpack.c.bf16 %v5255_v28, %v5255_v28  ;;  %v15163_v28 = vld [vmem:[%s25126_s0 + $0x5d8] sm:$0xf]  ;;  %7948 = vmatpush.bf16.msrb.mxu1 %v18807_v18 }
 0x586   :  { %v18640_v18 = vld [vmem:[%s25128_s3 + $0x398] sm:$0xff] }
 0x587   :  { %v5482_v56 = vunpack.c.l.b16 %v5287_v36 }
 0x588   :  { %v5186_v24 = vpop.f32.mrf.mxu2  ;;  %5541 = vmatpush.bf16.msrb.mxu0 %v18629_v40  ;;  %v21470_v51 = vpop.f32.mrf.mxu3 }
 0x589   :  { %v5187_v47 = vadd.f32 %v5186_v24, %v5098_v59  ;;  %v21467_v8 = vpop.f32.mrf.mxu1  ;;  %v18654_v59 = vld [vmem:[%s25126_s0 + $0x608] sm:$0xf0]  ;;  %v18598_v24 = vld [vmem:[%s25126_s0 + $0x5e0] sm:$0xf0] }
 0x58a   :  { %v15544_v30 = vor.u32 %v18654_v59, %v15543_v38  ;;  %v18638_v59 = vld [vmem:[%s25128_s3 + $0x388] sm:$0xff] }
 0x58b   :  { %v5256_v26 = vmax.f32 %v5187_v47, 0.0 }
 0x58d   :  { %v5288_v32 = vpack.c.bf16 %v5256_v26, %v5256_v26  ;;  %15265 = vmatmul.msk.bf16.gmra.mxu2 %vm480_vm1, %v15140_v3  ;;  %v5108_v3 = vadd.f32 %v21384_v60, %v5019_v21 }
 0x58e   :  { %5154 = vmatmul.bf16.gmra.mxu3 %v15172_v58  ;;  %v15557_v58 = vld [vmem:[%s25126_s0 + $0x624] sm:$0xf0] }
 0x58f   :  { %v5483_v44 = vunpack.c.l.b16 %v5288_v32  ;;  %v15164_v32 = vor.u32 %v18598_v24, %v15163_v28 }
 0x590   :  { %v5189_v17 = vpop.f32.mrf.mxu2  ;;  %v21502_v47 = vpop.f32.mrf.mxu3 }
 0x591   :  { %v5484_v42 = vpack.c.b16 %v5483_v44, %v5482_v56  ;;  %v5190_v50 = vadd.f32 %v5189_v17, %v5101_v25  ;;  %v21488_v52 = vpop.f32.mrf.mxu1  ;;  %v5022_v25 = vadd.f32 %v21243_v33, %v21402_v6  ;;  %v18656_v6 = vld [vmem:[%s25126_s0 + $0x61c] sm:$0xf] }
 0x592   :  { %v15560_v61 = vor.u32 %v18656_v6, %v15557_v58  ;;  %v5032_v6 = vadd.f32 %v21243_v33, %v21488_v52  ;;  %v18662_v52 = vld [vmem:[%s25126_s0 + $0x64c] sm:$0xf] }
 0x593   :  { %15368 = vmatmul.msk.bf16.vlgmr.msra.gmra.mxu0 %vm945_vm2, %v5484_v42  ;;  %v5257_v41 = vmax.f32 %v5190_v50, 0.0  ;;  %v5111_v60 = vadd.f32 %v21416_v19, %v5022_v25  ;;  %v18815_v50 = vld [vmem:[%s25125_s1 + $0x78] sm:$0xff]  ;;  %v16363_v19 = vld [vmem:[%s25125_s1 + $0x90] sm:$0xf]  ;;  %v18655_v25 = vld [vmem:[%s25126_s0 + $0x610] sm:$0xf0] }
 0x594   :  { %5574 = vmatpush.bf16.msra.mxu0 %v18632_v54  ;;  %6473 = vmatmul.bf16.vlgmr.msra.gmra.mxu1 %v15544_v30  ;;  %v15569_v30 = vld [vmem:[%s25126_s0 + $0x63c] sm:$0xf0] }
 0x595   :  { %v5289_v10 = vpack.c.bf16 %v5257_v41, %v5257_v41  ;;  %8037 = vmatpush.bf16.msra.mxu3 %v18815_v50  ;;  %v15572_v24 = vor.u32 %v18659_v15, %v15569_v30 }
 0x597   :  { %v5516_v34 = vunpack.c.l.b16 %v5289_v10  ;;  %v15175_v10 = vld [vmem:[%s25126_s0 + $0x5f0] sm:$0xf] }
 0x598   :  { %v5191_v9 = vpop.f32.mrf.mxu2  ;;  %5575 = vmatpush.bf16.msra.mxu0 %v18631_v16  ;;  %v21510_v0 = vpop.f32.mrf.mxu3  ;;  %v18818_v16 = vld [vmem:[%s25125_s1 + $0x90] sm:$0x30] }
 0x599   :  { %v5192_v29 = vadd.f32 %v5191_v9, %v5103_v63  ;;  %v21507_v17 = vpop.f32.mrf.mxu1  ;;  %v16364_v49 = vor.u32 %v18818_v16, %v16363_v19  ;;  %v18635_v63 = vld [vmem:[%s25128_s3 + $0x370] sm:$0xff] }
 0x59b   :  { %v5258_v53 = vmax.f32 %v5192_v29, 0.0  ;;  %v7946_v41 = vsel %vm529_vm0, %v16364_v49, 0  ;;  %v15555_v29 = vld [vmem:[%s25126_s0 + $0x618] sm:$0xf] }
 0x59c   :  { %8131 = vmatpush.bf16.msrb.mxu2 %v7946_v41 }
 0x59d   :  { %v5290_v27 = vpack.c.bf16 %v5258_v53, %v5258_v53  ;;  %15266 = vmatmul.msk.bf16.gmra.mxu2 %vm480_vm1, %v15152_v43  ;;  %v15556_v43 = vor.u32 %v18657_v5, %v15555_v29  ;;  %v5034_v29 = vadd.f32 %v21243_v33, %v21507_v17  ;;  %v18663_v17 = vld [vmem:[%s25126_s0 + $0x650] sm:$0xf0] }
 0x59e   :  { %6562 = vmatmul.bf16.vlgmr.msrb.gmra.mxu3 %v15548_v46 }
 0x59f   :  { %v5517_v57 = vunpack.c.l.b16 %v5290_v27  ;;  %v5113_v27 = vadd.f32 %v21424_v35, %v5024_v20  ;;  %v5116_v35 = vadd.f32 %v21462_v31, %v5027_v1  ;;  %v15581_v20 = vld [vmem:[%s25126_s0 + $0x654] sm:$0xf0] }
 0x5a0   :  { %v5194_v39 = vpop.f32.mrf.mxu2  ;;  %v21555_v53 = vpop.f32.mrf.mxu3  ;;  %v15584_v41 = vor.u32 %v18662_v52, %v15581_v20 }
 0x5a1   :  { %v5518_v40 = vpack.c.b16 %v5517_v57, %v5516_v34  ;;  %v5195_v37 = vadd.f32 %v5194_v39, %v5106_v4  ;;  %v21541_v9 = vpop.f32.mrf.mxu1  ;;  %v15176_v39 = vor.u32 %v18601_v55, %v15175_v10  ;;  %v15579_v55 = vld [vmem:[%s25126_s0 + $0x648] sm:$0xf] }
 0x5a3   :  { %15377 = vmatmul.msk.bf16.vlgmr.msrb.gmra.mxu0 %vm945_vm2, %v5518_v40  ;;  %v5259_v36 = vmax.f32 %v5195_v37, 0.0 }
 0x5a4   :  { %5608 = vmatpush.bf16.msrb.mxu0 %v18634_v7  ;;  %6478 = vmatmul.bf16.gmra.mxu1 %v15556_v43  ;;  %v18639_v43 = vld [vmem:[%s25128_s3 + $0x390] sm:$0xff] }
 0x5a5   :  { %v5291_v56 = vpack.c.bf16 %v5259_v36, %v5259_v36  ;;  %v18637_v36 = vld [vmem:[%s25128_s3 + $0x380] sm:$0xff] }
 0x5a7   :  { %v5550_v45 = vunpack.c.l.b16 %v5291_v56  ;;  %v15551_v56 = vld [vmem:[%s25126_s0 + $0x608] sm:$0xf] }
 0x5a8   :  { %v5196_v12 = vpop.f32.mrf.mxu2  ;;  %5609 = vmatpush.bf16.msrb.mxu0 %v18633_v23  ;;  %v21563_v21 = vpop.f32.mrf.mxu3 }
 0x5a9   :  { %v5197_v26 = vadd.f32 %v5196_v12, %v5108_v3  ;;  %v21560_v40 = vpop.f32.mrf.mxu1  ;;  %v5029_v3 = vadd.f32 %v21243_v33, %v21467_v8 }
 0x5ab   :  { %v5260_v44 = vmax.f32 %v5197_v26, 0.0  ;;  %v15567_v26 = vld [vmem:[%s25126_s0 + $0x630] sm:$0xf] }
 0x5ad   :  { %v5292_v54 = vpack.c.bf16 %v5260_v44, %v5260_v44  ;;  %15267 = vmatmul.msk.bf16.gmra.mxu2 %vm480_vm1, %v15164_v32  ;;  %v18660_v32 = vld [vmem:[%s25126_s0 + $0x638] sm:$0xf0] }
 0x5ae   :  { %6567 = vmatmul.bf16.gmra.mxu3 %v15560_v61  ;;  %v15568_v8 = vor.u32 %v18660_v32, %v15567_v26 }
 0x5af   :  { %v5551_v42 = vunpack.c.l.b16 %v5292_v54  ;;  %v5118_v54 = vadd.f32 %v21470_v51, %v5029_v3  ;;  %v5121_v51 = vadd.f32 %v21502_v47, %v5032_v6  ;;  %v18806_v47 = vld [vmem:[%s25125_s1 + $0x30] sm:$0xff] }
 0x5b0   :  { %v5199_v13 = vpop.f32.mrf.mxu2  ;;  %v21595_v44 = vpop.f32.mrf.mxu3  ;;  %7949 = vmatpush.bf16.msrb.mxu1 %v18806_v47 }
 0x5b1   :  { %v5552_v2 = vpack.c.b16 %v5551_v42, %v5550_v45  ;;  %v5200_v22 = vadd.f32 %v5199_v13, %v5111_v60  ;;  %v21581_v12 = vpop.f32.mrf.mxu1  ;;  %v15552_v13 = vor.u32 %v18655_v25, %v15551_v56  ;;  %v18641_v56 = vld [vmem:[%s25128_s3 + $0x3a0] sm:$0xff] }
 0x5b3   :  { %15386 = vmatmul.msk.bf16.vlgmr.msra.gmra.mxu0 %vm945_vm2, %v5552_v2  ;;  %v5261_v34 = vmax.f32 %v5200_v22, 0.0 }
 0x5b4   :  { %5642 = vmatpush.bf16.msra.mxu0 %v18636_v48  ;;  %6483 = vmatmul.bf16.gmra.mxu1 %v15568_v8 }
 0x5b5   :  { %v5293_v7 = vpack.c.bf16 %v5261_v34, %v5261_v34  ;;  %v15563_v34 = vld [vmem:[%s25126_s0 + $0x620] sm:$0xf] }
 0x5b7   :  { %v5584_v37 = vunpack.c.l.b16 %v5293_v7 }
 0x5b8   :  { %v5201_v4 = vpop.f32.mrf.mxu2  ;;  %5643 = vmatpush.bf16.msra.mxu0 %v18635_v63  ;;  %v21603_v19 = vpop.f32.mrf.mxu3  ;;  %v18814_v63 = vld [vmem:[%s25125_s1 + $0x70] sm:$0xff] }
 0x5b9   :  { %v5202_v57 = vadd.f32 %v5201_v4, %v5113_v27  ;;  %v21600_v2 = vpop.f32.mrf.mxu1  ;;  %8038 = vmatpush.bf16.msra.mxu3 %v18814_v63  ;;  %v15580_v27 = vor.u32 %v18663_v17, %v15579_v55  ;;  %v18658_v4 = vld [vmem:[%s25126_s0 + $0x628] sm:$0xf0] }
 0x5bb   :  { %v5262_v14 = vmax.f32 %v5202_v57, 0.0  ;;  %v5123_v57 = vadd.f32 %v21510_v0, %v5034_v29 }
 0x5bd   :  { %v5294_v46 = vpack.c.bf16 %v5262_v14, %v5262_v14  ;;  %15268 = vmatmul.msk.bf16.gmra.mxu2 %vm480_vm1, %v15176_v39 }
 0x5be   :  { %6572 = vmatmul.bf16.gmra.mxu3 %v15572_v24 }
 0x5bf   :  { %v5585_v23 = vunpack.c.l.b16 %v5294_v46  ;;  %v15564_v46 = vor.u32 %v18658_v4, %v15563_v34  ;;  %v5044_v4 = vadd.f32 %v21243_v33, %v21600_v2  ;;  %v18669_v2 = vld [vmem:[%s25126_s0 + $0x680] sm:$0xf0] }
 0x5c0   :  { %v5204_v38 = vpop.f32.mrf.mxu2 }
 0x5c1   :  { %v5586_v28 = vpack.c.b16 %v5585_v23, %v5584_v37  ;;  %v5205_v31 = vadd.f32 %v5204_v38, %v5116_v35  ;;  %v21627_v10 = vpop.f32.mrf.mxu1  ;;  %v5037_v35 = vadd.f32 %v21243_v33, %v21541_v9  ;;  %v18665_v9 = vld [vmem:[%s25126_s0 + $0x664] sm:$0xf] }
 0x5c3   :  { %15395 = vmatmul.msk.bf16.vlgmr.msrb.gmra.mxu0 %vm945_vm2, %v5586_v28  ;;  %v5263_v45 = vmax.f32 %v5205_v31, 0.0  ;;  %v5126_v0 = vadd.f32 %v21555_v53, %v5037_v35  ;;  %v18642_v31 = vld [vmem:[%s25128_s3 + $0x3a8] sm:$0xff]  ;;  %v5039_v53 = vadd.f32 %v21243_v33, %v21560_v40  ;;  %v18664_v35 = vld [vmem:[%s25126_s0 + $0x658] sm:$0xf0] }
 0x5c4   :  { %5676 = vmatpush.bf16.msrb.mxu0 %v18638_v59  ;;  %6488 = vmatmul.bf16.gmra.mxu1 %v15580_v27  ;;  %v18805_v27 = vld [vmem:[%s25125_s1 + $0x28] sm:$0xff] }
 0x5c5   :  { %v5295_v48 = vpack.c.bf16 %v5263_v45, %v5263_v45  ;;  %v18666_v45 = vld [vmem:[%s25126_s0 + $0x668] sm:$0xf0]  ;;  %7950 = vmatpush.bf16.msrb.mxu1 %v18805_v27 }
 0x5c7   :  { %v5618_v16 = vunpack.c.l.b16 %v5295_v48 }
 0x5c8   :  { %v5206_v60 = vpop.f32.mrf.mxu2  ;;  %5677 = vmatpush.bf16.msrb.mxu0 %v18637_v36  ;;  %v15593_v36 = vld [vmem:[%s25126_s0 + $0x66c] sm:$0xf0] }
 0x5c9   :  { %v5207_v42 = vadd.f32 %v5206_v60, %v5118_v54  ;;  %v21646_v38 = vpop.f32.mrf.mxu1  ;;  %v15596_v32 = vor.u32 %v18665_v9, %v15593_v36  ;;  %v15591_v54 = vld [vmem:[%s25126_s0 + $0x660] sm:$0xf]  ;;  %v15575_v60 = vld [vmem:[%s25126_s0 + $0x638] sm:$0xf]  ;;  %v5047_v36 = vadd.f32 %v21243_v33, %v21627_v10  ;;  %v18671_v10 = vld [vmem:[%s25126_s0 + $0x694] sm:$0xf] }
 0x5ca   :  { %v15592_v40 = vor.u32 %v18666_v45, %v15591_v54 }
 0x5cb   :  { %v5264_v58 = vmax.f32 %v5207_v42, 0.0  ;;  %v18661_v42 = vld [vmem:[%s25126_s0 + $0x640] sm:$0xf0] }
 0x5cd   :  { %v5296_v50 = vpack.c.bf16 %v5264_v58, %v5264_v58  ;;  %15809 = vmatmul.msk.bf16.vlgmr.msra.gmra.mxu2 %vm480_vm1, %v15552_v13  ;;  %v5128_v13 = vadd.f32 %v21563_v21, %v5039_v53 }
 0x5ce   :  { %6577 = vmatmul.bf16.gmra.mxu3 %v15584_v41 }
 0x5cf   :  { %v5619_v61 = vunpack.c.l.b16 %v5296_v50 }
 0x5d0   :  { %v5209_v49 = vpop.f32.mrf.mxu2 }
 0x5d1   :  { %v5620_v22 = vpack.c.b16 %v5619_v61, %v5618_v16  ;;  %v5210_v5 = vadd.f32 %v5209_v49, %v5121_v51  ;;  %v21642_v7 = vpop.f32.mrf.mxu3  ;;  %v21667_v25 = vpop.f32.mrf.mxu1  ;;  %v15576_v51 = vor.u32 %v18661_v42, %v15575_v60  ;;  %v5042_v49 = vadd.f32 %v21243_v33, %v21581_v12  ;;  %v18668_v12 = vld [vmem:[%s25126_s0 + $0x67c] sm:$0xf]  ;;  %v15617_v60 = vld [vmem:[%s25126_s0 + $0x69c] sm:$0xf0] }
 0x5d3   :  { %15404 = vmatmul.msk.bf16.vlgmr.msra.gmra.mxu0 %vm945_vm2, %v5620_v22  ;;  %v5265_v39 = vmax.f32 %v5210_v5, 0.0  ;;  %v5131_v22 = vadd.f32 %v21595_v44, %v5042_v49  ;;  %v18644_v5 = vld [vmem:[%s25128_s3 + $0x3b8] sm:$0xff]  ;;  %v18813_v44 = vld [vmem:[%s25125_s1 + $0x68] sm:$0xff] }
 0x5d4   :  { %5710 = vmatpush.bf16.msra.mxu0 %v18640_v18  ;;  %6493 = vmatmul.bf16.gmra.mxu1 %v15592_v40  ;;  %v18646_v40 = vld [vmem:[%s25128_s3 + $0x3c8] sm:$0xff]  ;;  %v18672_v49 = vld [vmem:[%s25126_s0 + $0x698] sm:$0xf0] }
 0x5d5   :  { %v5297_v37 = vpack.c.bf16 %v5265_v39, %v5265_v39  ;;  %8039 = vmatpush.bf16.msra.mxu3 %v18813_v44  ;;  %v18643_v39 = vld [vmem:[%s25128_s3 + $0x3b0] sm:$0xff]  ;;  %v5052_v44 = vadd.f32 %v21243_v33, %v21667_v25  ;;  %v18674_v25 = vld [vmem:[%s25126_s0 + $0x6ac] sm:$0xf] }
 0x5d7   :  { %v5652_v15 = vunpack.c.l.b16 %v5297_v37  ;;  %v15587_v37 = vld [vmem:[%s25126_s0 + $0x650] sm:$0xf] }
 0x5d8   :  { %v5211_v1 = vpop.f32.mrf.mxu2  ;;  %5711 = vmatpush.bf16.msra.mxu0 %v18639_v43  ;;  %v15605_v43 = vld [vmem:[%s25126_s0 + $0x684] sm:$0xf0] }
 0x5d9   :  { %v5212_v14 = vadd.f32 %v5211_v1, %v5123_v57  ;;  %v21650_v28 = vpop.f32.mrf.mxu3  ;;  %v21686_v52 = vpop.f32.mrf.mxu1  ;;  %v15608_v34 = vor.u32 %v18668_v12, %v15605_v43 }
 0x5db   :  { %v5266_v23 = vmax.f32 %v5212_v14, 0.0  ;;  %v15603_v14 = vld [vmem:[%s25126_s0 + $0x678] sm:$0xf] }
 0x5dd   :  { %v5298_v59 = vpack.c.bf16 %v5266_v23, %v5266_v23  ;;  %15810 = vmatmul.msk.bf16.gmra.mxu2 %vm480_vm1, %v15564_v46  ;;  %v15604_v46 = vor.u32 %v18669_v2, %v15603_v14  ;;  %v5133_v23 = vadd.f32 %v21603_v19, %v5044_v4 }
 0x5de   :  { %6582 = vmatmul.bf16.gmra.mxu3 %v15596_v32 }
 0x5df   :  { %v5653_v30 = vunpack.c.l.b16 %v5298_v59 }
 0x5e0   :  { %v5214_v24 = vpop.f32.mrf.mxu2  ;;  %v5407_v3 = vpop.f32.mrf.mxu0 }
 0x5e1   :  { %v5654_v26 = vpack.c.b16 %v5653_v30, %v5652_v15  ;;  %v5215_v8 = vadd.f32 %v5214_v24, %v5126_v0  ;;  %v21682_v6 = vpop.f32.mrf.mxu3  ;;  %v21713_v1 = vpop.f32.mrf.mxu1 }
 0x5e3   :  { %15413 = vmatmul.msk.bf16.vlgmr.msrb.gmra.mxu0 %vm945_vm2, %v5654_v26  ;;  %v5267_v48 = vmax.f32 %v5215_v8, 0.0  ;;  %v5136_v8 = vadd.f32 %v21642_v7, %v5047_v36  ;;  %v15620_v7 = vor.u32 %v18671_v10, %v15617_v60  ;;  %v15627_v36 = vld [vmem:[%s25126_s0 + $0x6a8] sm:$0xf] }
 0x5e4   :  { %5744 = vmatpush.bf16.msrb.mxu0 %v18642_v31  ;;  %6498 = vmatmul.bf16.gmra.mxu1 %v15604_v46  ;;  %v18648_v46 = vld [vmem:[%s25128_s3 + $0x3d8] sm:$0xff] }
 0x5e5   :  { %v5299_v61 = vpack.c.bf16 %v5267_v48, %v5267_v48 }
 0x5e7   :  { %v5686_v21 = vunpack.c.l.b16 %v5299_v61  ;;  %v15615_v61 = vld [vmem:[%s25126_s0 + $0x690] sm:$0xf] }
 0x5e8   :  { %v5216_v58 = vpop.f32.mrf.mxu2  ;;  %v5409_v50 = vpop.f32.mrf.mxu0  ;;  %5745 = vmatpush.bf16.msrb.mxu0 %v18641_v56 }
 0x5e9   :  { %v5217_v16 = vadd.f32 %v5216_v58, %v5128_v13  ;;  %v21690_v47 = vpop.f32.mrf.mxu3  ;;  %v21732_v32 = vpop.f32.mrf.mxu1  ;;  %v5049_v58 = vadd.f32 %v21243_v33, %v21646_v38  ;;  %v15616_v38 = vor.u32 %v18672_v49, %v15615_v61 }
 0x5eb   :  { %v5268_v18 = vmax.f32 %v5217_v16, 0.0  ;;  %v18645_v16 = vld [vmem:[%s25128_s3 + $0x3c0] sm:$0xff] }
 0x5ed   :  { %v5300_v20 = vpack.c.bf16 %v5268_v18, %v5268_v18  ;;  %15811 = vmatmul.msk.bf16.gmra.mxu2 %vm480_vm1, %v15576_v51  ;;  %v15599_v18 = vld [vmem:[%s25126_s0 + $0x668] sm:$0xf] }
 0x5ee   :  { %6587 = vmatmul.bf16.gmra.mxu3 %v15608_v34 }
 0x5ef   :  { %v5687_v63 = vunpack.c.l.b16 %v5300_v20  ;;  %v18667_v20 = vld [vmem:[%s25126_s0 + $0x670] sm:$0xf0] }
 0x5f0   :  { %v5219_v41 = vpop.f32.mrf.mxu2  ;;  %v5441_v29 = vpop.f32.mrf.mxu0  ;;  %v15600_v43 = vor.u32 %v18667_v20, %v15599_v18  ;;  %v18650_v20 = vld [vmem:[%s25128_s3 + $0x3e8] sm:$0xff] }
 0x5f1   :  { %v5688_v55 = vpack.c.b16 %v5687_v63, %v5686_v21  ;;  %v5922_v17 = vadd.f32 %v5441_v29, %v5407_v3  ;;  %v5220_v57 = vadd.f32 %v5219_v41, %v5131_v22  ;;  %v15588_v3 = vor.u32 %v18664_v35, %v15587_v37  ;;  %v21728_v31 = vpop.f32.mrf.mxu3  ;;  %v21753_v51 = vpop.f32.mrf.mxu1  ;;  %v18817_v63 = vld [vmem:[%s25125_s1 + $0x88] sm:$0xff]  ;;  %v15629_v37 = vld [vmem:[%s25126_s0 + $0x6b4] sm:$0xf0] }
 0x5f2   :  { %v5138_v21 = vadd.f32 %v21650_v28, %v5049_v58  ;;  %8132 = vmatpush.bf16.msrb.mxu2 %v18817_v63 }
 0x5f3   :  { %15422 = vmatmul.msk.bf16.vlgmr.msra.gmra.mxu0 %vm945_vm2, %v5688_v55  ;;  %v5269_v59 = vmax.f32 %v5220_v57, 0.0  ;;  %v5141_v57 = vadd.f32 %v21682_v6, %v5052_v44  ;;  %v18812_v6 = vld [vmem:[%s25125_s1 + $0x60] sm:$0xff]  ;;  %v18678_v44 = vld [vmem:[%s25126_s0 + $0x6c8] sm:$0xf0] }
 0x5f4   :  { %5778 = vmatpush.bf16.msra.mxu0 %v18644_v5  ;;  %6503 = vmatmul.bf16.gmra.mxu1 %v15616_v38 }
 0x5f5   :  { %v5301_v9 = vpack.c.bf16 %v5269_v59, %v5269_v59  ;;  %8040 = vmatpush.bf16.msra.mxu3 %v18812_v6 }
 0x5f7   :  { %v5720_v19 = vunpack.c.l.b16 %v5301_v9 }
 0x5f8   :  { %v5221_v15 = vpop.f32.mrf.mxu2  ;;  %v5443_v0 = vpop.f32.mrf.mxu0  ;;  %5779 = vmatpush.bf16.msra.mxu0 %v18643_v39 }
 0x5f9   :  { %v5222_v30 = vadd.f32 %v5221_v15, %v5133_v23  ;;  %v5937_v24 = vadd.f32 %v5443_v0, %v5409_v50  ;;  %v21745_v48 = vpop.f32.mrf.mxu3  ;;  %v21775_v27 = vpop.f32.mrf.mxu1  ;;  %v18804_v15 = vld [vmem:[%s25125_s1 + $0x20] sm:$0xff]  ;;  %v15632_v0 = vor.u32 %v18674_v25, %v15629_v37 }
 0x5fa   :  { %7951 = vmatpush.bf16.msrb.mxu1 %v18804_v15 }
 0x5fb   :  { %v5270_v26 = vmax.f32 %v5222_v30, 0.0  ;;  %v5054_v30 = vadd.f32 %v21243_v33, %v21686_v52  ;;  %v18675_v33 = vld [vmem:[%s25126_s0 + $0x6b0] sm:$0xf0] }
 0x5fc   :  { %v15628_v52 = vor.u32 %v18675_v33, %v15627_v36  ;;  %v18652_v33 = vld [vmem:[%s25128_s3 + $0x3f8] sm:$0xff] }
 0x5fd   :  { %v5302_v53 = vpack.c.bf16 %v5270_v26, %v5270_v26  ;;  %15812 = vmatmul.msk.bf16.gmra.mxu2 %vm480_vm1, %v15588_v3  ;;  %v18647_v3 = vld [vmem:[%s25128_s3 + $0x3d0] sm:$0xff]  ;;  %v15611_v26 = vld [vmem:[%s25126_s0 + $0x680] sm:$0xf] }
 0x5fe   :  { %6592 = vmatmul.bf16.gmra.mxu3 %v15620_v7 }
 0x5ff   :  { %v5721_v56 = vunpack.c.l.b16 %v5302_v53  ;;  %v18670_v53 = vld [vmem:[%s25126_s0 + $0x688] sm:$0xf0] }
 0x600   :  { %v5224_v54 = vpop.f32.mrf.mxu2  ;;  %v5475_v45 = vpop.f32.mrf.mxu0  ;;  %v15612_v10 = vor.u32 %v18670_v53, %v15611_v26 }
 0x601   :  { %v5722_v42 = vpack.c.b16 %v5721_v56, %v5720_v19  ;;  %v5923_v13 = vadd.f32 %v5922_v17, %v5475_v45  ;;  %v5225_v50 = vadd.f32 %v5224_v54, %v5136_v8  ;;  %v21771_v55 = vpop.f32.mrf.mxu3  ;;  %v21802_v9 = vpop.f32.mrf.mxu1  ;;  %v5143_v19 = vadd.f32 %v21690_v47, %v5054_v30 }
 0x603   :  { %15431 = vmatmul.msk.bf16.vlgmr.msrb.gmra.mxu0 %vm945_vm2, %v5722_v42  ;;  %v5271_v22 = vmax.f32 %v5225_v50, 0.0 }
 0x604   :  { %5812 = vmatpush.bf16.msrb.mxu0 %v18646_v40  ;;  %6508 = vmatmul.bf16.gmra.mxu1 %v15628_v52  ;;  %v15653_v52 = vld [vmem:[%s25126_s0 + $0x6e4] sm:$0xf0] }
 0x605   :  { %v5303_v17 = vpack.c.bf16 %v5271_v22, %v5271_v22 }
 0x607   :  { %v5754_v4 = vunpack.c.l.b16 %v5303_v17  ;;  %v15639_v17 = vld [vmem:[%s25126_s0 + $0x6c0] sm:$0xf] }
 0x608   :  { %v5226_v41 = vpop.f32.mrf.mxu2  ;;  %v5477_v29 = vpop.f32.mrf.mxu0  ;;  %5813 = vmatpush.bf16.msrb.mxu0 %v18645_v16 }
 0x609   :  { %v5227_v5 = vadd.f32 %v5226_v41, %v5138_v21  ;;  %v5938_v12 = vadd.f32 %v5937_v24, %v5477_v29  ;;  %v21791_v59 = vpop.f32.mrf.mxu3  ;;  %v21826_v58 = vpop.f32.mrf.mxu1  ;;  %v15641_v21 = vld [vmem:[%s25126_s0 + $0x6cc] sm:$0xf0] }
 0x60b   :  { %v5272_v28 = vmax.f32 %v5227_v5, 0.0 }
 0x60d   :  { %v5304_v34 = vpack.c.bf16 %v5272_v28, %v5272_v28  ;;  %15813 = vmatmul.msk.bf16.gmra.mxu2 %vm480_vm1, %v15600_v43  ;;  %v15623_v28 = vld [vmem:[%s25126_s0 + $0x698] sm:$0xf] }
 0x60e   :  { %6597 = vmatmul.bf16.gmra.mxu3 %v15632_v0 }
 0x60f   :  { %v5755_v39 = vunpack.c.l.b16 %v5304_v34  ;;  %v18673_v34 = vld [vmem:[%s25126_s0 + $0x6a0] sm:$0xf0] }
 0x610   :  { %v5229_v14 = vpop.f32.mrf.mxu2  ;;  %v5509_v2 = vpop.f32.mrf.mxu0  ;;  %v15624_v25 = vor.u32 %v18673_v34, %v15623_v28  ;;  %v18721_v28 = vld [vmem:[%s25128_s3 + $0x408] sm:$0xff]  ;;  %v15665_v34 = vld [vmem:[%s25126_s0 + $0x6fc] sm:$0xf0] }
 0x611   :  { %v5756_v35 = vpack.c.b16 %v5755_v39, %v5754_v4  ;;  %v5924_v23 = vadd.f32 %v5923_v13, %v5509_v2  ;;  %v5230_v24 = vadd.f32 %v5229_v14, %v5141_v57  ;;  %v21817_v60 = vpop.f32.mrf.mxu3  ;;  %v21822_v13 = vld [vmem:[%s25127_s2] ss:$0 sm:$0xff]  ;;  %v21847_v43 = vpop.f32.mrf.mxu1 }
 0x612   :  { %v5057_v7 = vadd.f32 %v21822_v13, %v21713_v1  ;;  %v18677_v1 = vld [vmem:[%s25126_s0 + $0x6c4] sm:$0xf]  ;;  %v5059_v29 = vadd.f32 %v21822_v13, %v21732_v32  ;;  %v15640_v32 = vor.u32 %v18678_v44, %v15639_v17 }
 0x613   :  { %15440 = vmatmul.msk.bf16.vlgmr.msra.gmra.mxu0 %vm945_vm2, %v5756_v35  ;;  %v5273_v8 = vmax.f32 %v5230_v24, 0.0 }
 0x614   :  { %5846 = vmatpush.bf16.msra.mxu0 %v18648_v46  ;;  %v5146_v61 = vadd.f32 %v21728_v31, %v5057_v7  ;;  %v15644_v31 = vor.u32 %v18677_v1, %v15641_v21  ;;  %v5148_v4 = vadd.f32 %v21745_v48, %v5059_v29  ;;  %6513 = vmatmul.bf16.gmra.mxu1 %v15640_v32 }
 0x615   :  { %v5305_v42 = vpack.c.bf16 %v5273_v8, %v5273_v8  ;;  %v18803_v8 = vld [vmem:[%s25125_s1 + $0x18] sm:$0xff] }
 0x616   :  { %7952 = vmatpush.bf16.msrb.mxu1 %v18803_v8 }
 0x617   :  { %v5788_v16 = vunpack.c.l.b16 %v5305_v42  ;;  %v15651_v42 = vld [vmem:[%s25126_s0 + $0x6d8] sm:$0xf] }
 0x618   :  { %v5231_v56 = vpop.f32.mrf.mxu2  ;;  %v5511_v54 = vpop.f32.mrf.mxu0  ;;  %5847 = vmatpush.bf16.msra.mxu0 %v18647_v3 }
 0x619   :  { %v5232_v45 = vadd.f32 %v5231_v56, %v5143_v19  ;;  %v5939_v40 = vadd.f32 %v5938_v12, %v5511_v54  ;;  %v21839_v41 = vpop.f32.mrf.mxu3  ;;  %v18649_v12 = vld [vmem:[%s25128_s3 + $0x3e0] sm:$0xff]  ;;  %v21866_v15 = vpop.f32.mrf.mxu1  ;;  %v5064_v54 = vadd.f32 %v21822_v13, %v21775_v27 }
 0x61a   :  { %v18681_v27 = vld [vmem:[%s25126_s0 + $0x6e0] sm:$0xf0] }
 0x61b   :  { %v5274_v47 = vmax.f32 %v5232_v45, 0.0  ;;  %v15652_v7 = vor.u32 %v18681_v27, %v15651_v42  ;;  %v18723_v27 = vld [vmem:[%s25128_s3 + $0x418] sm:$0xff] }
 0x61d   :  { %v5306_v50 = vpack.c.bf16 %v5274_v47, %v5274_v47  ;;  %15814 = vmatmul.msk.bf16.gmra.mxu2 %vm480_vm1, %v15612_v10  ;;  %v15635_v47 = vld [vmem:[%s25126_s0 + $0x6b0] sm:$0xf] }
 0x61e   :  { %6602 = vmatmul.bf16.gmra.mxu3 %v15644_v31 }
 0x61f   :  { %v5789_v49 = vunpack.c.l.b16 %v5306_v50  ;;  %v18676_v50 = vld [vmem:[%s25126_s0 + $0x6b8] sm:$0xf0] }
 0x620   :  { %v5234_v38 = vpop.f32.mrf.mxu2  ;;  %v5543_v18 = vpop.f32.mrf.mxu0  ;;  %v15636_v1 = vor.u32 %v18676_v50, %v15635_v47 }
 0x621   :  { %v5790_v22 = vpack.c.b16 %v5789_v49, %v5788_v16  ;;  %v5925_v63 = vadd.f32 %v5924_v23, %v5543_v18  ;;  %v5235_v5 = vadd.f32 %v5234_v38, %v5146_v61  ;;  %v21862_v37 = vpop.f32.mrf.mxu3  ;;  %v5062_v23 = vadd.f32 %v21822_v13, %v21753_v51  ;;  %v18680_v51 = vld [vmem:[%s25126_s0 + $0x6dc] sm:$0xf]  ;;  %v21893_v10 = vpop.f32.mrf.mxu1 }
 0x622   :  { %v15656_v56 = vor.u32 %v18680_v51, %v15653_v52  ;;  %v5153_v16 = vadd.f32 %v21791_v59, %v5064_v54 }
 0x623   :  { %15449 = vmatmul.msk.bf16.vlgmr.msrb.gmra.mxu0 %vm945_vm2, %v5790_v22  ;;  %v5275_v57 = vmax.f32 %v5235_v5, 0.0  ;;  %v5151_v30 = vadd.f32 %v21771_v55, %v5062_v23  ;;  %v18811_v55 = vld [vmem:[%s25125_s1 + $0x58] sm:$0xff] }
 0x624   :  { %5880 = vmatpush.bf16.msrb.mxu0 %v18650_v20  ;;  %8041 = vmatpush.bf16.msra.mxu3 %v18811_v55  ;;  %v18684_v23 = vld [vmem:[%s25126_s0 + $0x6f8] sm:$0xf0] }
 0x625   :  { %v5307_v35 = vpack.c.bf16 %v5275_v57, %v5275_v57  ;;  %6518 = vmatmul.bf16.gmra.mxu1 %v15652_v7  ;;  %v15677_v7 = vld [vmem:[%s25126_s0 + $0x714] sm:$0xf0] }
 0x627   :  { %v5822_v48 = vunpack.c.l.b16 %v5307_v35  ;;  %v15663_v35 = vld [vmem:[%s25126_s0 + $0x6f0] sm:$0xf] }
 0x628   :  { %v5236_v39 = vpop.f32.mrf.mxu2  ;;  %v5545_v14 = vpop.f32.mrf.mxu0  ;;  %5881 = vmatpush.bf16.msrb.mxu0 %v18649_v12 }
 0x629   :  { %v5237_v2 = vadd.f32 %v5236_v39, %v5148_v4  ;;  %v5940_v46 = vadd.f32 %v5939_v40, %v5545_v14  ;;  %v21882_v19 = vpop.f32.mrf.mxu3  ;;  %v18651_v40 = vld [vmem:[%s25128_s3 + $0x3f0] sm:$0xff]  ;;  %v21912_v29 = vpop.f32.mrf.mxu1  ;;  %v5069_v14 = vadd.f32 %v21822_v13, %v21826_v58  ;;  %v15647_v58 = vld [vmem:[%s25126_s0 + $0x6c8] sm:$0xf] }
 0x62b   :  { %v5276_v6 = vmax.f32 %v5237_v2, 0.0 }
 0x62d   :  { %v5308_v0 = vpack.c.bf16 %v5276_v6, %v5276_v6  ;;  %15815 = vmatmul.msk.bf16.gmra.mxu2 %vm480_vm1, %v15624_v25  ;;  %v18679_v6 = vld [vmem:[%s25126_s0 + $0x6d0] sm:$0xf0] }
 0x62e   :  { %6607 = vmatmul.bf16.gmra.mxu3 %v15656_v56  ;;  %v15648_v51 = vor.u32 %v18679_v6, %v15647_v58  ;;  %v18725_v58 = vld [vmem:[%s25128_s3 + $0x428] sm:$0xff]  ;;  %v15689_v6 = vld [vmem:[%s25126_s0 + $0x72c] sm:$0xf0] }
 0x62f   :  { %v5823_v24 = vunpack.c.l.b16 %v5308_v0  ;;  %v5158_v0 = vadd.f32 %v21839_v41, %v5069_v14 }
 0x630   :  { %v5239_v3 = vpop.f32.mrf.mxu2  ;;  %v5577_v36 = vpop.f32.mrf.mxu0 }
 0x631   :  { %v5824_v26 = vpack.c.b16 %v5823_v24, %v5822_v48  ;;  %v5926_v53 = vadd.f32 %v5925_v63, %v5577_v36  ;;  %v5240_v45 = vadd.f32 %v5239_v3, %v5151_v30  ;;  %v21908_v21 = vpop.f32.mrf.mxu3  ;;  %v5067_v63 = vadd.f32 %v21822_v13, %v21802_v9  ;;  %v18683_v9 = vld [vmem:[%s25126_s0 + $0x6f4] sm:$0xf]  ;;  %v21933_v25 = vpop.f32.mrf.mxu1  ;;  %v21951_v30 = vld [vmem:[%s25127_s2] ss:$0 sm:$0xff] }
 0x632   :  { %v15664_v13 = vor.u32 %v18684_v23, %v15663_v35 }
 0x633   :  { %15458 = vmatmul.msk.bf16.vlgmr.msra.gmra.mxu0 %vm945_vm2, %v5824_v26  ;;  %v5277_v61 = vmax.f32 %v5240_v45, 0.0  ;;  %v5156_v12 = vadd.f32 %v21817_v60, %v5067_v63  ;;  %v15668_v60 = vor.u32 %v18683_v9, %v15665_v34 }
 0x634   :  { %5914 = vmatpush.bf16.msra.mxu0 %v18652_v33 }
 0x635   :  { %v5309_v22 = vpack.c.bf16 %v5277_v61, %v5277_v61  ;;  %6523 = vmatmul.bf16.gmra.mxu1 %v15664_v13  ;;  %v18802_v61 = vld [vmem:[%s25125_s1 + $0x10] sm:$0xff] }
 0x636   :  { %7953 = vmatpush.bf16.msrb.mxu1 %v18802_v61 }
 0x637   :  { %v5856_v59 = vunpack.c.l.b16 %v5309_v22  ;;  %v15675_v22 = vld [vmem:[%s25126_s0 + $0x708] sm:$0xf] }
 0x638   :  { %v5241_v49 = vpop.f32.mrf.mxu2  ;;  %v5579_v38 = vpop.f32.mrf.mxu0  ;;  %5915 = vmatpush.bf16.msra.mxu0 %v18651_v40 }
 0x639   :  { %v5242_v18 = vadd.f32 %v5241_v49, %v5153_v16  ;;  %v5941_v20 = vadd.f32 %v5940_v46, %v5579_v38  ;;  %v21925_v39 = vpop.f32.mrf.mxu3  ;;  %v18720_v46 = vld [vmem:[%s25128_s3 + $0x400] sm:$0xff]  ;;  %v21957_v55 = vpop.f32.mrf.mxu1  ;;  %v6477_v38 = vadd.f32 %v21951_v30, %v21866_v15  ;;  %v18687_v15 = vld [vmem:[%s25126_s0 + $0x710] sm:$0xf0] }
 0x63a   :  { %v15676_v63 = vor.u32 %v18687_v15, %v15675_v22 }
 0x63b   :  { %v5278_v31 = vmax.f32 %v5242_v18, 0.0 }
 0x63d   :  { %v5310_v5 = vpack.c.bf16 %v5278_v31, %v5278_v31  ;;  %15816 = vmatmul.msk.bf16.gmra.mxu2 %vm480_vm1, %v15636_v1  ;;  %v15659_v31 = vld [vmem:[%s25126_s0 + $0x6e0] sm:$0xf] }
 0x63e   :  { %6612 = vmatmul.bf16.gmra.mxu3 %v15668_v60 }
 0x63f   :  { %v5857_v17 = vunpack.c.l.b16 %v5310_v5  ;;  %v18682_v5 = vld [vmem:[%s25126_s0 + $0x6e8] sm:$0xf0] }
 0x640   :  { %v5244_v44 = vpop.f32.mrf.mxu2  ;;  %v5611_v32 = vpop.f32.mrf.mxu0  ;;  %v15660_v9 = vor.u32 %v18682_v5, %v15659_v31  ;;  %v15701_v31 = vld [vmem:[%s25126_s0 + $0x744] sm:$0xf0] }
 0x641   :  { %v5858_v4 = vpack.c.b16 %v5857_v17, %v5856_v59  ;;  %v5927_v57 = vadd.f32 %v5926_v53, %v5611_v32  ;;  %v5245_v2 = vadd.f32 %v5244_v44, %v5156_v12  ;;  %v21953_v52 = vpop.f32.mrf.mxu3  ;;  %v6475_v53 = vadd.f32 %v21951_v30, %v21847_v43  ;;  %v18686_v43 = vld [vmem:[%s25126_s0 + $0x70c] sm:$0xf]  ;;  %v21984_v1 = vpop.f32.mrf.mxu1 }
 0x642   :  { %v15680_v49 = vor.u32 %v18686_v43, %v15677_v7  ;;  %v6566_v59 = vadd.f32 %v21882_v19, %v6477_v38 }
 0x643   :  { %15467 = vmatmul.msk.bf16.vlgmr.msrb.gmra.mxu0 %vm945_vm2, %v5858_v4  ;;  %v5279_v48 = vmax.f32 %v5245_v2, 0.0  ;;  %v6564_v54 = vadd.f32 %v21862_v37, %v6475_v53  ;;  %v18810_v37 = vld [vmem:[%s25125_s1 + $0x50] sm:$0xff]  ;;  %v15687_v53 = vld [vmem:[%s25126_s0 + $0x720] sm:$0xf] }
 0x644   :  { %6887 = vmatpush.bf16.msrb.mxu0 %v18721_v28  ;;  %8042 = vmatpush.bf16.msra.mxu3 %v18810_v37  ;;  %v6485_v37 = vadd.f32 %v21951_v30, %v21933_v25  ;;  %v18692_v25 = vld [vmem:[%s25126_s0 + $0x73c] sm:$0xf] }
 0x645   :  { %v5311_v26 = vpack.c.bf16 %v5279_v48, %v5279_v48  ;;  %6528 = vmatmul.bf16.gmra.mxu1 %v15676_v63  ;;  %v18727_v63 = vld [vmem:[%s25128_s3 + $0x438] sm:$0xff] }
 0x647   :  { %v5890_v56 = vunpack.c.l.b16 %v5311_v26 }
 0x648   :  { %v5246_v24 = vpop.f32.mrf.mxu2  ;;  %v5613_v3 = vpop.f32.mrf.mxu0  ;;  %6888 = vmatpush.bf16.msrb.mxu0 %v18720_v46 }
 0x649   :  { %v5247_v36 = vadd.f32 %v5246_v24, %v5158_v0  ;;  %v5942_v33 = vadd.f32 %v5941_v20, %v5613_v3  ;;  %v21973_v16 = vpop.f32.mrf.mxu3  ;;  %v18722_v20 = vld [vmem:[%s25128_s3 + $0x410] sm:$0xff]  ;;  %v22003_v14 = vpop.f32.mrf.mxu1 }
 0x64b   :  { %v5280_v41 = vmax.f32 %v5247_v36, 0.0  ;;  %v6482_v36 = vadd.f32 %v21951_v30, %v21912_v29 }
 0x64d   :  { %v5312_v8 = vpack.c.bf16 %v5280_v41, %v5280_v41  ;;  %15817 = vmatmul.msk.bf16.gmra.mxu2 %vm480_vm1, %v15648_v51  ;;  %v18724_v51 = vld [vmem:[%s25128_s3 + $0x420] sm:$0xff]  ;;  %v18690_v41 = vld [vmem:[%s25126_s0 + $0x728] sm:$0xf0] }
 0x64e   :  { %6617 = vmatmul.bf16.gmra.mxu3 %v15680_v49  ;;  %v15688_v29 = vor.u32 %v18690_v41, %v15687_v53 }
 0x64f   :  { %v5891_v45 = vunpack.c.l.b16 %v5312_v8  ;;  %v15671_v8 = vld [vmem:[%s25126_s0 + $0x6f8] sm:$0xf] }
 0x650   :  { %v5645_v40 = vpop.f32.mrf.mxu0  ;;  %v6652_v42 = vpop.f32.mrf.mxu2 }
 0x651   :  { %v5892_v47 = vpack.c.b16 %v5891_v45, %v5890_v56  ;;  %v5928_v50 = vadd.f32 %v5927_v57, %v5645_v40  ;;  %v6653_v18 = vadd.f32 %v6652_v42, %v6564_v54  ;;  %v21999_v34 = vpop.f32.mrf.mxu3  ;;  %v6480_v57 = vadd.f32 %v21951_v30, %v21893_v10  ;;  %v18689_v10 = vld [vmem:[%s25126_s0 + $0x724] sm:$0xf]  ;;  %v22027_v26 = vpop.f32.mrf.mxu1 }
 0x652   :  { %v15692_v3 = vor.u32 %v18689_v10, %v15689_v6  ;;  %v18685_v56 = vld [vmem:[%s25126_s0 + $0x700] sm:$0xf0]  ;;  %v6571_v54 = vadd.f32 %v21925_v39, %v6482_v36 }
 0x653   :  { %15476 = vmatmul.msk.bf16.vlgmr.msra.gmra.mxu0 %vm945_vm2, %v5892_v47  ;;  %v6732_v12 = vmax.f32 %v6653_v18, 0.0  ;;  %v6569_v46 = vadd.f32 %v21908_v21, %v6480_v57  ;;  %v18816_v21 = vld [vmem:[%s25125_s1 + $0x80] sm:$0xff]  ;;  %v15672_v7 = vor.u32 %v18685_v56, %v15671_v8  ;;  %v6574_v18 = vadd.f32 %v21953_v52, %v6485_v37  ;;  %v18809_v52 = vld [vmem:[%s25125_s1 + $0x48] sm:$0xff]  ;;  %v15699_v57 = vld [vmem:[%s25126_s0 + $0x738] sm:$0xf] }
 0x654   :  { %6921 = vmatpush.bf16.msra.mxu0 %v18723_v27  ;;  %8133 = vmatpush.bf16.msrb.mxu2 %v18816_v21  ;;  %v6490_v21 = vadd.f32 %v21951_v30, %v21984_v1  ;;  %v18729_v8 = vld [vmem:[%s25128_s3 + $0x448] sm:$0xff]  ;;  %v18695_v1 = vld [vmem:[%s25126_s0 + $0x754] sm:$0xf]  ;;  %v15713_v56 = vld [vmem:[%s25126_s0 + $0x75c] sm:$0xf0] }
 0x655   :  { %v6764_v4 = vpack.c.bf16 %v6732_v12, %v6732_v12  ;;  %6533 = vmatmul.bf16.gmra.mxu1 %v15688_v29  ;;  %8043 = vmatpush.bf16.msra.mxu3 %v18809_v52  ;;  %v18696_v37 = vld [vmem:[%s25126_s0 + $0x758] sm:$0xf0] }
 0x657   :  { %v6863_v19 = vunpack.c.l.b16 %v6764_v4 }
 0x658   :  { %v5647_v17 = vpop.f32.mrf.mxu0  ;;  %v6654_v44 = vpop.f32.mrf.mxu2  ;;  %6922 = vmatpush.bf16.msra.mxu0 %v18722_v20 }
 0x659   :  { %v5943_v32 = vadd.f32 %v5942_v33, %v5647_v17  ;;  %v6655_v28 = vadd.f32 %v6654_v44, %v6566_v59  ;;  %v22019_v24 = vpop.f32.mrf.mxu3  ;;  %v22046_v49 = vpop.f32.mrf.mxu1  ;;  %v18801_v17 = vld [vmem:[%s25125_s1 + $0x8] sm:$0xff]  ;;  %v15704_v44 = vor.u32 %v18692_v25, %v15701_v31 }
 0x65a   :  { %7954 = vmatpush.bf16.msrb.mxu1 %v18801_v17 }
 0x65b   :  { %v6733_v60 = vmax.f32 %v6655_v28, 0.0 }
 0x65d   :  { %v6765_v2 = vpack.c.bf16 %v6733_v60, %v6733_v60  ;;  %15818 = vmatmul.msk.bf16.gmra.mxu2 %vm480_vm1, %v15660_v9  ;;  %v18726_v9 = vld [vmem:[%s25128_s3 + $0x430] sm:$0xff] }
 0x65e   :  { %6622 = vmatmul.bf16.gmra.mxu3 %v15692_v3 }
 0x65f   :  { %v6864_v35 = vunpack.c.l.b16 %v6765_v2  ;;  %v15683_v2 = vld [vmem:[%s25126_s0 + $0x710] sm:$0xf] }
 0x660   :  { %v5679_v23 = vpop.f32.mrf.mxu0  ;;  %v6657_v13 = vpop.f32.mrf.mxu2 }
 0x661   :  { %v6865_v0 = vpack.c.b16 %v6864_v35, %v6863_v19  ;;  %v5929_v48 = vadd.f32 %v5928_v50, %v5679_v23  ;;  %v6658_v33 = vadd.f32 %v6657_v13, %v6569_v46  ;;  %v22042_v47 = vpop.f32.mrf.mxu3  ;;  %v22073_v4 = vpop.f32.mrf.mxu1  ;;  %v18688_v19 = vld [vmem:[%s25126_s0 + $0x718] sm:$0xf0] }
 0x662   :  { %v15684_v6 = vor.u32 %v18688_v19, %v15683_v2 }
 0x663   :  { %15897 = vmatmul.msk.bf16.vlgmr.msrb.gmra.mxu0 %vm945_vm2, %v6865_v0  ;;  %v6734_v45 = vmax.f32 %v6658_v33, 0.0 }
 0x664   :  { %6955 = vmatpush.bf16.msrb.mxu0 %v18725_v58 }
 0x665   :  { %v6766_v50 = vpack.c.bf16 %v6734_v45, %v6734_v45 }
 0x667   :  { %v6897_v39 = vunpack.c.l.b16 %v6766_v50  ;;  %v15711_v50 = vld [vmem:[%s25126_s0 + $0x750] sm:$0xf] }
 0x668   :  { %v5681_v40 = vpop.f32.mrf.mxu0  ;;  %v6659_v42 = vpop.f32.mrf.mxu2  ;;  %6956 = vmatpush.bf16.msrb.mxu0 %v18724_v51  ;;  %v6579_v51 = vadd.f32 %v21999_v34, %v6490_v21  ;;  %v15716_v34 = vor.u32 %v18695_v1, %v15713_v56 }
 0x669   :  { %v5944_v27 = vadd.f32 %v5943_v32, %v5681_v40  ;;  %v6660_v43 = vadd.f32 %v6659_v42, %v6571_v54  ;;  %v22062_v12 = vpop.f32.mrf.mxu3  ;;  %v6487_v32 = vadd.f32 %v21951_v30, %v21957_v55  ;;  %v18693_v55 = vld [vmem:[%s25126_s0 + $0x740] sm:$0xf0]  ;;  %v22092_v36 = vpop.f32.mrf.mxu1  ;;  %v6492_v42 = vadd.f32 %v21951_v30, %v22003_v14 }
 0x66a   :  { %v15700_v60 = vor.u32 %v18693_v55, %v15699_v57  ;;  %v15712_v14 = vor.u32 %v18696_v37, %v15711_v50  ;;  %v18731_v55 = vld [vmem:[%s25128_s3 + $0x458] sm:$0xff] }
 0x66b   :  { %v6735_v61 = vmax.f32 %v6660_v43, 0.0  ;;  %v6576_v46 = vadd.f32 %v21973_v16, %v6487_v32  ;;  %v18728_v43 = vld [vmem:[%s25128_s3 + $0x440] sm:$0xff] }
 0x66c   :  { %6538 = vmatmul.bf16.gmra.mxu1 %v15700_v60  ;;  %v15725_v60 = vld [vmem:[%s25126_s0 + $0x774] sm:$0xf0] }
 0x66d   :  { %v6767_v38 = vpack.c.bf16 %v6735_v61, %v6735_v61  ;;  %15819 = vmatmul.msk.bf16.gmra.mxu2 %vm480_vm1, %v15672_v7  ;;  %v15695_v61 = vld [vmem:[%s25126_s0 + $0x728] sm:$0xf] }
 0x66e   :  { %6627 = vmatmul.bf16.gmra.mxu3 %v15704_v44 }
 0x66f   :  { %v6898_v20 = vunpack.c.l.b16 %v6767_v38  ;;  %v18691_v38 = vld [vmem:[%s25126_s0 + $0x730] sm:$0xf0] }
 0x670   :  { %v5713_v22 = vpop.f32.mrf.mxu0  ;;  %v6662_v15 = vpop.f32.mrf.mxu2  ;;  %v15696_v25 = vor.u32 %v18691_v38, %v15695_v61  ;;  %v18733_v61 = vld [vmem:[%s25128_s3 + $0x468] sm:$0xff]  ;;  %v16101_v38 = vld [vmem:[%s25126_s0 + $0x78c] sm:$0xf0] }
 0x671   :  { %v6899_v5 = vpack.c.b16 %v6898_v20, %v6897_v39  ;;  %v5930_v59 = vadd.f32 %v5929_v48, %v5713_v22  ;;  %v6663_v28 = vadd.f32 %v6662_v15, %v6574_v18  ;;  %v22088_v0 = vpop.f32.mrf.mxu3  ;;  %v22113_v7 = vpop.f32.mrf.mxu1  ;;  %v6581_v39 = vadd.f32 %v22019_v24, %v6492_v42 }
 0x673   :  { %15906 = vmatmul.msk.bf16.vlgmr.msra.gmra.mxu0 %vm945_vm2, %v6899_v5  ;;  %v6736_v35 = vmax.f32 %v6663_v28, 0.0 }
 0x674   :  { %6989 = vmatpush.bf16.msra.mxu0 %v18727_v63 }
 0x675   :  { %v6768_v48 = vpack.c.bf16 %v6736_v35, %v6736_v35  ;;  %v18800_v35 = vld [vmem:[%s25125_s1] sm:$0xff] }
 0x676   :  { %7955 = vmatpush.bf16.msrb.mxu1 %v18800_v35 }
 0x677   :  { %v6931_v16 = vunpack.c.l.b16 %v6768_v48  ;;  %v15723_v48 = vld [vmem:[%s25126_s0 + $0x768] sm:$0xf] }
 0x678   :  { %v5715_v23 = vpop.f32.mrf.mxu0  ;;  %v6664_v13 = vpop.f32.mrf.mxu2  ;;  %6990 = vmatpush.bf16.msra.mxu0 %v18726_v9 }
 0x679   :  { %v5945_v58 = vadd.f32 %v5944_v27, %v5715_v23  ;;  %v6665_v10 = vadd.f32 %v6664_v13, %v6576_v46  ;;  %v22105_v40 = vpop.f32.mrf.mxu3  ;;  %v22132_v17 = vpop.f32.mrf.mxu1  ;;  %v6497_v13 = vadd.f32 %v21951_v30, %v22046_v49  ;;  %v18699_v49 = vld [vmem:[%s25126_s0 + $0x770] sm:$0xf0] }
 0x67a   :  { %v15724_v21 = vor.u32 %v18699_v49, %v15723_v48  ;;  %v18735_v49 = vld [vmem:[%s25128_s3 + $0x478] sm:$0xff] }
 0x67b   :  { %v6737_v3 = vmax.f32 %v6665_v10, 0.0  ;;  %v18730_v10 = vld [vmem:[%s25128_s3 + $0x450] sm:$0xff] }
 0x67c   :  { %6543 = vmatmul.bf16.gmra.mxu1 %v15712_v14 }
 0x67d   :  { %v6769_v33 = vpack.c.bf16 %v6737_v3, %v6737_v3  ;;  %15820 = vmatmul.msk.bf16.gmra.mxu2 %vm480_vm1, %v15684_v6  ;;  %v15707_v3 = vld [vmem:[%s25126_s0 + $0x740] sm:$0xf] }
 0x67e   :  { %6632 = vmatmul.bf16.gmra.mxu3 %v15716_v34 }
 0x67f   :  { %v6932_v53 = vunpack.c.l.b16 %v6769_v33  ;;  %v18694_v33 = vld [vmem:[%s25126_s0 + $0x748] sm:$0xf0] }
 0x680   :  { %v5747_v41 = vpop.f32.mrf.mxu0  ;;  %v6667_v29 = vpop.f32.mrf.mxu2  ;;  %v15708_v1 = vor.u32 %v18694_v33, %v15707_v3 }
 0x681   :  { %v6933_v54 = vpack.c.b16 %v6932_v53, %v6931_v16  ;;  %v5931_v45 = vadd.f32 %v5930_v59, %v5747_v41  ;;  %v6668_v27 = vadd.f32 %v6667_v29, %v6579_v51  ;;  %v22128_v31 = vpop.f32.mrf.mxu3  ;;  %v6495_v59 = vadd.f32 %v21951_v30, %v22027_v26  ;;  %v18698_v26 = vld [vmem:[%s25126_s0 + $0x76c] sm:$0xf]  ;;  %v22159_v6 = vpop.f32.mrf.mxu1 }
 0x682   :  { %v15728_v23 = vor.u32 %v18698_v26, %v15725_v60  ;;  %v6586_v16 = vadd.f32 %v22062_v12, %v6497_v13 }
 0x683   :  { %15915 = vmatmul.msk.bf16.vlgmr.msrb.gmra.mxu0 %vm945_vm2, %v6933_v54  ;;  %v6738_v18 = vmax.f32 %v6668_v27, 0.0  ;;  %v6584_v32 = vadd.f32 %v22042_v47, %v6495_v59  ;;  %v18808_v47 = vld [vmem:[%s25125_s1 + $0x40] sm:$0xff]  ;;  %v18753_v59 = vld [vmem:[%s25126_s0 + $0x788] sm:$0xf0] }
 0x684   :  { %7023 = vmatpush.bf16.msrb.mxu0 %v18729_v8  ;;  %8044 = vmatpush.bf16.msra.mxu3 %v18808_v47 }
 0x685   :  { %v6770_v5 = vpack.c.bf16 %v6738_v18, %v6738_v18 }
 0x687   :  { %v6965_v24 = vunpack.c.l.b16 %v6770_v5  ;;  %v16099_v5 = vld [vmem:[%s25126_s0 + $0x780] sm:$0xf] }
 0x688   :  { %v5749_v20 = vpop.f32.mrf.mxu0  ;;  %v6669_v22 = vpop.f32.mrf.mxu2  ;;  %7024 = vmatpush.bf16.msrb.mxu0 %v18728_v43 }
 0x689   :  { %v5946_v15 = vadd.f32 %v5945_v58, %v5749_v20  ;;  %v6670_v63 = vadd.f32 %v6669_v22, %v6581_v39  ;;  %v22148_v46 = vpop.f32.mrf.mxu3  ;;  %v22178_v42 = vpop.f32.mrf.mxu1  ;;  %v6502_v22 = vadd.f32 %v21951_v30, %v22092_v36  ;;  %v16100_v36 = vor.u32 %v18753_v59, %v16099_v5 }
 0x68b   :  { %v6739_v52 = vmax.f32 %v6670_v63, 0.0  ;;  %v18732_v63 = vld [vmem:[%s25128_s3 + $0x460] sm:$0xff] }
 0x68c   :  { %6548 = vmatmul.bf16.gmra.mxu1 %v15724_v21  ;;  %v16113_v21 = vld [vmem:[%s25126_s0 + $0x7a4] sm:$0xf0] }
 0x68d   :  { %v6771_v44 = vpack.c.bf16 %v6739_v52, %v6739_v52  ;;  %15821 = vmatmul.msk.bf16.gmra.mxu2 %vm480_vm1, %v15696_v25  ;;  %v15719_v52 = vld [vmem:[%s25126_s0 + $0x758] sm:$0xf] }
 0x68e   :  { %6637 = vmatmul.bf16.gmra.mxu3 %v15728_v23 }
 0x68f   :  { %v6966_v28 = vunpack.c.l.b16 %v6771_v44  ;;  %v18697_v44 = vld [vmem:[%s25126_s0 + $0x760] sm:$0xf0] }
 0x690   :  { %v5781_v9 = vpop.f32.mrf.mxu0  ;;  %v6672_v57 = vpop.f32.mrf.mxu2  ;;  %v15720_v26 = vor.u32 %v18697_v44, %v15719_v52 }
 0x691   :  { %v6967_v2 = vpack.c.b16 %v6966_v28, %v6965_v24  ;;  %v5932_v19 = vadd.f32 %v5931_v45, %v5781_v9  ;;  %v6673_v58 = vadd.f32 %v6672_v57, %v6584_v32  ;;  %v22174_v56 = vpop.f32.mrf.mxu3  ;;  %v6500_v45 = vadd.f32 %v21951_v30, %v22073_v4  ;;  %v18752_v4 = vld [vmem:[%s25126_s0 + $0x784] sm:$0xf]  ;;  %v22199_v25 = vpop.f32.mrf.mxu1 }
 0x692   :  { %v6591_v24 = vadd.f32 %v22105_v40, %v6502_v22 }
 0x693   :  { %15924 = vmatmul.msk.bf16.vlgmr.msra.gmra.mxu0 %vm945_vm2, %v6967_v2  ;;  %v6740_v51 = vmax.f32 %v6673_v58, 0.0  ;;  %v6589_v43 = vadd.f32 %v22088_v0, %v6500_v45  ;;  %v16104_v0 = vor.u32 %v18752_v4, %v16101_v38  ;;  %v18734_v45 = vld [vmem:[%s25128_s3 + $0x470] sm:$0xff] }
 0x694   :  { %7057 = vmatpush.bf16.msra.mxu0 %v18731_v55 }
 0x695   :  { %v6772_v54 = vpack.c.bf16 %v6740_v51, %v6740_v51  ;;  %v18917_v51 = vld [vmem:[%s25125_s1 + $0x90] sm:$0x30] }
 0x697   :  { %v6999_v12 = vunpack.c.l.b16 %v6772_v54 }
 0x698   :  { %v5783_v53 = vpop.f32.mrf.mxu0  ;;  %v6674_v41 = vpop.f32.mrf.mxu2  ;;  %7058 = vmatpush.bf16.msra.mxu0 %v18730_v10 }
 0x699   :  { %v5947_v29 = vadd.f32 %v5946_v15, %v5783_v53  ;;  %v6675_v8 = vadd.f32 %v6674_v41, %v6586_v16  ;;  %v22191_v20 = vpop.f32.mrf.mxu3  ;;  %v22218_v35 = vpop.f32.mrf.mxu1  ;;  %v16919_v16 = vld [vmem:[%s25125_s1 + $0x90] sm:$0xf] }
 0x69b   :  { %v6741_v34 = vmax.f32 %v6675_v8, 0.0  ;;  %v18906_v8 = vld [vmem:[%s25125_s1 + $0x38] sm:$0xff] }
 0x69c   :  { %7956 = vmatmul.bf16.vlgmr.msrb.gmra.mxu1 %v16100_v36 }
 0x69d   :  { %v6773_v27 = vpack.c.bf16 %v6741_v34, %v6741_v34  ;;  %15822 = vmatmul.msk.bf16.gmra.mxu2 %vm480_vm1, %v15708_v1  ;;  %v6507_v1 = vadd.f32 %v21951_v30, %v22132_v17  ;;  %9431 = vmatpush.bf16.msra.mxu1 %v18906_v8  ;;  %v18756_v17 = vld [vmem:[%s25126_s0 + $0x7a0] sm:$0xf0] }
 0x69e   :  { %8045 = vmatmul.bf16.vlgmr.msra.gmra.mxu3 %v16104_v0 }
 0x69f   :  { %v7000_v50 = vunpack.c.l.b16 %v6773_v27 }
 0x6a0   :  { %v5815_v37 = vpop.f32.mrf.mxu0  ;;  %v6677_v14 = vpop.f32.mrf.mxu2 }
 0x6a1   :  { %v7001_v39 = vpack.c.b16 %v7000_v50, %v6999_v12  ;;  %v5933_v18 = vadd.f32 %v5932_v19, %v5815_v37  ;;  %v6678_v15 = vadd.f32 %v6677_v14, %v6589_v43  ;;  %v22214_v60 = vpop.f32.mrf.mxu3  ;;  %v6505_v19 = vadd.f32 %v21951_v30, %v22113_v7  ;;  %v18755_v7 = vld [vmem:[%s25126_s0 + $0x79c] sm:$0xf]  ;;  %v16111_v12 = vld [vmem:[%s25126_s0 + $0x798] sm:$0xf]  ;;  %v15731_v50 = vld [vmem:[%s25126_s0 + $0x770] sm:$0xf] }
 0x6a2   :  { %v16116_v41 = vor.u32 %v18755_v7, %v16113_v21  ;;  %v22252_v27 = vpop.f32.mrf.mxu1  ;;  %v16112_v43 = vor.u32 %v18756_v17, %v16111_v12  ;;  %v18700_v37 = vld [vmem:[%s25126_s0 + $0x778] sm:$0xf0]  ;;  %v6596_v14 = vadd.f32 %v22148_v46, %v6507_v1 }
 0x6a3   :  { %15933 = vmatmul.msk.bf16.vlgmr.msrb.gmra.mxu0 %vm945_vm2, %v7001_v39  ;;  %v6742_v32 = vmax.f32 %v6678_v15, 0.0  ;;  %v6594_v13 = vadd.f32 %v22128_v31, %v6505_v19  ;;  %v18914_v31 = vld [vmem:[%s25125_s1 + $0x78] sm:$0xff]  ;;  %v15732_v0 = vor.u32 %v18700_v37, %v15731_v50 }
 0x6a4   :  { %7091 = vmatpush.bf16.msrb.mxu0 %v18733_v61  ;;  %9520 = vmatpush.bf16.msrb.mxu3 %v18914_v31  ;;  %v18739_v17 = vld [vmem:[%s25128_s3 + $0x498] sm:$0xff] }
 0x6a5   :  { %v6774_v2 = vpack.c.bf16 %v6742_v32, %v6742_v32 }
 0x6a7   :  { %v7033_v40 = vunpack.c.l.b16 %v6774_v2  ;;  %v6512_v2 = vadd.f32 %v21951_v30, %v22178_v42 }
 0x6a8   :  { %v5817_v28 = vpop.f32.mrf.mxu0  ;;  %v6679_v9 = vpop.f32.mrf.mxu2  ;;  %7092 = vmatpush.bf16.msrb.mxu0 %v18732_v63  ;;  %v6510_v63 = vadd.f32 %v21951_v30, %v22159_v6  ;;  %v18758_v6 = vld [vmem:[%s25126_s0 + $0x7b4] sm:$0xf] }
 0x6a9   :  { %v5948_v57 = vadd.f32 %v5947_v29, %v5817_v28  ;;  %v6680_v55 = vadd.f32 %v6679_v9, %v6591_v24  ;;  %v22240_v53 = vpop.f32.mrf.mxu3  ;;  %v16920_v29 = vor.u32 %v18917_v51, %v16919_v16  ;;  %v18737_v28 = vld [vmem:[%s25128_s3 + $0x488] sm:$0xff]  ;;  %v16125_v9 = vld [vmem:[%s25126_s0 + $0x7bc] sm:$0xf0] }
 0x6aa   :  { %v22271_v59 = vpop.f32.mrf.mxu1  ;;  %v6599_v52 = vadd.f32 %v22174_v56, %v6510_v63  ;;  %v16128_v56 = vor.u32 %v18758_v6, %v16125_v9  ;;  %v16135_v63 = vld [vmem:[%s25126_s0 + $0x7c8] sm:$0xf] }
 0x6ab   :  { %v6743_v47 = vmax.f32 %v6680_v55, 0.0  ;;  %v9429_v34 = vsel %vm529_vm0, %v16920_v29, 0 }
 0x6ac   :  { %9614 = vmatpush.bf16.msra.mxu2 %v9429_v34  ;;  %7961 = vmatmul.bf16.gmra.mxu1 %v16112_v43  ;;  %v16137_v43 = vld [vmem:[%s25126_s0 + $0x7d4] sm:$0xf0] }
 0x6ad   :  { %v6775_v23 = vpack.c.bf16 %v6743_v47, %v6743_v47  ;;  %15823 = vmatmul.msk.bf16.gmra.mxu2 %vm480_vm1, %v15720_v26  ;;  %v18736_v47 = vld [vmem:[%s25128_s3 + $0x480] sm:$0xff] }
 0x6ae   :  { %8050 = vmatmul.bf16.gmra.mxu3 %v16116_v41  ;;  %v6515_v41 = vadd.f32 %v21951_v30, %v22199_v25  ;;  %v18761_v25 = vld [vmem:[%s25126_s0 + $0x7cc] sm:$0xf] }
 0x6af   :  { %v7034_v58 = vunpack.c.l.b16 %v6775_v23 }
 0x6b0   :  { %v5849_v10 = vpop.f32.mrf.mxu0  ;;  %v6682_v48 = vpop.f32.mrf.mxu2 }
 0x6b1   :  { %v7035_v3 = vpack.c.b16 %v7034_v58, %v7033_v40  ;;  %v5934_v33 = vadd.f32 %v5933_v18, %v5849_v10  ;;  %v6683_v54 = vadd.f32 %v6682_v48, %v6594_v13  ;;  %v22267_v22 = vpop.f32.mrf.mxu3  ;;  %v16123_v40 = vld [vmem:[%s25126_s0 + $0x7b0] sm:$0xf]  ;;  %v18759_v13 = vld [vmem:[%s25126_s0 + $0x7b8] sm:$0xf0]  ;;  %v16107_v58 = vld [vmem:[%s25126_s0 + $0x788] sm:$0xf]  ;;  %v6601_v48 = vadd.f32 %v22191_v20, %v6512_v2 }
 0x6b2   :  { %v22292_v23 = vpop.f32.mrf.mxu1  ;;  %v16124_v42 = vor.u32 %v18759_v13, %v16123_v40  ;;  %v18754_v10 = vld [vmem:[%s25126_s0 + $0x790] sm:$0xf0] }
 0x6b3   :  { %15942 = vmatmul.msk.bf16.vlgmr.msra.gmra.mxu0 %vm945_vm2, %v7035_v3  ;;  %v6744_v61 = vmax.f32 %v6683_v54, 0.0  ;;  %v16108_v31 = vor.u32 %v18754_v10, %v16107_v58  ;;  %v6604_v54 = vadd.f32 %v22214_v60, %v6515_v41  ;;  %v18913_v60 = vld [vmem:[%s25125_s1 + $0x70] sm:$0xff]  ;;  %v18741_v10 = vld [vmem:[%s25128_s3 + $0x4a8] sm:$0xff]  ;;  %v16131_v41 = vld [vmem:[%s25126_s0 + $0x7b8] sm:$0xf] }
 0x6b4   :  { %7125 = vmatpush.bf16.msra.mxu0 %v18735_v49  ;;  %9521 = vmatpush.bf16.msrb.mxu3 %v18913_v60 }
 0x6b5   :  { %v6776_v15 = vpack.c.bf16 %v6744_v61, %v6744_v61  ;;  %v18905_v61 = vld [vmem:[%s25125_s1 + $0x30] sm:$0xff] }
 0x6b6   :  { %9432 = vmatpush.bf16.msra.mxu1 %v18905_v61 }
 0x6b7   :  { %v7067_v46 = vunpack.c.l.b16 %v6776_v15 }
 0x6b8   :  { %v5851_v4 = vpop.f32.mrf.mxu0  ;;  %v6684_v38 = vpop.f32.mrf.mxu2  ;;  %7126 = vmatpush.bf16.msra.mxu0 %v18734_v45 }
 0x6b9   :  { %v5949_v39 = vadd.f32 %v5948_v57, %v5851_v4  ;;  %v6685_v18 = vadd.f32 %v6684_v38, %v6596_v14  ;;  %v22284_v26 = vpop.f32.mrf.mxu3  ;;  %v16140_v4 = vor.u32 %v18761_v25, %v16137_v43  ;;  %v6517_v38 = vadd.f32 %v21951_v30, %v22218_v35 }
 0x6ba   :  { %v22311_v8 = vpop.f32.mrf.mxu1  ;;  %v6525_v43 = vadd.f32 %v21951_v30, %v22292_v23  ;;  %v18767_v23 = vld [vmem:[%s25126_s0 + $0x7fc] sm:$0xf] }
 0x6bb   :  { %v6745_v5 = vmax.f32 %v6685_v18, 0.0 }
 0x6bc   :  { %7966 = vmatmul.bf16.gmra.mxu1 %v16124_v42 }
 0x6bd   :  { %v6777_v36 = vpack.c.bf16 %v6745_v5, %v6745_v5  ;;  %15824 = vmatmul.msk.bf16.gmra.mxu2 %vm480_vm1, %v15732_v0  ;;  %v18738_v0 = vld [vmem:[%s25128_s3 + $0x490] sm:$0xff]  ;;  %v16119_v5 = vld [vmem:[%s25126_s0 + $0x7a0] sm:$0xf] }
 0x6be   :  { %8055 = vmatmul.bf16.gmra.mxu3 %v16128_v56 }
 0x6bf   :  { %v7068_v44 = vunpack.c.l.b16 %v6777_v36  ;;  %v18757_v36 = vld [vmem:[%s25126_s0 + $0x7a8] sm:$0xf0] }
 0x6c0   :  { %v5883_v24 = vpop.f32.mrf.mxu0  ;;  %v6687_v32 = vpop.f32.mrf.mxu2  ;;  %v16120_v6 = vor.u32 %v18757_v36, %v16119_v5  ;;  %v18904_v36 = vld [vmem:[%s25125_s1 + $0x28] sm:$0xff] }
 0x6c1   :  { %v7069_v57 = vpack.c.b16 %v7068_v44, %v7067_v46  ;;  %v5935_v55 = vadd.f32 %v5934_v33, %v5883_v24  ;;  %v6688_v19 = vadd.f32 %v6687_v32, %v6599_v52  ;;  %v22307_v16 = vpop.f32.mrf.mxu3  ;;  %v6606_v46 = vadd.f32 %v22240_v53, %v6517_v38  ;;  %9433 = vmatpush.bf16.msra.mxu1 %v18904_v36 }
 0x6c2   :  { %v22341_v15 = vpop.f32.mrf.mxu1  ;;  %v6614_v61 = vadd.f32 %v22307_v16, %v6525_v43  ;;  %v18912_v16 = vld [vmem:[%s25125_s1 + $0x68] sm:$0xff]  ;;  %v18771_v43 = vld [vmem:[%s25126_s0 + $0x818] sm:$0xf0] }
 0x6c3   :  { %15951 = vmatmul.msk.bf16.vlgmr.msrb.gmra.mxu0 %vm945_vm2, %v7069_v57  ;;  %v6746_v49 = vmax.f32 %v6688_v19, 0.0  ;;  %9522 = vmatpush.bf16.msrb.mxu3 %v18912_v16 }
 0x6c4   :  { %7159 = vmatpush.bf16.msrb.mxu0 %v18737_v28 }
 0x6c5   :  { %v6778_v51 = vpack.c.bf16 %v6746_v49, %v6746_v49 }
 0x6c7   :  { %v7101_v20 = vunpack.c.l.b16 %v6778_v51  ;;  %v18765_v51 = vld [vmem:[%s25126_s0 + $0x7e8] sm:$0xf0] }
 0x6c8   :  { %v5885_v7 = vpop.f32.mrf.mxu0  ;;  %v6689_v21 = vpop.f32.mrf.mxu2  ;;  %7160 = vmatpush.bf16.msrb.mxu0 %v18736_v47 }
 0x6c9   :  { %v5950_v3 = vadd.f32 %v5949_v39, %v5885_v7  ;;  %v6690_v33 = vadd.f32 %v6689_v21, %v6601_v48  ;;  %v22327_v14 = vpop.f32.mrf.mxu3 }
 0x6ca   :  { %v22363_v19 = vpop.f32.mrf.mxu1 }
 0x6cb   :  { %v6747_v29 = vmax.f32 %v6690_v33, 0.0 }
 0x6cd   :  { %v6779_v1 = vpack.c.bf16 %v6747_v29, %v6747_v29  ;;  %16365 = vmatmul.msk.bf16.vlgmr.msrb.gmra.mxu2 %vm480_vm1, %v16108_v31  ;;  %v16147_v31 = vld [vmem:[%s25126_s0 + $0x7e0] sm:$0xf]  ;;  %v18760_v29 = vld [vmem:[%s25126_s0 + $0x7c0] sm:$0xf0] }
 0x6ce   :  { %8060 = vmatmul.bf16.gmra.mxu3 %v16140_v4 }
 0x6cf   :  { %v7102_v45 = vunpack.c.l.b16 %v6779_v1 }
 0x6d0   :  { %v5917_v34 = vpop.f32.mrf.mxu0  ;;  %v6692_v12 = vpop.f32.mrf.mxu2 }
 0x6d1   :  { %v7103_v50 = vpack.c.b16 %v7102_v45, %v7101_v20  ;;  %v5936_v37 = vadd.f32 %v5935_v55, %v5917_v34  ;;  %v6693_v18 = vadd.f32 %v6692_v12, %v6604_v54  ;;  %v22356_v9 = vpop.f32.mrf.mxu3  ;;  %v6520_v55 = vadd.f32 %v21951_v30, %v22252_v27  ;;  %v16149_v27 = vld [vmem:[%s25126_s0 + $0x7ec] sm:$0xf0] }
 0x6d2   :  { %v22384_v33 = vpop.f32.mrf.mxu1  ;;  %v16132_v12 = vor.u32 %v18760_v29, %v16131_v41  ;;  %v16173_v41 = vld [vmem:[%s25126_s0 + $0x81c] sm:$0xf0] }
 0x6d3   :  { %v22335_v39 = vadd.f32 %v5936_v37, %v21222_v11  ;;  %15960 = vmatmul.msk.bf16.vlgmr.msra.gmra.mxu0 %vm945_vm2, %v7103_v50  ;;  %v18762_v11 = vld [vmem:[%s25126_s0 + $0x7d0] sm:$0xf0]  ;;  %v6748_v52 = vmax.f32 %v6693_v18, 0.0  ;;  %v6609_v40 = vadd.f32 %v22267_v22, %v6520_v55  ;;  %v6522_v22 = vadd.f32 %v21951_v30, %v22271_v59  ;;  %v18763_v55 = vld [vmem:[%s25126_s0 + $0x7d8] sm:$0xf0] }
 0x6d4   :  { %7193 = vmatpush.bf16.msra.mxu0 %v18739_v17  ;;  %v16136_v35 = vor.u32 %v18762_v11, %v16135_v63  ;;  %v16148_v59 = vor.u32 %v18765_v51, %v16147_v31  ;;  %v16161_v63 = vld [vmem:[%s25126_s0 + $0x804] sm:$0xf0] }
 0x6d5   :  { %v6780_v57 = vpack.c.bf16 %v6748_v52, %v6748_v52  ;;  %v6611_v1 = vadd.f32 %v22284_v26, %v6522_v22  ;;  %v6527_v52 = vadd.f32 %v21951_v30, %v22311_v8  ;;  %v18768_v8 = vld [vmem:[%s25126_s0 + $0x800] sm:$0xf0] }
 0x6d6   :  { %7971 = vmatmul.bf16.gmra.mxu1 %v16136_v35 }
 0x6d7   :  { %v7135_v47 = vunpack.c.l.b16 %v6780_v57  ;;  %v16143_v57 = vld [vmem:[%s25126_s0 + $0x7d0] sm:$0xf] }
 0x6d8   :  { %v5919_v44 = vpop.f32.mrf.mxu0  ;;  %v6694_v24 = vpop.f32.mrf.mxu2  ;;  %7194 = vmatpush.bf16.msra.mxu0 %v18738_v0  ;;  %v18743_v0 = vld [vmem:[%s25128_s3 + $0x4b8] sm:$0xff] }
 0x6d9   :  { %v5951_v32 = vadd.f32 %v5950_v3, %v5919_v44  ;;  %v6695_v28 = vadd.f32 %v6694_v24, %v6606_v46  ;;  %v22376_v49 = vpop.f32.mrf.mxu3  ;;  %v18740_v3 = vld [vmem:[%s25128_s3 + $0x4a0] sm:$0xff]  ;;  %v16164_v46 = vor.u32 %v18767_v23, %v16161_v63  ;;  %v18742_v24 = vld [vmem:[%s25128_s3 + $0x4b0] sm:$0xff] }
 0x6da   :  { %v22403_v37 = vpop.f32.mrf.mxu1 }
 0x6db   :  { %v22361_v56 = vadd.f32 %v5951_v32, %v21250_v62  ;;  %v6749_v2 = vmax.f32 %v6695_v28, 0.0  ;;  %v18764_v62 = vld [vmem:[%s25126_s0 + $0x7e4] sm:$0xf]  ;;  %v16159_v28 = vld [vmem:[%s25126_s0 + $0x7f8] sm:$0xf] }
 0x6dc   :  { %v16152_v7 = vor.u32 %v18764_v62, %v16149_v27  ;;  %v6530_v27 = vadd.f32 %v21951_v30, %v22341_v15  ;;  %v18770_v15 = vld [vmem:[%s25126_s0 + $0x814] sm:$0xf] }
 0x6dd   :  { %v6781_v53 = vpack.c.bf16 %v6749_v2, %v6749_v2  ;;  %16366 = vmatmul.msk.bf16.gmra.mxu2 %vm480_vm1, %v16120_v6  ;;  %v16160_v6 = vor.u32 %v18768_v8, %v16159_v28  ;;  %v6616_v2 = vadd.f32 %v22327_v14, %v6527_v52 }
 0x6de   :  { %8065 = vmatmul.bf16.gmra.mxu3 %v16152_v7 }
 0x6df   :  { %v7136_v13 = vunpack.c.l.b16 %v6781_v53 }
 0x6e0   :  { %v6697_v42 = vpop.f32.mrf.mxu2  ;;  %v6890_v58 = vpop.f32.mrf.mxu0 }
 0x6e1   :  { %v7137_v48 = vpack.c.b16 %v7136_v13, %v7135_v47  ;;  %v6698_v21 = vadd.f32 %v6697_v42, %v6609_v40  ;;  %v22399_v17 = vpop.f32.mrf.mxu3 }
 0x6e3   :  { %15969 = vmatmul.msk.bf16.vlgmr.msrb.gmra.mxu0 %vm945_vm2, %v7137_v48  ;;  %v6750_v20 = vmax.f32 %v6698_v21, 0.0  ;;  %v6619_v21 = vadd.f32 %v22356_v9, %v6530_v27  ;;  %v16176_v9 = vor.u32 %v18770_v15, %v16173_v41  ;;  %v16183_v27 = vld [vmem:[%s25126_s0 + $0x828] sm:$0xf] }
 0x6e4   :  { %7227 = vmatpush.bf16.msrb.mxu0 %v18741_v10 }
 0x6e5   :  { %v6782_v25 = vpack.c.bf16 %v6750_v20, %v6750_v20 }
 0x6e6   :  { %7976 = vmatmul.bf16.gmra.mxu1 %v16148_v59  ;;  %v18745_v59 = vld [vmem:[%s25128_s3 + $0x4c8] sm:$0xff] }
 0x6e7   :  { %v7169_v26 = vunpack.c.l.b16 %v6782_v25  ;;  %v16171_v25 = vld [vmem:[%s25126_s0 + $0x810] sm:$0xf] }
 0x6e8   :  { %v6699_v54 = vpop.f32.mrf.mxu2  ;;  %v6892_v45 = vpop.f32.mrf.mxu0  ;;  %7228 = vmatpush.bf16.msrb.mxu0 %v18740_v3 }
 0x6e9   :  { %v6700_v34 = vadd.f32 %v6699_v54, %v6611_v1  ;;  %v22419_v5 = vpop.f32.mrf.mxu3  ;;  %v22430_v32 = vpop.f32.mrf.mxu1  ;;  %v6532_v54 = vadd.f32 %v21951_v30, %v22363_v19  ;;  %v16172_v30 = vor.u32 %v18771_v43, %v16171_v25  ;;  %v16155_v19 = vld [vmem:[%s25126_s0 + $0x7e8] sm:$0xf] }
 0x6eb   :  { %v6751_v50 = vmax.f32 %v6700_v34, 0.0  ;;  %v18744_v34 = vld [vmem:[%s25128_s3 + $0x4c0] sm:$0xff] }
 0x6ed   :  { %v6783_v60 = vpack.c.bf16 %v6751_v50, %v6751_v50  ;;  %16367 = vmatmul.msk.bf16.gmra.mxu2 %vm480_vm1, %v16132_v12  ;;  %v18766_v50 = vld [vmem:[%s25126_s0 + $0x7f0] sm:$0xf0] }
 0x6ee   :  { %8070 = vmatmul.bf16.gmra.mxu3 %v16164_v46  ;;  %v16156_v23 = vor.u32 %v18766_v50, %v16155_v19  ;;  %v18749_v50 = vld [vmem:[%s25128_s3 + $0x4e8] sm:$0xff] }
 0x6ef   :  { %v7170_v4 = vunpack.c.l.b16 %v6783_v60  ;;  %v6621_v60 = vadd.f32 %v22376_v49, %v6532_v54  ;;  %v22493_v49 = vld [vmem:[%s25127_s2] ss:$0 sm:$0xff] }
 0x6f0   :  { %v6702_v38 = vpop.f32.mrf.mxu2  ;;  %v6924_v18 = vpop.f32.mrf.mxu0 }
 0x6f1   :  { %v7171_v11 = vpack.c.b16 %v7170_v4, %v7169_v26  ;;  %v7405_v35 = vadd.f32 %v6924_v18, %v6890_v58  ;;  %v6703_v44 = vadd.f32 %v6702_v38, %v6614_v61  ;;  %v16144_v58 = vor.u32 %v18763_v55, %v16143_v57  ;;  %v22445_v10 = vpop.f32.mrf.mxu3  ;;  %v22449_v7 = vpop.f32.mrf.mxu1  ;;  %v18916_v61 = vld [vmem:[%s25125_s1 + $0x88] sm:$0xff]  ;;  %v16185_v57 = vld [vmem:[%s25126_s0 + $0x834] sm:$0xf0] }
 0x6f2   :  { %9615 = vmatpush.bf16.msra.mxu2 %v18916_v61 }
 0x6f3   :  { %15978 = vmatmul.msk.bf16.vlgmr.msra.gmra.mxu0 %vm945_vm2, %v7171_v11  ;;  %v6752_v53 = vmax.f32 %v6703_v44, 0.0 }
 0x6f4   :  { %7261 = vmatpush.bf16.msra.mxu0 %v18743_v0 }
 0x6f5   :  { %v6784_v62 = vpack.c.bf16 %v6752_v53, %v6752_v53 }
 0x6f6   :  { %7981 = vmatmul.bf16.gmra.mxu1 %v16160_v6  ;;  %v18747_v6 = vld [vmem:[%s25128_s3 + $0x4d8] sm:$0xff] }
 0x6f7   :  { %v7203_v14 = vunpack.c.l.b16 %v6784_v62 }
 0x6f8   :  { %v6704_v47 = vpop.f32.mrf.mxu2  ;;  %v6926_v40 = vpop.f32.mrf.mxu0  ;;  %7262 = vmatpush.bf16.msra.mxu0 %v18742_v24 }
 0x6f9   :  { %v6705_v13 = vadd.f32 %v6704_v47, %v6616_v2  ;;  %v7420_v42 = vadd.f32 %v6926_v40, %v6892_v45  ;;  %v22462_v20 = vpop.f32.mrf.mxu3  ;;  %v22470_v12 = vpop.f32.mrf.mxu1  ;;  %v18903_v47 = vld [vmem:[%s25125_s1 + $0x20] sm:$0xff] }
 0x6fa   :  { %9434 = vmatpush.bf16.msra.mxu1 %v18903_v47 }
 0x6fb   :  { %v6753_v48 = vmax.f32 %v6705_v13, 0.0  ;;  %v6537_v13 = vadd.f32 %v22493_v49, %v22403_v37  ;;  %v18774_v37 = vld [vmem:[%s25126_s0 + $0x830] sm:$0xf0] }
 0x6fd   :  { %v6785_v22 = vpack.c.bf16 %v6753_v48, %v6753_v48  ;;  %16368 = vmatmul.msk.bf16.gmra.mxu2 %vm480_vm1, %v16144_v58  ;;  %v18746_v58 = vld [vmem:[%s25128_s3 + $0x4d0] sm:$0xff]  ;;  %v16184_v48 = vor.u32 %v18774_v37, %v16183_v27  ;;  %v18751_v37 = vld [vmem:[%s25128_s3 + $0x4f8] sm:$0xff] }
 0x6fe   :  { %8075 = vmatmul.bf16.gmra.mxu3 %v16176_v9  ;;  %v6540_v9 = vadd.f32 %v22493_v49, %v22430_v32  ;;  %v18776_v32 = vld [vmem:[%s25126_s0 + $0x844] sm:$0xf] }
 0x6ff   :  { %v7204_v3 = vunpack.c.l.b16 %v6785_v22  ;;  %v16167_v22 = vld [vmem:[%s25126_s0 + $0x800] sm:$0xf] }
 0x700   :  { %v6707_v31 = vpop.f32.mrf.mxu2  ;;  %v6958_v51 = vpop.f32.mrf.mxu0  ;;  %v6629_v25 = vadd.f32 %v22445_v10, %v6540_v9 }
 0x701   :  { %v7205_v29 = vpack.c.b16 %v7204_v3, %v7203_v14  ;;  %v7406_v1 = vadd.f32 %v7405_v35, %v6958_v51  ;;  %v6708_v45 = vadd.f32 %v6707_v31, %v6619_v21  ;;  %v22488_v63 = vpop.f32.mrf.mxu3  ;;  %v6535_v35 = vadd.f32 %v22493_v49, %v22384_v33  ;;  %v22497_v36 = vpop.f32.mrf.mxu1  ;;  %v18773_v33 = vld [vmem:[%s25126_s0 + $0x82c] sm:$0xf] }
 0x702   :  { %v16188_v40 = vor.u32 %v18773_v33, %v16185_v57  ;;  %v18769_v14 = vld [vmem:[%s25126_s0 + $0x808] sm:$0xf0]  ;;  %v6626_v21 = vadd.f32 %v22419_v5, %v6537_v13 }
 0x703   :  { %15987 = vmatmul.msk.bf16.vlgmr.msrb.gmra.mxu0 %vm945_vm2, %v7205_v29  ;;  %v6754_v26 = vmax.f32 %v6708_v45, 0.0  ;;  %v6624_v44 = vadd.f32 %v22399_v17, %v6535_v35  ;;  %v18911_v17 = vld [vmem:[%s25125_s1 + $0x60] sm:$0xff]  ;;  %v16168_v41 = vor.u32 %v18769_v14, %v16167_v22  ;;  %v18777_v35 = vld [vmem:[%s25126_s0 + $0x848] sm:$0xf0] }
 0x704   :  { %7295 = vmatpush.bf16.msrb.mxu0 %v18745_v59  ;;  %9523 = vmatpush.bf16.msrb.mxu3 %v18911_v17 }
 0x705   :  { %v6786_v11 = vpack.c.bf16 %v6754_v26, %v6754_v26 }
 0x706   :  { %7986 = vmatmul.bf16.gmra.mxu1 %v16172_v30 }
 0x707   :  { %v7237_v52 = vunpack.c.l.b16 %v6786_v11  ;;  %v16195_v11 = vld [vmem:[%s25126_s0 + $0x840] sm:$0xf] }
 0x708   :  { %v6709_v4 = vpop.f32.mrf.mxu2  ;;  %v6960_v38 = vpop.f32.mrf.mxu0  ;;  %7296 = vmatpush.bf16.msrb.mxu0 %v18744_v34 }
 0x709   :  { %v6710_v18 = vadd.f32 %v6709_v4, %v6621_v60  ;;  %v7421_v0 = vadd.f32 %v7420_v42, %v6960_v38  ;;  %v22513_v53 = vpop.f32.mrf.mxu3  ;;  %v22524_v62 = vpop.f32.mrf.mxu1  ;;  %v16197_v60 = vld [vmem:[%s25126_s0 + $0x84c] sm:$0xf0]  ;;  %v6542_v38 = vadd.f32 %v22493_v49, %v22449_v7  ;;  %v16196_v7 = vor.u32 %v18777_v35, %v16195_v11 }
 0x70a   :  { %v16200_v10 = vor.u32 %v18776_v32, %v16197_v60 }
 0x70b   :  { %v6755_v16 = vmax.f32 %v6710_v18, 0.0 }
 0x70d   :  { %v6787_v46 = vpack.c.bf16 %v6755_v16, %v6755_v16  ;;  %16369 = vmatmul.msk.bf16.gmra.mxu2 %vm480_vm1, %v16156_v23  ;;  %v16179_v16 = vld [vmem:[%s25126_s0 + $0x818] sm:$0xf] }
 0x70e   :  { %8080 = vmatmul.bf16.gmra.mxu3 %v16188_v40 }
 0x70f   :  { %v7238_v24 = vunpack.c.l.b16 %v6787_v46  ;;  %v18772_v46 = vld [vmem:[%s25126_s0 + $0x820] sm:$0xf0] }
 0x710   :  { %v6712_v28 = vpop.f32.mrf.mxu2  ;;  %v6992_v8 = vpop.f32.mrf.mxu0  ;;  %v16180_v33 = vor.u32 %v18772_v46, %v16179_v16  ;;  %v18820_v16 = vld [vmem:[%s25128_s3 + $0x508] sm:$0xff]  ;;  %v16221_v46 = vld [vmem:[%s25126_s0 + $0x87c] sm:$0xf0] }
 0x711   :  { %v7239_v55 = vpack.c.b16 %v7238_v24, %v7237_v52  ;;  %v7407_v2 = vadd.f32 %v7406_v1, %v6992_v8  ;;  %v6713_v42 = vadd.f32 %v6712_v28, %v6624_v44  ;;  %v22539_v29 = vpop.f32.mrf.mxu3  ;;  %v22543_v45 = vpop.f32.mrf.mxu1  ;;  %v6631_v52 = vadd.f32 %v22462_v20, %v6542_v38 }
 0x713   :  { %15996 = vmatmul.msk.bf16.vlgmr.msra.gmra.mxu0 %vm945_vm2, %v7239_v55  ;;  %v6756_v3 = vmax.f32 %v6713_v42, 0.0 }
 0x714   :  { %7329 = vmatpush.bf16.msra.mxu0 %v18747_v6 }
 0x715   :  { %v6788_v1 = vpack.c.bf16 %v6756_v3, %v6756_v3  ;;  %v18902_v3 = vld [vmem:[%s25125_s1 + $0x18] sm:$0xff] }
 0x716   :  { %7991 = vmatmul.bf16.gmra.mxu1 %v16184_v48  ;;  %v16209_v48 = vld [vmem:[%s25126_s0 + $0x864] sm:$0xf0] }
 0x717   :  { %v7271_v5 = vunpack.c.l.b16 %v6788_v1  ;;  %9435 = vmatpush.bf16.msra.mxu1 %v18902_v3  ;;  %v16207_v1 = vld [vmem:[%s25126_s0 + $0x858] sm:$0xf] }
 0x718   :  { %v6714_v31 = vpop.f32.mrf.mxu2  ;;  %v6994_v51 = vpop.f32.mrf.mxu0  ;;  %7330 = vmatpush.bf16.msra.mxu0 %v18746_v58 }
 0x719   :  { %v6715_v59 = vadd.f32 %v6714_v31, %v6626_v21  ;;  %v7422_v15 = vadd.f32 %v7421_v0, %v6994_v51  ;;  %v22556_v4 = vpop.f32.mrf.mxu3  ;;  %v18748_v0 = vld [vmem:[%s25128_s3 + $0x4e0] sm:$0xff]  ;;  %v22564_v23 = vpop.f32.mrf.mxu1  ;;  %v6547_v51 = vadd.f32 %v22493_v49, %v22497_v36 }
 0x71a   :  { %v18780_v36 = vld [vmem:[%s25126_s0 + $0x860] sm:$0xf0] }
 0x71b   :  { %v6757_v54 = vmax.f32 %v6715_v59, 0.0  ;;  %v16208_v9 = vor.u32 %v18780_v36, %v16207_v1  ;;  %v18822_v36 = vld [vmem:[%s25128_s3 + $0x518] sm:$0xff] }
 0x71d   :  { %v6789_v34 = vpack.c.bf16 %v6757_v54, %v6757_v54  ;;  %16370 = vmatmul.msk.bf16.gmra.mxu2 %vm480_vm1, %v16168_v41  ;;  %v16191_v54 = vld [vmem:[%s25126_s0 + $0x830] sm:$0xf] }
 0x71e   :  { %8085 = vmatmul.bf16.gmra.mxu3 %v16200_v10 }
 0x71f   :  { %v7272_v43 = vunpack.c.l.b16 %v6789_v34  ;;  %v18775_v34 = vld [vmem:[%s25126_s0 + $0x838] sm:$0xf0] }
 0x720   :  { %v6717_v30 = vpop.f32.mrf.mxu2  ;;  %v7026_v19 = vpop.f32.mrf.mxu0  ;;  %v16192_v32 = vor.u32 %v18775_v34, %v16191_v54 }
 0x721   :  { %v7273_v26 = vpack.c.b16 %v7272_v43, %v7271_v5  ;;  %v7408_v61 = vadd.f32 %v7407_v2, %v7026_v19  ;;  %v6718_v18 = vadd.f32 %v6717_v30, %v6629_v25  ;;  %v22579_v57 = vpop.f32.mrf.mxu3  ;;  %v6545_v2 = vadd.f32 %v22493_v49, %v22470_v12  ;;  %v22583_v47 = vpop.f32.mrf.mxu1  ;;  %v18779_v12 = vld [vmem:[%s25126_s0 + $0x85c] sm:$0xf] }
 0x722   :  { %v16212_v31 = vor.u32 %v18779_v12, %v16209_v48  ;;  %v6636_v5 = vadd.f32 %v22513_v53, %v6547_v51 }
 0x723   :  { %16005 = vmatmul.msk.bf16.vlgmr.msrb.gmra.mxu0 %vm945_vm2, %v7273_v26  ;;  %v6758_v44 = vmax.f32 %v6718_v18, 0.0  ;;  %v6634_v13 = vadd.f32 %v22488_v63, %v6545_v2  ;;  %v18910_v63 = vld [vmem:[%s25125_s1 + $0x58] sm:$0xff] }
 0x724   :  { %7363 = vmatpush.bf16.msrb.mxu0 %v18749_v50  ;;  %9524 = vmatpush.bf16.msrb.mxu3 %v18910_v63  ;;  %v18783_v2 = vld [vmem:[%s25126_s0 + $0x878] sm:$0xf0] }
 0x725   :  { %v6790_v55 = vpack.c.bf16 %v6758_v44, %v6758_v44 }
 0x726   :  { %7996 = vmatmul.bf16.gmra.mxu1 %v16196_v7 }
 0x727   :  { %v7305_v20 = vunpack.c.l.b16 %v6790_v55  ;;  %v16219_v55 = vld [vmem:[%s25126_s0 + $0x870] sm:$0xf] }
 0x728   :  { %v6719_v24 = vpop.f32.mrf.mxu2  ;;  %v7028_v28 = vpop.f32.mrf.mxu0  ;;  %7364 = vmatpush.bf16.msrb.mxu0 %v18748_v0 }
 0x729   :  { %v6720_v8 = vadd.f32 %v6719_v24, %v6631_v52  ;;  %v7423_v6 = vadd.f32 %v7422_v15, %v7028_v28  ;;  %v22599_v21 = vpop.f32.mrf.mxu3  ;;  %v18750_v15 = vld [vmem:[%s25128_s3 + $0x4f0] sm:$0xff]  ;;  %v22610_v41 = vpop.f32.mrf.mxu1  ;;  %v6552_v28 = vadd.f32 %v22493_v49, %v22543_v45  ;;  %v16203_v45 = vld [vmem:[%s25126_s0 + $0x848] sm:$0xf] }
 0x72b   :  { %v6759_v17 = vmax.f32 %v6720_v8, 0.0 }
 0x72d   :  { %v6791_v40 = vpack.c.bf16 %v6759_v17, %v6759_v17  ;;  %16371 = vmatmul.msk.bf16.gmra.mxu2 %vm480_vm1, %v16180_v33  ;;  %v18778_v17 = vld [vmem:[%s25126_s0 + $0x850] sm:$0xf0] }
 0x72e   :  { %8090 = vmatmul.bf16.gmra.mxu3 %v16212_v31  ;;  %v16204_v12 = vor.u32 %v18778_v17, %v16203_v45  ;;  %v18824_v45 = vld [vmem:[%s25128_s3 + $0x528] sm:$0xff]  ;;  %v16245_v17 = vld [vmem:[%s25126_s0 + $0x8ac] sm:$0xf0] }
 0x72f   :  { %v7306_v42 = vunpack.c.l.b16 %v6791_v40  ;;  %v6641_v40 = vadd.f32 %v22556_v4, %v6552_v28 }
 0x730   :  { %v6722_v58 = vpop.f32.mrf.mxu2  ;;  %v7060_v27 = vpop.f32.mrf.mxu0 }
 0x731   :  { %v7307_v22 = vpack.c.b16 %v7306_v42, %v7305_v20  ;;  %v7409_v14 = vadd.f32 %v7408_v61, %v7060_v27  ;;  %v6723_v59 = vadd.f32 %v6722_v58, %v6634_v13  ;;  %v22625_v60 = vpop.f32.mrf.mxu3  ;;  %v6550_v61 = vadd.f32 %v22493_v49, %v22524_v62  ;;  %v22629_v38 = vpop.f32.mrf.mxu1  ;;  %v18782_v62 = vld [vmem:[%s25126_s0 + $0x874] sm:$0xf]  ;;  %v22668_v13 = vld [vmem:[%s25127_s2] ss:$0 sm:$0xff] }
 0x732   :  { %v16220_v49 = vor.u32 %v18783_v2, %v16219_v55 }
 0x733   :  { %16014 = vmatmul.msk.bf16.vlgmr.msra.gmra.mxu0 %vm945_vm2, %v7307_v22  ;;  %v6760_v25 = vmax.f32 %v6723_v59, 0.0  ;;  %v6639_v0 = vadd.f32 %v22539_v29, %v6550_v61  ;;  %v16224_v29 = vor.u32 %v18782_v62, %v16221_v46 }
 0x734   :  { %7397 = vmatpush.bf16.msra.mxu0 %v18751_v37 }
 0x735   :  { %v6792_v26 = vpack.c.bf16 %v6760_v25, %v6760_v25  ;;  %v18901_v25 = vld [vmem:[%s25125_s1 + $0x10] sm:$0xff] }
 0x736   :  { %8001 = vmatmul.bf16.gmra.mxu1 %v16208_v9  ;;  %v16233_v9 = vld [vmem:[%s25126_s0 + $0x894] sm:$0xf0] }
 0x737   :  { %v7339_v53 = vunpack.c.l.b16 %v6792_v26  ;;  %9436 = vmatpush.bf16.msra.mxu1 %v18901_v25  ;;  %v16231_v26 = vld [vmem:[%s25126_s0 + $0x888] sm:$0xf] }
 0x738   :  { %v6724_v43 = vpop.f32.mrf.mxu2  ;;  %v7062_v30 = vpop.f32.mrf.mxu0  ;;  %7398 = vmatpush.bf16.msra.mxu0 %v18750_v15 }
 0x739   :  { %v6725_v19 = vadd.f32 %v6724_v43, %v6636_v5  ;;  %v7424_v50 = vadd.f32 %v7423_v6, %v7062_v30  ;;  %v22642_v24 = vpop.f32.mrf.mxu3  ;;  %v18819_v6 = vld [vmem:[%s25128_s3 + $0x500] sm:$0xff]  ;;  %v22650_v33 = vpop.f32.mrf.mxu1  ;;  %v7960_v30 = vadd.f32 %v22668_v13, %v22583_v47  ;;  %v18786_v47 = vld [vmem:[%s25126_s0 + $0x890] sm:$0xf0] }
 0x73a   :  { %v16232_v61 = vor.u32 %v18786_v47, %v16231_v26 }
 0x73b   :  { %v6761_v10 = vmax.f32 %v6725_v19, 0.0 }
 0x73d   :  { %v6793_v18 = vpack.c.bf16 %v6761_v10, %v6761_v10  ;;  %16372 = vmatmul.msk.bf16.gmra.mxu2 %vm480_vm1, %v16192_v32  ;;  %v16215_v10 = vld [vmem:[%s25126_s0 + $0x860] sm:$0xf] }
 0x73e   :  { %8095 = vmatmul.bf16.gmra.mxu3 %v16224_v29 }
 0x73f   :  { %v7340_v11 = vunpack.c.l.b16 %v6793_v18  ;;  %v18781_v18 = vld [vmem:[%s25126_s0 + $0x868] sm:$0xf0] }
 0x740   :  { %v6727_v35 = vpop.f32.mrf.mxu2  ;;  %v7094_v7 = vpop.f32.mrf.mxu0  ;;  %v16216_v62 = vor.u32 %v18781_v18, %v16215_v10  ;;  %v16257_v10 = vld [vmem:[%s25126_s0 + $0x8c4] sm:$0xf0] }
 0x741   :  { %v7341_v52 = vpack.c.b16 %v7340_v11, %v7339_v53  ;;  %v7410_v44 = vadd.f32 %v7409_v14, %v7094_v7  ;;  %v6728_v8 = vadd.f32 %v6727_v35, %v6639_v0  ;;  %v22670_v48 = vpop.f32.mrf.mxu3  ;;  %v7958_v14 = vadd.f32 %v22668_v13, %v22564_v23  ;;  %v22674_v63 = vpop.f32.mrf.mxu1  ;;  %v18785_v23 = vld [vmem:[%s25126_s0 + $0x88c] sm:$0xf] }
 0x742   :  { %v16236_v43 = vor.u32 %v18785_v23, %v16233_v9  ;;  %v8049_v53 = vadd.f32 %v22599_v21, %v7960_v30 }
 0x743   :  { %16023 = vmatmul.msk.bf16.vlgmr.msrb.gmra.mxu0 %vm945_vm2, %v7341_v52  ;;  %v6762_v20 = vmax.f32 %v6728_v8, 0.0  ;;  %v8047_v51 = vadd.f32 %v22579_v57, %v7958_v14  ;;  %v18909_v57 = vld [vmem:[%s25125_s1 + $0x50] sm:$0xff]  ;;  %v16243_v14 = vld [vmem:[%s25126_s0 + $0x8a0] sm:$0xf] }
 0x744   :  { %8370 = vmatpush.bf16.msrb.mxu0 %v18820_v16  ;;  %9525 = vmatpush.bf16.msrb.mxu3 %v18909_v57  ;;  %v7968_v57 = vadd.f32 %v22668_v13, %v22650_v33  ;;  %v18791_v33 = vld [vmem:[%s25126_s0 + $0x8bc] sm:$0xf] }
 0x745   :  { %v6794_v22 = vpack.c.bf16 %v6762_v20, %v6762_v20 }
 0x746   :  { %8006 = vmatmul.bf16.gmra.mxu1 %v16220_v49 }
 0x747   :  { %v7373_v31 = vunpack.c.l.b16 %v6794_v22 }
 0x748   :  { %v6729_v42 = vpop.f32.mrf.mxu2  ;;  %v7096_v58 = vpop.f32.mrf.mxu0  ;;  %8371 = vmatpush.bf16.msrb.mxu0 %v18819_v6 }
 0x749   :  { %v6730_v27 = vadd.f32 %v6729_v42, %v6641_v40  ;;  %v7425_v37 = vadd.f32 %v7424_v50, %v7096_v58  ;;  %v22690_v5 = vpop.f32.mrf.mxu3  ;;  %v18821_v50 = vld [vmem:[%s25128_s3 + $0x510] sm:$0xff] }
 0x74b   :  { %v6763_v4 = vmax.f32 %v6730_v27, 0.0  ;;  %v7965_v27 = vadd.f32 %v22668_v13, %v22629_v38 }
 0x74d   :  { %v6795_v3 = vpack.c.bf16 %v6763_v4, %v6763_v4  ;;  %16373 = vmatmul.msk.bf16.gmra.mxu2 %vm480_vm1, %v16204_v12  ;;  %v18823_v12 = vld [vmem:[%s25128_s3 + $0x520] sm:$0xff]  ;;  %v18789_v4 = vld [vmem:[%s25126_s0 + $0x8a8] sm:$0xf0] }
 0x74e   :  { %8100 = vmatmul.bf16.gmra.mxu3 %v16236_v43  ;;  %v16244_v38 = vor.u32 %v18789_v4, %v16243_v14 }
 0x74f   :  { %v7374_v59 = vunpack.c.l.b16 %v6795_v3  ;;  %v16227_v3 = vld [vmem:[%s25126_s0 + $0x878] sm:$0xf] }
 0x750   :  { %v7128_v15 = vpop.f32.mrf.mxu0  ;;  %v8135_v1 = vpop.f32.mrf.mxu2 }
 0x751   :  { %v7375_v54 = vpack.c.b16 %v7374_v59, %v7373_v31  ;;  %v7411_v34 = vadd.f32 %v7410_v44, %v7128_v15  ;;  %v8136_v19 = vadd.f32 %v8135_v1, %v8047_v51  ;;  %v22716_v46 = vpop.f32.mrf.mxu3  ;;  %v7963_v44 = vadd.f32 %v22668_v13, %v22610_v41  ;;  %v18788_v41 = vld [vmem:[%s25126_s0 + $0x8a4] sm:$0xf] }
 0x752   :  { %v16248_v58 = vor.u32 %v18788_v41, %v16245_v17  ;;  %v18784_v31 = vld [vmem:[%s25126_s0 + $0x880] sm:$0xf0]  ;;  %v8054_v51 = vadd.f32 %v22642_v24, %v7965_v27 }
 0x753   :  { %16032 = vmatmul.msk.bf16.vlgmr.msra.gmra.mxu0 %vm945_vm2, %v7375_v54  ;;  %v22701_v32 = vpop.f32.mrf.mxu1  ;;  %v8215_v0 = vmax.f32 %v8136_v19, 0.0  ;;  %v8052_v6 = vadd.f32 %v22625_v60, %v7963_v44  ;;  %v18915_v60 = vld [vmem:[%s25125_s1 + $0x80] sm:$0xff]  ;;  %v16228_v9 = vor.u32 %v18784_v31, %v16227_v3  ;;  %v8057_v19 = vadd.f32 %v22670_v48, %v7968_v57  ;;  %v18908_v48 = vld [vmem:[%s25125_s1 + $0x48] sm:$0xff]  ;;  %v16255_v44 = vld [vmem:[%s25126_s0 + $0x8b8] sm:$0xf] }
 0x754   :  { %8404 = vmatpush.bf16.msra.mxu0 %v18822_v36  ;;  %9616 = vmatpush.bf16.msra.mxu2 %v18915_v60  ;;  %v7973_v60 = vadd.f32 %v22668_v13, %v22701_v32  ;;  %v18828_v3 = vld [vmem:[%s25128_s3 + $0x548] sm:$0xff]  ;;  %v18794_v32 = vld [vmem:[%s25126_s0 + $0x8d4] sm:$0xf]  ;;  %v16269_v31 = vld [vmem:[%s25126_s0 + $0x8dc] sm:$0xf0] }
 0x755   :  { %v8247_v52 = vpack.c.bf16 %v8215_v0, %v8215_v0  ;;  %9526 = vmatpush.bf16.msrb.mxu3 %v18908_v48  ;;  %v18795_v57 = vld [vmem:[%s25126_s0 + $0x8d8] sm:$0xf0] }
 0x756   :  { %8011 = vmatmul.bf16.gmra.mxu1 %v16232_v61  ;;  %v18826_v61 = vld [vmem:[%s25128_s3 + $0x538] sm:$0xff] }
 0x757   :  { %v8346_v21 = vunpack.c.l.b16 %v8247_v52 }
 0x758   :  { %v7130_v11 = vpop.f32.mrf.mxu0  ;;  %v8137_v35 = vpop.f32.mrf.mxu2  ;;  %8405 = vmatpush.bf16.msra.mxu0 %v18821_v50 }
 0x759   :  { %v7426_v7 = vadd.f32 %v7425_v37, %v7130_v11  ;;  %v8138_v16 = vadd.f32 %v8137_v35, %v8049_v53  ;;  %v22736_v42 = vpop.f32.mrf.mxu3  ;;  %v18900_v11 = vld [vmem:[%s25125_s1 + $0x8] sm:$0xff]  ;;  %v16260_v35 = vor.u32 %v18791_v33, %v16257_v10 }
 0x75a   :  { %9437 = vmatpush.bf16.msra.mxu1 %v18900_v11 }
 0x75b   :  { %v8216_v29 = vmax.f32 %v8138_v16, 0.0  ;;  %v22720_v28 = vpop.f32.mrf.mxu1 }
 0x75d   :  { %v8248_v8 = vpack.c.bf16 %v8216_v29, %v8216_v29  ;;  %16374 = vmatmul.msk.bf16.gmra.mxu2 %vm480_vm1, %v16216_v62  ;;  %v18825_v62 = vld [vmem:[%s25128_s3 + $0x530] sm:$0xff] }
 0x75e   :  { %8105 = vmatmul.bf16.gmra.mxu3 %v16248_v58 }
 0x75f   :  { %v8347_v55 = vunpack.c.l.b16 %v8248_v8  ;;  %v16239_v8 = vld [vmem:[%s25126_s0 + $0x890] sm:$0xf] }
 0x760   :  { %v7162_v2 = vpop.f32.mrf.mxu0  ;;  %v8140_v49 = vpop.f32.mrf.mxu2 }
 0x761   :  { %v8348_v40 = vpack.c.b16 %v8347_v55, %v8346_v21  ;;  %v7412_v20 = vadd.f32 %v7411_v34, %v7162_v2  ;;  %v8141_v37 = vadd.f32 %v8140_v49, %v8052_v6  ;;  %v22759_v54 = vpop.f32.mrf.mxu3  ;;  %v18787_v21 = vld [vmem:[%s25126_s0 + $0x898] sm:$0xf0] }
 0x762   :  { %v16240_v17 = vor.u32 %v18787_v21, %v16239_v8 }
 0x763   :  { %16453 = vmatmul.msk.bf16.vlgmr.msrb.gmra.mxu0 %vm945_vm2, %v8348_v40  ;;  %v22744_v22 = vpop.f32.mrf.mxu1  ;;  %v8217_v59 = vmax.f32 %v8141_v37, 0.0 }
 0x764   :  { %8438 = vmatpush.bf16.msrb.mxu0 %v18824_v45 }
 0x765   :  { %v8249_v34 = vpack.c.bf16 %v8217_v59, %v8217_v59 }
 0x766   :  { %8016 = vmatmul.bf16.gmra.mxu1 %v16244_v38 }
 0x767   :  { %v8380_v24 = vunpack.c.l.b16 %v8249_v34  ;;  %v16267_v34 = vld [vmem:[%s25126_s0 + $0x8d0] sm:$0xf] }
 0x768   :  { %v7164_v15 = vpop.f32.mrf.mxu0  ;;  %v8142_v1 = vpop.f32.mrf.mxu2  ;;  %8439 = vmatpush.bf16.msrb.mxu0 %v18823_v12  ;;  %v8062_v12 = vadd.f32 %v22716_v46, %v7973_v60  ;;  %v16272_v46 = vor.u32 %v18794_v32, %v16269_v31 }
 0x769   :  { %v7427_v36 = vadd.f32 %v7426_v7, %v7164_v15  ;;  %v8143_v23 = vadd.f32 %v8142_v1, %v8054_v51  ;;  %v22779_v0 = vpop.f32.mrf.mxu3  ;;  %v7970_v7 = vadd.f32 %v22668_v13, %v22674_v63  ;;  %v18792_v63 = vld [vmem:[%s25126_s0 + $0x8c0] sm:$0xf0]  ;;  %v7975_v1 = vadd.f32 %v22668_v13, %v22720_v28 }
 0x76a   :  { %v16256_v29 = vor.u32 %v18792_v63, %v16255_v44  ;;  %v16268_v28 = vor.u32 %v18795_v57, %v16267_v34  ;;  %v18830_v63 = vld [vmem:[%s25128_s3 + $0x558] sm:$0xff] }
 0x76b   :  { %v8218_v25 = vmax.f32 %v8143_v23, 0.0  ;;  %v22763_v43 = vpop.f32.mrf.mxu1  ;;  %v8059_v6 = vadd.f32 %v22690_v5, %v7970_v7  ;;  %v18827_v23 = vld [vmem:[%s25128_s3 + $0x540] sm:$0xff] }
 0x76d   :  { %v8250_v30 = vpack.c.bf16 %v8218_v25, %v8218_v25  ;;  %16375 = vmatmul.msk.bf16.gmra.mxu2 %vm480_vm1, %v16228_v9  ;;  %v16251_v25 = vld [vmem:[%s25126_s0 + $0x8a8] sm:$0xf] }
 0x76e   :  { %8110 = vmatmul.bf16.gmra.mxu3 %v16260_v35 }
 0x76f   :  { %v8381_v50 = vunpack.c.l.b16 %v8250_v30  ;;  %v18790_v30 = vld [vmem:[%s25126_s0 + $0x8b0] sm:$0xf0] }
 0x770   :  { %v7196_v26 = vpop.f32.mrf.mxu0  ;;  %v8145_v47 = vpop.f32.mrf.mxu2  ;;  %v16252_v33 = vor.u32 %v18790_v30, %v16251_v25  ;;  %v18832_v25 = vld [vmem:[%s25128_s3 + $0x568] sm:$0xff]  ;;  %v16657_v30 = vld [vmem:[%s25126_s0 + $0x90c] sm:$0xf0] }
 0x771   :  { %v8382_v18 = vpack.c.b16 %v8381_v50, %v8380_v24  ;;  %v7413_v53 = vadd.f32 %v7412_v20, %v7196_v26  ;;  %v8146_v16 = vadd.f32 %v8145_v47, %v8057_v19  ;;  %v22805_v40 = vpop.f32.mrf.mxu3  ;;  %v8064_v24 = vadd.f32 %v22736_v42, %v7975_v1 }
 0x773   :  { %16462 = vmatmul.msk.bf16.vlgmr.msra.gmra.mxu0 %vm945_vm2, %v8382_v18  ;;  %v22790_v52 = vpop.f32.mrf.mxu1  ;;  %v8219_v55 = vmax.f32 %v8146_v16, 0.0 }
 0x774   :  { %8472 = vmatpush.bf16.msra.mxu0 %v18826_v61 }
 0x775   :  { %v8251_v20 = vpack.c.bf16 %v8219_v55, %v8219_v55  ;;  %v18899_v55 = vld [vmem:[%s25125_s1] sm:$0xff] }
 0x776   :  { %8021 = vmatmul.bf16.gmra.mxu1 %v16256_v29  ;;  %v16281_v29 = vld [vmem:[%s25126_s0 + $0x8f4] sm:$0xf0] }
 0x777   :  { %v8414_v5 = vunpack.c.l.b16 %v8251_v20  ;;  %9438 = vmatpush.bf16.msra.mxu1 %v18899_v55  ;;  %v16279_v20 = vld [vmem:[%s25126_s0 + $0x8e8] sm:$0xf] }
 0x778   :  { %v7198_v2 = vpop.f32.mrf.mxu0  ;;  %v8147_v49 = vpop.f32.mrf.mxu2  ;;  %8473 = vmatpush.bf16.msra.mxu0 %v18825_v62 }
 0x779   :  { %v7428_v45 = vadd.f32 %v7427_v36, %v7198_v2  ;;  %v8148_v41 = vadd.f32 %v8147_v49, %v8059_v6  ;;  %v22822_v15 = vpop.f32.mrf.mxu3  ;;  %v7980_v49 = vadd.f32 %v22668_v13, %v22763_v43  ;;  %v18798_v43 = vld [vmem:[%s25126_s0 + $0x8f0] sm:$0xf0] }
 0x77a   :  { %v16280_v60 = vor.u32 %v18798_v43, %v16279_v20  ;;  %v18834_v43 = vld [vmem:[%s25128_s3 + $0x578] sm:$0xff] }
 0x77b   :  { %v8220_v58 = vmax.f32 %v8148_v41, 0.0  ;;  %v22809_v27 = vpop.f32.mrf.mxu1  ;;  %v18829_v41 = vld [vmem:[%s25128_s3 + $0x550] sm:$0xff] }
 0x77d   :  { %v8252_v37 = vpack.c.bf16 %v8220_v58, %v8220_v58  ;;  %16376 = vmatmul.msk.bf16.gmra.mxu2 %vm480_vm1, %v16240_v17  ;;  %v16263_v58 = vld [vmem:[%s25126_s0 + $0x8c0] sm:$0xf] }
 0x77e   :  { %8115 = vmatmul.bf16.gmra.mxu3 %v16272_v46 }
 0x77f   :  { %v8415_v14 = vunpack.c.l.b16 %v8252_v37  ;;  %v18793_v37 = vld [vmem:[%s25126_s0 + $0x8c8] sm:$0xf0] }
 0x780   :  { %v7230_v4 = vpop.f32.mrf.mxu0  ;;  %v8150_v38 = vpop.f32.mrf.mxu2  ;;  %v16264_v32 = vor.u32 %v18793_v37, %v16263_v58 }
 0x781   :  { %v8416_v51 = vpack.c.b16 %v8415_v14, %v8414_v5  ;;  %v7414_v59 = vadd.f32 %v7413_v53, %v7230_v4  ;;  %v8151_v36 = vadd.f32 %v8150_v38, %v8062_v12  ;;  %v22845_v10 = vpop.f32.mrf.mxu3  ;;  %v7978_v53 = vadd.f32 %v22668_v13, %v22744_v22  ;;  %v18797_v22 = vld [vmem:[%s25126_s0 + $0x8ec] sm:$0xf] }
 0x782   :  { %v16284_v2 = vor.u32 %v18797_v22, %v16281_v29  ;;  %v8069_v5 = vadd.f32 %v22779_v0, %v7980_v49 }
 0x783   :  { %16471 = vmatmul.msk.bf16.vlgmr.msrb.gmra.mxu0 %vm945_vm2, %v8416_v51  ;;  %v22830_v9 = vpop.f32.mrf.mxu1  ;;  %v8221_v19 = vmax.f32 %v8151_v36, 0.0  ;;  %v8067_v7 = vadd.f32 %v22759_v54, %v7978_v53  ;;  %v18907_v54 = vld [vmem:[%s25125_s1 + $0x40] sm:$0xff]  ;;  %v18852_v53 = vld [vmem:[%s25126_s0 + $0x908] sm:$0xf0] }
 0x784   :  { %8506 = vmatpush.bf16.msrb.mxu0 %v18828_v3  ;;  %9527 = vmatpush.bf16.msrb.mxu3 %v18907_v54 }
 0x785   :  { %v8253_v18 = vpack.c.bf16 %v8221_v19, %v8221_v19 }
 0x786   :  { %8026 = vmatmul.bf16.gmra.mxu1 %v16268_v28 }
 0x787   :  { %v8448_v42 = vunpack.c.l.b16 %v8253_v18  ;;  %v16655_v18 = vld [vmem:[%s25126_s0 + $0x900] sm:$0xf] }
 0x788   :  { %v7232_v50 = vpop.f32.mrf.mxu0  ;;  %v8152_v26 = vpop.f32.mrf.mxu2  ;;  %8507 = vmatpush.bf16.msrb.mxu0 %v18827_v23 }
 0x789   :  { %v7429_v47 = vadd.f32 %v7428_v45, %v7232_v50  ;;  %v8153_v61 = vadd.f32 %v8152_v26, %v8064_v24  ;;  %v22865_v6 = vpop.f32.mrf.mxu3  ;;  %v7985_v26 = vadd.f32 %v22668_v13, %v22809_v27  ;;  %v16656_v27 = vor.u32 %v18852_v53, %v16655_v18 }
 0x78b   :  { %v8222_v48 = vmax.f32 %v8153_v61, 0.0  ;;  %v22849_v11 = vpop.f32.mrf.mxu1  ;;  %v18831_v61 = vld [vmem:[%s25128_s3 + $0x560] sm:$0xff] }
 0x78d   :  { %v8254_v35 = vpack.c.bf16 %v8222_v48, %v8222_v48  ;;  %16377 = vmatmul.msk.bf16.gmra.mxu2 %vm480_vm1, %v16252_v33  ;;  %v16275_v48 = vld [vmem:[%s25126_s0 + $0x8d8] sm:$0xf] }
 0x78e   :  { %8120 = vmatmul.bf16.gmra.mxu3 %v16284_v2 }
 0x78f   :  { %v8449_v16 = vunpack.c.l.b16 %v8254_v35  ;;  %v18796_v35 = vld [vmem:[%s25126_s0 + $0x8e0] sm:$0xf0] }
 0x790   :  { %v7264_v62 = vpop.f32.mrf.mxu0  ;;  %v8155_v44 = vpop.f32.mrf.mxu2  ;;  %v16276_v22 = vor.u32 %v18796_v35, %v16275_v48 }
 0x791   :  { %v8450_v8 = vpack.c.b16 %v8449_v16, %v8448_v42  ;;  %v7415_v21 = vadd.f32 %v7414_v59, %v7264_v62  ;;  %v8156_v45 = vadd.f32 %v8155_v44, %v8067_v7  ;;  %v22891_v31 = vpop.f32.mrf.mxu3  ;;  %v7983_v59 = vadd.f32 %v22668_v13, %v22790_v52  ;;  %v18851_v52 = vld [vmem:[%s25126_s0 + $0x904] sm:$0xf] }
 0x792   :  { %v8074_v42 = vadd.f32 %v22822_v15, %v7985_v26 }
 0x793   :  { %16480 = vmatmul.msk.bf16.vlgmr.msra.gmra.mxu0 %vm945_vm2, %v8450_v8  ;;  %v22876_v17 = vpop.f32.mrf.mxu1  ;;  %v8223_v12 = vmax.f32 %v8156_v45, 0.0  ;;  %v8072_v23 = vadd.f32 %v22805_v40, %v7983_v59  ;;  %v16660_v40 = vor.u32 %v18851_v52, %v16657_v30  ;;  %v18833_v59 = vld [vmem:[%s25128_s3 + $0x570] sm:$0xff] }
 0x794   :  { %8540 = vmatpush.bf16.msra.mxu0 %v18830_v63 }
 0x795   :  { %v8255_v51 = vpack.c.bf16 %v8223_v12, %v8223_v12  ;;  %v19016_v12 = vld [vmem:[%s25125_s1 + $0x90] sm:$0x30] }
 0x796   :  { %8031 = vmatmul.bf16.gmra.mxu1 %v16280_v60  ;;  %v16669_v60 = vld [vmem:[%s25126_s0 + $0x924] sm:$0xf0] }
 0x797   :  { %v8482_v0 = vunpack.c.l.b16 %v8255_v51 }
 0x798   :  { %v7266_v14 = vpop.f32.mrf.mxu0  ;;  %v8157_v4 = vpop.f32.mrf.mxu2  ;;  %8541 = vmatpush.bf16.msra.mxu0 %v18829_v41 }
 0x799   :  { %v7430_v38 = vadd.f32 %v7429_v47, %v7266_v14  ;;  %v8158_v3 = vadd.f32 %v8157_v4, %v8069_v5  ;;  %v22908_v50 = vpop.f32.mrf.mxu3  ;;  %v17475_v5 = vld [vmem:[%s25125_s1 + $0x90] sm:$0xf] }
 0x79b   :  { %v8224_v46 = vmax.f32 %v8158_v3, 0.0  ;;  %v22895_v1 = vpop.f32.mrf.mxu1  ;;  %v19005_v3 = vld [vmem:[%s25125_s1 + $0x38] sm:$0xff] }
 0x79c   :  { %10914 = vmatpush.bf16.msrb.mxu1 %v19005_v3 }
 0x79d   :  { %v8256_v36 = vpack.c.bf16 %v8224_v46, %v8224_v46  ;;  %16378 = vmatmul.msk.bf16.gmra.mxu2 %vm480_vm1, %v16264_v32  ;;  %v7990_v32 = vadd.f32 %v22668_v13, %v22849_v11  ;;  %v18855_v11 = vld [vmem:[%s25126_s0 + $0x920] sm:$0xf0] }
 0x79e   :  { %9528 = vmatmul.bf16.vlgmr.msrb.gmra.mxu3 %v16660_v40 }
 0x79f   :  { %v8483_v34 = vunpack.c.l.b16 %v8256_v36 }
 0x7a0   :  { %v7298_v57 = vpop.f32.mrf.mxu0  ;;  %v8160_v28 = vpop.f32.mrf.mxu2 }
 0x7a1   :  { %v8484_v24 = vpack.c.b16 %v8483_v34, %v8482_v0  ;;  %v7416_v19 = vadd.f32 %v7415_v21, %v7298_v57  ;;  %v8161_v47 = vadd.f32 %v8160_v28, %v8072_v23  ;;  %v22931_v29 = vpop.f32.mrf.mxu3  ;;  %v7988_v21 = vadd.f32 %v22668_v13, %v22830_v9  ;;  %v18854_v9 = vld [vmem:[%s25126_s0 + $0x91c] sm:$0xf]  ;;  %v16667_v0 = vld [vmem:[%s25126_s0 + $0x918] sm:$0xf]  ;;  %v16287_v34 = vld [vmem:[%s25126_s0 + $0x8f0] sm:$0xf] }
 0x7a2   :  { %v16672_v4 = vor.u32 %v18854_v9, %v16669_v60  ;;  %v16668_v23 = vor.u32 %v18855_v11, %v16667_v0  ;;  %v18799_v57 = vld [vmem:[%s25126_s0 + $0x8f8] sm:$0xf0]  ;;  %v8079_v28 = vadd.f32 %v22865_v6, %v7990_v32 }
 0x7a3   :  { %16489 = vmatmul.msk.bf16.vlgmr.msrb.gmra.mxu0 %vm945_vm2, %v8484_v24  ;;  %v22916_v33 = vpop.f32.mrf.mxu1  ;;  %v8225_v7 = vmax.f32 %v8161_v47, 0.0  ;;  %v8077_v49 = vadd.f32 %v22845_v10, %v7988_v21  ;;  %v19013_v10 = vld [vmem:[%s25125_s1 + $0x78] sm:$0xff]  ;;  %v16288_v40 = vor.u32 %v18799_v57, %v16287_v34 }
 0x7a4   :  { %8574 = vmatpush.bf16.msrb.mxu0 %v18832_v25  ;;  %11003 = vmatpush.bf16.msra.mxu3 %v19013_v10  ;;  %v18838_v11 = vld [vmem:[%s25128_s3 + $0x598] sm:$0xff] }
 0x7a5   :  { %v8257_v8 = vpack.c.bf16 %v8225_v7, %v8225_v7 }
 0x7a6   :  { %9439 = vmatmul.bf16.vlgmr.msra.gmra.mxu1 %v16656_v27 }
 0x7a7   :  { %v8516_v15 = vunpack.c.l.b16 %v8257_v8  ;;  %v7995_v8 = vadd.f32 %v22668_v13, %v22895_v1 }
 0x7a8   :  { %v7300_v16 = vpop.f32.mrf.mxu0  ;;  %v8162_v62 = vpop.f32.mrf.mxu2  ;;  %8575 = vmatpush.bf16.msrb.mxu0 %v18831_v61  ;;  %v7993_v61 = vadd.f32 %v22668_v13, %v22876_v17  ;;  %v18857_v17 = vld [vmem:[%s25126_s0 + $0x934] sm:$0xf] }
 0x7a9   :  { %v7431_v44 = vadd.f32 %v7430_v38, %v7300_v16  ;;  %v8163_v63 = vadd.f32 %v8162_v62, %v8074_v42  ;;  %v22957_v14 = vpop.f32.mrf.mxu3  ;;  %v17476_v38 = vor.u32 %v19016_v12, %v17475_v5  ;;  %v18836_v16 = vld [vmem:[%s25128_s3 + $0x588] sm:$0xff]  ;;  %v16681_v62 = vld [vmem:[%s25126_s0 + $0x93c] sm:$0xf0] }
 0x7aa   :  { %v8082_v48 = vadd.f32 %v22891_v31, %v7993_v61  ;;  %v16684_v31 = vor.u32 %v18857_v17, %v16681_v62  ;;  %v16691_v61 = vld [vmem:[%s25126_s0 + $0x948] sm:$0xf] }
 0x7ab   :  { %v8226_v54 = vmax.f32 %v8163_v63, 0.0  ;;  %v22935_v55 = vpop.f32.mrf.mxu1  ;;  %v10912_v46 = vsel %vm529_vm0, %v17476_v38, 0 }
 0x7ac   :  { %11097 = vmatpush.bf16.msrb.mxu2 %v10912_v46 }
 0x7ad   :  { %v8258_v2 = vpack.c.bf16 %v8226_v54, %v8226_v54  ;;  %16379 = vmatmul.msk.bf16.gmra.mxu2 %vm480_vm1, %v16276_v22  ;;  %v18835_v54 = vld [vmem:[%s25128_s3 + $0x580] sm:$0xff] }
 0x7ae   :  { %9533 = vmatmul.bf16.gmra.mxu3 %v16672_v4  ;;  %v7998_v4 = vadd.f32 %v22668_v13, %v22916_v33  ;;  %v18860_v33 = vld [vmem:[%s25126_s0 + $0x94c] sm:$0xf] }
 0x7af   :  { %v8517_v45 = vunpack.c.l.b16 %v8258_v2 }
 0x7b0   :  { %v7332_v41 = vpop.f32.mrf.mxu0  ;;  %v8165_v20 = vpop.f32.mrf.mxu2 }
 0x7b1   :  { %v8518_v58 = vpack.c.b16 %v8517_v45, %v8516_v15  ;;  %v7417_v37 = vadd.f32 %v7416_v19, %v7332_v41  ;;  %v8166_v51 = vadd.f32 %v8165_v20, %v8077_v49  ;;  %v22984_v26 = vpop.f32.mrf.mxu3  ;;  %v16679_v15 = vld [vmem:[%s25126_s0 + $0x930] sm:$0xf]  ;;  %v18858_v49 = vld [vmem:[%s25126_s0 + $0x938] sm:$0xf0]  ;;  %v16663_v45 = vld [vmem:[%s25126_s0 + $0x908] sm:$0xf]  ;;  %v8084_v20 = vadd.f32 %v22908_v50, %v7995_v8 }
 0x7b2   :  { %v16680_v1 = vor.u32 %v18858_v49, %v16679_v15  ;;  %v18853_v41 = vld [vmem:[%s25126_s0 + $0x910] sm:$0xf0] }
 0x7b3   :  { %16498 = vmatmul.msk.bf16.vlgmr.msra.gmra.mxu0 %vm945_vm2, %v8518_v58  ;;  %v22969_v36 = vpop.f32.mrf.mxu1  ;;  %v8227_v25 = vmax.f32 %v8166_v51, 0.0  ;;  %v16664_v10 = vor.u32 %v18853_v41, %v16663_v45  ;;  %v8087_v51 = vadd.f32 %v22931_v29, %v7998_v4  ;;  %v19012_v29 = vld [vmem:[%s25125_s1 + $0x70] sm:$0xff]  ;;  %v18840_v41 = vld [vmem:[%s25128_s3 + $0x5a8] sm:$0xff]  ;;  %v16687_v4 = vld [vmem:[%s25126_s0 + $0x938] sm:$0xf] }
 0x7b4   :  { %8608 = vmatpush.bf16.msra.mxu0 %v18834_v43  ;;  %11004 = vmatpush.bf16.msra.mxu3 %v19012_v29 }
 0x7b5   :  { %v8259_v47 = vpack.c.bf16 %v8227_v25, %v8227_v25  ;;  %v19004_v25 = vld [vmem:[%s25125_s1 + $0x30] sm:$0xff] }
 0x7b6   :  { %9444 = vmatmul.bf16.gmra.mxu1 %v16668_v23  ;;  %v16693_v23 = vld [vmem:[%s25126_s0 + $0x954] sm:$0xf0] }
 0x7b7   :  { %v8550_v6 = vunpack.c.l.b16 %v8259_v47  ;;  %10915 = vmatpush.bf16.msrb.mxu1 %v19004_v25 }
 0x7b8   :  { %v7334_v52 = vpop.f32.mrf.mxu0  ;;  %v8167_v30 = vpop.f32.mrf.mxu2  ;;  %8609 = vmatpush.bf16.msra.mxu0 %v18833_v59 }
 0x7b9   :  { %v7432_v24 = vadd.f32 %v7431_v44, %v7334_v52  ;;  %v8168_v19 = vadd.f32 %v8167_v30, %v8079_v28  ;;  %v23001_v22 = vpop.f32.mrf.mxu3  ;;  %v16696_v52 = vor.u32 %v18860_v33, %v16693_v23  ;;  %v8000_v30 = vadd.f32 %v22668_v13, %v22935_v55 }
 0x7bb   :  { %v8228_v18 = vmax.f32 %v8168_v19, 0.0  ;;  %v22988_v53 = vpop.f32.mrf.mxu1 }
 0x7bd   :  { %v8260_v27 = vpack.c.bf16 %v8228_v18, %v8228_v18  ;;  %16380 = vmatmul.msk.bf16.gmra.mxu2 %vm480_vm1, %v16288_v40  ;;  %v18837_v40 = vld [vmem:[%s25128_s3 + $0x590] sm:$0xff]  ;;  %v16675_v18 = vld [vmem:[%s25126_s0 + $0x920] sm:$0xf] }
 0x7be   :  { %9538 = vmatmul.bf16.gmra.mxu3 %v16684_v31 }
 0x7bf   :  { %v8551_v35 = vunpack.c.l.b16 %v8260_v27  ;;  %v18856_v27 = vld [vmem:[%s25126_s0 + $0x928] sm:$0xf0] }
 0x7c0   :  { %v7366_v42 = vpop.f32.mrf.mxu0  ;;  %v8170_v7 = vpop.f32.mrf.mxu2  ;;  %v16676_v17 = vor.u32 %v18856_v27, %v16675_v18  ;;  %v19003_v27 = vld [vmem:[%s25125_s1 + $0x28] sm:$0xff] }
 0x7c1   :  { %v8552_v44 = vpack.c.b16 %v8551_v35, %v8550_v6  ;;  %v7418_v63 = vadd.f32 %v7417_v37, %v7366_v42  ;;  %v8171_v21 = vadd.f32 %v8170_v7, %v8082_v48  ;;  %v23024_v5 = vpop.f32.mrf.mxu3  ;;  %v8089_v6 = vadd.f32 %v22957_v14, %v8000_v30  ;;  %10916 = vmatpush.bf16.msrb.mxu1 %v19003_v27 }
 0x7c3   :  { %16507 = vmatmul.msk.bf16.vlgmr.msrb.gmra.mxu0 %vm945_vm2, %v8552_v44  ;;  %v23009_v2 = vpop.f32.mrf.mxu1  ;;  %v8229_v43 = vmax.f32 %v8171_v21, 0.0 }
 0x7c4   :  { %8642 = vmatpush.bf16.msrb.mxu0 %v18836_v16  ;;  %v8008_v23 = vadd.f32 %v22668_v13, %v23009_v2  ;;  %v18866_v2 = vld [vmem:[%s25126_s0 + $0x97c] sm:$0xf] }
 0x7c5   :  { %v8261_v12 = vpack.c.bf16 %v8229_v43, %v8229_v43 }
 0x7c6   :  { %9449 = vmatmul.bf16.gmra.mxu1 %v16680_v1  ;;  %v8097_v25 = vadd.f32 %v23024_v5, %v8008_v23  ;;  %v19011_v5 = vld [vmem:[%s25125_s1 + $0x68] sm:$0xff]  ;;  %v18870_v23 = vld [vmem:[%s25126_s0 + $0x998] sm:$0xf0] }
 0x7c7   :  { %v8584_v50 = vunpack.c.l.b16 %v8261_v12  ;;  %v18864_v12 = vld [vmem:[%s25126_s0 + $0x968] sm:$0xf0]  ;;  %11005 = vmatpush.bf16.msra.mxu3 %v19011_v5 }
 0x7c8   :  { %v7368_v9 = vpop.f32.mrf.mxu0  ;;  %v8172_v60 = vpop.f32.mrf.mxu2  ;;  %8643 = vmatpush.bf16.msrb.mxu0 %v18835_v54 }
 0x7c9   :  { %v7433_v58 = vadd.f32 %v7432_v24, %v7368_v9  ;;  %v8173_v37 = vadd.f32 %v8172_v60, %v8084_v20  ;;  %v23044_v28 = vpop.f32.mrf.mxu3 }
 0x7cb   :  { %v8230_v38 = vmax.f32 %v8173_v37, 0.0  ;;  %v23028_v3 = vpop.f32.mrf.mxu1 }
 0x7cd   :  { %v8262_v32 = vpack.c.bf16 %v8230_v38, %v8230_v38  ;;  %16921 = vmatmul.msk.bf16.vlgmr.msra.gmra.mxu2 %vm480_vm1, %v16664_v10  ;;  %v16703_v10 = vld [vmem:[%s25126_s0 + $0x960] sm:$0xf]  ;;  %v18859_v38 = vld [vmem:[%s25126_s0 + $0x940] sm:$0xf0] }
 0x7ce   :  { %9543 = vmatmul.bf16.gmra.mxu3 %v16696_v52 }
 0x7cf   :  { %v8585_v59 = vunpack.c.l.b16 %v8262_v32 }
 0x7d0   :  { %v7400_v46 = vpop.f32.mrf.mxu0  ;;  %v8175_v0 = vpop.f32.mrf.mxu2 }
 0x7d1   :  { %v8586_v34 = vpack.c.b16 %v8585_v59, %v8584_v50  ;;  %v7419_v57 = vadd.f32 %v7418_v63, %v7400_v46  ;;  %v8176_v19 = vadd.f32 %v8175_v0, %v8087_v51  ;;  %v23073_v62 = vpop.f32.mrf.mxu3  ;;  %v8003_v63 = vadd.f32 %v22668_v13, %v22969_v36  ;;  %v16705_v36 = vld [vmem:[%s25126_s0 + $0x96c] sm:$0xf0] }
 0x7d2   :  { %v16688_v0 = vor.u32 %v18859_v38, %v16687_v4  ;;  %v16729_v4 = vld [vmem:[%s25126_s0 + $0x99c] sm:$0xf0] }
 0x7d3   :  { %v23052_v24 = vadd.f32 %v7419_v57, %v22335_v39  ;;  %16516 = vmatmul.msk.bf16.vlgmr.msra.gmra.mxu0 %vm945_vm2, %v8586_v34  ;;  %v23058_v47 = vpop.f32.mrf.mxu1  ;;  %v18861_v39 = vld [vmem:[%s25126_s0 + $0x950] sm:$0xf0]  ;;  %v8231_v48 = vmax.f32 %v8176_v19, 0.0  ;;  %v8092_v15 = vadd.f32 %v22984_v26, %v8003_v63  ;;  %v8005_v26 = vadd.f32 %v22668_v13, %v22988_v53  ;;  %v18862_v63 = vld [vmem:[%s25126_s0 + $0x958] sm:$0xf0] }
 0x7d4   :  { %8676 = vmatpush.bf16.msra.mxu0 %v18838_v11  ;;  %v16692_v55 = vor.u32 %v18861_v39, %v16691_v61  ;;  %v16704_v53 = vor.u32 %v18864_v12, %v16703_v10  ;;  %v16717_v61 = vld [vmem:[%s25126_s0 + $0x984] sm:$0xf0] }
 0x7d5   :  { %v8263_v44 = vpack.c.bf16 %v8231_v48, %v8231_v48  ;;  %v8094_v32 = vadd.f32 %v23001_v22, %v8005_v26  ;;  %v8010_v48 = vadd.f32 %v22668_v13, %v23028_v3  ;;  %v18867_v3 = vld [vmem:[%s25126_s0 + $0x980] sm:$0xf0] }
 0x7d6   :  { %9454 = vmatmul.bf16.gmra.mxu1 %v16692_v55 }
 0x7d7   :  { %v8618_v54 = vunpack.c.l.b16 %v8263_v44  ;;  %v16699_v44 = vld [vmem:[%s25126_s0 + $0x950] sm:$0xf] }
 0x7d8   :  { %v7402_v35 = vpop.f32.mrf.mxu0  ;;  %v8177_v42 = vpop.f32.mrf.mxu2  ;;  %8677 = vmatpush.bf16.msra.mxu0 %v18837_v40  ;;  %v18842_v40 = vld [vmem:[%s25128_s3 + $0x5b8] sm:$0xff] }
 0x7d9   :  { %v7434_v7 = vadd.f32 %v7433_v58, %v7402_v35  ;;  %v8178_v16 = vadd.f32 %v8177_v42, %v8089_v6  ;;  %v23093_v43 = vpop.f32.mrf.mxu3  ;;  %v18839_v58 = vld [vmem:[%s25128_s3 + $0x5a0] sm:$0xff]  ;;  %v16720_v6 = vor.u32 %v18866_v2, %v16717_v61  ;;  %v18841_v42 = vld [vmem:[%s25128_s3 + $0x5b0] sm:$0xff] }
 0x7db   :  { %v23078_v31 = vadd.f32 %v7434_v7, %v22361_v56  ;;  %v8232_v8 = vmax.f32 %v8178_v16, 0.0  ;;  %v23080_v21 = vpop.f32.mrf.mxu1  ;;  %v18863_v56 = vld [vmem:[%s25126_s0 + $0x964] sm:$0xf]  ;;  %v16715_v16 = vld [vmem:[%s25126_s0 + $0x978] sm:$0xf] }
 0x7dc   :  { %v16708_v9 = vor.u32 %v18863_v56, %v16705_v36  ;;  %v8013_v36 = vadd.f32 %v22668_v13, %v23058_v47  ;;  %v18869_v47 = vld [vmem:[%s25126_s0 + $0x994] sm:$0xf] }
 0x7dd   :  { %v8264_v14 = vpack.c.bf16 %v8232_v8, %v8232_v8  ;;  %16922 = vmatmul.msk.bf16.gmra.mxu2 %vm480_vm1, %v16676_v17  ;;  %v16716_v17 = vor.u32 %v18867_v3, %v16715_v16  ;;  %v8099_v8 = vadd.f32 %v23044_v28, %v8010_v48 }
 0x7de   :  { %9548 = vmatmul.bf16.gmra.mxu3 %v16708_v9 }
 0x7df   :  { %v8619_v49 = vunpack.c.l.b16 %v8264_v14 }
 0x7e0   :  { %v8180_v1 = vpop.f32.mrf.mxu2  ;;  %v8373_v45 = vpop.f32.mrf.mxu0 }
 0x7e1   :  { %v8620_v20 = vpack.c.b16 %v8619_v49, %v8618_v54  ;;  %v8181_v60 = vadd.f32 %v8180_v1, %v8092_v15  ;;  %v23116_v11 = vpop.f32.mrf.mxu3 }
 0x7e3   :  { %16525 = vmatmul.msk.bf16.vlgmr.msrb.gmra.mxu0 %vm945_vm2, %v8620_v20  ;;  %v23101_v37 = vpop.f32.mrf.mxu1  ;;  %v8233_v50 = vmax.f32 %v8181_v60, 0.0  ;;  %v8102_v60 = vadd.f32 %v23073_v62, %v8013_v36  ;;  %v16732_v62 = vor.u32 %v18869_v47, %v16729_v4  ;;  %v16739_v36 = vld [vmem:[%s25126_s0 + $0x9a8] sm:$0xf] }
 0x7e4   :  { %8710 = vmatpush.bf16.msrb.mxu0 %v18840_v41 }
 0x7e5   :  { %v8265_v33 = vpack.c.bf16 %v8233_v50, %v8233_v50 }
 0x7e6   :  { %9459 = vmatmul.bf16.gmra.mxu1 %v16704_v53  ;;  %v18844_v53 = vld [vmem:[%s25128_s3 + $0x5c8] sm:$0xff] }
 0x7e7   :  { %v8652_v22 = vunpack.c.l.b16 %v8265_v33  ;;  %v16727_v33 = vld [vmem:[%s25126_s0 + $0x990] sm:$0xf] }
 0x7e8   :  { %v8182_v51 = vpop.f32.mrf.mxu2  ;;  %v8375_v59 = vpop.f32.mrf.mxu0  ;;  %8711 = vmatpush.bf16.msrb.mxu0 %v18839_v58 }
 0x7e9   :  { %v8183_v46 = vadd.f32 %v8182_v51, %v8094_v32  ;;  %v23136_v18 = vpop.f32.mrf.mxu3  ;;  %v8015_v51 = vadd.f32 %v22668_v13, %v23080_v21  ;;  %v16728_v13 = vor.u32 %v18870_v23, %v16727_v33  ;;  %v16711_v21 = vld [vmem:[%s25126_s0 + $0x968] sm:$0xf] }
 0x7eb   :  { %v8234_v34 = vmax.f32 %v8183_v46, 0.0  ;;  %v23120_v57 = vpop.f32.mrf.mxu1  ;;  %v18843_v46 = vld [vmem:[%s25128_s3 + $0x5c0] sm:$0xff] }
 0x7ed   :  { %v8266_v29 = vpack.c.bf16 %v8234_v34, %v8234_v34  ;;  %16923 = vmatmul.msk.bf16.gmra.mxu2 %vm480_vm1, %v16688_v0  ;;  %v18865_v34 = vld [vmem:[%s25126_s0 + $0x970] sm:$0xf0] }
 0x7ee   :  { %9553 = vmatmul.bf16.gmra.mxu3 %v16720_v6  ;;  %v16712_v2 = vor.u32 %v18865_v34, %v16711_v21  ;;  %v18848_v34 = vld [vmem:[%s25128_s3 + $0x5e8] sm:$0xff] }
 0x7ef   :  { %v8653_v52 = vunpack.c.l.b16 %v8266_v29  ;;  %v8104_v29 = vadd.f32 %v23093_v43, %v8015_v51  ;;  %v23210_v43 = vld [vmem:[%s25127_s2] ss:$0 sm:$0xff] }
 0x7f0   :  { %v8185_v30 = vpop.f32.mrf.mxu2  ;;  %v8407_v19 = vpop.f32.mrf.mxu0 }
 0x7f1   :  { %v8654_v39 = vpack.c.b16 %v8653_v52, %v8652_v22  ;;  %v8888_v55 = vadd.f32 %v8407_v19, %v8373_v45  ;;  %v8186_v35 = vadd.f32 %v8185_v30, %v8097_v25  ;;  %v16700_v45 = vor.u32 %v18862_v63, %v16699_v44  ;;  %v23162_v41 = vpop.f32.mrf.mxu3  ;;  %v19015_v25 = vld [vmem:[%s25125_s1 + $0x88] sm:$0xff]  ;;  %v16741_v44 = vld [vmem:[%s25126_s0 + $0x9b4] sm:$0xf0] }
 0x7f2   :  { %11098 = vmatpush.bf16.msrb.mxu2 %v19015_v25 }
 0x7f3   :  { %16534 = vmatmul.msk.bf16.vlgmr.msra.gmra.mxu0 %vm945_vm2, %v8654_v39  ;;  %v23147_v7 = vpop.f32.mrf.mxu1  ;;  %v8235_v14 = vmax.f32 %v8186_v35, 0.0 }
 0x7f4   :  { %8744 = vmatpush.bf16.msra.mxu0 %v18842_v40 }
 0x7f5   :  { %v8267_v56 = vpack.c.bf16 %v8235_v14, %v8235_v14 }
 0x7f6   :  { %9464 = vmatmul.bf16.gmra.mxu1 %v16716_v17  ;;  %v18846_v17 = vld [vmem:[%s25128_s3 + $0x5d8] sm:$0xff] }
 0x7f7   :  { %v8686_v28 = vunpack.c.l.b16 %v8267_v56 }
 0x7f8   :  { %v8187_v54 = vpop.f32.mrf.mxu2  ;;  %v8409_v15 = vpop.f32.mrf.mxu0  ;;  %8745 = vmatpush.bf16.msra.mxu0 %v18841_v42 }
 0x7f9   :  { %v8188_v49 = vadd.f32 %v8187_v54, %v8099_v8  ;;  %v8903_v1 = vadd.f32 %v8409_v15, %v8375_v59  ;;  %v23179_v50 = vpop.f32.mrf.mxu3  ;;  %v19002_v54 = vld [vmem:[%s25125_s1 + $0x20] sm:$0xff] }
 0x7fa   :  { %10917 = vmatpush.bf16.msrb.mxu1 %v19002_v54 }
 0x7fb   :  { %v8236_v20 = vmax.f32 %v8188_v49, 0.0  ;;  %v23166_v9 = vpop.f32.mrf.mxu1  ;;  %v8020_v49 = vadd.f32 %v23210_v43, %v23120_v57  ;;  %v18873_v57 = vld [vmem:[%s25126_s0 + $0x9b0] sm:$0xf0] }
 0x7fd   :  { %v8268_v26 = vpack.c.bf16 %v8236_v20, %v8236_v20  ;;  %16924 = vmatmul.msk.bf16.gmra.mxu2 %vm480_vm1, %v16700_v45  ;;  %v18845_v45 = vld [vmem:[%s25128_s3 + $0x5d0] sm:$0xff]  ;;  %v16740_v20 = vor.u32 %v18873_v57, %v16739_v36  ;;  %v18850_v57 = vld [vmem:[%s25128_s3 + $0x5f8] sm:$0xff] }
 0x7fe   :  { %9558 = vmatmul.bf16.gmra.mxu3 %v16732_v62  ;;  %v8023_v62 = vadd.f32 %v23210_v43, %v23147_v7  ;;  %v18875_v7 = vld [vmem:[%s25126_s0 + $0x9c4] sm:$0xf] }
 0x7ff   :  { %v8687_v58 = vunpack.c.l.b16 %v8268_v26  ;;  %v16723_v26 = vld [vmem:[%s25126_s0 + $0x980] sm:$0xf] }
 0x800   :  { %v8190_v10 = vpop.f32.mrf.mxu2  ;;  %v8441_v12 = vpop.f32.mrf.mxu0  ;;  %v8112_v33 = vadd.f32 %v23162_v41, %v8023_v62 }
 0x801   :  { %v8688_v38 = vpack.c.b16 %v8687_v58, %v8686_v28  ;;  %v8889_v32 = vadd.f32 %v8888_v55, %v8441_v12  ;;  %v8191_v59 = vadd.f32 %v8190_v10, %v8102_v60  ;;  %v23205_v61 = vpop.f32.mrf.mxu3  ;;  %v8018_v55 = vadd.f32 %v23210_v43, %v23101_v37  ;;  %v18872_v37 = vld [vmem:[%s25126_s0 + $0x9ac] sm:$0xf] }
 0x802   :  { %v16744_v15 = vor.u32 %v18872_v37, %v16741_v44  ;;  %v18868_v28 = vld [vmem:[%s25126_s0 + $0x988] sm:$0xf0]  ;;  %v8109_v60 = vadd.f32 %v23136_v18, %v8020_v49 }
 0x803   :  { %16543 = vmatmul.msk.bf16.vlgmr.msrb.gmra.mxu0 %vm945_vm2, %v8688_v38  ;;  %v23187_v0 = vpop.f32.mrf.mxu1  ;;  %v8237_v22 = vmax.f32 %v8191_v59, 0.0  ;;  %v8107_v35 = vadd.f32 %v23116_v11, %v8018_v55  ;;  %v19010_v11 = vld [vmem:[%s25125_s1 + $0x60] sm:$0xff]  ;;  %v16724_v4 = vor.u32 %v18868_v28, %v16723_v26  ;;  %v18876_v55 = vld [vmem:[%s25126_s0 + $0x9c8] sm:$0xf0] }
 0x804   :  { %8778 = vmatpush.bf16.msrb.mxu0 %v18844_v53  ;;  %11006 = vmatpush.bf16.msra.mxu3 %v19010_v11 }
 0x805   :  { %v8269_v39 = vpack.c.bf16 %v8237_v22, %v8237_v22 }
 0x806   :  { %9469 = vmatmul.bf16.gmra.mxu1 %v16728_v13 }
 0x807   :  { %v8720_v48 = vunpack.c.l.b16 %v8269_v39  ;;  %v16751_v39 = vld [vmem:[%s25126_s0 + $0x9c0] sm:$0xf] }
 0x808   :  { %v8192_v52 = vpop.f32.mrf.mxu2  ;;  %v8443_v30 = vpop.f32.mrf.mxu0  ;;  %8779 = vmatpush.bf16.msrb.mxu0 %v18843_v46 }
 0x809   :  { %v8193_v19 = vadd.f32 %v8192_v52, %v8104_v29  ;;  %v8904_v40 = vadd.f32 %v8903_v1, %v8443_v30  ;;  %v23230_v14 = vpop.f32.mrf.mxu3  ;;  %v16753_v29 = vld [vmem:[%s25126_s0 + $0x9cc] sm:$0xf0]  ;;  %v8025_v30 = vadd.f32 %v23210_v43, %v23166_v9  ;;  %v16752_v9 = vor.u32 %v18876_v55, %v16751_v39 }
 0x80a   :  { %v16756_v41 = vor.u32 %v18875_v7, %v16753_v29 }
 0x80b   :  { %v8238_v5 = vmax.f32 %v8193_v19, 0.0  ;;  %v23214_v27 = vpop.f32.mrf.mxu1 }
 0x80d   :  { %v8270_v6 = vpack.c.bf16 %v8238_v5, %v8238_v5  ;;  %16925 = vmatmul.msk.bf16.gmra.mxu2 %vm480_vm1, %v16712_v2  ;;  %v16735_v5 = vld [vmem:[%s25126_s0 + $0x998] sm:$0xf] }
 0x80e   :  { %9563 = vmatmul.bf16.gmra.mxu3 %v16744_v15 }
 0x80f   :  { %v8721_v42 = vunpack.c.l.b16 %v8270_v6  ;;  %v18871_v6 = vld [vmem:[%s25126_s0 + $0x9a0] sm:$0xf0] }
 0x810   :  { %v8195_v16 = vpop.f32.mrf.mxu2  ;;  %v8475_v3 = vpop.f32.mrf.mxu0  ;;  %v16736_v37 = vor.u32 %v18871_v6, %v16735_v5  ;;  %v18919_v5 = vld [vmem:[%s25128_s3 + $0x608] sm:$0xff]  ;;  %v16777_v6 = vld [vmem:[%s25126_s0 + $0x9fc] sm:$0xf0] }
 0x811   :  { %v8722_v63 = vpack.c.b16 %v8721_v42, %v8720_v48  ;;  %v8890_v8 = vadd.f32 %v8889_v32, %v8475_v3  ;;  %v8196_v1 = vadd.f32 %v8195_v16, %v8107_v35  ;;  %v23256_v38 = vpop.f32.mrf.mxu3  ;;  %v8114_v48 = vadd.f32 %v23179_v50, %v8025_v30 }
 0x813   :  { %16552 = vmatmul.msk.bf16.vlgmr.msra.gmra.mxu0 %vm945_vm2, %v8722_v63  ;;  %v23241_v56 = vpop.f32.mrf.mxu1  ;;  %v8239_v58 = vmax.f32 %v8196_v1, 0.0 }
 0x814   :  { %8812 = vmatpush.bf16.msra.mxu0 %v18846_v17 }
 0x815   :  { %v8271_v32 = vpack.c.bf16 %v8239_v58, %v8239_v58  ;;  %v19001_v58 = vld [vmem:[%s25125_s1 + $0x18] sm:$0xff] }
 0x816   :  { %9474 = vmatmul.bf16.gmra.mxu1 %v16740_v20  ;;  %v16765_v20 = vld [vmem:[%s25126_s0 + $0x9e4] sm:$0xf0] }
 0x817   :  { %v8754_v18 = vunpack.c.l.b16 %v8271_v32  ;;  %10918 = vmatpush.bf16.msrb.mxu1 %v19001_v58  ;;  %v16763_v32 = vld [vmem:[%s25126_s0 + $0x9d8] sm:$0xf] }
 0x818   :  { %v8197_v10 = vpop.f32.mrf.mxu2  ;;  %v8477_v12 = vpop.f32.mrf.mxu0  ;;  %8813 = vmatpush.bf16.msra.mxu0 %v18845_v45 }
 0x819   :  { %v8198_v53 = vadd.f32 %v8197_v10, %v8109_v60  ;;  %v8905_v47 = vadd.f32 %v8904_v40, %v8477_v12  ;;  %v23273_v52 = vpop.f32.mrf.mxu3  ;;  %v18847_v40 = vld [vmem:[%s25128_s3 + $0x5e0] sm:$0xff]  ;;  %v8030_v12 = vadd.f32 %v23210_v43, %v23214_v27 }
 0x81a   :  { %v18879_v27 = vld [vmem:[%s25126_s0 + $0x9e0] sm:$0xf0] }
 0x81b   :  { %v8240_v51 = vmax.f32 %v8198_v53, 0.0  ;;  %v23260_v59 = vpop.f32.mrf.mxu1  ;;  %v16764_v62 = vor.u32 %v18879_v27, %v16763_v32  ;;  %v18921_v27 = vld [vmem:[%s25128_s3 + $0x618] sm:$0xff] }
 0x81d   :  { %v8272_v46 = vpack.c.bf16 %v8240_v51, %v8240_v51  ;;  %16926 = vmatmul.msk.bf16.gmra.mxu2 %vm480_vm1, %v16724_v4  ;;  %v16747_v51 = vld [vmem:[%s25126_s0 + $0x9b0] sm:$0xf] }
 0x81e   :  { %9568 = vmatmul.bf16.gmra.mxu3 %v16756_v41 }
 0x81f   :  { %v8755_v23 = vunpack.c.l.b16 %v8272_v46  ;;  %v18874_v46 = vld [vmem:[%s25126_s0 + $0x9b8] sm:$0xf0] }
 0x820   :  { %v8200_v13 = vpop.f32.mrf.mxu2  ;;  %v8509_v21 = vpop.f32.mrf.mxu0  ;;  %v16748_v7 = vor.u32 %v18874_v46, %v16747_v51 }
 0x821   :  { %v8756_v22 = vpack.c.b16 %v8755_v23, %v8754_v18  ;;  %v8891_v25 = vadd.f32 %v8890_v8, %v8509_v21  ;;  %v8201_v19 = vadd.f32 %v8200_v13, %v8112_v33  ;;  %v23296_v44 = vpop.f32.mrf.mxu3  ;;  %v8028_v8 = vadd.f32 %v23210_v43, %v23187_v0  ;;  %v18878_v0 = vld [vmem:[%s25126_s0 + $0x9dc] sm:$0xf] }
 0x822   :  { %v16768_v10 = vor.u32 %v18878_v0, %v16765_v20  ;;  %v8119_v18 = vadd.f32 %v23230_v14, %v8030_v12 }
 0x823   :  { %16561 = vmatmul.msk.bf16.vlgmr.msrb.gmra.mxu0 %vm945_vm2, %v8756_v22  ;;  %v23281_v2 = vpop.f32.mrf.mxu1  ;;  %v8241_v35 = vmax.f32 %v8201_v19, 0.0  ;;  %v8117_v49 = vadd.f32 %v23205_v61, %v8028_v8  ;;  %v19009_v61 = vld [vmem:[%s25125_s1 + $0x58] sm:$0xff] }
 0x824   :  { %8846 = vmatpush.bf16.msrb.mxu0 %v18848_v34  ;;  %11007 = vmatpush.bf16.msra.mxu3 %v19009_v61  ;;  %v18882_v8 = vld [vmem:[%s25126_s0 + $0x9f8] sm:$0xf0] }
 0x825   :  { %v8273_v63 = vpack.c.bf16 %v8241_v35, %v8241_v35 }
 0x826   :  { %9479 = vmatmul.bf16.gmra.mxu1 %v16752_v9 }
 0x827   :  { %v8788_v50 = vunpack.c.l.b16 %v8273_v63  ;;  %v16775_v63 = vld [vmem:[%s25126_s0 + $0x9f0] sm:$0xf] }
 0x828   :  { %v8202_v42 = vpop.f32.mrf.mxu2  ;;  %v8511_v16 = vpop.f32.mrf.mxu0  ;;  %8847 = vmatpush.bf16.msrb.mxu0 %v18847_v40 }
 0x829   :  { %v8203_v3 = vadd.f32 %v8202_v42, %v8114_v48  ;;  %v8906_v17 = vadd.f32 %v8905_v47, %v8511_v16  ;;  %v23316_v60 = vpop.f32.mrf.mxu3  ;;  %v18849_v47 = vld [vmem:[%s25128_s3 + $0x5f0] sm:$0xff]  ;;  %v8035_v16 = vadd.f32 %v23210_v43, %v23260_v59  ;;  %v16759_v59 = vld [vmem:[%s25126_s0 + $0x9c8] sm:$0xf] }
 0x82b   :  { %v8242_v11 = vmax.f32 %v8203_v3, 0.0  ;;  %v23300_v54 = vpop.f32.mrf.mxu1 }
 0x82d   :  { %v8274_v15 = vpack.c.bf16 %v8242_v11, %v8242_v11  ;;  %16927 = vmatmul.msk.bf16.gmra.mxu2 %vm480_vm1, %v16736_v37  ;;  %v18877_v11 = vld [vmem:[%s25126_s0 + $0x9d0] sm:$0xf0] }
 0x82e   :  { %9573 = vmatmul.bf16.gmra.mxu3 %v16768_v10  ;;  %v16760_v0 = vor.u32 %v18877_v11, %v16759_v59  ;;  %v18923_v59 = vld [vmem:[%s25128_s3 + $0x628] sm:$0xff]  ;;  %v16801_v11 = vld [vmem:[%s25126_s0 + $0xa2c] sm:$0xf0] }
 0x82f   :  { %v8789_v1 = vunpack.c.l.b16 %v8274_v15  ;;  %v8124_v15 = vadd.f32 %v23273_v52, %v8035_v16 }
 0x830   :  { %v8205_v45 = vpop.f32.mrf.mxu2  ;;  %v8543_v36 = vpop.f32.mrf.mxu0 }
 0x831   :  { %v8790_v26 = vpack.c.b16 %v8789_v1, %v8788_v50  ;;  %v8892_v28 = vadd.f32 %v8891_v25, %v8543_v36  ;;  %v8206_v53 = vadd.f32 %v8205_v45, %v8117_v49  ;;  %v23342_v29 = vpop.f32.mrf.mxu3  ;;  %v8033_v25 = vadd.f32 %v23210_v43, %v23241_v56  ;;  %v18881_v56 = vld [vmem:[%s25126_s0 + $0x9f4] sm:$0xf]  ;;  %v23385_v49 = vld [vmem:[%s25127_s2] ss:$0 sm:$0xff] }
 0x832   :  { %v16776_v43 = vor.u32 %v18882_v8, %v16775_v63 }
 0x833   :  { %16570 = vmatmul.msk.bf16.vlgmr.msra.gmra.mxu0 %vm945_vm2, %v8790_v26  ;;  %v23327_v4 = vpop.f32.mrf.mxu1  ;;  %v8243_v33 = vmax.f32 %v8206_v53, 0.0  ;;  %v8122_v40 = vadd.f32 %v23256_v38, %v8033_v25  ;;  %v16780_v38 = vor.u32 %v18881_v56, %v16777_v6 }
 0x834   :  { %8880 = vmatpush.bf16.msra.mxu0 %v18850_v57 }
 0x835   :  { %v8275_v22 = vpack.c.bf16 %v8243_v33, %v8243_v33  ;;  %v19000_v33 = vld [vmem:[%s25125_s1 + $0x10] sm:$0xff] }
 0x836   :  { %9484 = vmatmul.bf16.gmra.mxu1 %v16764_v62  ;;  %v16789_v62 = vld [vmem:[%s25126_s0 + $0xa14] sm:$0xf0] }
 0x837   :  { %v8822_v14 = vunpack.c.l.b16 %v8275_v22  ;;  %10919 = vmatpush.bf16.msrb.mxu1 %v19000_v33  ;;  %v16787_v22 = vld [vmem:[%s25126_s0 + $0xa08] sm:$0xf] }
 0x838   :  { %v8207_v23 = vpop.f32.mrf.mxu2  ;;  %v8545_v13 = vpop.f32.mrf.mxu0  ;;  %8881 = vmatpush.bf16.msra.mxu0 %v18849_v47 }
 0x839   :  { %v8208_v21 = vadd.f32 %v8207_v23, %v8119_v18  ;;  %v8907_v34 = vadd.f32 %v8906_v17, %v8545_v13  ;;  %v23359_v42 = vpop.f32.mrf.mxu3  ;;  %v18918_v17 = vld [vmem:[%s25128_s3 + $0x600] sm:$0xff]  ;;  %v9443_v13 = vadd.f32 %v23385_v49, %v23300_v54  ;;  %v18885_v54 = vld [vmem:[%s25126_s0 + $0xa10] sm:$0xf0] }
 0x83a   :  { %v16788_v25 = vor.u32 %v18885_v54, %v16787_v22 }
 0x83b   :  { %v8244_v41 = vmax.f32 %v8208_v21, 0.0  ;;  %v23346_v30 = vpop.f32.mrf.mxu1 }
 0x83d   :  { %v8276_v19 = vpack.c.bf16 %v8244_v41, %v8244_v41  ;;  %16928 = vmatmul.msk.bf16.gmra.mxu2 %vm480_vm1, %v16748_v7  ;;  %v16771_v41 = vld [vmem:[%s25126_s0 + $0x9e0] sm:$0xf] }
 0x83e   :  { %9578 = vmatmul.bf16.gmra.mxu3 %v16780_v38 }
 0x83f   :  { %v8823_v39 = vunpack.c.l.b16 %v8276_v19  ;;  %v18880_v19 = vld [vmem:[%s25126_s0 + $0x9e8] sm:$0xf0] }
 0x840   :  { %v8210_v55 = vpop.f32.mrf.mxu2  ;;  %v8577_v9 = vpop.f32.mrf.mxu0  ;;  %v16772_v56 = vor.u32 %v18880_v19, %v16771_v41  ;;  %v16813_v41 = vld [vmem:[%s25126_s0 + $0xa44] sm:$0xf0] }
 0x841   :  { %v8824_v48 = vpack.c.b16 %v8823_v39, %v8822_v14  ;;  %v8893_v35 = vadd.f32 %v8892_v28, %v8577_v9  ;;  %v8211_v3 = vadd.f32 %v8210_v55, %v8122_v40  ;;  %v23387_v20 = vpop.f32.mrf.mxu3  ;;  %v9441_v28 = vadd.f32 %v23385_v49, %v23281_v2  ;;  %v18884_v2 = vld [vmem:[%s25126_s0 + $0xa0c] sm:$0xf] }
 0x842   :  { %v16792_v23 = vor.u32 %v18884_v2, %v16789_v62  ;;  %v9532_v14 = vadd.f32 %v23316_v60, %v9443_v13 }
 0x843   :  { %16579 = vmatmul.msk.bf16.vlgmr.msrb.gmra.mxu0 %vm945_vm2, %v8824_v48  ;;  %v23367_v37 = vpop.f32.mrf.mxu1  ;;  %v8245_v50 = vmax.f32 %v8211_v3, 0.0  ;;  %v9530_v12 = vadd.f32 %v23296_v44, %v9441_v28  ;;  %v19008_v44 = vld [vmem:[%s25125_s1 + $0x50] sm:$0xff]  ;;  %v16799_v28 = vld [vmem:[%s25126_s0 + $0xa20] sm:$0xf] }
 0x844   :  { %9853 = vmatpush.bf16.msrb.mxu0 %v18919_v5  ;;  %11008 = vmatpush.bf16.msra.mxu3 %v19008_v44  ;;  %v9451_v44 = vadd.f32 %v23385_v49, %v23367_v37  ;;  %v18890_v37 = vld [vmem:[%s25126_s0 + $0xa3c] sm:$0xf] }
 0x845   :  { %v8277_v26 = vpack.c.bf16 %v8245_v50, %v8245_v50 }
 0x846   :  { %9489 = vmatmul.bf16.gmra.mxu1 %v16776_v43 }
 0x847   :  { %v8856_v10 = vunpack.c.l.b16 %v8277_v26 }
 0x848   :  { %v8212_v1 = vpop.f32.mrf.mxu2  ;;  %v8579_v45 = vpop.f32.mrf.mxu0  ;;  %9854 = vmatpush.bf16.msrb.mxu0 %v18918_v17 }
 0x849   :  { %v8213_v36 = vadd.f32 %v8212_v1, %v8124_v15  ;;  %v8908_v57 = vadd.f32 %v8907_v34, %v8579_v45  ;;  %v23407_v18 = vpop.f32.mrf.mxu3  ;;  %v18920_v34 = vld [vmem:[%s25128_s3 + $0x610] sm:$0xff] }
 0x84b   :  { %v8246_v52 = vmax.f32 %v8213_v36, 0.0  ;;  %v23391_v61 = vpop.f32.mrf.mxu1  ;;  %v9448_v36 = vadd.f32 %v23385_v49, %v23346_v30 }
 0x84d   :  { %v8278_v58 = vpack.c.bf16 %v8246_v52, %v8246_v52  ;;  %16929 = vmatmul.msk.bf16.gmra.mxu2 %vm480_vm1, %v16760_v0  ;;  %v18922_v0 = vld [vmem:[%s25128_s3 + $0x620] sm:$0xff]  ;;  %v18888_v52 = vld [vmem:[%s25126_s0 + $0xa28] sm:$0xf0] }
 0x84e   :  { %9583 = vmatmul.bf16.gmra.mxu3 %v16792_v23  ;;  %v16800_v30 = vor.u32 %v18888_v52, %v16799_v28 }
 0x84f   :  { %v8857_v53 = vunpack.c.l.b16 %v8278_v58  ;;  %v16783_v58 = vld [vmem:[%s25126_s0 + $0x9f8] sm:$0xf] }
 0x850   :  { %v8611_v47 = vpop.f32.mrf.mxu0  ;;  %v9618_v32 = vpop.f32.mrf.mxu2 }
 0x851   :  { %v8858_v51 = vpack.c.b16 %v8857_v53, %v8856_v10  ;;  %v8894_v46 = vadd.f32 %v8893_v35, %v8611_v47  ;;  %v9619_v21 = vadd.f32 %v9618_v32, %v9530_v12  ;;  %v23433_v6 = vpop.f32.mrf.mxu3  ;;  %v9446_v35 = vadd.f32 %v23385_v49, %v23327_v4  ;;  %v18887_v4 = vld [vmem:[%s25126_s0 + $0xa24] sm:$0xf] }
 0x852   :  { %v16804_v45 = vor.u32 %v18887_v4, %v16801_v11  ;;  %v18883_v10 = vld [vmem:[%s25126_s0 + $0xa00] sm:$0xf0]  ;;  %v9537_v12 = vadd.f32 %v23359_v42, %v9448_v36 }
 0x853   :  { %16588 = vmatmul.msk.bf16.vlgmr.msra.gmra.mxu0 %vm945_vm2, %v8858_v51  ;;  %v23418_v7 = vpop.f32.mrf.mxu1  ;;  %v9698_v40 = vmax.f32 %v9619_v21, 0.0  ;;  %v9535_v17 = vadd.f32 %v23342_v29, %v9446_v35  ;;  %v19014_v29 = vld [vmem:[%s25125_s1 + $0x80] sm:$0xff]  ;;  %v16784_v62 = vor.u32 %v18883_v10, %v16783_v58  ;;  %v9540_v21 = vadd.f32 %v23387_v20, %v9451_v44  ;;  %v19007_v20 = vld [vmem:[%s25125_s1 + $0x48] sm:$0xff]  ;;  %v16811_v35 = vld [vmem:[%s25126_s0 + $0xa38] sm:$0xf] }
 0x854   :  { %9887 = vmatpush.bf16.msra.mxu0 %v18921_v27  ;;  %11099 = vmatpush.bf16.msrb.mxu2 %v19014_v29  ;;  %v9456_v29 = vadd.f32 %v23385_v49, %v23418_v7  ;;  %v18927_v58 = vld [vmem:[%s25128_s3 + $0x648] sm:$0xff]  ;;  %v18893_v7 = vld [vmem:[%s25126_s0 + $0xa54] sm:$0xf]  ;;  %v16825_v10 = vld [vmem:[%s25126_s0 + $0xa5c] sm:$0xf0] }
 0x855   :  { %v9730_v48 = vpack.c.bf16 %v9698_v40, %v9698_v40  ;;  %11009 = vmatpush.bf16.msra.mxu3 %v19007_v20  ;;  %v18894_v44 = vld [vmem:[%s25126_s0 + $0xa58] sm:$0xf0] }
 0x856   :  { %9494 = vmatmul.bf16.gmra.mxu1 %v16788_v25  ;;  %v18925_v25 = vld [vmem:[%s25128_s3 + $0x638] sm:$0xff] }
 0x857   :  { %v9829_v60 = vunpack.c.l.b16 %v9730_v48 }
 0x858   :  { %v8613_v39 = vpop.f32.mrf.mxu0  ;;  %v9620_v55 = vpop.f32.mrf.mxu2  ;;  %9888 = vmatpush.bf16.msra.mxu0 %v18920_v34 }
 0x859   :  { %v8909_v9 = vadd.f32 %v8908_v57, %v8613_v39  ;;  %v9621_v5 = vadd.f32 %v9620_v55, %v9532_v14  ;;  %v23453_v1 = vpop.f32.mrf.mxu3  ;;  %v18999_v39 = vld [vmem:[%s25125_s1 + $0x8] sm:$0xff]  ;;  %v16816_v55 = vor.u32 %v18890_v37, %v16813_v41 }
 0x85a   :  { %10920 = vmatpush.bf16.msrb.mxu1 %v18999_v39 }
 0x85b   :  { %v9699_v38 = vmax.f32 %v9621_v5, 0.0  ;;  %v23437_v16 = vpop.f32.mrf.mxu1 }
 0x85d   :  { %v9731_v3 = vpack.c.bf16 %v9699_v38, %v9699_v38  ;;  %16930 = vmatmul.msk.bf16.gmra.mxu2 %vm480_vm1, %v16772_v56  ;;  %v18924_v56 = vld [vmem:[%s25128_s3 + $0x630] sm:$0xff] }
 0x85e   :  { %9588 = vmatmul.bf16.gmra.mxu3 %v16804_v45 }
 0x85f   :  { %v9830_v63 = vunpack.c.l.b16 %v9731_v3  ;;  %v16795_v3 = vld [vmem:[%s25126_s0 + $0xa10] sm:$0xf] }
 0x860   :  { %v8645_v8 = vpop.f32.mrf.mxu0  ;;  %v9623_v43 = vpop.f32.mrf.mxu2 }
 0x861   :  { %v9831_v15 = vpack.c.b16 %v9830_v63, %v9829_v60  ;;  %v8895_v50 = vadd.f32 %v8894_v46, %v8645_v8  ;;  %v9624_v57 = vadd.f32 %v9623_v43, %v9535_v17  ;;  %v23476_v51 = vpop.f32.mrf.mxu3  ;;  %v18886_v60 = vld [vmem:[%s25126_s0 + $0xa18] sm:$0xf0] }
 0x862   :  { %v16796_v11 = vor.u32 %v18886_v60, %v16795_v3 }
 0x863   :  { %17009 = vmatmul.msk.bf16.vlgmr.msrb.gmra.mxu0 %vm945_vm2, %v9831_v15  ;;  %v23461_v26 = vpop.f32.mrf.mxu1  ;;  %v9700_v53 = vmax.f32 %v9624_v57, 0.0 }
 0x864   :  { %9921 = vmatpush.bf16.msrb.mxu0 %v18923_v59 }
 0x865   :  { %v9732_v46 = vpack.c.bf16 %v9700_v53, %v9700_v53 }
 0x866   :  { %9499 = vmatmul.bf16.gmra.mxu1 %v16800_v30 }
 0x867   :  { %v9863_v42 = vunpack.c.l.b16 %v9732_v46  ;;  %v16823_v46 = vld [vmem:[%s25126_s0 + $0xa50] sm:$0xf] }
 0x868   :  { %v8647_v47 = vpop.f32.mrf.mxu0  ;;  %v9625_v32 = vpop.f32.mrf.mxu2  ;;  %9922 = vmatpush.bf16.msrb.mxu0 %v18922_v0  ;;  %v9545_v0 = vadd.f32 %v23433_v6, %v9456_v29  ;;  %v16828_v6 = vor.u32 %v18893_v7, %v16825_v10 }
 0x869   :  { %v8910_v27 = vadd.f32 %v8909_v9, %v8647_v47  ;;  %v9626_v2 = vadd.f32 %v9625_v32, %v9537_v12  ;;  %v23496_v40 = vpop.f32.mrf.mxu3  ;;  %v9453_v9 = vadd.f32 %v23385_v49, %v23391_v61  ;;  %v18891_v61 = vld [vmem:[%s25126_s0 + $0xa40] sm:$0xf0]  ;;  %v9458_v32 = vadd.f32 %v23385_v49, %v23437_v16 }
 0x86a   :  { %v16812_v38 = vor.u32 %v18891_v61, %v16811_v35  ;;  %v16824_v16 = vor.u32 %v18894_v44, %v16823_v46  ;;  %v18929_v61 = vld [vmem:[%s25128_s3 + $0x658] sm:$0xff] }
 0x86b   :  { %v9701_v33 = vmax.f32 %v9626_v2, 0.0  ;;  %v23480_v23 = vpop.f32.mrf.mxu1  ;;  %v9542_v17 = vadd.f32 %v23407_v18, %v9453_v9  ;;  %v18926_v2 = vld [vmem:[%s25128_s3 + $0x640] sm:$0xff] }
 0x86d   :  { %v9733_v13 = vpack.c.bf16 %v9701_v33, %v9701_v33  ;;  %16931 = vmatmul.msk.bf16.gmra.mxu2 %vm480_vm1, %v16784_v62  ;;  %v16807_v33 = vld [vmem:[%s25126_s0 + $0xa28] sm:$0xf] }
 0x86e   :  { %9593 = vmatmul.bf16.gmra.mxu3 %v16816_v55 }
 0x86f   :  { %v9864_v34 = vunpack.c.l.b16 %v9733_v13  ;;  %v18889_v13 = vld [vmem:[%s25126_s0 + $0xa30] sm:$0xf0] }
 0x870   :  { %v8679_v22 = vpop.f32.mrf.mxu0  ;;  %v9628_v54 = vpop.f32.mrf.mxu2  ;;  %v16808_v37 = vor.u32 %v18889_v13, %v16807_v33  ;;  %v18931_v33 = vld [vmem:[%s25128_s3 + $0x668] sm:$0xff]  ;;  %v17213_v13 = vld [vmem:[%s25126_s0 + $0xa8c] sm:$0xf0] }
 0x871   :  { %v9865_v19 = vpack.c.b16 %v9864_v34, %v9863_v42  ;;  %v8896_v14 = vadd.f32 %v8895_v50, %v8679_v22  ;;  %v9629_v5 = vadd.f32 %v9628_v54, %v9540_v21  ;;  %v23522_v15 = vpop.f32.mrf.mxu3  ;;  %v9547_v42 = vadd.f32 %v23453_v1, %v9458_v32 }
 0x873   :  { %17018 = vmatmul.msk.bf16.vlgmr.msra.gmra.mxu0 %vm945_vm2, %v9865_v19  ;;  %v23507_v48 = vpop.f32.mrf.mxu1  ;;  %v9702_v63 = vmax.f32 %v9629_v5, 0.0 }
 0x874   :  { %9955 = vmatpush.bf16.msra.mxu0 %v18925_v25 }
 0x875   :  { %v9734_v50 = vpack.c.bf16 %v9702_v63, %v9702_v63  ;;  %v18998_v63 = vld [vmem:[%s25125_s1] sm:$0xff] }
 0x876   :  { %9504 = vmatmul.bf16.gmra.mxu1 %v16812_v38  ;;  %v16837_v38 = vld [vmem:[%s25126_s0 + $0xa74] sm:$0xf0] }
 0x877   :  { %v9897_v18 = vunpack.c.l.b16 %v9734_v50  ;;  %10921 = vmatpush.bf16.msrb.mxu1 %v18998_v63  ;;  %v16835_v50 = vld [vmem:[%s25126_s0 + $0xa68] sm:$0xf] }
 0x878   :  { %v8681_v8 = vpop.f32.mrf.mxu0  ;;  %v9630_v43 = vpop.f32.mrf.mxu2  ;;  %9956 = vmatpush.bf16.msra.mxu0 %v18924_v56 }
 0x879   :  { %v8911_v59 = vadd.f32 %v8910_v27, %v8681_v8  ;;  %v9631_v4 = vadd.f32 %v9630_v43, %v9542_v17  ;;  %v23539_v47 = vpop.f32.mrf.mxu3  ;;  %v9463_v43 = vadd.f32 %v23385_v49, %v23480_v23  ;;  %v18897_v23 = vld [vmem:[%s25126_s0 + $0xa70] sm:$0xf0] }
 0x87a   :  { %v16836_v29 = vor.u32 %v18897_v23, %v16835_v50  ;;  %v18933_v23 = vld [vmem:[%s25128_s3 + $0x678] sm:$0xff] }
 0x87b   :  { %v9703_v45 = vmax.f32 %v9631_v4, 0.0  ;;  %v23526_v36 = vpop.f32.mrf.mxu1  ;;  %v18928_v4 = vld [vmem:[%s25128_s3 + $0x650] sm:$0xff] }
 0x87d   :  { %v9735_v57 = vpack.c.bf16 %v9703_v45, %v9703_v45  ;;  %16932 = vmatmul.msk.bf16.gmra.mxu2 %vm480_vm1, %v16796_v11  ;;  %v16819_v45 = vld [vmem:[%s25126_s0 + $0xa40] sm:$0xf] }
 0x87e   :  { %9598 = vmatmul.bf16.gmra.mxu3 %v16828_v6 }
 0x87f   :  { %v9898_v28 = vunpack.c.l.b16 %v9735_v57  ;;  %v18892_v57 = vld [vmem:[%s25126_s0 + $0xa48] sm:$0xf0] }
 0x880   :  { %v8713_v52 = vpop.f32.mrf.mxu0  ;;  %v9633_v30 = vpop.f32.mrf.mxu2  ;;  %v16820_v7 = vor.u32 %v18892_v57, %v16819_v45 }
 0x881   :  { %v9899_v12 = vpack.c.b16 %v9898_v28, %v9897_v18  ;;  %v8897_v53 = vadd.f32 %v8896_v14, %v8713_v52  ;;  %v9634_v27 = vadd.f32 %v9633_v30, %v9545_v0  ;;  %v23562_v41 = vpop.f32.mrf.mxu3  ;;  %v9461_v14 = vadd.f32 %v23385_v49, %v23461_v26  ;;  %v18896_v26 = vld [vmem:[%s25126_s0 + $0xa6c] sm:$0xf] }
 0x882   :  { %v16840_v8 = vor.u32 %v18896_v26, %v16837_v38  ;;  %v9552_v18 = vadd.f32 %v23496_v40, %v9463_v43 }
 0x883   :  { %17027 = vmatmul.msk.bf16.vlgmr.msrb.gmra.mxu0 %vm945_vm2, %v9899_v12  ;;  %v23547_v62 = vpop.f32.mrf.mxu1  ;;  %v9704_v21 = vmax.f32 %v9634_v27, 0.0  ;;  %v9550_v9 = vadd.f32 %v23476_v51, %v9461_v14  ;;  %v19006_v51 = vld [vmem:[%s25125_s1 + $0x40] sm:$0xff]  ;;  %v18951_v14 = vld [vmem:[%s25126_s0 + $0xa88] sm:$0xf0] }
 0x884   :  { %9989 = vmatpush.bf16.msrb.mxu0 %v18927_v58  ;;  %11010 = vmatpush.bf16.msra.mxu3 %v19006_v51 }
 0x885   :  { %v9736_v19 = vpack.c.bf16 %v9704_v21, %v9704_v21 }
 0x886   :  { %9509 = vmatmul.bf16.gmra.mxu1 %v16824_v16 }
 0x887   :  { %v9931_v1 = vunpack.c.l.b16 %v9736_v19  ;;  %v17211_v19 = vld [vmem:[%s25126_s0 + $0xa80] sm:$0xf] }
 0x888   :  { %v8715_v34 = vpop.f32.mrf.mxu0  ;;  %v9635_v22 = vpop.f32.mrf.mxu2  ;;  %9990 = vmatpush.bf16.msrb.mxu0 %v18926_v2 }
 0x889   :  { %v8912_v54 = vadd.f32 %v8911_v59, %v8715_v34  ;;  %v9636_v25 = vadd.f32 %v9635_v22, %v9547_v42  ;;  %v23582_v17 = vpop.f32.mrf.mxu3  ;;  %v9468_v22 = vadd.f32 %v23385_v49, %v23526_v36  ;;  %v17212_v36 = vor.u32 %v18951_v14, %v17211_v19 }
 0x88b   :  { %v9705_v20 = vmax.f32 %v9636_v25, 0.0  ;;  %v23566_v39 = vpop.f32.mrf.mxu1  ;;  %v18930_v25 = vld [vmem:[%s25128_s3 + $0x660] sm:$0xff] }
 0x88d   :  { %v9737_v55 = vpack.c.bf16 %v9705_v20, %v9705_v20  ;;  %16933 = vmatmul.msk.bf16.gmra.mxu2 %vm480_vm1, %v16808_v37  ;;  %v16831_v20 = vld [vmem:[%s25126_s0 + $0xa58] sm:$0xf] }
 0x88e   :  { %9603 = vmatmul.bf16.gmra.mxu3 %v16840_v8 }
 0x88f   :  { %v9932_v5 = vunpack.c.l.b16 %v9737_v55  ;;  %v18895_v55 = vld [vmem:[%s25126_s0 + $0xa60] sm:$0xf0] }
 0x890   :  { %v8747_v56 = vpop.f32.mrf.mxu0  ;;  %v9638_v35 = vpop.f32.mrf.mxu2  ;;  %v16832_v26 = vor.u32 %v18895_v55, %v16831_v20 }
 0x891   :  { %v9933_v3 = vpack.c.b16 %v9932_v5, %v9931_v1  ;;  %v8898_v60 = vadd.f32 %v8897_v53, %v8747_v56  ;;  %v9639_v59 = vadd.f32 %v9638_v35, %v9550_v9  ;;  %v23608_v10 = vpop.f32.mrf.mxu3  ;;  %v9466_v53 = vadd.f32 %v23385_v49, %v23507_v48  ;;  %v18950_v48 = vld [vmem:[%s25126_s0 + $0xa84] sm:$0xf] }
 0x892   :  { %v9557_v1 = vadd.f32 %v23539_v47, %v9468_v22 }
 0x893   :  { %17036 = vmatmul.msk.bf16.vlgmr.msra.gmra.mxu0 %vm945_vm2, %v9933_v3  ;;  %v23593_v11 = vpop.f32.mrf.mxu1  ;;  %v9706_v0 = vmax.f32 %v9639_v59, 0.0  ;;  %v9555_v2 = vadd.f32 %v23522_v15, %v9466_v53  ;;  %v17216_v15 = vor.u32 %v18950_v48, %v17213_v13  ;;  %v18932_v53 = vld [vmem:[%s25128_s3 + $0x670] sm:$0xff] }
 0x894   :  { %10023 = vmatpush.bf16.msra.mxu0 %v18929_v61 }
 0x895   :  { %v9738_v12 = vpack.c.bf16 %v9706_v0, %v9706_v0  ;;  %v19115_v0 = vld [vmem:[%s25125_s1 + $0x90] sm:$0x30] }
 0x896   :  { %9514 = vmatmul.bf16.gmra.mxu1 %v16836_v29  ;;  %v17225_v29 = vld [vmem:[%s25126_s0 + $0xaa4] sm:$0xf0] }
 0x897   :  { %v9965_v40 = vunpack.c.l.b16 %v9738_v12 }
 0x898   :  { %v8749_v28 = vpop.f32.mrf.mxu0  ;;  %v9640_v52 = vpop.f32.mrf.mxu2  ;;  %10024 = vmatpush.bf16.msra.mxu0 %v18928_v4 }
 0x899   :  { %v8913_v30 = vadd.f32 %v8912_v54, %v8749_v28  ;;  %v9641_v58 = vadd.f32 %v9640_v52, %v9552_v18  ;;  %v23625_v34 = vpop.f32.mrf.mxu3  ;;  %v18031_v18 = vld [vmem:[%s25125_s1 + $0x90] sm:$0xf] }
 0x89b   :  { %v9707_v6 = vmax.f32 %v9641_v58, 0.0  ;;  %v23612_v32 = vpop.f32.mrf.mxu1  ;;  %v19104_v58 = vld [vmem:[%s25125_s1 + $0x38] sm:$0xff] }
 0x89c   :  { %12397 = vmatpush.bf16.msra.mxu1 %v19104_v58 }
 0x89d   :  { %v9739_v27 = vpack.c.bf16 %v9707_v6, %v9707_v6  ;;  %16934 = vmatmul.msk.bf16.gmra.mxu2 %vm480_vm1, %v16820_v7  ;;  %v9473_v7 = vadd.f32 %v23385_v49, %v23566_v39  ;;  %v18954_v39 = vld [vmem:[%s25126_s0 + $0xaa0] sm:$0xf0] }
 0x89e   :  { %11011 = vmatmul.bf16.vlgmr.msra.gmra.mxu3 %v17216_v15 }
 0x89f   :  { %v9966_v46 = vunpack.c.l.b16 %v9739_v27 }
 0x8a0   :  { %v8781_v44 = vpop.f32.mrf.mxu0  ;;  %v9643_v16 = vpop.f32.mrf.mxu2 }
 0x8a1   :  { %v9967_v42 = vpack.c.b16 %v9966_v46, %v9965_v40  ;;  %v8899_v21 = vadd.f32 %v8898_v60, %v8781_v44  ;;  %v9644_v54 = vadd.f32 %v9643_v16, %v9555_v2  ;;  %v23648_v38 = vpop.f32.mrf.mxu3  ;;  %v9471_v60 = vadd.f32 %v23385_v49, %v23547_v62  ;;  %v18953_v62 = vld [vmem:[%s25126_s0 + $0xa9c] sm:$0xf]  ;;  %v17223_v40 = vld [vmem:[%s25126_s0 + $0xa98] sm:$0xf]  ;;  %v16843_v46 = vld [vmem:[%s25126_s0 + $0xa70] sm:$0xf] }
 0x8a2   :  { %v17228_v52 = vor.u32 %v18953_v62, %v17225_v29  ;;  %v17224_v2 = vor.u32 %v18954_v39, %v17223_v40  ;;  %v18898_v44 = vld [vmem:[%s25126_s0 + $0xa78] sm:$0xf0]  ;;  %v9562_v16 = vadd.f32 %v23582_v17, %v9473_v7 }
 0x8a3   :  { %17045 = vmatmul.msk.bf16.vlgmr.msrb.gmra.mxu0 %vm945_vm2, %v9967_v42  ;;  %v23633_v37 = vpop.f32.mrf.mxu1  ;;  %v9708_v9 = vmax.f32 %v9644_v54, 0.0  ;;  %v9560_v43 = vadd.f32 %v23562_v41, %v9471_v60  ;;  %v19112_v41 = vld [vmem:[%s25125_s1 + $0x78] sm:$0xff]  ;;  %v16844_v15 = vor.u32 %v18898_v44, %v16843_v46 }
 0x8a4   :  { %10057 = vmatpush.bf16.msrb.mxu0 %v18931_v33  ;;  %12486 = vmatpush.bf16.msrb.mxu3 %v19112_v41  ;;  %v18937_v39 = vld [vmem:[%s25128_s3 + $0x698] sm:$0xff] }
 0x8a5   :  { %v9740_v3 = vpack.c.bf16 %v9708_v9, %v9708_v9 }
 0x8a6   :  { %10922 = vmatmul.bf16.vlgmr.msrb.gmra.mxu1 %v17212_v36 }
 0x8a7   :  { %v9999_v47 = vunpack.c.l.b16 %v9740_v3  ;;  %v9478_v3 = vadd.f32 %v23385_v49, %v23612_v32 }
 0x8a8   :  { %v8783_v5 = vpop.f32.mrf.mxu0  ;;  %v9645_v56 = vpop.f32.mrf.mxu2  ;;  %10058 = vmatpush.bf16.msrb.mxu0 %v18930_v25  ;;  %v9476_v25 = vadd.f32 %v23385_v49, %v23593_v11  ;;  %v18956_v11 = vld [vmem:[%s25126_s0 + $0xab4] sm:$0xf] }
 0x8a9   :  { %v8914_v35 = vadd.f32 %v8913_v30, %v8783_v5  ;;  %v9646_v61 = vadd.f32 %v9645_v56, %v9557_v1  ;;  %v23674_v28 = vpop.f32.mrf.mxu3  ;;  %v18032_v30 = vor.u32 %v19115_v0, %v18031_v18  ;;  %v18935_v5 = vld [vmem:[%s25128_s3 + $0x688] sm:$0xff]  ;;  %v17237_v56 = vld [vmem:[%s25126_s0 + $0xabc] sm:$0xf0] }
 0x8aa   :  { %v9565_v20 = vadd.f32 %v23608_v10, %v9476_v25  ;;  %v17240_v10 = vor.u32 %v18956_v11, %v17237_v56  ;;  %v17247_v25 = vld [vmem:[%s25126_s0 + $0xac8] sm:$0xf] }
 0x8ab   :  { %v9709_v51 = vmax.f32 %v9646_v61, 0.0  ;;  %v23652_v63 = vpop.f32.mrf.mxu1  ;;  %v12395_v6 = vsel %vm529_vm0, %v18032_v30, 0 }
 0x8ac   :  { %12580 = vmatpush.bf16.msra.mxu2 %v12395_v6 }
 0x8ad   :  { %v9741_v8 = vpack.c.bf16 %v9709_v51, %v9709_v51  ;;  %16935 = vmatmul.msk.bf16.gmra.mxu2 %vm480_vm1, %v16832_v26  ;;  %v18934_v51 = vld [vmem:[%s25128_s3 + $0x680] sm:$0xff] }
 0x8ae   :  { %11016 = vmatmul.bf16.gmra.mxu3 %v17228_v52  ;;  %v9481_v52 = vadd.f32 %v23385_v49, %v23633_v37  ;;  %v18959_v37 = vld [vmem:[%s25126_s0 + $0xacc] sm:$0xf] }
 0x8af   :  { %v10000_v59 = vunpack.c.l.b16 %v9741_v8 }
 0x8b0   :  { %v8815_v4 = vpop.f32.mrf.mxu0  ;;  %v9648_v50 = vpop.f32.mrf.mxu2 }
 0x8b1   :  { %v10001_v45 = vpack.c.b16 %v10000_v59, %v9999_v47  ;;  %v8900_v57 = vadd.f32 %v8899_v21, %v8815_v4  ;;  %v9649_v12 = vadd.f32 %v9648_v50, %v9560_v43  ;;  %v23701_v22 = vpop.f32.mrf.mxu3  ;;  %v17235_v47 = vld [vmem:[%s25126_s0 + $0xab0] sm:$0xf]  ;;  %v18957_v43 = vld [vmem:[%s25126_s0 + $0xab8] sm:$0xf0]  ;;  %v17219_v59 = vld [vmem:[%s25126_s0 + $0xa88] sm:$0xf]  ;;  %v9567_v50 = vadd.f32 %v23625_v34, %v9478_v3 }
 0x8b2   :  { %v17236_v32 = vor.u32 %v18957_v43, %v17235_v47  ;;  %v18952_v4 = vld [vmem:[%s25126_s0 + $0xa90] sm:$0xf0] }
 0x8b3   :  { %17054 = vmatmul.msk.bf16.vlgmr.msra.gmra.mxu0 %vm945_vm2, %v10001_v45  ;;  %v23686_v27 = vpop.f32.mrf.mxu1  ;;  %v9710_v33 = vmax.f32 %v9649_v12, 0.0  ;;  %v17220_v41 = vor.u32 %v18952_v4, %v17219_v59  ;;  %v9570_v12 = vadd.f32 %v23648_v38, %v9481_v52  ;;  %v19111_v38 = vld [vmem:[%s25125_s1 + $0x70] sm:$0xff]  ;;  %v18939_v4 = vld [vmem:[%s25128_s3 + $0x6a8] sm:$0xff]  ;;  %v17243_v52 = vld [vmem:[%s25126_s0 + $0xab8] sm:$0xf] }
 0x8b4   :  { %10091 = vmatpush.bf16.msra.mxu0 %v18933_v23  ;;  %12487 = vmatpush.bf16.msrb.mxu3 %v19111_v38 }
 0x8b5   :  { %v9742_v54 = vpack.c.bf16 %v9710_v33, %v9710_v33  ;;  %v19103_v33 = vld [vmem:[%s25125_s1 + $0x30] sm:$0xff] }
 0x8b6   :  { %10927 = vmatmul.bf16.gmra.mxu1 %v17224_v2  ;;  %v17249_v2 = vld [vmem:[%s25126_s0 + $0xad4] sm:$0xf0] }
 0x8b7   :  { %v10033_v17 = vunpack.c.l.b16 %v9742_v54  ;;  %12398 = vmatpush.bf16.msra.mxu1 %v19103_v33 }
 0x8b8   :  { %v8817_v48 = vpop.f32.mrf.mxu0  ;;  %v9650_v13 = vpop.f32.mrf.mxu2  ;;  %10092 = vmatpush.bf16.msra.mxu0 %v18932_v53 }
 0x8b9   :  { %v8915_v42 = vadd.f32 %v8914_v35, %v8817_v48  ;;  %v9651_v21 = vadd.f32 %v9650_v13, %v9562_v16  ;;  %v23718_v26 = vpop.f32.mrf.mxu3  ;;  %v17252_v48 = vor.u32 %v18959_v37, %v17249_v2  ;;  %v9483_v13 = vadd.f32 %v23385_v49, %v23652_v63 }
 0x8bb   :  { %v9711_v19 = vmax.f32 %v9651_v21, 0.0  ;;  %v23705_v14 = vpop.f32.mrf.mxu1 }
 0x8bd   :  { %v9743_v36 = vpack.c.bf16 %v9711_v19, %v9711_v19  ;;  %16936 = vmatmul.msk.bf16.gmra.mxu2 %vm480_vm1, %v16844_v15  ;;  %v18936_v15 = vld [vmem:[%s25128_s3 + $0x690] sm:$0xff]  ;;  %v17231_v19 = vld [vmem:[%s25126_s0 + $0xaa0] sm:$0xf] }
 0x8be   :  { %11021 = vmatmul.bf16.gmra.mxu3 %v17240_v10 }
 0x8bf   :  { %v10034_v55 = vunpack.c.l.b16 %v9743_v36  ;;  %v18955_v36 = vld [vmem:[%s25126_s0 + $0xaa8] sm:$0xf0] }
 0x8c0   :  { %v8849_v1 = vpop.f32.mrf.mxu0  ;;  %v9653_v9 = vpop.f32.mrf.mxu2  ;;  %v17232_v11 = vor.u32 %v18955_v36, %v17231_v19  ;;  %v19102_v36 = vld [vmem:[%s25125_s1 + $0x28] sm:$0xff] }
 0x8c1   :  { %v10035_v35 = vpack.c.b16 %v10034_v55, %v10033_v17  ;;  %v8901_v61 = vadd.f32 %v8900_v57, %v8849_v1  ;;  %v9654_v60 = vadd.f32 %v9653_v9, %v9565_v20  ;;  %v23741_v18 = vpop.f32.mrf.mxu3  ;;  %v9572_v17 = vadd.f32 %v23674_v28, %v9483_v13  ;;  %12399 = vmatpush.bf16.msra.mxu1 %v19102_v36 }
 0x8c3   :  { %17063 = vmatmul.msk.bf16.vlgmr.msrb.gmra.mxu0 %vm945_vm2, %v10035_v35  ;;  %v23726_v8 = vpop.f32.mrf.mxu1  ;;  %v9712_v23 = vmax.f32 %v9654_v60, 0.0 }
 0x8c4   :  { %10125 = vmatpush.bf16.msrb.mxu0 %v18935_v5  ;;  %v9491_v2 = vadd.f32 %v23385_v49, %v23726_v8  ;;  %v18965_v8 = vld [vmem:[%s25126_s0 + $0xafc] sm:$0xf] }
 0x8c5   :  { %v9744_v0 = vpack.c.bf16 %v9712_v23, %v9712_v23 }
 0x8c6   :  { %10932 = vmatmul.bf16.gmra.mxu1 %v17236_v32  ;;  %v9580_v33 = vadd.f32 %v23741_v18, %v9491_v2  ;;  %v19110_v18 = vld [vmem:[%s25125_s1 + $0x68] sm:$0xff]  ;;  %v18969_v2 = vld [vmem:[%s25126_s0 + $0xb18] sm:$0xf0] }
 0x8c7   :  { %v10067_v34 = vunpack.c.l.b16 %v9744_v0  ;;  %v18963_v0 = vld [vmem:[%s25126_s0 + $0xae8] sm:$0xf0]  ;;  %12488 = vmatpush.bf16.msrb.mxu3 %v19110_v18 }
 0x8c8   :  { %v8851_v62 = vpop.f32.mrf.mxu0  ;;  %v9655_v29 = vpop.f32.mrf.mxu2  ;;  %10126 = vmatpush.bf16.msrb.mxu0 %v18934_v51 }
 0x8c9   :  { %v8916_v45 = vadd.f32 %v8915_v42, %v8851_v62  ;;  %v9656_v57 = vadd.f32 %v9655_v29, %v9567_v50  ;;  %v23761_v16 = vpop.f32.mrf.mxu3 }
 0x8cb   :  { %v9713_v30 = vmax.f32 %v9656_v57, 0.0  ;;  %v23745_v58 = vpop.f32.mrf.mxu1 }
 0x8cd   :  { %v9745_v7 = vpack.c.bf16 %v9713_v30, %v9713_v30  ;;  %17477 = vmatmul.msk.bf16.vlgmr.msrb.gmra.mxu2 %vm480_vm1, %v17220_v41  ;;  %v17259_v41 = vld [vmem:[%s25126_s0 + $0xae0] sm:$0xf]  ;;  %v18958_v30 = vld [vmem:[%s25126_s0 + $0xac0] sm:$0xf0] }
 0x8ce   :  { %11026 = vmatmul.bf16.gmra.mxu3 %v17252_v48 }
 0x8cf   :  { %v10068_v53 = vunpack.c.l.b16 %v9745_v7 }
 0x8d0   :  { %v8883_v6 = vpop.f32.mrf.mxu0  ;;  %v9658_v40 = vpop.f32.mrf.mxu2 }
 0x8d1   :  { %v10069_v46 = vpack.c.b16 %v10068_v53, %v10067_v34  ;;  %v8902_v44 = vadd.f32 %v8901_v61, %v8883_v6  ;;  %v9659_v21 = vadd.f32 %v9658_v40, %v9570_v12  ;;  %v23790_v56 = vpop.f32.mrf.mxu3  ;;  %v9486_v61 = vadd.f32 %v23385_v49, %v23686_v27  ;;  %v17261_v27 = vld [vmem:[%s25126_s0 + $0xaec] sm:$0xf0] }
 0x8d2   :  { %v17244_v40 = vor.u32 %v18958_v30, %v17243_v52  ;;  %v17285_v52 = vld [vmem:[%s25126_s0 + $0xb1c] sm:$0xf0] }
 0x8d3   :  { %v23769_v42 = vadd.f32 %v8902_v44, %v23052_v24  ;;  %17072 = vmatmul.msk.bf16.vlgmr.msra.gmra.mxu0 %vm945_vm2, %v10069_v46  ;;  %v23775_v54 = vpop.f32.mrf.mxu1  ;;  %v18960_v24 = vld [vmem:[%s25126_s0 + $0xad0] sm:$0xf0]  ;;  %v9714_v20 = vmax.f32 %v9659_v21, 0.0  ;;  %v9575_v47 = vadd.f32 %v23701_v22, %v9486_v61  ;;  %v9488_v22 = vadd.f32 %v23385_v49, %v23705_v14  ;;  %v18961_v61 = vld [vmem:[%s25126_s0 + $0xad8] sm:$0xf0] }
 0x8d4   :  { %10159 = vmatpush.bf16.msra.mxu0 %v18937_v39  ;;  %v17248_v63 = vor.u32 %v18960_v24, %v17247_v25  ;;  %v17260_v14 = vor.u32 %v18963_v0, %v17259_v41  ;;  %v17273_v25 = vld [vmem:[%s25126_s0 + $0xb04] sm:$0xf0] }
 0x8d5   :  { %v9746_v35 = vpack.c.bf16 %v9714_v20, %v9714_v20  ;;  %v9577_v7 = vadd.f32 %v23718_v26, %v9488_v22  ;;  %v9493_v20 = vadd.f32 %v23385_v49, %v23745_v58  ;;  %v18966_v58 = vld [vmem:[%s25126_s0 + $0xb00] sm:$0xf0] }
 0x8d6   :  { %10937 = vmatmul.bf16.gmra.mxu1 %v17248_v63 }
 0x8d7   :  { %v10101_v51 = vunpack.c.l.b16 %v9746_v35  ;;  %v17255_v35 = vld [vmem:[%s25126_s0 + $0xad0] sm:$0xf] }
 0x8d8   :  { %v8885_v55 = vpop.f32.mrf.mxu0  ;;  %v9660_v1 = vpop.f32.mrf.mxu2  ;;  %10160 = vmatpush.bf16.msra.mxu0 %v18936_v15  ;;  %v18941_v15 = vld [vmem:[%s25128_s3 + $0x6b8] sm:$0xff] }
 0x8d9   :  { %v8917_v9 = vadd.f32 %v8916_v45, %v8885_v55  ;;  %v9661_v5 = vadd.f32 %v9660_v1, %v9572_v17  ;;  %v23810_v23 = vpop.f32.mrf.mxu3  ;;  %v18938_v45 = vld [vmem:[%s25128_s3 + $0x6a0] sm:$0xff]  ;;  %v17276_v17 = vor.u32 %v18965_v8, %v17273_v25  ;;  %v18940_v1 = vld [vmem:[%s25128_s3 + $0x6b0] sm:$0xff] }
 0x8db   :  { %v23795_v10 = vadd.f32 %v8917_v9, %v23078_v31  ;;  %v9715_v3 = vmax.f32 %v9661_v5, 0.0  ;;  %v23797_v60 = vpop.f32.mrf.mxu1  ;;  %v18962_v31 = vld [vmem:[%s25126_s0 + $0xae4] sm:$0xf]  ;;  %v17271_v5 = vld [vmem:[%s25126_s0 + $0xaf8] sm:$0xf] }
 0x8dc   :  { %v17264_v62 = vor.u32 %v18962_v31, %v17261_v27  ;;  %v9496_v27 = vadd.f32 %v23385_v49, %v23775_v54  ;;  %v18968_v54 = vld [vmem:[%s25126_s0 + $0xb14] sm:$0xf] }
 0x8dd   :  { %v9747_v28 = vpack.c.bf16 %v9715_v3, %v9715_v3  ;;  %17478 = vmatmul.msk.bf16.gmra.mxu2 %vm480_vm1, %v17232_v11  ;;  %v17272_v11 = vor.u32 %v18966_v58, %v17271_v5  ;;  %v9582_v3 = vadd.f32 %v23761_v16, %v9493_v20 }
 0x8de   :  { %11031 = vmatmul.bf16.gmra.mxu3 %v17264_v62 }
 0x8df   :  { %v10102_v43 = vunpack.c.l.b16 %v9747_v28 }
 0x8e0   :  { %v9663_v32 = vpop.f32.mrf.mxu2  ;;  %v9856_v59 = vpop.f32.mrf.mxu0 }
 0x8e1   :  { %v10103_v50 = vpack.c.b16 %v10102_v43, %v10101_v51  ;;  %v9664_v29 = vadd.f32 %v9663_v32, %v9575_v47  ;;  %v23833_v39 = vpop.f32.mrf.mxu3 }
 0x8e3   :  { %17081 = vmatmul.msk.bf16.vlgmr.msrb.gmra.mxu0 %vm945_vm2, %v10103_v50  ;;  %v23818_v57 = vpop.f32.mrf.mxu1  ;;  %v9716_v34 = vmax.f32 %v9664_v29, 0.0  ;;  %v9585_v29 = vadd.f32 %v23790_v56, %v9496_v27  ;;  %v17288_v56 = vor.u32 %v18968_v54, %v17285_v52  ;;  %v17295_v27 = vld [vmem:[%s25126_s0 + $0xb28] sm:$0xf] }
 0x8e4   :  { %10193 = vmatpush.bf16.msrb.mxu0 %v18939_v4 }
 0x8e5   :  { %v9748_v37 = vpack.c.bf16 %v9716_v34, %v9716_v34 }
 0x8e6   :  { %10942 = vmatmul.bf16.gmra.mxu1 %v17260_v14  ;;  %v18943_v14 = vld [vmem:[%s25128_s3 + $0x6c8] sm:$0xff] }
 0x8e7   :  { %v10135_v26 = vunpack.c.l.b16 %v9748_v37  ;;  %v17283_v37 = vld [vmem:[%s25126_s0 + $0xb10] sm:$0xf] }
 0x8e8   :  { %v9665_v12 = vpop.f32.mrf.mxu2  ;;  %v9858_v53 = vpop.f32.mrf.mxu0  ;;  %10194 = vmatpush.bf16.msrb.mxu0 %v18938_v45 }
 0x8e9   :  { %v9666_v6 = vadd.f32 %v9665_v12, %v9577_v7  ;;  %v23853_v19 = vpop.f32.mrf.mxu3  ;;  %v9498_v12 = vadd.f32 %v23385_v49, %v23797_v60  ;;  %v17284_v49 = vor.u32 %v18969_v2, %v17283_v37  ;;  %v17267_v60 = vld [vmem:[%s25126_s0 + $0xae8] sm:$0xf] }
 0x8eb   :  { %v9717_v46 = vmax.f32 %v9666_v6, 0.0  ;;  %v23837_v44 = vpop.f32.mrf.mxu1  ;;  %v18942_v6 = vld [vmem:[%s25128_s3 + $0x6c0] sm:$0xff] }
 0x8ed   :  { %v9749_v38 = vpack.c.bf16 %v9717_v46, %v9717_v46  ;;  %17479 = vmatmul.msk.bf16.gmra.mxu2 %vm480_vm1, %v17244_v40  ;;  %v18964_v46 = vld [vmem:[%s25126_s0 + $0xaf0] sm:$0xf0] }
 0x8ee   :  { %11036 = vmatmul.bf16.gmra.mxu3 %v17276_v17  ;;  %v17268_v8 = vor.u32 %v18964_v46, %v17267_v60  ;;  %v18947_v46 = vld [vmem:[%s25128_s3 + $0x6e8] sm:$0xff] }
 0x8ef   :  { %v10136_v48 = vunpack.c.l.b16 %v9749_v38  ;;  %v9587_v38 = vadd.f32 %v23810_v23, %v9498_v12  ;;  %v23927_v23 = vld [vmem:[%s25127_s2] ss:$0 sm:$0xff] }
 0x8f0   :  { %v9668_v13 = vpop.f32.mrf.mxu2  ;;  %v9890_v21 = vpop.f32.mrf.mxu0 }
 0x8f1   :  { %v10137_v24 = vpack.c.b16 %v10136_v48, %v10135_v26  ;;  %v10371_v63 = vadd.f32 %v9890_v21, %v9856_v59  ;;  %v9669_v55 = vadd.f32 %v9668_v13, %v9580_v33  ;;  %v17256_v59 = vor.u32 %v18961_v61, %v17255_v35  ;;  %v23879_v4 = vpop.f32.mrf.mxu3  ;;  %v19114_v33 = vld [vmem:[%s25125_s1 + $0x88] sm:$0xff]  ;;  %v17297_v35 = vld [vmem:[%s25126_s0 + $0xb34] sm:$0xf0] }
 0x8f2   :  { %12581 = vmatpush.bf16.msra.mxu2 %v19114_v33 }
 0x8f3   :  { %17090 = vmatmul.msk.bf16.vlgmr.msra.gmra.mxu0 %vm945_vm2, %v10137_v24  ;;  %v23864_v9 = vpop.f32.mrf.mxu1  ;;  %v9718_v28 = vmax.f32 %v9669_v55, 0.0 }
 0x8f4   :  { %10227 = vmatpush.bf16.msra.mxu0 %v18941_v15 }
 0x8f5   :  { %v9750_v31 = vpack.c.bf16 %v9718_v28, %v9718_v28 }
 0x8f6   :  { %10947 = vmatmul.bf16.gmra.mxu1 %v17272_v11  ;;  %v18945_v11 = vld [vmem:[%s25128_s3 + $0x6d8] sm:$0xff] }
 0x8f7   :  { %v10169_v16 = vunpack.c.l.b16 %v9750_v31 }
 0x8f8   :  { %v9670_v51 = vpop.f32.mrf.mxu2  ;;  %v9892_v47 = vpop.f32.mrf.mxu0  ;;  %10228 = vmatpush.bf16.msra.mxu0 %v18940_v1 }
 0x8f9   :  { %v9671_v43 = vadd.f32 %v9670_v51, %v9582_v3  ;;  %v10386_v32 = vadd.f32 %v9892_v47, %v9858_v53  ;;  %v23896_v34 = vpop.f32.mrf.mxu3  ;;  %v19101_v51 = vld [vmem:[%s25125_s1 + $0x20] sm:$0xff] }
 0x8fa   :  { %12400 = vmatpush.bf16.msra.mxu1 %v19101_v51 }
 0x8fb   :  { %v9719_v50 = vmax.f32 %v9671_v43, 0.0  ;;  %v23883_v62 = vpop.f32.mrf.mxu1  ;;  %v9503_v43 = vadd.f32 %v23927_v23, %v23837_v44  ;;  %v18972_v44 = vld [vmem:[%s25126_s0 + $0xb30] sm:$0xf0] }
 0x8fd   :  { %v9751_v22 = vpack.c.bf16 %v9719_v50, %v9719_v50  ;;  %17480 = vmatmul.msk.bf16.gmra.mxu2 %vm480_vm1, %v17256_v59  ;;  %v18944_v59 = vld [vmem:[%s25128_s3 + $0x6d0] sm:$0xff]  ;;  %v17296_v50 = vor.u32 %v18972_v44, %v17295_v27  ;;  %v18949_v44 = vld [vmem:[%s25128_s3 + $0x6f8] sm:$0xff] }
 0x8fe   :  { %11041 = vmatmul.bf16.gmra.mxu3 %v17288_v56  ;;  %v9506_v56 = vadd.f32 %v23927_v23, %v23864_v9  ;;  %v18974_v9 = vld [vmem:[%s25126_s0 + $0xb44] sm:$0xf] }
 0x8ff   :  { %v10170_v45 = vunpack.c.l.b16 %v9751_v22  ;;  %v17279_v22 = vld [vmem:[%s25126_s0 + $0xb00] sm:$0xf] }
 0x900   :  { %v9673_v41 = vpop.f32.mrf.mxu2  ;;  %v9924_v0 = vpop.f32.mrf.mxu0  ;;  %v9595_v37 = vadd.f32 %v23879_v4, %v9506_v56 }
 0x901   :  { %v10171_v30 = vpack.c.b16 %v10170_v45, %v10169_v16  ;;  %v10372_v7 = vadd.f32 %v10371_v63, %v9924_v0  ;;  %v9674_v53 = vadd.f32 %v9673_v41, %v9585_v29  ;;  %v23922_v25 = vpop.f32.mrf.mxu3  ;;  %v9501_v63 = vadd.f32 %v23927_v23, %v23818_v57  ;;  %v18971_v57 = vld [vmem:[%s25126_s0 + $0xb2c] sm:$0xf] }
 0x902   :  { %v17300_v47 = vor.u32 %v18971_v57, %v17297_v35  ;;  %v18967_v16 = vld [vmem:[%s25126_s0 + $0xb08] sm:$0xf0]  ;;  %v9592_v29 = vadd.f32 %v23853_v19, %v9503_v43 }
 0x903   :  { %17099 = vmatmul.msk.bf16.vlgmr.msrb.gmra.mxu0 %vm945_vm2, %v10171_v30  ;;  %v23904_v40 = vpop.f32.mrf.mxu1  ;;  %v9720_v26 = vmax.f32 %v9674_v53, 0.0  ;;  %v9590_v55 = vadd.f32 %v23833_v39, %v9501_v63  ;;  %v19109_v39 = vld [vmem:[%s25125_s1 + $0x60] sm:$0xff]  ;;  %v17280_v52 = vor.u32 %v18967_v16, %v17279_v22  ;;  %v18975_v63 = vld [vmem:[%s25126_s0 + $0xb48] sm:$0xf0] }
 0x904   :  { %10261 = vmatpush.bf16.msrb.mxu0 %v18943_v14  ;;  %12489 = vmatpush.bf16.msrb.mxu3 %v19109_v39 }
 0x905   :  { %v9752_v24 = vpack.c.bf16 %v9720_v26, %v9720_v26 }
 0x906   :  { %10952 = vmatmul.bf16.gmra.mxu1 %v17284_v49 }
 0x907   :  { %v10203_v20 = vunpack.c.l.b16 %v9752_v24  ;;  %v17307_v24 = vld [vmem:[%s25126_s0 + $0xb40] sm:$0xf] }
 0x908   :  { %v9675_v48 = vpop.f32.mrf.mxu2  ;;  %v9926_v13 = vpop.f32.mrf.mxu0  ;;  %10262 = vmatpush.bf16.msrb.mxu0 %v18942_v6 }
 0x909   :  { %v9676_v21 = vadd.f32 %v9675_v48, %v9587_v38  ;;  %v10387_v15 = vadd.f32 %v10386_v32, %v9926_v13  ;;  %v23947_v28 = vpop.f32.mrf.mxu3  ;;  %v17309_v38 = vld [vmem:[%s25126_s0 + $0xb4c] sm:$0xf0]  ;;  %v9508_v13 = vadd.f32 %v23927_v23, %v23883_v62  ;;  %v17308_v62 = vor.u32 %v18975_v63, %v17307_v24 }
 0x90a   :  { %v17312_v4 = vor.u32 %v18974_v9, %v17309_v38 }
 0x90b   :  { %v9721_v18 = vmax.f32 %v9676_v21, 0.0  ;;  %v23931_v36 = vpop.f32.mrf.mxu1 }
 0x90d   :  { %v9753_v17 = vpack.c.bf16 %v9721_v18, %v9721_v18  ;;  %17481 = vmatmul.msk.bf16.gmra.mxu2 %vm480_vm1, %v17268_v8  ;;  %v17291_v18 = vld [vmem:[%s25126_s0 + $0xb18] sm:$0xf] }
 0x90e   :  { %11046 = vmatmul.bf16.gmra.mxu3 %v17300_v47 }
 0x90f   :  { %v10204_v1 = vunpack.c.l.b16 %v9753_v17  ;;  %v18970_v17 = vld [vmem:[%s25126_s0 + $0xb20] sm:$0xf0] }
 0x910   :  { %v9678_v5 = vpop.f32.mrf.mxu2  ;;  %v9958_v58 = vpop.f32.mrf.mxu0  ;;  %v17292_v57 = vor.u32 %v18970_v17, %v17291_v18  ;;  %v19018_v18 = vld [vmem:[%s25128_s3 + $0x708] sm:$0xff]  ;;  %v17333_v17 = vld [vmem:[%s25126_s0 + $0xb7c] sm:$0xf0] }
 0x911   :  { %v10205_v61 = vpack.c.b16 %v10204_v1, %v10203_v20  ;;  %v10373_v3 = vadd.f32 %v10372_v7, %v9958_v58  ;;  %v9679_v32 = vadd.f32 %v9678_v5, %v9590_v55  ;;  %v23973_v30 = vpop.f32.mrf.mxu3  ;;  %v9597_v20 = vadd.f32 %v23896_v34, %v9508_v13 }
 0x913   :  { %17108 = vmatmul.msk.bf16.vlgmr.msra.gmra.mxu0 %vm945_vm2, %v10205_v61  ;;  %v23958_v31 = vpop.f32.mrf.mxu1  ;;  %v9722_v45 = vmax.f32 %v9679_v32, 0.0 }
 0x914   :  { %10295 = vmatpush.bf16.msra.mxu0 %v18945_v11 }
 0x915   :  { %v9754_v7 = vpack.c.bf16 %v9722_v45, %v9722_v45  ;;  %v19100_v45 = vld [vmem:[%s25125_s1 + $0x18] sm:$0xff] }
 0x916   :  { %10957 = vmatmul.bf16.gmra.mxu1 %v17296_v50  ;;  %v17321_v50 = vld [vmem:[%s25126_s0 + $0xb64] sm:$0xf0] }
 0x917   :  { %v10237_v19 = vunpack.c.l.b16 %v9754_v7  ;;  %12401 = vmatpush.bf16.msra.mxu1 %v19100_v45  ;;  %v17319_v7 = vld [vmem:[%s25126_s0 + $0xb58] sm:$0xf] }
 0x918   :  { %v9680_v41 = vpop.f32.mrf.mxu2  ;;  %v9960_v0 = vpop.f32.mrf.mxu0  ;;  %10296 = vmatpush.bf16.msra.mxu0 %v18944_v59 }
 0x919   :  { %v9681_v14 = vadd.f32 %v9680_v41, %v9592_v29  ;;  %v10388_v54 = vadd.f32 %v10387_v15, %v9960_v0  ;;  %v23990_v48 = vpop.f32.mrf.mxu3  ;;  %v18946_v15 = vld [vmem:[%s25128_s3 + $0x6e0] sm:$0xff]  ;;  %v9513_v0 = vadd.f32 %v23927_v23, %v23931_v36 }
 0x91a   :  { %v18978_v36 = vld [vmem:[%s25126_s0 + $0xb60] sm:$0xf0] }
 0x91b   :  { %v9723_v12 = vmax.f32 %v9681_v14, 0.0  ;;  %v23977_v53 = vpop.f32.mrf.mxu1  ;;  %v17320_v56 = vor.u32 %v18978_v36, %v17319_v7  ;;  %v19020_v36 = vld [vmem:[%s25128_s3 + $0x718] sm:$0xff] }
 0x91d   :  { %v9755_v6 = vpack.c.bf16 %v9723_v12, %v9723_v12  ;;  %17482 = vmatmul.msk.bf16.gmra.mxu2 %vm480_vm1, %v17280_v52  ;;  %v17303_v12 = vld [vmem:[%s25126_s0 + $0xb30] sm:$0xf] }
 0x91e   :  { %11051 = vmatmul.bf16.gmra.mxu3 %v17312_v4 }
 0x91f   :  { %v10238_v2 = vunpack.c.l.b16 %v9755_v6  ;;  %v18973_v6 = vld [vmem:[%s25126_s0 + $0xb38] sm:$0xf0] }
 0x920   :  { %v9683_v49 = vpop.f32.mrf.mxu2  ;;  %v9992_v60 = vpop.f32.mrf.mxu0  ;;  %v17304_v9 = vor.u32 %v18973_v6, %v17303_v12 }
 0x921   :  { %v10239_v26 = vpack.c.b16 %v10238_v2, %v10237_v19  ;;  %v10374_v33 = vadd.f32 %v10373_v3, %v9992_v60  ;;  %v9684_v21 = vadd.f32 %v9683_v49, %v9595_v37  ;;  %v24013_v35 = vpop.f32.mrf.mxu3  ;;  %v9511_v3 = vadd.f32 %v23927_v23, %v23904_v40  ;;  %v18977_v40 = vld [vmem:[%s25126_s0 + $0xb5c] sm:$0xf] }
 0x922   :  { %v17324_v41 = vor.u32 %v18977_v40, %v17321_v50  ;;  %v9602_v19 = vadd.f32 %v23947_v28, %v9513_v0 }
 0x923   :  { %17117 = vmatmul.msk.bf16.vlgmr.msrb.gmra.mxu0 %vm945_vm2, %v10239_v26  ;;  %v23998_v8 = vpop.f32.mrf.mxu1  ;;  %v9724_v55 = vmax.f32 %v9684_v21, 0.0  ;;  %v9600_v43 = vadd.f32 %v23922_v25, %v9511_v3  ;;  %v19108_v25 = vld [vmem:[%s25125_s1 + $0x58] sm:$0xff] }
 0x924   :  { %10329 = vmatpush.bf16.msrb.mxu0 %v18947_v46  ;;  %12490 = vmatpush.bf16.msrb.mxu3 %v19108_v25  ;;  %v18981_v3 = vld [vmem:[%s25126_s0 + $0xb78] sm:$0xf0] }
 0x925   :  { %v9756_v61 = vpack.c.bf16 %v9724_v55, %v9724_v55 }
 0x926   :  { %10962 = vmatmul.bf16.gmra.mxu1 %v17308_v62 }
 0x927   :  { %v10271_v34 = vunpack.c.l.b16 %v9756_v61  ;;  %v17331_v61 = vld [vmem:[%s25126_s0 + $0xb70] sm:$0xf] }
 0x928   :  { %v9685_v1 = vpop.f32.mrf.mxu2  ;;  %v9994_v5 = vpop.f32.mrf.mxu0  ;;  %10330 = vmatpush.bf16.msrb.mxu0 %v18946_v15 }
 0x929   :  { %v9686_v58 = vadd.f32 %v9685_v1, %v9597_v20  ;;  %v10389_v11 = vadd.f32 %v10388_v54, %v9994_v5  ;;  %v24033_v29 = vpop.f32.mrf.mxu3  ;;  %v18948_v54 = vld [vmem:[%s25128_s3 + $0x6f0] sm:$0xff]  ;;  %v9518_v5 = vadd.f32 %v23927_v23, %v23977_v53  ;;  %v17315_v53 = vld [vmem:[%s25126_s0 + $0xb48] sm:$0xf] }
 0x92b   :  { %v9725_v39 = vmax.f32 %v9686_v58, 0.0  ;;  %v24017_v51 = vpop.f32.mrf.mxu1 }
 0x92d   :  { %v9757_v47 = vpack.c.bf16 %v9725_v39, %v9725_v39  ;;  %17483 = vmatmul.msk.bf16.gmra.mxu2 %vm480_vm1, %v17292_v57  ;;  %v18976_v39 = vld [vmem:[%s25126_s0 + $0xb50] sm:$0xf0] }
 0x92e   :  { %11056 = vmatmul.bf16.gmra.mxu3 %v17324_v41  ;;  %v17316_v40 = vor.u32 %v18976_v39, %v17315_v53  ;;  %v19022_v53 = vld [vmem:[%s25128_s3 + $0x728] sm:$0xff]  ;;  %v17357_v39 = vld [vmem:[%s25126_s0 + $0xbac] sm:$0xf0] }
 0x92f   :  { %v10272_v32 = vunpack.c.l.b16 %v9757_v47  ;;  %v9607_v47 = vadd.f32 %v23990_v48, %v9518_v5 }
 0x930   :  { %v9688_v59 = vpop.f32.mrf.mxu2  ;;  %v10026_v27 = vpop.f32.mrf.mxu0 }
 0x931   :  { %v10273_v22 = vpack.c.b16 %v10272_v32, %v10271_v34  ;;  %v10375_v16 = vadd.f32 %v10374_v33, %v10026_v27  ;;  %v9689_v14 = vadd.f32 %v9688_v59, %v9600_v43  ;;  %v24059_v38 = vpop.f32.mrf.mxu3  ;;  %v9516_v33 = vadd.f32 %v23927_v23, %v23958_v31  ;;  %v18980_v31 = vld [vmem:[%s25126_s0 + $0xb74] sm:$0xf]  ;;  %v24102_v43 = vld [vmem:[%s25127_s2] ss:$0 sm:$0xff] }
 0x932   :  { %v17332_v23 = vor.u32 %v18981_v3, %v17331_v61 }
 0x933   :  { %17126 = vmatmul.msk.bf16.vlgmr.msra.gmra.mxu0 %vm945_vm2, %v10273_v22  ;;  %v24044_v52 = vpop.f32.mrf.mxu1  ;;  %v9726_v37 = vmax.f32 %v9689_v14, 0.0  ;;  %v9605_v15 = vadd.f32 %v23973_v30, %v9516_v33  ;;  %v17336_v30 = vor.u32 %v18980_v31, %v17333_v17 }
 0x934   :  { %10363 = vmatpush.bf16.msra.mxu0 %v18949_v44 }
 0x935   :  { %v9758_v26 = vpack.c.bf16 %v9726_v37, %v9726_v37  ;;  %v19099_v37 = vld [vmem:[%s25125_s1 + $0x10] sm:$0xff] }
 0x936   :  { %10967 = vmatmul.bf16.gmra.mxu1 %v17320_v56  ;;  %v17345_v56 = vld [vmem:[%s25126_s0 + $0xb94] sm:$0xf0] }
 0x937   :  { %v10305_v28 = vunpack.c.l.b16 %v9758_v26  ;;  %12402 = vmatpush.bf16.msra.mxu1 %v19099_v37  ;;  %v17343_v26 = vld [vmem:[%s25126_s0 + $0xb88] sm:$0xf] }
 0x938   :  { %v9690_v2 = vpop.f32.mrf.mxu2  ;;  %v10028_v49 = vpop.f32.mrf.mxu0  ;;  %10364 = vmatpush.bf16.msra.mxu0 %v18948_v54 }
 0x939   :  { %v9691_v60 = vadd.f32 %v9690_v2, %v9602_v19  ;;  %v10390_v46 = vadd.f32 %v10389_v11, %v10028_v49  ;;  %v24076_v1 = vpop.f32.mrf.mxu3  ;;  %v19017_v11 = vld [vmem:[%s25128_s3 + $0x700] sm:$0xff]  ;;  %v10926_v49 = vadd.f32 %v24102_v43, %v24017_v51  ;;  %v18984_v51 = vld [vmem:[%s25126_s0 + $0xb90] sm:$0xf0] }
 0x93a   :  { %v17344_v33 = vor.u32 %v18984_v51, %v17343_v26 }
 0x93b   :  { %v9727_v4 = vmax.f32 %v9691_v60, 0.0  ;;  %v24063_v13 = vpop.f32.mrf.mxu1 }
 0x93d   :  { %v9759_v21 = vpack.c.bf16 %v9727_v4, %v9727_v4  ;;  %17484 = vmatmul.msk.bf16.gmra.mxu2 %vm480_vm1, %v17304_v9  ;;  %v17327_v4 = vld [vmem:[%s25126_s0 + $0xb60] sm:$0xf] }
 0x93e   :  { %11061 = vmatmul.bf16.gmra.mxu3 %v17336_v30 }
 0x93f   :  { %v10306_v24 = vunpack.c.l.b16 %v9759_v21  ;;  %v18979_v21 = vld [vmem:[%s25126_s0 + $0xb68] sm:$0xf0] }
 0x940   :  { %v9693_v63 = vpop.f32.mrf.mxu2  ;;  %v10060_v62 = vpop.f32.mrf.mxu0  ;;  %v17328_v31 = vor.u32 %v18979_v21, %v17327_v4  ;;  %v17369_v4 = vld [vmem:[%s25126_s0 + $0xbc4] sm:$0xf0] }
 0x941   :  { %v10307_v20 = vpack.c.b16 %v10306_v24, %v10305_v28  ;;  %v10376_v55 = vadd.f32 %v10375_v16, %v10060_v62  ;;  %v9694_v58 = vadd.f32 %v9693_v63, %v9605_v15  ;;  %v24104_v50 = vpop.f32.mrf.mxu3  ;;  %v10924_v16 = vadd.f32 %v24102_v43, %v23998_v8  ;;  %v18983_v8 = vld [vmem:[%s25126_s0 + $0xb8c] sm:$0xf] }
 0x942   :  { %v17348_v2 = vor.u32 %v18983_v8, %v17345_v56  ;;  %v11015_v28 = vadd.f32 %v24033_v29, %v10926_v49 }
 0x943   :  { %17135 = vmatmul.msk.bf16.vlgmr.msrb.gmra.mxu0 %vm945_vm2, %v10307_v20  ;;  %v24084_v57 = vpop.f32.mrf.mxu1  ;;  %v9728_v34 = vmax.f32 %v9694_v58, 0.0  ;;  %v11013_v0 = vadd.f32 %v24013_v35, %v10924_v16  ;;  %v19107_v35 = vld [vmem:[%s25125_s1 + $0x50] sm:$0xff]  ;;  %v17355_v16 = vld [vmem:[%s25126_s0 + $0xba0] sm:$0xf] }
 0x944   :  { %11336 = vmatpush.bf16.msrb.mxu0 %v19018_v18  ;;  %12491 = vmatpush.bf16.msrb.mxu3 %v19107_v35  ;;  %v10934_v35 = vadd.f32 %v24102_v43, %v24084_v57  ;;  %v18989_v57 = vld [vmem:[%s25126_s0 + $0xbbc] sm:$0xf] }
 0x945   :  { %v9760_v22 = vpack.c.bf16 %v9728_v34, %v9728_v34 }
 0x946   :  { %10972 = vmatmul.bf16.gmra.mxu1 %v17332_v23 }
 0x947   :  { %v10339_v41 = vunpack.c.l.b16 %v9760_v22 }
 0x948   :  { %v9695_v32 = vpop.f32.mrf.mxu2  ;;  %v10062_v59 = vpop.f32.mrf.mxu0  ;;  %11337 = vmatpush.bf16.msrb.mxu0 %v19017_v11 }
 0x949   :  { %v9696_v27 = vadd.f32 %v9695_v32, %v9607_v47  ;;  %v10391_v44 = vadd.f32 %v10390_v46, %v10062_v59  ;;  %v24124_v19 = vpop.f32.mrf.mxu3  ;;  %v19019_v46 = vld [vmem:[%s25128_s3 + $0x710] sm:$0xff] }
 0x94b   :  { %v9729_v48 = vmax.f32 %v9696_v27, 0.0  ;;  %v24108_v25 = vpop.f32.mrf.mxu1  ;;  %v10931_v27 = vadd.f32 %v24102_v43, %v24063_v13 }
 0x94d   :  { %v9761_v45 = vpack.c.bf16 %v9729_v48, %v9729_v48  ;;  %17485 = vmatmul.msk.bf16.gmra.mxu2 %vm480_vm1, %v17316_v40  ;;  %v19021_v40 = vld [vmem:[%s25128_s3 + $0x720] sm:$0xff]  ;;  %v18987_v48 = vld [vmem:[%s25126_s0 + $0xba8] sm:$0xf0] }
 0x94e   :  { %11066 = vmatmul.bf16.gmra.mxu3 %v17348_v2  ;;  %v17356_v13 = vor.u32 %v18987_v48, %v17355_v16 }
 0x94f   :  { %v10340_v14 = vunpack.c.l.b16 %v9761_v45  ;;  %v17339_v45 = vld [vmem:[%s25126_s0 + $0xb78] sm:$0xf] }
 0x950   :  { %v10094_v54 = vpop.f32.mrf.mxu0  ;;  %v11101_v7 = vpop.f32.mrf.mxu2 }
 0x951   :  { %v10341_v12 = vpack.c.b16 %v10340_v14, %v10339_v41  ;;  %v10377_v6 = vadd.f32 %v10376_v55, %v10094_v54  ;;  %v11102_v60 = vadd.f32 %v11101_v7, %v11013_v0  ;;  %v24150_v17 = vpop.f32.mrf.mxu3  ;;  %v10929_v55 = vadd.f32 %v24102_v43, %v24044_v52  ;;  %v18986_v52 = vld [vmem:[%s25126_s0 + $0xba4] sm:$0xf] }
 0x952   :  { %v17360_v59 = vor.u32 %v18986_v52, %v17357_v39  ;;  %v18982_v41 = vld [vmem:[%s25126_s0 + $0xb80] sm:$0xf0]  ;;  %v11020_v0 = vadd.f32 %v24076_v1, %v10931_v27 }
 0x953   :  { %17144 = vmatmul.msk.bf16.vlgmr.msra.gmra.mxu0 %vm945_vm2, %v10341_v12  ;;  %v24135_v9 = vpop.f32.mrf.mxu1  ;;  %v11181_v15 = vmax.f32 %v11102_v60, 0.0  ;;  %v11018_v11 = vadd.f32 %v24059_v38, %v10929_v55  ;;  %v19113_v38 = vld [vmem:[%s25125_s1 + $0x80] sm:$0xff]  ;;  %v17340_v56 = vor.u32 %v18982_v41, %v17339_v45  ;;  %v11023_v60 = vadd.f32 %v24104_v50, %v10934_v35  ;;  %v19106_v50 = vld [vmem:[%s25125_s1 + $0x48] sm:$0xff]  ;;  %v17367_v55 = vld [vmem:[%s25126_s0 + $0xbb8] sm:$0xf] }
 0x954   :  { %11370 = vmatpush.bf16.msra.mxu0 %v19020_v36  ;;  %12582 = vmatpush.bf16.msra.mxu2 %v19113_v38  ;;  %v10939_v38 = vadd.f32 %v24102_v43, %v24135_v9  ;;  %v19026_v45 = vld [vmem:[%s25128_s3 + $0x748] sm:$0xff]  ;;  %v18992_v9 = vld [vmem:[%s25126_s0 + $0xbd4] sm:$0xf]  ;;  %v17381_v41 = vld [vmem:[%s25126_s0 + $0xbdc] sm:$0xf0] }
 0x955   :  { %v11213_v20 = vpack.c.bf16 %v11181_v15, %v11181_v15  ;;  %12492 = vmatpush.bf16.msrb.mxu3 %v19106_v50  ;;  %v18993_v35 = vld [vmem:[%s25126_s0 + $0xbd8] sm:$0xf0] }
 0x956   :  { %10977 = vmatmul.bf16.gmra.mxu1 %v17344_v33  ;;  %v19024_v33 = vld [vmem:[%s25128_s3 + $0x738] sm:$0xff] }
 0x957   :  { %v11312_v29 = vunpack.c.l.b16 %v11213_v20 }
 0x958   :  { %v10096_v24 = vpop.f32.mrf.mxu0  ;;  %v11103_v63 = vpop.f32.mrf.mxu2  ;;  %11371 = vmatpush.bf16.msra.mxu0 %v19019_v46 }
 0x959   :  { %v10392_v62 = vadd.f32 %v10391_v44, %v10096_v24  ;;  %v11104_v18 = vadd.f32 %v11103_v63, %v11015_v28  ;;  %v24170_v32 = vpop.f32.mrf.mxu3  ;;  %v19098_v24 = vld [vmem:[%s25125_s1 + $0x8] sm:$0xff]  ;;  %v17372_v63 = vor.u32 %v18989_v57, %v17369_v4 }
 0x95a   :  { %12403 = vmatpush.bf16.msra.mxu1 %v19098_v24 }
 0x95b   :  { %v11182_v30 = vmax.f32 %v11104_v18, 0.0  ;;  %v24154_v5 = vpop.f32.mrf.mxu1 }
 0x95d   :  { %v11214_v58 = vpack.c.bf16 %v11182_v30, %v11182_v30  ;;  %17486 = vmatmul.msk.bf16.gmra.mxu2 %vm480_vm1, %v17328_v31  ;;  %v19023_v31 = vld [vmem:[%s25128_s3 + $0x730] sm:$0xff] }
 0x95e   :  { %11071 = vmatmul.bf16.gmra.mxu3 %v17360_v59 }
 0x95f   :  { %v11313_v61 = vunpack.c.l.b16 %v11214_v58  ;;  %v17351_v58 = vld [vmem:[%s25126_s0 + $0xb90] sm:$0xf] }
 0x960   :  { %v10128_v3 = vpop.f32.mrf.mxu0  ;;  %v11106_v23 = vpop.f32.mrf.mxu2 }
 0x961   :  { %v11314_v47 = vpack.c.b16 %v11313_v61, %v11312_v29  ;;  %v10378_v34 = vadd.f32 %v10377_v6, %v10128_v3  ;;  %v11107_v44 = vadd.f32 %v11106_v23, %v11018_v11  ;;  %v24193_v12 = vpop.f32.mrf.mxu3  ;;  %v18985_v29 = vld [vmem:[%s25126_s0 + $0xb98] sm:$0xf0] }
 0x962   :  { %v17352_v39 = vor.u32 %v18985_v29, %v17351_v58 }
 0x963   :  { %17565 = vmatmul.msk.bf16.vlgmr.msrb.gmra.mxu0 %vm945_vm2, %v11314_v47  ;;  %v24178_v22 = vpop.f32.mrf.mxu1  ;;  %v11183_v14 = vmax.f32 %v11107_v44, 0.0 }
 0x964   :  { %11404 = vmatpush.bf16.msrb.mxu0 %v19022_v53 }
 0x965   :  { %v11215_v6 = vpack.c.bf16 %v11183_v14, %v11183_v14 }
 0x966   :  { %10982 = vmatmul.bf16.gmra.mxu1 %v17356_v13 }
 0x967   :  { %v11346_v1 = vunpack.c.l.b16 %v11215_v6  ;;  %v17379_v6 = vld [vmem:[%s25126_s0 + $0xbd0] sm:$0xf] }
 0x968   :  { %v10130_v54 = vpop.f32.mrf.mxu0  ;;  %v11108_v7 = vpop.f32.mrf.mxu2  ;;  %11405 = vmatpush.bf16.msrb.mxu0 %v19021_v40  ;;  %v11028_v40 = vadd.f32 %v24150_v17, %v10939_v38  ;;  %v17384_v17 = vor.u32 %v18992_v9, %v17381_v41 }
 0x969   :  { %v10393_v36 = vadd.f32 %v10392_v62, %v10130_v54  ;;  %v11109_v8 = vadd.f32 %v11108_v7, %v11020_v0  ;;  %v24213_v15 = vpop.f32.mrf.mxu3  ;;  %v10936_v62 = vadd.f32 %v24102_v43, %v24108_v25  ;;  %v18990_v25 = vld [vmem:[%s25126_s0 + $0xbc0] sm:$0xf0]  ;;  %v10941_v7 = vadd.f32 %v24102_v43, %v24154_v5 }
 0x96a   :  { %v17368_v30 = vor.u32 %v18990_v25, %v17367_v55  ;;  %v17380_v5 = vor.u32 %v18993_v35, %v17379_v6  ;;  %v19028_v25 = vld [vmem:[%s25128_s3 + $0x758] sm:$0xff] }
 0x96b   :  { %v11184_v37 = vmax.f32 %v11109_v8, 0.0  ;;  %v24197_v2 = vpop.f32.mrf.mxu1  ;;  %v11025_v11 = vadd.f32 %v24124_v19, %v10936_v62  ;;  %v19025_v8 = vld [vmem:[%s25128_s3 + $0x740] sm:$0xff] }
 0x96d   :  { %v11216_v49 = vpack.c.bf16 %v11184_v37, %v11184_v37  ;;  %17487 = vmatmul.msk.bf16.gmra.mxu2 %vm480_vm1, %v17340_v56  ;;  %v17363_v37 = vld [vmem:[%s25126_s0 + $0xba8] sm:$0xf] }
 0x96e   :  { %11076 = vmatmul.bf16.gmra.mxu3 %v17372_v63 }
 0x96f   :  { %v11347_v46 = vunpack.c.l.b16 %v11216_v49  ;;  %v18988_v49 = vld [vmem:[%s25126_s0 + $0xbb0] sm:$0xf0] }
 0x970   :  { %v10162_v26 = vpop.f32.mrf.mxu0  ;;  %v11111_v51 = vpop.f32.mrf.mxu2  ;;  %v17364_v57 = vor.u32 %v18988_v49, %v17363_v37  ;;  %v19030_v37 = vld [vmem:[%s25128_s3 + $0x768] sm:$0xff]  ;;  %v17769_v49 = vld [vmem:[%s25126_s0 + $0xc0c] sm:$0xf0] }
 0x971   :  { %v11348_v21 = vpack.c.b16 %v11347_v46, %v11346_v1  ;;  %v10379_v28 = vadd.f32 %v10378_v34, %v10162_v26  ;;  %v11112_v18 = vadd.f32 %v11111_v51, %v11023_v60  ;;  %v24239_v47 = vpop.f32.mrf.mxu3  ;;  %v11030_v1 = vadd.f32 %v24170_v32, %v10941_v7 }
 0x973   :  { %17574 = vmatmul.msk.bf16.vlgmr.msra.gmra.mxu0 %vm945_vm2, %v11348_v21  ;;  %v24224_v20 = vpop.f32.mrf.mxu1  ;;  %v11185_v61 = vmax.f32 %v11112_v18, 0.0 }
 0x974   :  { %11438 = vmatpush.bf16.msra.mxu0 %v19024_v33 }
 0x975   :  { %v11217_v34 = vpack.c.bf16 %v11185_v61, %v11185_v61  ;;  %v19097_v61 = vld [vmem:[%s25125_s1] sm:$0xff] }
 0x976   :  { %10987 = vmatmul.bf16.gmra.mxu1 %v17368_v30  ;;  %v17393_v30 = vld [vmem:[%s25126_s0 + $0xbf4] sm:$0xf0] }
 0x977   :  { %v11380_v19 = vunpack.c.l.b16 %v11217_v34  ;;  %12404 = vmatpush.bf16.msra.mxu1 %v19097_v61  ;;  %v17391_v34 = vld [vmem:[%s25126_s0 + $0xbe8] sm:$0xf] }
 0x978   :  { %v10164_v3 = vpop.f32.mrf.mxu0  ;;  %v11113_v23 = vpop.f32.mrf.mxu2  ;;  %11439 = vmatpush.bf16.msra.mxu0 %v19023_v31 }
 0x979   :  { %v10394_v53 = vadd.f32 %v10393_v36, %v10164_v3  ;;  %v11114_v52 = vadd.f32 %v11113_v23, %v11025_v11  ;;  %v24256_v54 = vpop.f32.mrf.mxu3  ;;  %v10946_v23 = vadd.f32 %v24102_v43, %v24197_v2  ;;  %v18996_v2 = vld [vmem:[%s25126_s0 + $0xbf0] sm:$0xf0] }
 0x97a   :  { %v17392_v38 = vor.u32 %v18996_v2, %v17391_v34  ;;  %v19032_v2 = vld [vmem:[%s25128_s3 + $0x778] sm:$0xff] }
 0x97b   :  { %v11186_v59 = vmax.f32 %v11114_v52, 0.0  ;;  %v24243_v27 = vpop.f32.mrf.mxu1  ;;  %v19027_v52 = vld [vmem:[%s25128_s3 + $0x750] sm:$0xff] }
 0x97d   :  { %v11218_v44 = vpack.c.bf16 %v11186_v59, %v11186_v59  ;;  %17488 = vmatmul.msk.bf16.gmra.mxu2 %vm480_vm1, %v17352_v39  ;;  %v17375_v59 = vld [vmem:[%s25126_s0 + $0xbc0] sm:$0xf] }
 0x97e   :  { %11081 = vmatmul.bf16.gmra.mxu3 %v17384_v17 }
 0x97f   :  { %v11381_v16 = vunpack.c.l.b16 %v11218_v44  ;;  %v18991_v44 = vld [vmem:[%s25126_s0 + $0xbc8] sm:$0xf0] }
 0x980   :  { %v10196_v48 = vpop.f32.mrf.mxu0  ;;  %v11116_v13 = vpop.f32.mrf.mxu2  ;;  %v17376_v9 = vor.u32 %v18991_v44, %v17375_v59 }
 0x981   :  { %v11382_v0 = vpack.c.b16 %v11381_v16, %v11380_v19  ;;  %v10380_v14 = vadd.f32 %v10379_v28, %v10196_v48  ;;  %v11117_v36 = vadd.f32 %v11116_v13, %v11028_v40  ;;  %v24279_v4 = vpop.f32.mrf.mxu3  ;;  %v10944_v28 = vadd.f32 %v24102_v43, %v24178_v22  ;;  %v18995_v22 = vld [vmem:[%s25126_s0 + $0xbec] sm:$0xf] }
 0x982   :  { %v17396_v3 = vor.u32 %v18995_v22, %v17393_v30  ;;  %v11035_v19 = vadd.f32 %v24213_v15, %v10946_v23 }
 0x983   :  { %17583 = vmatmul.msk.bf16.vlgmr.msrb.gmra.mxu0 %vm945_vm2, %v11382_v0  ;;  %v24264_v56 = vpop.f32.mrf.mxu1  ;;  %v11187_v60 = vmax.f32 %v11117_v36, 0.0  ;;  %v11033_v62 = vadd.f32 %v24193_v12, %v10944_v28  ;;  %v19105_v12 = vld [vmem:[%s25125_s1 + $0x40] sm:$0xff]  ;;  %v19050_v28 = vld [vmem:[%s25126_s0 + $0xc08] sm:$0xf0] }
 0x984   :  { %11472 = vmatpush.bf16.msrb.mxu0 %v19026_v45  ;;  %12493 = vmatpush.bf16.msrb.mxu3 %v19105_v12 }
 0x985   :  { %v11219_v21 = vpack.c.bf16 %v11187_v60, %v11187_v60 }
 0x986   :  { %10992 = vmatmul.bf16.gmra.mxu1 %v17380_v5 }
 0x987   :  { %v11414_v32 = vunpack.c.l.b16 %v11219_v21  ;;  %v17767_v21 = vld [vmem:[%s25126_s0 + $0xc00] sm:$0xf] }
 0x988   :  { %v10198_v46 = vpop.f32.mrf.mxu0  ;;  %v11118_v26 = vpop.f32.mrf.mxu2  ;;  %11473 = vmatpush.bf16.msrb.mxu0 %v19025_v8 }
 0x989   :  { %v10395_v51 = vadd.f32 %v10394_v53, %v10198_v46  ;;  %v11119_v33 = vadd.f32 %v11118_v26, %v11030_v1  ;;  %v24299_v11 = vpop.f32.mrf.mxu3  ;;  %v10951_v26 = vadd.f32 %v24102_v43, %v24243_v27  ;;  %v17768_v27 = vor.u32 %v19050_v28, %v17767_v21  ;;  %v19034_v28 = vld [vmem:[%s25128_s3 + $0x788] sm:$0xff] }
 0x98b   :  { %v11188_v50 = vmax.f32 %v11119_v33, 0.0  ;;  %v24283_v24 = vpop.f32.mrf.mxu1  ;;  %v19029_v33 = vld [vmem:[%s25128_s3 + $0x760] sm:$0xff] }
 0x98d   :  { %v11220_v63 = vpack.c.bf16 %v11188_v50, %v11188_v50  ;;  %17489 = vmatmul.msk.bf16.gmra.mxu2 %vm480_vm1, %v17364_v57  ;;  %v17387_v50 = vld [vmem:[%s25126_s0 + $0xbd8] sm:$0xf] }
 0x98e   :  { %11086 = vmatmul.bf16.gmra.mxu3 %v17396_v3 }
 0x98f   :  { %v11415_v18 = vunpack.c.l.b16 %v11220_v63  ;;  %v18994_v63 = vld [vmem:[%s25126_s0 + $0xbe0] sm:$0xf0] }
 0x990   :  { %v10230_v31 = vpop.f32.mrf.mxu0  ;;  %v11121_v55 = vpop.f32.mrf.mxu2  ;;  %v17388_v22 = vor.u32 %v18994_v63, %v17387_v50 }
 0x991   :  { %v11416_v58 = vpack.c.b16 %v11415_v18, %v11414_v32  ;;  %v10381_v29 = vadd.f32 %v10380_v14, %v10230_v31  ;;  %v11122_v53 = vadd.f32 %v11121_v55, %v11033_v62  ;;  %v24325_v41 = vpop.f32.mrf.mxu3  ;;  %v10949_v14 = vadd.f32 %v24102_v43, %v24224_v20  ;;  %v19049_v20 = vld [vmem:[%s25126_s0 + $0xc04] sm:$0xf] }
 0x992   :  { %v11040_v32 = vadd.f32 %v24256_v54, %v10951_v26 }
 0x993   :  { %17592 = vmatmul.msk.bf16.vlgmr.msra.gmra.mxu0 %vm945_vm2, %v11416_v58  ;;  %v24310_v39 = vpop.f32.mrf.mxu1  ;;  %v11189_v40 = vmax.f32 %v11122_v53, 0.0  ;;  %v11038_v8 = vadd.f32 %v24239_v47, %v10949_v14  ;;  %v17772_v47 = vor.u32 %v19049_v20, %v17769_v49  ;;  %v18997_v14 = vld [vmem:[%s25126_s0 + $0xbf8] sm:$0xf0] }
 0x994   :  { %11506 = vmatpush.bf16.msra.mxu0 %v19028_v25  ;;  %v10959_v49 = vadd.f32 %v24102_v43, %v24310_v39  ;;  %v19055_v39 = vld [vmem:[%s25126_s0 + $0xc34] sm:$0xf] }
 0x995   :  { %v11221_v0 = vpack.c.bf16 %v11189_v40, %v11189_v40  ;;  %v10956_v40 = vadd.f32 %v24102_v43, %v24283_v24 }
 0x996   :  { %10997 = vmatmul.bf16.gmra.mxu1 %v17392_v38  ;;  %v17781_v38 = vld [vmem:[%s25126_s0 + $0xc24] sm:$0xf0]  ;;  %v11048_v26 = vadd.f32 %v24325_v41, %v10959_v49  ;;  %v19054_v49 = vld [vmem:[%s25126_s0 + $0xc28] sm:$0xf0] }
 0x997   :  { %v11448_v15 = vunpack.c.l.b16 %v11221_v0  ;;  %v17399_v0 = vld [vmem:[%s25126_s0 + $0xbf0] sm:$0xf] }
 0x998   :  { %v10232_v16 = vpop.f32.mrf.mxu0  ;;  %v11123_v48 = vpop.f32.mrf.mxu2  ;;  %11507 = vmatpush.bf16.msra.mxu0 %v19027_v52 }
 0x999   :  { %v10396_v13 = vadd.f32 %v10395_v51, %v10232_v16  ;;  %v11124_v45 = vadd.f32 %v11123_v48, %v11035_v19  ;;  %v24342_v46 = vpop.f32.mrf.mxu3  ;;  %v19031_v48 = vld [vmem:[%s25128_s3 + $0x770] sm:$0xff] }
 0x99b   :  { %v11190_v17 = vmax.f32 %v11124_v45, 0.0  ;;  %v24329_v7 = vpop.f32.mrf.mxu1  ;;  %v17779_v45 = vld [vmem:[%s25126_s0 + $0xc18] sm:$0xf] }
 0x99d   :  { %v11222_v36 = vpack.c.bf16 %v11190_v17, %v11190_v17  ;;  %17490 = vmatmul.msk.bf16.gmra.mxu2 %vm480_vm1, %v17376_v9  ;;  %v19053_v9 = vld [vmem:[%s25126_s0 + $0xc20] sm:$0xf0]  ;;  %v11045_v17 = vadd.f32 %v24299_v11, %v10956_v40 }
 0x99e   :  { %12494 = vmatmul.bf16.vlgmr.msrb.gmra.mxu3 %v17772_v47  ;;  %v17780_v24 = vor.u32 %v19053_v9, %v17779_v45  ;;  %v19036_v9 = vld [vmem:[%s25128_s3 + $0x798] sm:$0xff] }
 0x99f   :  { %v11449_v6 = vunpack.c.l.b16 %v11222_v36 }
 0x9a0   :  { %v10264_v35 = vpop.f32.mrf.mxu0  ;;  %v11126_v5 = vpop.f32.mrf.mxu2 }
 0x9a1   :  { %v11450_v1 = vpack.c.b16 %v11449_v6, %v11448_v15  ;;  %v10382_v60 = vadd.f32 %v10381_v29, %v10264_v35  ;;  %v11127_v51 = vadd.f32 %v11126_v5, %v11038_v8  ;;  %v24365_v30 = vpop.f32.mrf.mxu3  ;;  %v10954_v29 = vadd.f32 %v24102_v43, %v24264_v56  ;;  %v19052_v56 = vld [vmem:[%s25126_s0 + $0xc1c] sm:$0xf] }
 0x9a2   :  { %v17400_v5 = vor.u32 %v18997_v14, %v17399_v0 }
 0x9a3   :  { %17601 = vmatmul.msk.bf16.vlgmr.msrb.gmra.mxu0 %vm945_vm2, %v11450_v1  ;;  %v24350_v57 = vpop.f32.mrf.mxu1  ;;  %v11191_v62 = vmax.f32 %v11127_v51, 0.0  ;;  %v11043_v23 = vadd.f32 %v24279_v4, %v10954_v29  ;;  %v17784_v4 = vor.u32 %v19052_v56, %v17781_v38  ;;  %v19051_v29 = vld [vmem:[%s25126_s0 + $0xc10] sm:$0xf0] }
 0x9a4   :  { %11540 = vmatpush.bf16.msrb.mxu0 %v19030_v37  ;;  %v10964_v38 = vadd.f32 %v24102_v43, %v24350_v57  ;;  %v19058_v57 = vld [vmem:[%s25126_s0 + $0xc4c] sm:$0xf] }
 0x9a5   :  { %v11223_v58 = vpack.c.bf16 %v11191_v62, %v11191_v62  ;;  %v10961_v62 = vadd.f32 %v24102_v43, %v24329_v7 }
 0x9a6   :  { %12405 = vmatmul.bf16.vlgmr.msra.gmra.mxu1 %v17768_v27  ;;  %v17793_v27 = vld [vmem:[%s25126_s0 + $0xc3c] sm:$0xf0]  ;;  %v11053_v40 = vadd.f32 %v24365_v30, %v10964_v38 }
 0x9a7   :  { %v11482_v54 = vunpack.c.l.b16 %v11223_v58  ;;  %v17796_v41 = vor.u32 %v19055_v39, %v17793_v27  ;;  %v17775_v58 = vld [vmem:[%s25126_s0 + $0xc08] sm:$0xf] }
 0x9a8   :  { %v10266_v18 = vpop.f32.mrf.mxu0  ;;  %v11128_v31 = vpop.f32.mrf.mxu2  ;;  %11541 = vmatpush.bf16.msrb.mxu0 %v19029_v33 }
 0x9a9   :  { %v10397_v55 = vadd.f32 %v10396_v13, %v10266_v18  ;;  %v11129_v25 = vadd.f32 %v11128_v31, %v11040_v32  ;;  %v24382_v19 = vpop.f32.mrf.mxu3  ;;  %v19033_v31 = vld [vmem:[%s25128_s3 + $0x780] sm:$0xff] }
 0x9ab   :  { %v11192_v12 = vmax.f32 %v11129_v25, 0.0  ;;  %v24369_v61 = vpop.f32.mrf.mxu1  ;;  %v17791_v25 = vld [vmem:[%s25126_s0 + $0xc30] sm:$0xf] }
 0x9ad   :  { %v11224_v3 = vpack.c.bf16 %v11192_v12, %v11192_v12  ;;  %17491 = vmatmul.msk.bf16.gmra.mxu2 %vm480_vm1, %v17388_v22  ;;  %v19056_v22 = vld [vmem:[%s25126_s0 + $0xc38] sm:$0xf0]  ;;  %v11050_v12 = vadd.f32 %v24342_v46, %v10961_v62 }
 0x9ae   :  { %12499 = vmatmul.bf16.gmra.mxu3 %v17784_v4  ;;  %v17792_v7 = vor.u32 %v19056_v22, %v17791_v25 }
 0x9af   :  { %v11483_v53 = vunpack.c.l.b16 %v11224_v3 }
 0x9b0   :  { %v10298_v52 = vpop.f32.mrf.mxu0  ;;  %v11131_v34 = vpop.f32.mrf.mxu2 }
 0x9b1   :  { %v11484_v59 = vpack.c.b16 %v11483_v53, %v11482_v54  ;;  %v10383_v44 = vadd.f32 %v10382_v60, %v10298_v52  ;;  %v11132_v16 = vadd.f32 %v11131_v34, %v11043_v23  ;;  %v24405_v37 = vpop.f32.mrf.mxu3  ;;  %v17776_v34 = vor.u32 %v19051_v29, %v17775_v58 }
 0x9b3   :  { %17610 = vmatmul.msk.bf16.vlgmr.msra.gmra.mxu0 %vm945_vm2, %v11484_v59  ;;  %v24390_v13 = vpop.f32.mrf.mxu1  ;;  %v11193_v36 = vmax.f32 %v11132_v16, 0.0 }
 0x9b4   :  { %11574 = vmatpush.bf16.msra.mxu0 %v19032_v2  ;;  %v10969_v27 = vadd.f32 %v24102_v43, %v24390_v13  ;;  %v17817_v13 = vld [vmem:[%s25126_s0 + $0xc6c] sm:$0xf0] }
 0x9b5   :  { %v11225_v20 = vpack.c.bf16 %v11193_v36, %v11193_v36  ;;  %v10966_v36 = vadd.f32 %v24102_v43, %v24369_v61  ;;  %v19059_v61 = vld [vmem:[%s25126_s0 + $0xc50] sm:$0xf0] }
 0x9b6   :  { %12410 = vmatmul.bf16.gmra.mxu1 %v17780_v24  ;;  %v17805_v24 = vld [vmem:[%s25126_s0 + $0xc54] sm:$0xf0] }
 0x9b7   :  { %v11516_v11 = vunpack.c.l.b16 %v11225_v20  ;;  %v17808_v30 = vor.u32 %v19058_v57, %v17805_v24  ;;  %v17787_v20 = vld [vmem:[%s25126_s0 + $0xc20] sm:$0xf] }
 0x9b8   :  { %v10300_v15 = vpop.f32.mrf.mxu0  ;;  %v11133_v8 = vpop.f32.mrf.mxu2  ;;  %11575 = vmatpush.bf16.msra.mxu0 %v19031_v48 }
 0x9b9   :  { %v10398_v6 = vadd.f32 %v10397_v55, %v10300_v15  ;;  %v11134_v35 = vadd.f32 %v11133_v8, %v11045_v17  ;;  %v24422_v32 = vpop.f32.mrf.mxu3 }
 0x9bb   :  { %v11194_v1 = vmax.f32 %v11134_v35, 0.0  ;;  %v24409_v60 = vpop.f32.mrf.mxu1 }
 0x9bd   :  { %v11226_v47 = vpack.c.bf16 %v11194_v1, %v11194_v1  ;;  %17492 = vmatmul.msk.bf16.gmra.mxu2 %vm480_vm1, %v17400_v5  ;;  %v17803_v5 = vld [vmem:[%s25126_s0 + $0xc48] sm:$0xf]  ;;  %v11055_v1 = vadd.f32 %v24382_v19, %v10966_v36 }
 0x9be   :  { %12504 = vmatmul.bf16.gmra.mxu3 %v17796_v41 }
 0x9bf   :  { %v11517_v51 = vunpack.c.l.b16 %v11226_v47 }
 0x9c0   :  { %v10332_v33 = vpop.f32.mrf.mxu0  ;;  %v11136_v21 = vpop.f32.mrf.mxu2 }
 0x9c1   :  { %v11518_v50 = vpack.c.b16 %v11517_v51, %v11516_v11  ;;  %v10384_v63 = vadd.f32 %v10383_v44, %v10332_v33  ;;  %v11137_v18 = vadd.f32 %v11136_v21, %v11048_v26  ;;  %v24445_v2 = vpop.f32.mrf.mxu3  ;;  %v17788_v21 = vor.u32 %v19054_v49, %v17787_v20 }
 0x9c3   :  { %17619 = vmatmul.msk.bf16.vlgmr.msrb.gmra.mxu0 %vm945_vm2, %v11518_v50  ;;  %v24430_v55 = vpop.f32.mrf.mxu1  ;;  %v11195_v3 = vmax.f32 %v11137_v18, 0.0  ;;  %v11058_v18 = vadd.f32 %v24405_v37, %v10969_v27  ;;  %v10971_v37 = vadd.f32 %v24102_v43, %v24409_v60 }
 0x9c4   :  { %11608 = vmatpush.bf16.msrb.mxu0 %v19034_v28 }
 0x9c5   :  { %v11227_v56 = vpack.c.bf16 %v11195_v3, %v11195_v3  ;;  %v11060_v38 = vadd.f32 %v24422_v32, %v10971_v37 }
 0x9c6   :  { %12415 = vmatmul.bf16.gmra.mxu1 %v17792_v7  ;;  %v19038_v7 = vld [vmem:[%s25128_s3 + $0x7a8] sm:$0xff] }
 0x9c7   :  { %v11550_v46 = vunpack.c.l.b16 %v11227_v56  ;;  %v19057_v56 = vld [vmem:[%s25126_s0 + $0xc40] sm:$0xf0] }
 0x9c8   :  { %v10334_v54 = vpop.f32.mrf.mxu0  ;;  %v11138_v23 = vpop.f32.mrf.mxu2  ;;  %11609 = vmatpush.bf16.msrb.mxu0 %v19033_v31 }
 0x9c9   :  { %v10399_v53 = vadd.f32 %v10398_v6, %v10334_v54  ;;  %v11139_v52 = vadd.f32 %v11138_v23, %v11050_v12  ;;  %v24462_v17 = vpop.f32.mrf.mxu3  ;;  %v19035_v6 = vld [vmem:[%s25128_s3 + $0x790] sm:$0xff]  ;;  %v19037_v54 = vld [vmem:[%s25128_s3 + $0x7a0] sm:$0xff] }
 0x9cb   :  { %v11196_v59 = vmax.f32 %v11139_v52, 0.0  ;;  %v24449_v44 = vpop.f32.mrf.mxu1  ;;  %v19062_v52 = vld [vmem:[%s25126_s0 + $0xc68] sm:$0xf0] }
 0x9cc   :  { %v10976_v49 = vadd.f32 %v24102_v43, %v24449_v44 }
 0x9cd   :  { %v11228_v4 = vpack.c.bf16 %v11196_v59, %v11196_v59  ;;  %18033 = vmatmul.msk.bf16.vlgmr.msra.gmra.mxu2 %vm480_vm1, %v17776_v34  ;;  %v17799_v34 = vld [vmem:[%s25126_s0 + $0xc38] sm:$0xf] }
 0x9ce   :  { %12509 = vmatmul.bf16.gmra.mxu3 %v17808_v30 }
 0x9cf   :  { %v11551_v16 = vunpack.c.l.b16 %v11228_v4 }
 0x9d0   :  { %v10366_v48 = vpop.f32.mrf.mxu0  ;;  %v11141_v45 = vpop.f32.mrf.mxu2 }
 0x9d1   :  { %v11552_v0 = vpack.c.b16 %v11551_v16, %v11550_v46  ;;  %v10385_v14 = vadd.f32 %v10384_v63, %v10366_v48  ;;  %v11142_v8 = vadd.f32 %v11141_v45, %v11053_v40  ;;  %v24488_v28 = vpop.f32.mrf.mxu3  ;;  %v17800_v16 = vor.u32 %v19057_v56, %v17799_v34 }
 0x9d3   :  { %v24467_v15 = vadd.f32 %v10385_v14, %v23769_v42  ;;  %17628 = vmatmul.msk.bf16.vlgmr.msra.gmra.mxu0 %vm945_vm2, %v11552_v0  ;;  %v24473_v35 = vpop.f32.mrf.mxu1  ;;  %v17804_v42 = vor.u32 %v19059_v61, %v17803_v5  ;;  %v11197_v47 = vmax.f32 %v11142_v8, 0.0  ;;  %v17829_v5 = vld [vmem:[%s25126_s0 + $0xc84] sm:$0xf0] }
 0x9d4   :  { %11642 = vmatpush.bf16.msra.mxu0 %v19036_v9  ;;  %v10974_v9 = vadd.f32 %v24102_v43, %v24430_v55  ;;  %v19064_v55 = vld [vmem:[%s25126_s0 + $0xc7c] sm:$0xf] }
 0x9d5   :  { %v11229_v39 = vpack.c.bf16 %v11197_v47, %v11197_v47  ;;  %v19039_v47 = vld [vmem:[%s25128_s3 + $0x7b0] sm:$0xff] }
 0x9d6   :  { %12420 = vmatmul.bf16.gmra.mxu1 %v17804_v42  ;;  %v11063_v14 = vadd.f32 %v24445_v2, %v10974_v9  ;;  %v17832_v2 = vor.u32 %v19064_v55, %v17829_v5  ;;  %v19063_v9 = vld [vmem:[%s25126_s0 + $0xc70] sm:$0xf0] }
 0x9d7   :  { %v11584_v62 = vunpack.c.l.b16 %v11229_v39  ;;  %v11065_v39 = vadd.f32 %v24462_v17, %v10976_v49 }
 0x9d8   :  { %v10368_v11 = vpop.f32.mrf.mxu0  ;;  %v11143_v26 = vpop.f32.mrf.mxu2  ;;  %11643 = vmatpush.bf16.msra.mxu0 %v19035_v6  ;;  %v19040_v6 = vld [vmem:[%s25128_s3 + $0x7b8] sm:$0xff] }
 0x9d9   :  { %v10400_v51 = vadd.f32 %v10399_v53, %v10368_v11  ;;  %v11144_v33 = vadd.f32 %v11143_v26, %v11055_v1  ;;  %v24508_v29 = vpop.f32.mrf.mxu3  ;;  %v17815_v53 = vld [vmem:[%s25126_s0 + $0xc60] sm:$0xf]  ;;  %v17827_v26 = vld [vmem:[%s25126_s0 + $0xc78] sm:$0xf] }
 0x9da   :  { %v17816_v60 = vor.u32 %v19062_v52, %v17815_v53  ;;  %v19042_v53 = vld [vmem:[%s25128_s3 + $0x7c8] sm:$0xff]  ;;  %v17841_v52 = vld [vmem:[%s25126_s0 + $0xc9c] sm:$0xf0] }
 0x9db   :  { %v24493_v50 = vadd.f32 %v10400_v51, %v23795_v10  ;;  %v11198_v63 = vmax.f32 %v11144_v33, 0.0  ;;  %v24495_v41 = vpop.f32.mrf.mxu1  ;;  %v19061_v10 = vld [vmem:[%s25126_s0 + $0xc64] sm:$0xf]  ;;  %v17811_v33 = vld [vmem:[%s25126_s0 + $0xc50] sm:$0xf] }
 0x9dc   :  { %v17820_v12 = vor.u32 %v19061_v10, %v17817_v13  ;;  %v19065_v51 = vld [vmem:[%s25126_s0 + $0xc80] sm:$0xf0] }
 0x9dd   :  { %v11230_v19 = vpack.c.bf16 %v11198_v63, %v11198_v63  ;;  %18034 = vmatmul.msk.bf16.gmra.mxu2 %vm480_vm1, %v17788_v21  ;;  %v17828_v44 = vor.u32 %v19065_v51, %v17827_v26  ;;  %v19060_v21 = vld [vmem:[%s25126_s0 + $0xc58] sm:$0xf0] }
 0x9de   :  { %12514 = vmatmul.bf16.gmra.mxu3 %v17820_v12  ;;  %v19044_v51 = vld [vmem:[%s25128_s3 + $0x7d8] sm:$0xff] }
 0x9df   :  { %v11585_v31 = vunpack.c.l.b16 %v11230_v19 }
 0x9e0   :  { %v11146_v25 = vpop.f32.mrf.mxu2  ;;  %v11339_v22 = vpop.f32.mrf.mxu0 }
 0x9e1   :  { %v11586_v58 = vpack.c.b16 %v11585_v31, %v11584_v62  ;;  %v11147_v3 = vadd.f32 %v11146_v25, %v11058_v18  ;;  %v24531_v48 = vpop.f32.mrf.mxu3  ;;  %v17812_v31 = vor.u32 %v19060_v21, %v17811_v33 }
 0x9e3   :  { %17637 = vmatmul.msk.bf16.vlgmr.msrb.gmra.mxu0 %vm945_vm2, %v11586_v58  ;;  %v24516_v23 = vpop.f32.mrf.mxu1  ;;  %v11199_v59 = vmax.f32 %v11147_v3, 0.0 }
 0x9e4   :  { %11676 = vmatpush.bf16.msrb.mxu0 %v19038_v7  ;;  %v10979_v7 = vadd.f32 %v24102_v43, %v24473_v35  ;;  %v19067_v35 = vld [vmem:[%s25126_s0 + $0xc94] sm:$0xf]  ;;  %v10984_v5 = vadd.f32 %v24102_v43, %v24516_v23  ;;  %v17853_v23 = vld [vmem:[%s25126_s0 + $0xcb4] sm:$0xf0] }
 0x9e5   :  { %v11231_v45 = vpack.c.bf16 %v11199_v59, %v11199_v59 }
 0x9e6   :  { %12425 = vmatmul.bf16.gmra.mxu1 %v17816_v60  ;;  %v11068_v12 = vadd.f32 %v24488_v28, %v10979_v7  ;;  %v17844_v28 = vor.u32 %v19067_v35, %v17841_v52  ;;  %v11073_v49 = vadd.f32 %v24531_v48, %v10984_v5  ;;  %v19066_v7 = vld [vmem:[%s25126_s0 + $0xc88] sm:$0xf0]  ;;  %v19069_v5 = vld [vmem:[%s25126_s0 + $0xca0] sm:$0xf0] }
 0x9e7   :  { %v11618_v32 = vunpack.c.l.b16 %v11231_v45  ;;  %v17823_v45 = vld [vmem:[%s25126_s0 + $0xc68] sm:$0xf] }
 0x9e8   :  { %v11148_v4 = vpop.f32.mrf.mxu2  ;;  %v11341_v46 = vpop.f32.mrf.mxu0  ;;  %11677 = vmatpush.bf16.msrb.mxu0 %v19037_v54 }
 0x9e9   :  { %v11149_v40 = vadd.f32 %v11148_v4, %v11060_v38  ;;  %v24548_v20 = vpop.f32.mrf.mxu3  ;;  %v10981_v38 = vadd.f32 %v24102_v43, %v24495_v41  ;;  %v19041_v4 = vld [vmem:[%s25128_s3 + $0x7c0] sm:$0xff]  ;;  %v19070_v43 = vld [vmem:[%s25126_s0 + $0xcac] sm:$0xf] }
 0x9ea   :  { %v17856_v48 = vor.u32 %v19070_v43, %v17853_v23 }
 0x9eb   :  { %v11200_v57 = vmax.f32 %v11149_v40, 0.0  ;;  %v24535_v24 = vpop.f32.mrf.mxu1  ;;  %v17839_v40 = vld [vmem:[%s25126_s0 + $0xc90] sm:$0xf] }
 0x9ed   :  { %v11232_v0 = vpack.c.bf16 %v11200_v57, %v11200_v57  ;;  %18035 = vmatmul.msk.bf16.gmra.mxu2 %vm480_vm1, %v17800_v16  ;;  %v19068_v16 = vld [vmem:[%s25126_s0 + $0xc98] sm:$0xf0]  ;;  %v11070_v57 = vadd.f32 %v24508_v29, %v10981_v38 }
 0x9ee   :  { %12519 = vmatmul.bf16.gmra.mxu3 %v17832_v2  ;;  %v17840_v41 = vor.u32 %v19068_v16, %v17839_v40  ;;  %v19046_v16 = vld [vmem:[%s25128_s3 + $0x7e8] sm:$0xff] }
 0x9ef   :  { %v11619_v30 = vunpack.c.l.b16 %v11232_v0 }
 0x9f0   :  { %v11151_v36 = vpop.f32.mrf.mxu2  ;;  %v11373_v8 = vpop.f32.mrf.mxu0 }
 0x9f1   :  { %v11620_v61 = vpack.c.b16 %v11619_v30, %v11618_v32  ;;  %v11854_v42 = vadd.f32 %v11373_v8, %v11339_v22  ;;  %v11152_v1 = vadd.f32 %v11151_v36, %v11063_v14  ;;  %v24571_v25 = vpop.f32.mrf.mxu3  ;;  %v17824_v8 = vor.u32 %v19063_v9, %v17823_v45 }
 0x9f3   :  { %17646 = vmatmul.msk.bf16.vlgmr.msra.gmra.mxu0 %vm945_vm2, %v11620_v61  ;;  %v24556_v11 = vpop.f32.mrf.mxu1  ;;  %v11201_v27 = vmax.f32 %v11152_v1, 0.0 }
 0x9f4   :  { %11710 = vmatpush.bf16.msra.mxu0 %v19040_v6 }
 0x9f5   :  { %v11233_v22 = vpack.c.bf16 %v11201_v27, %v11201_v27 }
 0x9f6   :  { %12430 = vmatmul.bf16.gmra.mxu1 %v17828_v44 }
 0x9f7   :  { %v11652_v17 = vunpack.c.l.b16 %v11233_v22  ;;  %v17835_v22 = vld [vmem:[%s25126_s0 + $0xc80] sm:$0xf] }
 0x9f8   :  { %v11153_v63 = vpop.f32.mrf.mxu2  ;;  %v11375_v19 = vpop.f32.mrf.mxu0  ;;  %11711 = vmatpush.bf16.msra.mxu0 %v19039_v47 }
 0x9f9   :  { %v11154_v62 = vadd.f32 %v11153_v63, %v11065_v39  ;;  %v11869_v18 = vadd.f32 %v11375_v19, %v11341_v46  ;;  %v24588_v56 = vpop.f32.mrf.mxu3  ;;  %v24633_v39 = vld [vmem:[%s25127_s2] ss:$0 sm:$0xff]  ;;  %v19043_v19 = vld [vmem:[%s25128_s3 + $0x7d0] sm:$0xff] }
 0x9fa   :  { %v10986_v27 = vadd.f32 %v24633_v39, %v24535_v24  ;;  %v10989_v52 = vadd.f32 %v24633_v39, %v24556_v11  ;;  %v19073_v11 = vld [vmem:[%s25126_s0 + $0xcc4] sm:$0xf] }
 0x9fb   :  { %v11202_v10 = vmax.f32 %v11154_v62, 0.0  ;;  %v24575_v13 = vpop.f32.mrf.mxu1 }
 0x9fc   :  { %v11078_v38 = vadd.f32 %v24571_v25, %v10989_v52  ;;  %v19072_v52 = vld [vmem:[%s25126_s0 + $0xcb8] sm:$0xf0] }
 0x9fd   :  { %v11234_v58 = vpack.c.bf16 %v11202_v10, %v11202_v10  ;;  %18036 = vmatmul.msk.bf16.gmra.mxu2 %vm480_vm1, %v17812_v31  ;;  %v19071_v31 = vld [vmem:[%s25126_s0 + $0xcb0] sm:$0xf0]  ;;  %v11075_v10 = vadd.f32 %v24548_v20, %v10986_v27 }
 0x9fe   :  { %12524 = vmatmul.bf16.gmra.mxu3 %v17844_v28 }
 0x9ff   :  { %v11653_v37 = vunpack.c.l.b16 %v11234_v58 }
 0xa00   :  { %v11156_v3 = vpop.f32.mrf.mxu2  ;;  %v11407_v54 = vpop.f32.mrf.mxu0 }
 0xa01   :  { %v11654_v60 = vpack.c.b16 %v11653_v37, %v11652_v17  ;;  %v11855_v34 = vadd.f32 %v11854_v42, %v11407_v54  ;;  %v11157_v59 = vadd.f32 %v11156_v3, %v11068_v12  ;;  %v24611_v6 = vpop.f32.mrf.mxu3  ;;  %v17836_v54 = vor.u32 %v19066_v7, %v17835_v22 }
 0xa03   :  { %17655 = vmatmul.msk.bf16.vlgmr.msrb.gmra.mxu0 %vm945_vm2, %v11654_v60  ;;  %v24596_v46 = vpop.f32.mrf.mxu1  ;;  %v11203_v0 = vmax.f32 %v11157_v59, 0.0 }
 0xa04   :  { %11744 = vmatpush.bf16.msrb.mxu0 %v19042_v53  ;;  %v10994_v23 = vadd.f32 %v24633_v39, %v24596_v46  ;;  %v19076_v46 = vld [vmem:[%s25126_s0 + $0xcdc] sm:$0xf] }
 0xa05   :  { %v11235_v55 = vpack.c.bf16 %v11203_v0, %v11203_v0  ;;  %v10991_v0 = vadd.f32 %v24633_v39, %v24575_v13 }
 0xa06   :  { %12435 = vmatmul.bf16.gmra.mxu1 %v17840_v41  ;;  %v17865_v41 = vld [vmem:[%s25126_s0 + $0xccc] sm:$0xf0]  ;;  %v11083_v27 = vadd.f32 %v24611_v6, %v10994_v23 }
 0xa07   :  { %v11686_v29 = vunpack.c.l.b16 %v11235_v55  ;;  %v17868_v25 = vor.u32 %v19073_v11, %v17865_v41  ;;  %v17847_v55 = vld [vmem:[%s25126_s0 + $0xc98] sm:$0xf] }
 0xa08   :  { %v11158_v32 = vpop.f32.mrf.mxu2  ;;  %v11409_v14 = vpop.f32.mrf.mxu0  ;;  %11745 = vmatpush.bf16.msrb.mxu0 %v19041_v4 }
 0xa09   :  { %v11159_v30 = vadd.f32 %v11158_v32, %v11070_v57  ;;  %v11870_v36 = vadd.f32 %v11869_v18, %v11409_v14  ;;  %v24628_v21 = vpop.f32.mrf.mxu3  ;;  %v17851_v18 = vld [vmem:[%s25126_s0 + $0xca8] sm:$0xf]  ;;  %v19045_v14 = vld [vmem:[%s25128_s3 + $0x7e0] sm:$0xff] }
 0xa0a   :  { %v17852_v24 = vor.u32 %v19071_v31, %v17851_v18  ;;  %v19048_v31 = vld [vmem:[%s25128_s3 + $0x7f8] sm:$0xff] }
 0xa0b   :  { %v11204_v61 = vmax.f32 %v11159_v30, 0.0  ;;  %v24615_v42 = vpop.f32.mrf.mxu1 }
 0xa0d   :  { %v11236_v2 = vpack.c.bf16 %v11204_v61, %v11204_v61  ;;  %18037 = vmatmul.msk.bf16.gmra.mxu2 %vm480_vm1, %v17824_v8  ;;  %v19074_v8 = vld [vmem:[%s25126_s0 + $0xcc8] sm:$0xf0]  ;;  %v11080_v61 = vadd.f32 %v24588_v56, %v10991_v0 }
 0xa0e   :  { %12529 = vmatmul.bf16.gmra.mxu3 %v17856_v48 }
 0xa0f   :  { %v11687_v1 = vunpack.c.l.b16 %v11236_v2 }
 0xa10   :  { %v11161_v47 = vpop.f32.mrf.mxu2  ;;  %v11441_v26 = vpop.f32.mrf.mxu0 }
 0xa11   :  { %v11688_v44 = vpack.c.b16 %v11687_v1, %v11686_v29  ;;  %v11856_v33 = vadd.f32 %v11855_v34, %v11441_v26  ;;  %v11162_v63 = vadd.f32 %v11161_v47, %v11073_v49  ;;  %v24656_v53 = vpop.f32.mrf.mxu3  ;;  %v17848_v26 = vor.u32 %v19069_v5, %v17847_v55 }
 0xa13   :  { %17664 = vmatmul.msk.bf16.vlgmr.msra.gmra.mxu0 %vm945_vm2, %v11688_v44  ;;  %v24641_v62 = vpop.f32.mrf.mxu1  ;;  %v11205_v58 = vmax.f32 %v11162_v63, 0.0 }
 0xa14   :  { %11778 = vmatpush.bf16.msra.mxu0 %v19044_v51  ;;  %v10999_v41 = vadd.f32 %v24633_v39, %v24641_v62  ;;  %v19079_v62 = vld [vmem:[%s25126_s0 + $0xcf4] sm:$0xf] }
 0xa15   :  { %v11237_v35 = vpack.c.bf16 %v11205_v58, %v11205_v58  ;;  %v10996_v58 = vadd.f32 %v24633_v39, %v24615_v42 }
 0xa16   :  { %12440 = vmatmul.bf16.gmra.mxu1 %v17852_v24  ;;  %v17877_v24 = vld [vmem:[%s25126_s0 + $0xce4] sm:$0xf0]  ;;  %v11088_v0 = vadd.f32 %v24656_v53, %v10999_v41  ;;  %v19078_v41 = vld [vmem:[%s25126_s0 + $0xce8] sm:$0xf0] }
 0xa17   :  { %v11720_v20 = vunpack.c.l.b16 %v11237_v35  ;;  %v17880_v6 = vor.u32 %v19076_v46, %v17877_v24  ;;  %v17859_v35 = vld [vmem:[%s25126_s0 + $0xcb0] sm:$0xf] }
 0xa18   :  { %v11163_v17 = vpop.f32.mrf.mxu2  ;;  %v11443_v12 = vpop.f32.mrf.mxu0  ;;  %11779 = vmatpush.bf16.msra.mxu0 %v19043_v19 }
 0xa19   :  { %v11164_v37 = vadd.f32 %v11163_v17, %v11075_v10  ;;  %v11871_v3 = vadd.f32 %v11870_v36, %v11443_v12  ;;  %v24673_v57 = vpop.f32.mrf.mxu3  ;;  %v17863_v36 = vld [vmem:[%s25126_s0 + $0xcc0] sm:$0xf]  ;;  %v19047_v12 = vld [vmem:[%s25128_s3 + $0x7f0] sm:$0xff] }
 0xa1a   :  { %v17864_v13 = vor.u32 %v19074_v8, %v17863_v36  ;;  %v19117_v8 = vld [vmem:[%s25128_s3 + $0x808] sm:$0xff] }
 0xa1b   :  { %v11206_v60 = vmax.f32 %v11164_v37, 0.0  ;;  %v24660_v34 = vpop.f32.mrf.mxu1 }
 0xa1d   :  { %v11238_v28 = vpack.c.bf16 %v11206_v60, %v11206_v60  ;;  %18038 = vmatmul.msk.bf16.gmra.mxu2 %vm480_vm1, %v17836_v54  ;;  %v19077_v54 = vld [vmem:[%s25126_s0 + $0xce0] sm:$0xf0]  ;;  %v11085_v60 = vadd.f32 %v24628_v21, %v10996_v58 }
 0xa1e   :  { %12534 = vmatmul.bf16.gmra.mxu3 %v17868_v25 }
 0xa1f   :  { %v11721_v59 = vunpack.c.l.b16 %v11238_v28 }
 0xa20   :  { %v11166_v4 = vpop.f32.mrf.mxu2  ;;  %v11475_v40 = vpop.f32.mrf.mxu0 }
 0xa21   :  { %v11722_v45 = vpack.c.b16 %v11721_v59, %v11720_v20  ;;  %v11857_v9 = vadd.f32 %v11856_v33, %v11475_v40  ;;  %v11167_v32 = vadd.f32 %v11166_v4, %v11078_v38  ;;  %v24696_v51 = vpop.f32.mrf.mxu3  ;;  %v17860_v40 = vor.u32 %v19072_v52, %v17859_v35 }
 0xa23   :  { %17673 = vmatmul.msk.bf16.vlgmr.msrb.gmra.mxu0 %vm945_vm2, %v11722_v45  ;;  %v24681_v30 = vpop.f32.mrf.mxu1  ;;  %v11207_v2 = vmax.f32 %v11167_v32, 0.0 }
 0xa24   :  { %11812 = vmatpush.bf16.msrb.mxu0 %v19046_v16 }
 0xa25   :  { %v11239_v43 = vpack.c.bf16 %v11207_v2, %v11207_v2  ;;  %v11001_v2 = vadd.f32 %v24633_v39, %v24660_v34  ;;  %v17871_v34 = vld [vmem:[%s25126_s0 + $0xcc8] sm:$0xf] }
 0xa26   :  { %12445 = vmatmul.bf16.gmra.mxu1 %v17864_v13  ;;  %v17889_v13 = vld [vmem:[%s25126_s0 + $0xcfc] sm:$0xf0] }
 0xa27   :  { %v11754_v56 = vunpack.c.l.b16 %v11239_v43  ;;  %v17892_v53 = vor.u32 %v19079_v62, %v17889_v13  ;;  %v19075_v43 = vld [vmem:[%s25126_s0 + $0xcd0] sm:$0xf0]  ;;  %v11090_v23 = vadd.f32 %v24673_v57, %v11001_v2 }
 0xa28   :  { %v11168_v29 = vpop.f32.mrf.mxu2  ;;  %v11477_v49 = vpop.f32.mrf.mxu0  ;;  %11813 = vmatpush.bf16.msrb.mxu0 %v19045_v14 }
 0xa29   :  { %v11169_v1 = vadd.f32 %v11168_v29, %v11080_v61  ;;  %v11872_v47 = vadd.f32 %v11871_v3, %v11477_v49  ;;  %v24713_v10 = vpop.f32.mrf.mxu3  ;;  %v17875_v3 = vld [vmem:[%s25126_s0 + $0xcd8] sm:$0xf]  ;;  %v19116_v49 = vld [vmem:[%s25128_s3 + $0x800] sm:$0xff] }
 0xa2a   :  { %v17876_v42 = vor.u32 %v19077_v54, %v17875_v3  ;;  %v19119_v54 = vld [vmem:[%s25128_s3 + $0x818] sm:$0xff] }
 0xa2b   :  { %v11208_v44 = vmax.f32 %v11169_v1, 0.0  ;;  %v24700_v33 = vpop.f32.mrf.mxu1 }
 0xa2d   :  { %v11240_v48 = vpack.c.bf16 %v11208_v44, %v11208_v44  ;;  %18039 = vmatmul.msk.bf16.gmra.mxu2 %vm480_vm1, %v17848_v26  ;;  %v19080_v26 = vld [vmem:[%s25126_s0 + $0xcf8] sm:$0xf0] }
 0xa2e   :  { %12539 = vmatmul.bf16.gmra.mxu3 %v17880_v6 }
 0xa2f   :  { %v11755_v63 = vunpack.c.l.b16 %v11240_v48  ;;  %v24779_v48 = vld [vmem:[%s25127_s2] ss:$0 sm:$0xff] }
 0xa30   :  { %v11171_v19 = vpop.f32.mrf.mxu2  ;;  %v11509_v18 = vpop.f32.mrf.mxu0  ;;  %v12407_v24 = vadd.f32 %v24779_v48, %v24681_v30  ;;  %v19082_v30 = vld [vmem:[%s25126_s0 + $0xd0c] sm:$0xf] }
 0xa31   :  { %v11756_v22 = vpack.c.b16 %v11755_v63, %v11754_v56  ;;  %v11858_v7 = vadd.f32 %v11857_v9, %v11509_v18  ;;  %v11172_v17 = vadd.f32 %v11171_v19, %v11083_v27  ;;  %v24736_v16 = vpop.f32.mrf.mxu3  ;;  %v17872_v18 = vor.u32 %v19075_v43, %v17871_v34 }
 0xa32   :  { %v12496_v58 = vadd.f32 %v24696_v51, %v12407_v24  ;;  %v19081_v24 = vld [vmem:[%s25126_s0 + $0xd00] sm:$0xf0] }
 0xa33   :  { %17682 = vmatmul.msk.bf16.vlgmr.msra.gmra.mxu0 %vm945_vm2, %v11756_v22  ;;  %v24721_v37 = vpop.f32.mrf.mxu1  ;;  %v11209_v28 = vmax.f32 %v11172_v17, 0.0 }
 0xa34   :  { %11846 = vmatpush.bf16.msra.mxu0 %v19048_v31  ;;  %v12412_v13 = vadd.f32 %v24779_v48, %v24721_v37  ;;  %v19085_v37 = vld [vmem:[%s25126_s0 + $0xd24] sm:$0xf] }
 0xa35   :  { %v11241_v11 = vpack.c.bf16 %v11209_v28, %v11209_v28  ;;  %v12409_v28 = vadd.f32 %v24779_v48, %v24700_v33 }
 0xa36   :  { %12450 = vmatmul.bf16.gmra.mxu1 %v17876_v42  ;;  %v17901_v42 = vld [vmem:[%s25126_s0 + $0xd14] sm:$0xf0]  ;;  %v12501_v2 = vadd.f32 %v24736_v16, %v12412_v13  ;;  %v19084_v13 = vld [vmem:[%s25126_s0 + $0xd18] sm:$0xf0] }
 0xa37   :  { %v11788_v21 = vunpack.c.l.b16 %v11241_v11  ;;  %v17904_v51 = vor.u32 %v19082_v30, %v17901_v42  ;;  %v17883_v11 = vld [vmem:[%s25126_s0 + $0xce0] sm:$0xf] }
 0xa38   :  { %v11173_v20 = vpop.f32.mrf.mxu2  ;;  %v11511_v38 = vpop.f32.mrf.mxu0  ;;  %11847 = vmatpush.bf16.msra.mxu0 %v19047_v12 }
 0xa39   :  { %v11174_v59 = vadd.f32 %v11173_v20, %v11085_v60  ;;  %v11873_v4 = vadd.f32 %v11872_v47, %v11511_v38  ;;  %v24753_v61 = vpop.f32.mrf.mxu3  ;;  %v17887_v47 = vld [vmem:[%s25126_s0 + $0xcf0] sm:$0xf] }
 0xa3a   :  { %v17888_v39 = vor.u32 %v19080_v26, %v17887_v47  ;;  %v19118_v38 = vld [vmem:[%s25128_s3 + $0x810] sm:$0xff]  ;;  %v19121_v26 = vld [vmem:[%s25128_s3 + $0x828] sm:$0xff] }
 0xa3b   :  { %v11210_v45 = vmax.f32 %v11174_v59, 0.0  ;;  %v24740_v9 = vpop.f32.mrf.mxu1 }
 0xa3d   :  { %v11242_v25 = vpack.c.bf16 %v11210_v45, %v11210_v45  ;;  %18040 = vmatmul.msk.bf16.gmra.mxu2 %vm480_vm1, %v17860_v40  ;;  %v19083_v40 = vld [vmem:[%s25126_s0 + $0xd10] sm:$0xf0]  ;;  %v12498_v45 = vadd.f32 %v24713_v10, %v12409_v28 }
 0xa3e   :  { %12544 = vmatmul.bf16.gmra.mxu3 %v17892_v53 }
 0xa3f   :  { %v11789_v32 = vunpack.c.l.b16 %v11242_v25 }
 0xa40   :  { %v11176_v14 = vpop.f32.mrf.mxu2  ;;  %v11543_v36 = vpop.f32.mrf.mxu0 }
 0xa41   :  { %v11790_v55 = vpack.c.b16 %v11789_v32, %v11788_v21  ;;  %v11859_v5 = vadd.f32 %v11858_v7, %v11543_v36  ;;  %v11177_v29 = vadd.f32 %v11176_v14, %v11088_v0  ;;  %v24781_v31 = vpop.f32.mrf.mxu3  ;;  %v17884_v36 = vor.u32 %v19078_v41, %v17883_v11 }
 0xa43   :  { %17691 = vmatmul.msk.bf16.vlgmr.msrb.gmra.mxu0 %vm945_vm2, %v11790_v55  ;;  %v24761_v1 = vpop.f32.mrf.mxu1  ;;  %v11211_v44 = vmax.f32 %v11177_v29, 0.0 }
 0xa44   :  { %12819 = vmatpush.bf16.msrb.mxu0 %v19117_v8  ;;  %v12417_v42 = vadd.f32 %v24779_v48, %v24761_v1  ;;  %v19088_v1 = vld [vmem:[%s25126_s0 + $0xd3c] sm:$0xf] }
 0xa45   :  { %v11243_v46 = vpack.c.bf16 %v11211_v44, %v11211_v44  ;;  %v12414_v44 = vadd.f32 %v24779_v48, %v24740_v9 }
 0xa46   :  { %12455 = vmatmul.bf16.gmra.mxu1 %v17888_v39  ;;  %v17913_v39 = vld [vmem:[%s25126_s0 + $0xd2c] sm:$0xf0]  ;;  %v12506_v28 = vadd.f32 %v24781_v31, %v12417_v42  ;;  %v19087_v42 = vld [vmem:[%s25126_s0 + $0xd30] sm:$0xf0] }
 0xa47   :  { %v11822_v6 = vunpack.c.l.b16 %v11243_v46  ;;  %v17916_v16 = vor.u32 %v19085_v37, %v17913_v39  ;;  %v17895_v46 = vld [vmem:[%s25126_s0 + $0xcf8] sm:$0xf] }
 0xa48   :  { %v11178_v56 = vpop.f32.mrf.mxu2  ;;  %v11545_v27 = vpop.f32.mrf.mxu0  ;;  %12820 = vmatpush.bf16.msrb.mxu0 %v19116_v49 }
 0xa49   :  { %v11179_v63 = vadd.f32 %v11178_v56, %v11090_v23  ;;  %v11874_v19 = vadd.f32 %v11873_v4, %v11545_v27  ;;  %v24798_v60 = vpop.f32.mrf.mxu3  ;;  %v17899_v4 = vld [vmem:[%s25126_s0 + $0xd08] sm:$0xf]  ;;  %v19120_v27 = vld [vmem:[%s25128_s3 + $0x820] sm:$0xff] }
 0xa4a   :  { %v17900_v33 = vor.u32 %v19083_v40, %v17899_v4  ;;  %v19123_v40 = vld [vmem:[%s25128_s3 + $0x838] sm:$0xff] }
 0xa4b   :  { %v11212_v57 = vmax.f32 %v11179_v63, 0.0  ;;  %v24785_v22 = vpop.f32.mrf.mxu1 }
 0xa4d   :  { %v11244_v7 = vpack.c.bf16 %v11212_v57, %v11212_v57  ;;  %18041 = vmatmul.msk.bf16.gmra.mxu2 %vm480_vm1, %v17872_v18  ;;  %v19086_v18 = vld [vmem:[%s25126_s0 + $0xd28] sm:$0xf0]  ;;  %v12503_v57 = vadd.f32 %v24753_v61, %v12414_v44 }
 0xa4e   :  { %12549 = vmatmul.bf16.gmra.mxu3 %v17904_v51 }
 0xa4f   :  { %v11823_v17 = vunpack.c.l.b16 %v11244_v7 }
 0xa50   :  { %v11577_v12 = vpop.f32.mrf.mxu0  ;;  %v12584_v3 = vpop.f32.mrf.mxu2 }
 0xa51   :  { %v11824_v35 = vpack.c.b16 %v11823_v17, %v11822_v6  ;;  %v11860_v52 = vadd.f32 %v11859_v5, %v11577_v12  ;;  %v12585_v20 = vadd.f32 %v12584_v3, %v12496_v58  ;;  %v24821_v8 = vpop.f32.mrf.mxu3  ;;  %v17896_v3 = vor.u32 %v19081_v24, %v17895_v46 }
 0xa53   :  { %17700 = vmatmul.msk.bf16.vlgmr.msra.gmra.mxu0 %vm945_vm2, %v11824_v35  ;;  %v24806_v59 = vpop.f32.mrf.mxu1  ;;  %v12664_v25 = vmax.f32 %v12585_v20, 0.0 }
 0xa54   :  { %12853 = vmatpush.bf16.msra.mxu0 %v19119_v54  ;;  %v12422_v39 = vadd.f32 %v24779_v48, %v24806_v59  ;;  %v19091_v59 = vld [vmem:[%s25126_s0 + $0xd54] sm:$0xf] }
 0xa55   :  { %v12696_v62 = vpack.c.bf16 %v12664_v25, %v12664_v25  ;;  %v12419_v25 = vadd.f32 %v24779_v48, %v24785_v22 }
 0xa56   :  { %12460 = vmatmul.bf16.gmra.mxu1 %v17900_v33  ;;  %v17925_v33 = vld [vmem:[%s25126_s0 + $0xd44] sm:$0xf0]  ;;  %v12511_v44 = vadd.f32 %v24821_v8, %v12422_v39  ;;  %v19090_v39 = vld [vmem:[%s25126_s0 + $0xd48] sm:$0xf0] }
 0xa57   :  { %v12795_v10 = vunpack.c.l.b16 %v12696_v62  ;;  %v17928_v31 = vor.u32 %v19088_v1, %v17925_v33  ;;  %v17907_v62 = vld [vmem:[%s25126_s0 + $0xd10] sm:$0xf] }
 0xa58   :  { %v11579_v21 = vpop.f32.mrf.mxu0  ;;  %v12586_v0 = vpop.f32.mrf.mxu2  ;;  %12854 = vmatpush.bf16.msra.mxu0 %v19118_v38 }
 0xa59   :  { %v11875_v32 = vadd.f32 %v11874_v19, %v11579_v21  ;;  %v12587_v14 = vadd.f32 %v12586_v0, %v12498_v45  ;;  %v24838_v23 = vpop.f32.mrf.mxu3  ;;  %v17911_v19 = vld [vmem:[%s25126_s0 + $0xd20] sm:$0xf]  ;;  %v19122_v0 = vld [vmem:[%s25128_s3 + $0x830] sm:$0xff] }
 0xa5a   :  { %v17912_v9 = vor.u32 %v19086_v18, %v17911_v19  ;;  %v19125_v18 = vld [vmem:[%s25128_s3 + $0x848] sm:$0xff] }
 0xa5b   :  { %v12665_v55 = vmax.f32 %v12587_v14, 0.0  ;;  %v24825_v5 = vpop.f32.mrf.mxu1  ;;  %v17923_v14 = vld [vmem:[%s25126_s0 + $0xd38] sm:$0xf] }
 0xa5d   :  { %v12697_v53 = vpack.c.bf16 %v12665_v55, %v12665_v55  ;;  %18042 = vmatmul.msk.bf16.gmra.mxu2 %vm480_vm1, %v17884_v36  ;;  %v19089_v36 = vld [vmem:[%s25126_s0 + $0xd40] sm:$0xf0]  ;;  %v12508_v55 = vadd.f32 %v24798_v60, %v12419_v25 }
 0xa5e   :  { %12554 = vmatmul.bf16.gmra.mxu3 %v17916_v16  ;;  %v17924_v22 = vor.u32 %v19089_v36, %v17923_v14  ;;  %v19127_v36 = vld [vmem:[%s25128_s3 + $0x858] sm:$0xff] }
 0xa5f   :  { %v12796_v29 = vunpack.c.l.b16 %v12697_v53 }
 0xa60   :  { %v11611_v49 = vpop.f32.mrf.mxu0  ;;  %v12589_v47 = vpop.f32.mrf.mxu2 }
 0xa61   :  { %v12797_v34 = vpack.c.b16 %v12796_v29, %v12795_v10  ;;  %v11861_v43 = vadd.f32 %v11860_v52, %v11611_v49  ;;  %v12590_v56 = vadd.f32 %v12589_v47, %v12501_v2  ;;  %v24861_v54 = vpop.f32.mrf.mxu3  ;;  %v17908_v47 = vor.u32 %v19084_v13, %v17907_v62 }
 0xa63   :  { %18121 = vmatmul.msk.bf16.vlgmr.msrb.gmra.mxu0 %vm945_vm2, %v12797_v34  ;;  %v24846_v63 = vpop.f32.mrf.mxu1  ;;  %v12666_v7 = vmax.f32 %v12590_v56, 0.0 }
 0xa64   :  { %12887 = vmatpush.bf16.msrb.mxu0 %v19121_v26  ;;  %v12427_v33 = vadd.f32 %v24779_v48, %v24846_v63  ;;  %v19094_v63 = vld [vmem:[%s25126_s0 + $0xd6c] sm:$0xf] }
 0xa65   :  { %v12698_v30 = vpack.c.bf16 %v12666_v7, %v12666_v7  ;;  %v12424_v7 = vadd.f32 %v24779_v48, %v24825_v5 }
 0xa66   :  { %12465 = vmatmul.bf16.gmra.mxu1 %v17912_v9  ;;  %v17937_v9 = vld [vmem:[%s25126_s0 + $0xd5c] sm:$0xf0]  ;;  %v12516_v25 = vadd.f32 %v24861_v54, %v12427_v33 }
 0xa67   :  { %v12829_v61 = vunpack.c.l.b16 %v12698_v30  ;;  %v17940_v8 = vor.u32 %v19091_v59, %v17937_v9  ;;  %v17919_v30 = vld [vmem:[%s25126_s0 + $0xd28] sm:$0xf] }
 0xa68   :  { %v11613_v6 = vpop.f32.mrf.mxu0  ;;  %v12591_v58 = vpop.f32.mrf.mxu2  ;;  %12888 = vmatpush.bf16.msrb.mxu0 %v19120_v27 }
 0xa69   :  { %v11876_v17 = vadd.f32 %v11875_v32, %v11613_v6  ;;  %v12592_v12 = vadd.f32 %v12591_v58, %v12503_v57  ;;  %v24878_v45 = vpop.f32.mrf.mxu3  ;;  %v19124_v58 = vld [vmem:[%s25128_s3 + $0x840] sm:$0xff] }
 0xa6b   :  { %v12667_v35 = vmax.f32 %v12592_v12, 0.0  ;;  %v24865_v52 = vpop.f32.mrf.mxu1  ;;  %v17935_v12 = vld [vmem:[%s25126_s0 + $0xd50] sm:$0xf] }
 0xa6d   :  { %v12699_v51 = vpack.c.bf16 %v12667_v35, %v12667_v35  ;;  %18043 = vmatmul.msk.bf16.gmra.mxu2 %vm480_vm1, %v17896_v3  ;;  %v19092_v3 = vld [vmem:[%s25126_s0 + $0xd58] sm:$0xf0]  ;;  %v12513_v35 = vadd.f32 %v24838_v23, %v12424_v7 }
 0xa6e   :  { %12559 = vmatmul.bf16.gmra.mxu3 %v17928_v31  ;;  %v17936_v5 = vor.u32 %v19092_v3, %v17935_v12  ;;  %v19129_v3 = vld [vmem:[%s25128_s3 + $0x868] sm:$0xff] }
 0xa6f   :  { %v12830_v20 = vunpack.c.l.b16 %v12699_v51 }
 0xa70   :  { %v11645_v38 = vpop.f32.mrf.mxu0  ;;  %v12594_v4 = vpop.f32.mrf.mxu2 }
 0xa71   :  { %v12831_v11 = vpack.c.b16 %v12830_v20, %v12829_v61  ;;  %v11862_v41 = vadd.f32 %v11861_v43, %v11645_v38  ;;  %v12595_v21 = vadd.f32 %v12594_v4, %v12506_v28  ;;  %v24901_v26 = vpop.f32.mrf.mxu3  ;;  %v17920_v4 = vor.u32 %v19087_v42, %v17919_v30 }
 0xa73   :  { %18130 = vmatmul.msk.bf16.vlgmr.msra.gmra.mxu0 %vm945_vm2, %v12831_v11  ;;  %v24886_v32 = vpop.f32.mrf.mxu1  ;;  %v12668_v53 = vmax.f32 %v12595_v21, 0.0 }
 0xa74   :  { %12921 = vmatpush.bf16.msra.mxu0 %v19123_v40  ;;  %v12432_v9 = vadd.f32 %v24779_v48, %v24886_v32 }
 0xa75   :  { %v12700_v37 = vpack.c.bf16 %v12668_v53, %v12668_v53  ;;  %v12429_v53 = vadd.f32 %v24779_v48, %v24865_v52 }
 0xa76   :  { %12470 = vmatmul.bf16.gmra.mxu1 %v17924_v22  ;;  %v17949_v22 = vld [vmem:[%s25126_s0 + $0xd74] sm:$0xf0] }
 0xa77   :  { %v12863_v60 = vunpack.c.l.b16 %v12700_v37  ;;  %v17952_v54 = vor.u32 %v19094_v63, %v17949_v22  ;;  %v17931_v37 = vld [vmem:[%s25126_s0 + $0xd40] sm:$0xf] }
 0xa78   :  { %v11647_v10 = vpop.f32.mrf.mxu0  ;;  %v12596_v2 = vpop.f32.mrf.mxu2  ;;  %12922 = vmatpush.bf16.msra.mxu0 %v19122_v0 }
 0xa79   :  { %v11877_v29 = vadd.f32 %v11876_v17, %v11647_v10  ;;  %v12597_v49 = vadd.f32 %v12596_v2, %v12508_v55  ;;  %v24918_v57 = vpop.f32.mrf.mxu3  ;;  %v19126_v2 = vld [vmem:[%s25128_s3 + $0x850] sm:$0xff] }
 0xa7b   :  { %v12669_v34 = vmax.f32 %v12597_v49, 0.0  ;;  %v24905_v43 = vpop.f32.mrf.mxu1  ;;  %v19095_v49 = vld [vmem:[%s25126_s0 + $0xd70] sm:$0xf0] }
 0xa7c   :  { %v12434_v32 = vadd.f32 %v24779_v48, %v24905_v43 }
 0xa7d   :  { %v12701_v16 = vpack.c.bf16 %v12669_v34, %v12669_v34  ;;  %18044 = vmatmul.msk.bf16.gmra.mxu2 %vm480_vm1, %v17908_v47  ;;  %v12518_v34 = vadd.f32 %v24878_v45, %v12429_v53  ;;  %v12521_v45 = vadd.f32 %v24901_v26, %v12432_v9  ;;  %v19128_v26 = vld [vmem:[%s25128_s3 + $0x860] sm:$0xff] }
 0xa7e   :  { %12564 = vmatmul.bf16.gmra.mxu3 %v17940_v8  ;;  %v12523_v43 = vadd.f32 %v24918_v57, %v12434_v32 }
 0xa7f   :  { %v12864_v56 = vunpack.c.l.b16 %v12701_v16 }
 0xa80   :  { %v11679_v27 = vpop.f32.mrf.mxu0  ;;  %v12599_v19 = vpop.f32.mrf.mxu2 }
 0xa81   :  { %v12865_v46 = vpack.c.b16 %v12864_v56, %v12863_v60  ;;  %v11863_v24 = vadd.f32 %v11862_v41, %v11679_v27  ;;  %v12600_v6 = vadd.f32 %v12599_v19, %v12511_v44  ;;  %v24941_v40 = vpop.f32.mrf.mxu3  ;;  %v17932_v19 = vor.u32 %v19090_v39, %v17931_v37 }
 0xa83   :  { %18139 = vmatmul.msk.bf16.vlgmr.msrb.gmra.mxu0 %vm945_vm2, %v12865_v46  ;;  %v24926_v17 = vpop.f32.mrf.mxu1  ;;  %v12670_v51 = vmax.f32 %v12600_v6, 0.0 }
 0xa84   :  { %12955 = vmatpush.bf16.msrb.mxu0 %v19125_v18 }
 0xa85   :  { %v12702_v1 = vpack.c.bf16 %v12670_v51, %v12670_v51  ;;  %v17943_v51 = vld [vmem:[%s25126_s0 + $0xd58] sm:$0xf] }
 0xa86   :  { %12475 = vmatmul.bf16.gmra.mxu1 %v17936_v5 }
 0xa87   :  { %v12897_v23 = vunpack.c.l.b16 %v12702_v1 }
 0xa88   :  { %v11681_v61 = vpop.f32.mrf.mxu0  ;;  %v12601_v28 = vpop.f32.mrf.mxu2  ;;  %12956 = vmatpush.bf16.msrb.mxu0 %v19124_v58 }
 0xa89   :  { %v11878_v20 = vadd.f32 %v11877_v29, %v11681_v61  ;;  %v12602_v38 = vadd.f32 %v12601_v28, %v12513_v35  ;;  %v24958_v55 = vpop.f32.mrf.mxu3  ;;  %v17947_v29 = vld [vmem:[%s25126_s0 + $0xd68] sm:$0xf]  ;;  %v19093_v61 = vld [vmem:[%s25126_s0 + $0xd60] sm:$0xf0] }
 0xa8a   :  { %v17948_v52 = vor.u32 %v19095_v49, %v17947_v29  ;;  %v17944_v33 = vor.u32 %v19093_v61, %v17943_v51  ;;  %v19096_v29 = vld [vmem:[%s25126_s0 + $0xd78] sm:$0xf0] }
 0xa8b   :  { %v12671_v11 = vmax.f32 %v12602_v38, 0.0  ;;  %v24945_v41 = vpop.f32.mrf.mxu1 }
 0xa8d   :  { %v12703_v31 = vpack.c.bf16 %v12671_v11, %v12671_v11  ;;  %18045 = vmatmul.msk.bf16.gmra.mxu2 %vm480_vm1, %v17920_v4 }
 0xa8e   :  { %12569 = vmatmul.bf16.gmra.mxu3 %v17952_v54 }
 0xa8f   :  { %v12898_v21 = vunpack.c.l.b16 %v12703_v31 }
 0xa90   :  { %v11713_v0 = vpop.f32.mrf.mxu0  ;;  %v12604_v14 = vpop.f32.mrf.mxu2 }
 0xa91   :  { %v12899_v62 = vpack.c.b16 %v12898_v21, %v12897_v23  ;;  %v11864_v13 = vadd.f32 %v11863_v24, %v11713_v0  ;;  %v12605_v10 = vadd.f32 %v12604_v14, %v12516_v25  ;;  %v24981_v18 = vpop.f32.mrf.mxu3  ;;  %v12437_v23 = vadd.f32 %v24779_v48, %v24926_v17 }
 0xa92   :  { %v12439_v17 = vadd.f32 %v24779_v48, %v24945_v41 }
 0xa93   :  { %18148 = vmatmul.msk.bf16.vlgmr.msra.gmra.mxu0 %vm945_vm2, %v12899_v62  ;;  %v24972_v47 = vpop.f32.mrf.mxu1  ;;  %v12672_v16 = vmax.f32 %v12605_v10, 0.0  ;;  %v12526_v57 = vadd.f32 %v24941_v40, %v12437_v23  ;;  %v19131_v62 = vld [vmem:[%s25128_s3 + $0x878] sm:$0xff]  ;;  %v19130_v40 = vld [vmem:[%s25128_s3 + $0x870] sm:$0xff] }
 0xa94   :  { %12989 = vmatpush.bf16.msra.mxu0 %v19127_v36  ;;  %v12528_v49 = vadd.f32 %v24958_v55, %v12439_v17 }
 0xa95   :  { %v12704_v59 = vpack.c.bf16 %v12672_v16, %v12672_v16 }
 0xa96   :  { %12480 = vmatmul.bf16.gmra.mxu1 %v17948_v52 }
 0xa97   :  { %v12931_v8 = vunpack.c.l.b16 %v12704_v59 }
 0xa98   :  { %v11715_v60 = vpop.f32.mrf.mxu0  ;;  %v12606_v44 = vpop.f32.mrf.mxu2  ;;  %12990 = vmatpush.bf16.msra.mxu0 %v19126_v2  ;;  %v17955_v2 = vld [vmem:[%s25126_s0 + $0xd70] sm:$0xf] }
 0xa99   :  { %v11879_v56 = vadd.f32 %v11878_v20, %v11715_v60  ;;  %v12607_v27 = vadd.f32 %v12606_v44, %v12518_v34  ;;  %v24995_v35 = vpop.f32.mrf.mxu3  ;;  %v17956_v60 = vor.u32 %v19096_v29, %v17955_v2 }
 0xa9b   :  { %v12673_v46 = vmax.f32 %v12607_v27, 0.0  ;;  %v24987_v6 = vpop.f32.mrf.mxu1 }
 0xa9d   :  { %v12705_v24 = vpack.c.bf16 %v12673_v46, %v12673_v46  ;;  %18046 = vmatmul.msk.bf16.gmra.mxu2 %vm480_vm1, %v17932_v19 }
 0xa9f   :  { %v12932_v7 = vunpack.c.l.b16 %v12705_v24 }
 0xaa0   :  { %v11747_v58 = vpop.f32.mrf.mxu0  ;;  %v12609_v12 = vpop.f32.mrf.mxu2 }
 0xaa1   :  { %v12933_v5 = vpack.c.b16 %v12932_v7, %v12931_v8  ;;  %v11865_v30 = vadd.f32 %v11864_v13, %v11747_v58  ;;  %v12610_v42 = vadd.f32 %v12609_v12, %v12521_v45  ;;  %v12535_v0 = vpop.f32.mrf.mxu3  ;;  %v19133_v45 = vld [vmem:[%s25128_s3 + $0x888] sm:$0xff] }
 0xaa3   :  { %18157 = vmatmul.msk.bf16.vlgmr.msrb.gmra.mxu0 %vm945_vm2, %v12933_v5  ;;  %v12674_v28 = vmax.f32 %v12610_v42, 0.0  ;;  %v12446_v11 = vpop.f32.mrf.mxu1 }
 0xaa4   :  { %13023 = vmatpush.bf16.msrb.mxu0 %v19129_v3 }
 0xaa5   :  { %v12706_v31 = vpack.c.bf16 %v12674_v28, %v12674_v28 }
 0xaa7   :  { %v12965_v14 = vunpack.c.l.b16 %v12706_v31 }
 0xaa8   :  { %v11749_v20 = vpop.f32.mrf.mxu0  ;;  %v12611_v38 = vpop.f32.mrf.mxu2  ;;  %13024 = vmatpush.bf16.msrb.mxu0 %v19128_v26 }
 0xaa9   :  { %v11880_v4 = vadd.f32 %v11879_v56, %v11749_v20  ;;  %v12612_v1 = vadd.f32 %v12611_v38, %v12523_v43  ;;  %v12537_v52 = vpop.f32.mrf.mxu3  ;;  %v12442_v56 = vadd.f32 %v24779_v48, %v24972_v47  ;;  %v12444_v47 = vadd.f32 %v24779_v48, %v24987_v6 }
 0xaaa   :  { %v12447_v6 = vadd.f32 %v24779_v48, %v12446_v11 }
 0xaab   :  { %v12675_v25 = vmax.f32 %v12612_v1, 0.0  ;;  %v12448_v10 = vpop.f32.mrf.mxu1  ;;  %v12531_v55 = vadd.f32 %v24981_v18, %v12442_v56  ;;  %v19132_v18 = vld [vmem:[%s25128_s3 + $0x880] sm:$0xff]  ;;  %v12533_v5 = vadd.f32 %v24995_v35, %v12444_v47  ;;  %v19135_v35 = vld [vmem:[%s25128_s3 + $0x898] sm:$0xff] }
 0xaac   :  { %v12536_v1 = vadd.f32 %v12535_v0, %v12447_v6  ;;  %v19134_v0 = vld [vmem:[%s25128_s3 + $0x890] sm:$0xff] }
 0xaad   :  { %v12707_v21 = vpack.c.bf16 %v12675_v25, %v12675_v25  ;;  %18047 = vmatmul.msk.bf16.gmra.mxu2 %vm480_vm1, %v17944_v33 }
 0xaaf   :  { %v12966_v36 = vunpack.c.l.b16 %v12707_v21 }
 0xab0   :  { %v11781_v63 = vpop.f32.mrf.mxu0  ;;  %v12614_v22 = vpop.f32.mrf.mxu2 }
 0xab1   :  { %v12967_v13 = vpack.c.b16 %v12966_v36, %v12965_v14  ;;  %v11866_v54 = vadd.f32 %v11865_v30, %v11781_v63  ;;  %v12615_v53 = vadd.f32 %v12614_v22, %v12526_v57  ;;  %v12540_v12 = vpop.f32.mrf.mxu3  ;;  %v12449_v57 = vadd.f32 %v24779_v48, %v12448_v10 }
 0xab3   :  { %18166 = vmatmul.msk.bf16.vlgmr.msra.gmra.mxu0 %vm945_vm2, %v12967_v13  ;;  %v12676_v41 = vmax.f32 %v12615_v53, 0.0  ;;  %v12451_v59 = vpop.f32.mrf.mxu1  ;;  %v12538_v22 = vadd.f32 %v12537_v52, %v12449_v57 }
 0xab4   :  { %13057 = vmatpush.bf16.msra.mxu0 %v19131_v62 }
 0xab5   :  { %v12708_v44 = vpack.c.bf16 %v12676_v41, %v12676_v41 }
 0xab7   :  { %v12999_v9 = vunpack.c.l.b16 %v12708_v44 }
 0xab8   :  { %v11783_v37 = vpop.f32.mrf.mxu0  ;;  %v12616_v39 = vpop.f32.mrf.mxu2  ;;  %13058 = vmatpush.bf16.msra.mxu0 %v19130_v40 }
 0xab9   :  { %v11881_v34 = vadd.f32 %v11880_v4, %v11783_v37  ;;  %v12617_v16 = vadd.f32 %v12616_v39, %v12528_v49  ;;  %v12542_v20 = vpop.f32.mrf.mxu3 }
 0xabb   :  { %v12677_v27 = vmax.f32 %v12617_v16, 0.0  ;;  %v12453_v32 = vpop.f32.mrf.mxu1 }
 0xabc   :  { %v12454_v56 = vadd.f32 %v24779_v48, %v12453_v32 }
 0xabd   :  { %v12709_v19 = vpack.c.bf16 %v12677_v27, %v12677_v27  ;;  %18048 = vmatmul.msk.bf16.gmra.mxu2 %vm480_vm1, %v17956_v60  ;;  %v19137_v60 = vld [vmem:[%s25128_s3 + $0x8a8] sm:$0xff] }
 0xabf   :  { %v13000_v46 = vunpack.c.l.b16 %v12709_v19 }
 0xac0   :  { %v11815_v24 = vpop.f32.mrf.mxu0  ;;  %v12619_v8 = vpop.f32.mrf.mxu2 }
 0xac1   :  { %v13001_v7 = vpack.c.b16 %v13000_v46, %v12999_v9  ;;  %v11867_v58 = vadd.f32 %v11866_v54, %v11815_v24  ;;  %v12620_v3 = vadd.f32 %v12619_v8, %v12531_v55  ;;  %v12545_v63 = vpop.f32.mrf.mxu3 }
 0xac3   :  { %18175 = vmatmul.msk.bf16.vlgmr.msrb.gmra.mxu0 %vm945_vm2, %v13001_v7  ;;  %v12678_v30 = vmax.f32 %v12620_v3, 0.0  ;;  %v12456_v14 = vpop.f32.mrf.mxu1 }
 0xac4   :  { %13091 = vmatpush.bf16.msrb.mxu0 %v19133_v45  ;;  %v12457_v7 = vadd.f32 %v24779_v48, %v12456_v14 }
 0xac5   :  { %v12710_v43 = vpack.c.bf16 %v12678_v30, %v12678_v30 }
 0xac6   :  { %v12546_v3 = vadd.f32 %v12545_v63, %v12457_v7 }
 0xac7   :  { %v13033_v4 = vunpack.c.l.b16 %v12710_v43 }
 0xac8   :  { %v11817_v42 = vpop.f32.mrf.mxu0  ;;  %v12621_v26 = vpop.f32.mrf.mxu2  ;;  %13092 = vmatpush.bf16.msrb.mxu0 %v19132_v18 }
 0xac9   :  { %v11882_v51 = vadd.f32 %v11881_v34, %v11817_v42  ;;  %v12622_v61 = vadd.f32 %v12621_v26, %v12533_v5  ;;  %v12547_v34 = vpop.f32.mrf.mxu3  ;;  %v19139_v42 = vld [vmem:[%s25128_s3 + $0x8b8] sm:$0xff] }
 0xacb   :  { %v12679_v28 = vmax.f32 %v12622_v61, 0.0  ;;  %v12458_v29 = vpop.f32.mrf.mxu1 }
 0xacc   :  { %v12459_v61 = vadd.f32 %v24779_v48, %v12458_v29 }
 0xacd   :  { %v12711_v38 = vpack.c.bf16 %v12679_v28, %v12679_v28  ;;  %v19138_v28 = vld [vmem:[%s25128_s3 + $0x8b0] sm:$0xff] }
 0xacf   :  { %v13034_v33 = vunpack.c.l.b16 %v12711_v38 }
 0xad0   :  { %v11849_v31 = vpop.f32.mrf.mxu0  ;;  %v12624_v23 = vpop.f32.mrf.mxu2 }
 0xad1   :  { %v13035_v25 = vpack.c.b16 %v13034_v33, %v13033_v4  ;;  %v11868_v21 = vadd.f32 %v11867_v58, %v11849_v31  ;;  %v12625_v11 = vadd.f32 %v12624_v23, %v12536_v1  ;;  %v12550_v8 = vpop.f32.mrf.mxu3 }
 0xad3   :  { %v25047_v36 = vadd.f32 %v11868_v21, %v24467_v15  ;;  %18184 = vmatmul.msk.bf16.vlgmr.msra.gmra.mxu0 %vm945_vm2, %v13035_v25  ;;  %v12680_v62 = vmax.f32 %v12625_v11, 0.0  ;;  %v12452_v15 = vadd.f32 %v24779_v48, %v12451_v59  ;;  %v12461_v19 = vpop.f32.mrf.mxu1  ;;  %v12543_v59 = vadd.f32 %v12542_v20, %v12454_v56 }
 0xad4   :  { %13125 = vmatpush.bf16.msra.mxu0 %v19135_v35  ;;  %v12548_v20 = vadd.f32 %v12547_v34, %v12459_v61  ;;  %v12462_v25 = vadd.f32 %v24779_v48, %v12461_v19 }
 0xad5   :  { %v12712_v10 = vpack.c.bf16 %v12680_v62, %v12680_v62  ;;  %v12541_v37 = vadd.f32 %v12540_v12, %v12452_v15 }
 0xad7   :  { %v13067_v41 = vunpack.c.l.b16 %v12712_v10 }
 0xad8   :  { %v11851_v13 = vpop.f32.mrf.mxu0  ;;  %v12626_v54 = vpop.f32.mrf.mxu2  ;;  %13126 = vmatpush.bf16.msra.mxu0 %v19134_v0  ;;  %v12551_v0 = vadd.f32 %v12550_v8, %v12462_v25 }
 0xad9   :  { %v11883_v17 = vadd.f32 %v11882_v51, %v11851_v13  ;;  %v12627_v53 = vadd.f32 %v12626_v54, %v12538_v22  ;;  %v12552_v6 = vpop.f32.mrf.mxu3  ;;  %v19141_v13 = vld [vmem:[%s25128_s3 + $0x8c8] sm:$0xff] }
 0xadb   :  { %v25055_v40 = vadd.f32 %v11883_v17, %v24493_v50  ;;  %v12681_v2 = vmax.f32 %v12627_v53, 0.0  ;;  %v19136_v50 = vld [vmem:[%s25128_s3 + $0x8a0] sm:$0xff]  ;;  %v12463_v5 = vpop.f32.mrf.mxu1 }
 0xadc   :  { %v12464_v53 = vadd.f32 %v24779_v48, %v12463_v5 }
 0xadd   :  { %v12713_v49 = vpack.c.bf16 %v12681_v2, %v12681_v2  ;;  %v19140_v2 = vld [vmem:[%s25128_s3 + $0x8c0] sm:$0xff] }
 0xade   :  { %v12553_v29 = vadd.f32 %v12552_v6, %v12464_v53 }
 0xadf   :  { %v13068_v39 = vunpack.c.l.b16 %v12713_v49 }
 0xae0   :  { %v12629_v52 = vpop.f32.mrf.mxu2  ;;  %v12822_v16 = vpop.f32.mrf.mxu0 }
 0xae1   :  { %v13069_v44 = vpack.c.b16 %v13068_v39, %v13067_v41  ;;  %v12630_v27 = vadd.f32 %v12629_v52, %v12541_v37  ;;  %v12555_v57 = vpop.f32.mrf.mxu3 }
 0xae3   :  { %18193 = vmatmul.msk.bf16.vlgmr.msrb.gmra.mxu0 %vm945_vm2, %v13069_v44  ;;  %v12682_v9 = vmax.f32 %v12630_v27, 0.0  ;;  %v12466_v23 = vpop.f32.mrf.mxu1 }
 0xae4   :  { %13159 = vmatpush.bf16.msrb.mxu0 %v19137_v60  ;;  %v12467_v60 = vadd.f32 %v24779_v48, %v12466_v23 }
 0xae5   :  { %v12714_v45 = vpack.c.bf16 %v12682_v9, %v12682_v9 }
 0xae6   :  { %v12556_v19 = vadd.f32 %v12555_v57, %v12467_v60 }
 0xae7   :  { %v13101_v47 = vunpack.c.l.b16 %v12714_v45 }
 0xae8   :  { %v12631_v55 = vpop.f32.mrf.mxu2  ;;  %v12824_v46 = vpop.f32.mrf.mxu0  ;;  %13160 = vmatpush.bf16.msrb.mxu0 %v19136_v50 }
 0xae9   :  { %v12632_v24 = vadd.f32 %v12631_v55, %v12543_v59  ;;  %v12557_v41 = vpop.f32.mrf.mxu3 }
 0xaeb   :  { %v12683_v58 = vmax.f32 %v12632_v24, 0.0  ;;  %v12468_v15 = vpop.f32.mrf.mxu1 }
 0xaec   :  { %v12469_v7 = vadd.f32 %v24779_v48, %v12468_v15 }
 0xaed   :  { %v12715_v12 = vpack.c.bf16 %v12683_v58, %v12683_v58 }
 0xaef   :  { %v13102_v18 = vunpack.c.l.b16 %v12715_v12  ;;  %v19142_v12 = vld [vmem:[%s25128_s3 + $0x8d0] sm:$0xff] }
 0xaf0   :  { %v12634_v30 = vpop.f32.mrf.mxu2  ;;  %v12856_v32 = vpop.f32.mrf.mxu0 }
 0xaf1   :  { %v13103_v26 = vpack.c.b16 %v13102_v18, %v13101_v47  ;;  %v13337_v51 = vadd.f32 %v12856_v32, %v12822_v16  ;;  %v12635_v43 = vadd.f32 %v12634_v30, %v12546_v3  ;;  %v12560_v45 = vpop.f32.mrf.mxu3  ;;  %v12558_v47 = vadd.f32 %v12557_v41, %v12469_v7 }
 0xaf3   :  { %18202 = vmatmul.msk.bf16.vlgmr.msra.gmra.mxu0 %vm945_vm2, %v13103_v26  ;;  %v12684_v38 = vmax.f32 %v12635_v43, 0.0  ;;  %v12471_v27 = vpop.f32.mrf.mxu1 }
 0xaf4   :  { %13193 = vmatpush.bf16.msra.mxu0 %v19139_v42 }
 0xaf5   :  { %v12716_v35 = vpack.c.bf16 %v12684_v38, %v12684_v38 }
 0xaf7   :  { %v13135_v11 = vunpack.c.l.b16 %v12716_v35 }
 0xaf8   :  { %v12636_v4 = vpop.f32.mrf.mxu2  ;;  %v12858_v1 = vpop.f32.mrf.mxu0  ;;  %13194 = vmatpush.bf16.msra.mxu0 %v19138_v28 }
 0xaf9   :  { %v12637_v33 = vadd.f32 %v12636_v4, %v12548_v20  ;;  %v13352_v31 = vadd.f32 %v12858_v1, %v12824_v46  ;;  %v19143_v46 = vld [vmem:[%s25128_s3 + $0x8d8] sm:$0xff]  ;;  %v12562_v43 = vpop.f32.mrf.mxu3 }
 0xafb   :  { %v12685_v21 = vmax.f32 %v12637_v33, 0.0  ;;  %v12473_v18 = vpop.f32.mrf.mxu1  ;;  %v19145_v33 = vld [vmem:[%s25128_s3 + $0x8e8] sm:$0xff] }
 0xafc   :  { %v12474_v25 = vadd.f32 %v24779_v48, %v12473_v18 }
 0xafd   :  { %v12717_v14 = vpack.c.bf16 %v12685_v21, %v12685_v21 }
 0xaff   :  { %v13136_v63 = vunpack.c.l.b16 %v12717_v14  ;;  %v19144_v14 = vld [vmem:[%s25128_s3 + $0x8e0] sm:$0xff] }
 0xb00   :  { %v12639_v22 = vpop.f32.mrf.mxu2  ;;  %v12890_v62 = vpop.f32.mrf.mxu0 }
 0xb01   :  { %v13137_v54 = vpack.c.b16 %v13136_v63, %v13135_v11  ;;  %v13338_v17 = vadd.f32 %v13337_v51, %v12890_v62  ;;  %v12640_v10 = vadd.f32 %v12639_v22, %v12551_v0  ;;  %v12472_v51 = vadd.f32 %v24779_v48, %v12471_v27  ;;  %v12565_v57 = vpop.f32.mrf.mxu3 }
 0xb02   :  { %v12563_v11 = vadd.f32 %v12562_v43, %v12474_v25 }
 0xb03   :  { %18211 = vmatmul.msk.bf16.vlgmr.msrb.gmra.mxu0 %vm945_vm2, %v13137_v54  ;;  %v12686_v49 = vmax.f32 %v12640_v10, 0.0  ;;  %v12561_v20 = vadd.f32 %v12560_v45, %v12472_v51  ;;  %v12476_v35 = vpop.f32.mrf.mxu1 }
 0xb04   :  { %13227 = vmatpush.bf16.msrb.mxu0 %v19141_v13 }
 0xb05   :  { %v12718_v16 = vpack.c.bf16 %v12686_v49, %v12686_v49 }
 0xb07   :  { %v13169_v50 = vunpack.c.l.b16 %v12718_v16 }
 0xb08   :  { %v12641_v37 = vpop.f32.mrf.mxu2  ;;  %v12892_v39 = vpop.f32.mrf.mxu0  ;;  %13228 = vmatpush.bf16.msrb.mxu0 %v19140_v2 }
 0xb09   :  { %v12642_v34 = vadd.f32 %v12641_v37, %v12553_v29  ;;  %v13353_v52 = vadd.f32 %v13352_v31, %v12892_v39  ;;  %v12567_v41 = vpop.f32.mrf.mxu3 }
 0xb0b   :  { %v12687_v44 = vmax.f32 %v12642_v34, 0.0  ;;  %v12478_v10 = vpop.f32.mrf.mxu1  ;;  %v19147_v34 = vld [vmem:[%s25128_s3 + $0x8f8] sm:$0xff] }
 0xb0c   :  { %v12479_v60 = vadd.f32 %v24779_v48, %v12478_v10 }
 0xb0d   :  { %v12719_v56 = vpack.c.bf16 %v12687_v44, %v12687_v44 }
 0xb0f   :  { %v13170_v59 = vunpack.c.l.b16 %v12719_v56  ;;  %v19146_v56 = vld [vmem:[%s25128_s3 + $0x8f0] sm:$0xff] }
 0xb10   :  { %v12644_v9 = vpop.f32.mrf.mxu2  ;;  %v12924_v55 = vpop.f32.mrf.mxu0 }
 0xb11   :  { %v13171_v24 = vpack.c.b16 %v13170_v59, %v13169_v50  ;;  %v13339_v8 = vadd.f32 %v13338_v17, %v12924_v55  ;;  %v12645_v58 = vadd.f32 %v12644_v9, %v12556_v19  ;;  %v12477_v17 = vadd.f32 %v24779_v48, %v12476_v35 }
 0xb12   :  { %v12568_v50 = vadd.f32 %v12567_v41, %v12479_v60 }
 0xb13   :  { %18220 = vmatmul.msk.bf16.vlgmr.msra.gmra.mxu0 %vm945_vm2, %v13171_v24  ;;  %v12688_v3 = vmax.f32 %v12645_v58, 0.0  ;;  %v12566_v29 = vadd.f32 %v12565_v57, %v12477_v17  ;;  %v12481_v27 = vpop.f32.mrf.mxu1  ;;  %v12570_v24 = vpop.f32.mrf.mxu3 }
 0xb14   :  { %13261 = vmatpush.bf16.msra.mxu0 %v19143_v46  ;;  %v12482_v45 = vadd.f32 %v24779_v48, %v12481_v27 }
 0xb15   :  { %v12720_v26 = vpack.c.bf16 %v12688_v3, %v12688_v3 }
 0xb17   :  { %v13203_v28 = vunpack.c.l.b16 %v12720_v26 }
 0xb18   :  { %v12646_v5 = vpop.f32.mrf.mxu2  ;;  %v12926_v30 = vpop.f32.mrf.mxu0  ;;  %13262 = vmatpush.bf16.msra.mxu0 %v19142_v12 }
 0xb19   :  { %v12647_v32 = vadd.f32 %v12646_v5, %v12558_v47  ;;  %v13354_v42 = vadd.f32 %v13353_v52, %v12926_v30  ;;  %v12571_v47 = vadd.f32 %v12570_v24, %v12482_v45 }
 0xb1b   :  { %v12689_v61 = vmax.f32 %v12647_v32, 0.0  ;;  %v12483_v18 = vpop.f32.mrf.mxu1 }
 0xb1c   :  { %v12484_v26 = vadd.f32 %v24779_v48, %v12483_v18 }
 0xb1d   :  { %v12721_v6 = vpack.c.bf16 %v12689_v61, %v12689_v61  ;;  %v12572_v61 = vpop.f32.mrf.mxu3 }
 0xb1e   :  { %v12573_v43 = vadd.f32 %v12572_v61, %v12484_v26 }
 0xb1f   :  { %v13204_v38 = vunpack.c.l.b16 %v12721_v6 }
 0xb20   :  { %v12649_v4 = vpop.f32.mrf.mxu2  ;;  %v12958_v1 = vpop.f32.mrf.mxu0 }
 0xb21   :  { %v13205_v31 = vpack.c.b16 %v13204_v38, %v13203_v28  ;;  %v13340_v23 = vadd.f32 %v13339_v8, %v12958_v1  ;;  %v12650_v21 = vadd.f32 %v12649_v4, %v12561_v20 }
 0xb23   :  { %18229 = vmatmul.msk.bf16.vlgmr.msrb.gmra.mxu0 %vm945_vm2, %v13205_v31  ;;  %v12690_v0 = vmax.f32 %v12650_v21, 0.0 }
 0xb24   :  { %13295 = vmatpush.bf16.msrb.mxu0 %v19145_v33 }
 0xb25   :  { %v12722_v54 = vpack.c.bf16 %v12690_v0, %v12690_v0 }
 0xb27   :  { %v13237_v2 = vunpack.c.l.b16 %v12722_v54 }
 0xb28   :  { %v12651_v63 = vpop.f32.mrf.mxu2  ;;  %v12960_v22 = vpop.f32.mrf.mxu0  ;;  %13296 = vmatpush.bf16.msrb.mxu0 %v19144_v14 }
 0xb29   :  { %v12652_v62 = vadd.f32 %v12651_v63, %v12563_v11  ;;  %v13355_v13 = vadd.f32 %v13354_v42, %v12960_v22 }
 0xb2b   :  { %v12691_v53 = vmax.f32 %v12652_v62, 0.0 }
 0xb2d   :  { %v12723_v15 = vpack.c.bf16 %v12691_v53, %v12691_v53 }
 0xb2f   :  { %v13238_v49 = vunpack.c.l.b16 %v12723_v15 }
 0xb30   :  { %v12654_v37 = vpop.f32.mrf.mxu2  ;;  %v12992_v39 = vpop.f32.mrf.mxu0 }
 0xb31   :  { %v13239_v52 = vpack.c.b16 %v13238_v49, %v13237_v2  ;;  %v13341_v16 = vadd.f32 %v13340_v23, %v12992_v39  ;;  %v12655_v44 = vadd.f32 %v12654_v37, %v12566_v29 }
 0xb33   :  { %18238 = vmatmul.msk.bf16.vlgmr.msra.gmra.mxu0 %vm945_vm2, %v13239_v52  ;;  %v12692_v19 = vmax.f32 %v12655_v44, 0.0 }
 0xb34   :  { %13329 = vmatpush.bf16.msra.mxu0 %v19147_v34 }
 0xb35   :  { %v12724_v8 = vpack.c.bf16 %v12692_v19, %v12692_v19 }
 0xb37   :  { %v13271_v12 = vunpack.c.l.b16 %v12724_v8 }
 0xb38   :  { %v12656_v59 = vpop.f32.mrf.mxu2  ;;  %v12994_v9 = vpop.f32.mrf.mxu0  ;;  %13330 = vmatpush.bf16.msra.mxu0 %v19146_v56 }
 0xb39   :  { %v12657_v55 = vadd.f32 %v12656_v59, %v12568_v50  ;;  %v13356_v46 = vadd.f32 %v13355_v13, %v12994_v9  ;;  %v19157_v9 = vld [vmem:[%s25129_s4] ss:$0 sm:$0xff] }
 0xb3b   :  { %v12693_v7 = vmax.f32 %v12657_v55, 0.0 }
 0xb3d   :  { %v12725_v58 = vpack.c.bf16 %v12693_v7, %v12693_v7 }
 0xb3f   :  { %v13272_v3 = vunpack.c.l.b16 %v12725_v58 }
 0xb40   :  { %v12659_v5 = vpop.f32.mrf.mxu2  ;;  %v13026_v30 = vpop.f32.mrf.mxu0 }
 0xb41   :  { %v13273_v32 = vpack.c.b16 %v13272_v3, %v13271_v12  ;;  %v13342_v42 = vadd.f32 %v13341_v16, %v13026_v30  ;;  %v12660_v51 = vadd.f32 %v12659_v5, %v12571_v47 }
 0xb43   :  { %18247 = vmatmul.msk.bf16.vlgmr.msrb.gmra.mxu0 %vm945_vm2, %v13273_v32  ;;  %v12694_v6 = vmax.f32 %v12660_v51, 0.0 }
 0xb45   :  { %v12726_v1 = vpack.c.bf16 %v12694_v6, %v12694_v6 }
 0xb47   :  { %v13305_v23 = vunpack.c.l.b16 %v12726_v1 }
 0xb48   :  { %v12661_v28 = vpop.f32.mrf.mxu2  ;;  %v13028_v20 = vpop.f32.mrf.mxu0 }
 0xb49   :  { %v12662_v38 = vadd.f32 %v12661_v28, %v12573_v43  ;;  %v13357_v4 = vadd.f32 %v13356_v46, %v13028_v20 }
 0xb4b   :  { %v12695_v33 = vmax.f32 %v12662_v38, 0.0 }
 0xb4d   :  { %v12727_v31 = vpack.c.bf16 %v12695_v33, %v12695_v33 }
 0xb4f   :  { %v13306_v35 = vunpack.c.l.b16 %v12727_v31 }
 0xb50   :  { %v13060_v25 = vpop.f32.mrf.mxu0 }
 0xb51   :  { %v13307_v21 = vpack.c.b16 %v13306_v35, %v13305_v23  ;;  %v13343_v14 = vadd.f32 %v13342_v42, %v13060_v25 }
 0xb53   :  { %18256 = vmatmul.msk.bf16.vlgmr.msra.gmra.mxu0 %vm945_vm2, %v13307_v21 }
 0xb58   :  { %v13062_v48 = vpop.f32.mrf.mxu0 }
 0xb59   :  { %v13358_v57 = vadd.f32 %v13357_v4, %v13062_v48 }
 0xb60   :  { %v13094_v11 = vpop.f32.mrf.mxu0 }
 0xb61   :  { %v13344_v0 = vadd.f32 %v13343_v14, %v13094_v11 }
 0xb68   :  { %v13096_v63 = vpop.f32.mrf.mxu0 }
 0xb69   :  { %v13359_v22 = vadd.f32 %v13358_v57, %v13096_v63 }
 0xb70   :  { %v13128_v62 = vpop.f32.mrf.mxu0 }
 0xb71   :  { %v13345_v13 = vadd.f32 %v13344_v0, %v13128_v62 }
 0xb78   :  { %v13130_v54 = vpop.f32.mrf.mxu0 }
 0xb79   :  { %v13360_v17 = vadd.f32 %v13359_v22, %v13130_v54 }
 0xb80   :  { %v13162_v53 = vpop.f32.mrf.mxu0 }
 0xb81   :  { %v13346_v10 = vadd.f32 %v13345_v13, %v13162_v53 }
 0xb88   :  { %v13164_v15 = vpop.f32.mrf.mxu0 }
 0xb89   :  { %v13361_v2 = vadd.f32 %v13360_v17, %v13164_v15 }
 0xb90   :  { %v13196_v29 = vpop.f32.mrf.mxu0 }
 0xb91   :  { %v13347_v60 = vadd.f32 %v13346_v10, %v13196_v29 }
 0xb98   :  { %v13198_v49 = vpop.f32.mrf.mxu0 }
 0xb99   :  { %v13362_v19 = vadd.f32 %v13361_v2, %v13198_v49 }
 0xba0   :  { %v13230_v41 = vpop.f32.mrf.mxu0 }
 0xba1   :  { %v13348_v44 = vadd.f32 %v13347_v60, %v13230_v41 }
 0xba8   :  { %v13232_v37 = vpop.f32.mrf.mxu0 }
 0xba9   :  { %v13363_v55 = vadd.f32 %v13362_v19, %v13232_v37 }
 0xbb0   :  { %v13264_v39 = vpop.f32.mrf.mxu0 }
 0xbb1   :  { %v13349_v56 = vadd.f32 %v13348_v44, %v13264_v39 }
 0xbb8   :  { %v13266_v34 = vpop.f32.mrf.mxu0 }
 0xbb9   :  { %v13364_v24 = vadd.f32 %v13363_v55, %v13266_v34 }
 0xbc0   :  { %v13298_v52 = vpop.f32.mrf.mxu0 }
 0xbc1   :  { %v13350_v27 = vadd.f32 %v13349_v56, %v13298_v52 }
 0xbc8   :  { %v13300_v16 = vpop.f32.mrf.mxu0 }
 0xbc9   :  { %v13365_v45 = vadd.f32 %v13364_v24, %v13300_v16 }
 0xbd0   :  { %v13332_v50 = vpop.f32.mrf.mxu0 }
 0xbd1   :  { %v13351_v59 = vadd.f32 %v13350_v27, %v13332_v50 }
 0xbd3   :  { %v13367_v46 = vadd.f32 %v13351_v59, %v25047_v36 }
 0xbd5   :  { %v13373_v8 = vadd.f32 %v19157_v9, %v13367_v46 }
 0xbd7   :  { %13375 = vst [vmem:[%s25130_s5] sm:$0xff] %v13373_v8 }
 0xbd8   :  { %v13334_v7 = vpop.f32.mrf.mxu0 }
 0xbd9   :  { %v13366_v58 = vadd.f32 %v13365_v45, %v13334_v7 }
 0xbdb   :  { %v13368_v12 = vadd.f32 %v13366_v58, %v25055_v40 }
 0xbdd   :  { %v13374_v47 = vadd.f32 %v19157_v9, %v13368_v12 }
 0xbdf   :  { %13376 = vst [vmem:[%s25130_s5 + $0x8] sm:$0xff] %v13374_v47 }

</bundles_post_ra>
